<compile_context>
chip_gen: v7x
topology: tpu7x:2x2x1
jax: 0.10.0
libtpu: 0.0.40
codegen_flags: <defaults>
</compile_context>

<pallas_src>
import jax
import jax.numpy as jnp
from jax.experimental import pallas as pl
from jax.experimental.pallas import tpu as pltpu

NCHANNELS = 1
NGF = 64
ZSIZE = 128
K = 4                       # kernel size of every ConvTranspose2d
EPS = 1e-5                  # BatchNorm2d eps
_COUT_PAD = 128             # lane padding for the single-channel final layer
_VMEM_LIMIT = 24 * 1024 * 1024


# ---------------------------------------------------------------------------
# Pallas kernels
# ---------------------------------------------------------------------------
def _l0_kernel(z_ref, w_ref, y_ref):
    """Layer 0: ConvTranspose of a 1x1 input == one dense matmul (outer product)."""
    y_ref[...] = jnp.dot(z_ref[...], w_ref[...], preferred_element_type=jnp.float32)


def _phase_conv_bn_kernel(x_ref, w_ref, y_ref, sum_ref, sq_ref):
    """One phase of a stride-2 ConvTranspose + per-phase BN partial statistics.

    x_ref: (1, M, 4*Cin)   bf16  taps packed along the contraction dim
    w_ref: (1, 4*Cin, Cout) bf16
    y_ref: (1, M, Cout)    bf16  phase output (every row is a valid position)
    sum/sq: (1, 1, Cout)   f32   per-phase statistics from the f32 accumulator
    """
    acc = jnp.dot(x_ref[0], w_ref[0], preferred_element_type=jnp.float32)
    y_ref[0] = acc.astype(y_ref.dtype)
    sum_ref[0] = jnp.sum(acc, axis=0, keepdims=True)
    sq_ref[0] = jnp.sum(acc * acc, axis=0, keepdims=True)


def _phase_conv_tanh_kernel(x_ref, w_ref, o_ref):
    """Final ConvTranspose phase (Cout lane-padded to 128 for the MXU) + tanh."""
    acc = jnp.dot(x_ref[0], w_ref[0], preferred_element_type=jnp.float32)
    o_ref[0] = jnp.tanh(acc[:, 0:1])


# ---------------------------------------------------------------------------
# pallas_call wrappers
# ---------------------------------------------------------------------------
def l0_matmul(z, w):
    n = z.shape[0]
    cols = w.shape[1]
    return pl.pallas_call(
        _l0_kernel,
        out_shape=jax.ShapeDtypeStruct((n, cols), jnp.float32),
        grid_spec=pltpu.PrefetchScalarGridSpec(
            num_scalar_prefetch=0,
            grid=(1,),
            in_specs=[
                pl.BlockSpec((n, ZSIZE), lambda i: (0, 0)),
                pl.BlockSpec((ZSIZE, cols), lambda i: (0, 0)),
            ],
            out_specs=pl.BlockSpec((n, cols), lambda i: (0, 0)),
        ),
        compiler_params=pltpu.CompilerParams(
            dimension_semantics=("arbitrary",),
            vmem_limit_bytes=_VMEM_LIMIT,
        ),
    )(z, w)


def phase_conv_bn(xp, wp):
    _, m, c4 = xp.shape
    _, _, cout = wp.shape
    return pl.pallas_call(
        _phase_conv_bn_kernel,
        out_shape=(
            jax.ShapeDtypeStruct((4, m, cout), jnp.bfloat16),
            jax.ShapeDtypeStruct((4, 1, cout), jnp.float32),
            jax.ShapeDtypeStruct((4, 1, cout), jnp.float32),
        ),
        grid_spec=pltpu.PrefetchScalarGridSpec(
            num_scalar_prefetch=0,
            grid=(4,),
            in_specs=[
                pl.BlockSpec((1, m, c4), lambda ph: (ph, 0, 0)),
                pl.BlockSpec((1, c4, cout), lambda ph: (ph, 0, 0)),
            ],
            out_specs=(
                pl.BlockSpec((1, m, cout), lambda ph: (ph, 0, 0)),
                pl.BlockSpec((1, 1, cout), lambda ph: (ph, 0, 0)),
                pl.BlockSpec((1, 1, cout), lambda ph: (ph, 0, 0)),
            ),
        ),
        compiler_params=pltpu.CompilerParams(
            dimension_semantics=("parallel",),
            vmem_limit_bytes=_VMEM_LIMIT,
        ),
    )(xp, wp)


def phase_conv_tanh(xp, wp):
    _, m, c4 = xp.shape
    _, _, cpad = wp.shape
    return pl.pallas_call(
        _phase_conv_tanh_kernel,
        out_shape=jax.ShapeDtypeStruct((4, m, 1), jnp.float32),
        grid_spec=pltpu.PrefetchScalarGridSpec(
            num_scalar_prefetch=0,
            grid=(4,),
            in_specs=[
                pl.BlockSpec((1, m, c4), lambda ph: (ph, 0, 0)),
                pl.BlockSpec((1, c4, cpad), lambda ph: (ph, 0, 0)),
            ],
            out_specs=pl.BlockSpec((1, m, 1), lambda ph: (ph, 0, 0)),
        ),
        compiler_params=pltpu.CompilerParams(
            dimension_semantics=("parallel",),
            vmem_limit_bytes=_VMEM_LIMIT,
        ),
    )(xp, wp)


# ---------------------------------------------------------------------------
# Cheap JAX glue (pad / pack / interleave / BN affine; fused by XLA)
# ---------------------------------------------------------------------------
def _pack_phases(a):
    """(N, H, W, C) f32 -> (4, N*H*W, 4*C) bf16 per-phase, tap-packed LHS.

    Phase (r_h, r_w) output pixel (q, p) needs padded-input pixels
    (q + r_h + dh, p + r_w + dw), dh, dw in {0, 1}; those 4 taps are concatenated
    along channels so each phase becomes a single matmul.
    """
    n, h, w, c = a.shape
    ap = jnp.pad(a, ((0, 0), (1, 1), (1, 1), (0, 0)))
    phases = []
    for r_h in (0, 1):
        for r_w in (0, 1):
            taps = [ap[:, r_h + dh:r_h + dh + h, r_w + dw:r_w + dw + w, :]
                    for dh in (0, 1) for dw in (0, 1)]
            phases.append(jnp.concatenate(taps, axis=-1).reshape(n * h * w, 4 * c))
    return jnp.stack(phases).astype(jnp.bfloat16)


def _interleave_phases(y, n, h, w, c):
    """(4, N*H*W, C) phase outputs -> (N, 2H, 2W, C): out[.., 2q+r_h, 2p+r_w, :]."""
    y = y.reshape(2, 2, n, h, w, c)
    y = jnp.transpose(y, (2, 3, 0, 4, 1, 5))
    return y.reshape(n, 2 * h, 2 * w, c)


def _bn_relu(y, gamma, beta):
    """Training-mode BN (batch stats, biased var) + ReLU for the layer-0 output."""
    mean = jnp.mean(y, axis=(0, 1, 2))
    var = jnp.maximum(jnp.mean(y * y, axis=(0, 1, 2)) - mean * mean, 0.0)
    scale = gamma / jnp.sqrt(var + EPS)
    return jnp.maximum(y * scale + (beta - mean * scale), 0.0)


# ---------------------------------------------------------------------------
# Weight packing — done ONCE, outside the jitted forward
# ---------------------------------------------------------------------------
def _pack_phase_weight(w_pt, cout_pad=None):
    """(Cin, Cout, K, K) -> (4, 4*Cin, Cout[pad]) bf16, tap order matching _pack_phases.

    Tap (dh, dw) of phase (r_h, r_w) corresponds to kernel index
    (kh, kw) = (3 - r_h - 2*dh, 3 - r_w - 2*dw) (flipped kernel of the equivalent
    stride-1 conv, stride-2 / padding-1 ConvTranspose).
    """
    cin, cout = w_pt.shape[:2]
    phases = []
    for r_h in (0, 1):
        for r_w in (0, 1):
            blocks = [w_pt[:, :, 3 - r_h - 2 * dh, 3 - r_w - 2 * dw]
                      for dh in (0, 1) for dw in (0, 1)]
            phases.append(jnp.concatenate(blocks, axis=0))          # (4*Cin, Cout)
    wp = jnp.stack(phases)                                          # (4, 4*Cin, Cout)
    if cout_pad is not None and cout_pad > cout:
        wp = jnp.pad(wp, ((0, 0), (0, 0), (0, cout_pad - cout)))
    return wp.astype(jnp.bfloat16)


def prepare_params(params):
    packed = {
        # layer 0: columns ordered (kh, kw, cout) so the matmul output reshapes to NHWC
        "w0": params["w0"].transpose(0, 2, 3, 1)
                          .reshape(ZSIZE, K * K * NGF * 8).astype(jnp.bfloat16),
        "w4": _pack_phase_weight(params["w4"], cout_pad=_COUT_PAD),
    }
    for li in (1, 2, 3):
        packed[f"w{li}"] = _pack_phase_weight(params[f"w{li}"])
    for li in (0, 1, 2, 3):
        packed[f"gamma{li}"] = params[f"gamma{li}"].reshape(-1)
        packed[f"beta{li}"] = params[f"beta{li}"].reshape(-1)
    return packed


# ---------------------------------------------------------------------------
# Generator forward
# ---------------------------------------------------------------------------
def generator_forward(z_nchw, packed):
    n = z_nchw.shape[0]
    z = z_nchw.reshape(n, ZSIZE).astype(jnp.bfloat16)

    # Layer 0: ConvTranspose(zsize -> ngf*8, 1x1 -> 4x4, s=2, p=0) + BN + ReLU.
    y0 = l0_matmul(z, packed["w0"])                    # (N, K*K*512) f32
    y0 = y0.reshape(n, K, K, NGF * 8)                  # NHWC
    a = _bn_relu(y0, packed["gamma0"], packed["beta0"])

    # Layers 1-3: stride-2 ConvTranspose + BN + ReLU via the 4-phase decomposition.
    for li in (1, 2, 3):
        nb, h, w, _ = a.shape
        xp = _pack_phases(a)                           # (4, N*h*w, 4*Cin) bf16
        wp = packed[f"w{li}"]
        cout = wp.shape[-1]
        y, s, sq = phase_conv_bn(xp, wp)               # (4, M, cout), 2x(4, 1, cout)
        cnt = jnp.float32(4 * nb * h * w)              # = N * H_out * W_out
        mean = jnp.sum(s, axis=0) / cnt                # (1, cout)
        var = jnp.maximum(jnp.sum(sq, axis=0) / cnt - mean * mean, 0.0)
        scale = packed[f"gamma{li}"] / jnp.sqrt(var + EPS)
        shift = packed[f"beta{li}"] - mean * scale
        ya = jnp.maximum(y.astype(jnp.float32) * scale + shift, 0.0)
        a = _interleave_phases(ya, nb, h, w, cout)     # (N, 2h, 2w, cout)

    # Layer 4: final stride-2 ConvTranspose -> 1 channel, tanh.
    nb, h, w, _ = a.shape
    xp = _pack_phases(a)                               # (4, N*h*w, 256) bf16
    yo = phase_conv_tanh(xp, packed["w4"])             # (4, N*h*w, 1) f32
    img = _interleave_phases(yo, nb, h, w, 1)          # (N, 2h, 2w, 1)
    return jnp.transpose(img, (0, 3, 1, 2))            # NCHW


# ---------------------------------------------------------------------------
# Deterministic parameter init (synthetic; shapes match the PyTorch module)
# ---------------------------------------------------------------------------
def init_params(key):
    params = {}
    cins = [ZSIZE, NGF * 8, NGF * 4, NGF * 2, NGF]
    couts = [NGF * 8, NGF * 4, NGF * 2, NGF, NCHANNELS]
    for li, (ci, co) in enumerate(zip(cins, couts)):
        key, k1, k2, k3 = jax.random.split(key, 4)
        params[f"w{li}"] = 0.02 * jax.random.normal(k1, (ci, co, K, K), jnp.float32)
        if li < 4:  # all but the final layer have BatchNorm
            params[f"gamma{li}"] = 1.0 + 0.02 * jax.random.normal(k2, (1, co), jnp.float32)
            params[f"beta{li}"] = 0.02 * jax.random.normal(k3, (1, co), jnp.float32)
    return params


if __name__ == "__main__":
    key = jax.random.PRNGKey(0)
    pkey, zkey = jax.random.split(key)
    params = init_params(pkey)
    packed = prepare_params(params)      # weight re-layout hoisted out of the jitted forward

    # Latent input, NCHW like PyTorch: (batch=2, zsize=128, 1, 1)
    z = jax.random.normal(zkey, (2, ZSIZE, 1, 1), jnp.float32)

    out = jax.jit(generator_forward)(z, packed)
    out = jax.block_until_ready(out)

    assert out.shape == (2, NCHANNELS, 64, 64), out.shape
    assert bool(jnp.all(jnp.isfinite(out)))
    assert bool(jnp.all(jnp.abs(out) <= 1.0))   # tanh output range
    print("KERNEL_OK")
</pallas_src>

<mosaic_0001>
module attributes {stable_mosaic.version = 11 : i64} {
  func.func @_l0_kernel(%arg0: i32, %arg1: memref<2x128xbf16, #tpu.memory_space<vmem>>, %arg2: memref<128x8192xbf16, #tpu.memory_space<vmem>>, %arg3: memref<2x8192xf32, #tpu.memory_space<vmem>>) attributes {dimension_semantics = [#tpu.dimension_semantics<arbitrary>], iteration_bounds = array<i64: 1>, scalar_prefetch = 0 : i64, scratch_operands = 0 : i64, tpu.core_type = #tpu.core_type<tc>, window_params = [{pipeline_mode = #tpu.pipeline_mode<synchronous>, transform_indices = @transform_0, window_bounds = array<i64: 2, 128>}, {pipeline_mode = #tpu.pipeline_mode<synchronous>, transform_indices = @transform_1, window_bounds = array<i64: 128, 8192>}, {pipeline_mode = #tpu.pipeline_mode<synchronous>, transform_indices = @transform_2, window_bounds = array<i64: 2, 8192>}]} {
    %c0 = arith.constant 0 : index
    %c0_0 = arith.constant 0 : index
    %0 = vector.load %arg1[%c0, %c0_0] : memref<2x128xbf16, #tpu.memory_space<vmem>>, vector<2x128xbf16>
    %c0_1 = arith.constant 0 : index
    %c0_2 = arith.constant 0 : index
    %1 = vector.load %arg2[%c0_1, %c0_2] : memref<128x8192xbf16, #tpu.memory_space<vmem>>, vector<128x8192xbf16>
    %cst = arith.constant dense<0.000000e+00> : vector<2x8192xf32>
    %2 = tpu.matmul %0, %1, %cst {dimension_numbers = #tpu.dot_dimension_numbers<[1], [0], [0], [1], [0, 0, 1, 1], [], []>} : vector<2x128xbf16>, vector<128x8192xbf16>, vector<2x8192xf32> -> vector<2x8192xf32>
    %c0_3 = arith.constant 0 : index
    %c0_4 = arith.constant 0 : index
    %3 = vector.load %arg3[%c0_3, %c0_4] : memref<2x8192xf32, #tpu.memory_space<vmem>>, vector<2x8192xf32>
    tpu.vector_store %arg3[%c0_3, %c0_4], %2 {strides = array<i32>} : memref<2x8192xf32, #tpu.memory_space<vmem>>, vector<2x8192xf32>,
    return
  }
  func.func @transform_0(%arg0: i32) -> (i32, i32) {
    %c0_i32 = arith.constant 0 : i32
    %c0_i32_0 = arith.constant 0 : i32
    %c0_i32_1 = arith.constant 0 : i32
    return %c0_i32, %c0_i32_0 : i32, i32
  }
  func.func @transform_1(%arg0: i32) -> (i32, i32) {
    %c0_i32 = arith.constant 0 : i32
    %c0_i32_0 = arith.constant 0 : i32
    %c0_i32_1 = arith.constant 0 : i32
    return %c0_i32, %c0_i32_0 : i32, i32
  }
  func.func @transform_2(%arg0: i32) -> (i32, i32) {
    %c0_i32 = arith.constant 0 : i32
    %c0_i32_0 = arith.constant 0 : i32
    %c0_i32_1 = arith.constant 0 : i32
    return %c0_i32, %c0_i32_0 : i32, i32
  }
}

module attributes {stable_mosaic.version = 11 : i64} {
  func.func @_phase_conv_bn_kernel(%arg0: i32, %arg1: memref<1x32x2048xbf16, #tpu.memory_space<vmem>>, %arg2: memref<1x2048x256xbf16, #tpu.memory_space<vmem>>, %arg3: memref<1x32x256xbf16, #tpu.memory_space<vmem>>, %arg4: memref<1x1x256xf32, #tpu.memory_space<vmem>>, %arg5: memref<1x1x256xf32, #tpu.memory_space<vmem>>) attributes {dimension_semantics = [#tpu.dimension_semantics<parallel>], iteration_bounds = array<i64: 4>, scalar_prefetch = 0 : i64, scratch_operands = 0 : i64, tpu.core_type = #tpu.core_type<tc>, window_params = [{transform_indices = @transform_0, window_bounds = array<i64: 1, 32, 2048>}, {transform_indices = @transform_1, window_bounds = array<i64: 1, 2048, 256>}, {transform_indices = @transform_2, window_bounds = array<i64: 1, 32, 256>}, {transform_indices = @transform_3, window_bounds = array<i64: 1, 1, 256>}, {transform_indices = @transform_4, window_bounds = array<i64: 1, 1, 256>}]} {
    %c0 = arith.constant 0 : index
    %c0_0 = arith.constant 0 : index
    %c0_1 = arith.constant 0 : index
    %0 = vector.load %arg1[%c0, %c0_0, %c0_1] : memref<1x32x2048xbf16, #tpu.memory_space<vmem>>, vector<1x32x2048xbf16>
    %1 = vector.shape_cast %0 : vector<1x32x2048xbf16> to vector<32x2048xbf16>
    %c0_2 = arith.constant 0 : index
    %c0_3 = arith.constant 0 : index
    %c0_4 = arith.constant 0 : index
    %2 = vector.load %arg2[%c0_2, %c0_3, %c0_4] : memref<1x2048x256xbf16, #tpu.memory_space<vmem>>, vector<1x2048x256xbf16>
    %3 = vector.shape_cast %2 : vector<1x2048x256xbf16> to vector<2048x256xbf16>
    %cst = arith.constant dense<0.000000e+00> : vector<32x256xf32>
    %4 = tpu.matmul %1, %3, %cst {dimension_numbers = #tpu.dot_dimension_numbers<[1], [0], [0], [1], [0, 0, 1, 1], [], []>} : vector<32x2048xbf16>, vector<2048x256xbf16>, vector<32x256xf32> -> vector<32x256xf32>
    %5 = arith.truncf %4 : vector<32x256xf32> to vector<32x256xbf16>
    %c0_5 = arith.constant 0 : index
    %c0_6 = arith.constant 0 : index
    %c0_7 = arith.constant 0 : index
    %6 = vector.load %arg3[%c0_5, %c0_6, %c0_7] : memref<1x32x256xbf16, #tpu.memory_space<vmem>>, vector<1x32x256xbf16>
    %7 = vector.shape_cast %6 : vector<1x32x256xbf16> to vector<32x256xbf16>
    %8 = vector.shape_cast %5 : vector<32x256xbf16> to vector<1x32x256xbf16>
    tpu.vector_store %arg3[%c0_5, %c0_6, %c0_7], %8 {strides = array<i32>} : memref<1x32x256xbf16, #tpu.memory_space<vmem>>, vector<1x32x256xbf16>,
    %cst_8 = arith.constant dense<0.000000e+00> : vector<256xf32>
    %9 = vector.multi_reduction <add>, %4, %cst_8 [0] : vector<32x256xf32> to vector<256xf32>
    %10 = vector.shape_cast %9 : vector<256xf32> to vector<1x256xf32>
    %c0_9 = arith.constant 0 : index
    %c0_10 = arith.constant 0 : index
    %c0_11 = arith.constant 0 : index
    %11 = vector.load %arg4[%c0_9, %c0_10, %c0_11] : memref<1x1x256xf32, #tpu.memory_space<vmem>>, vector<1x1x256xf32>
    %12 = vector.shape_cast %11 : vector<1x1x256xf32> to vector<1x256xf32>
    %13 = vector.shape_cast %10 : vector<1x256xf32> to vector<1x1x256xf32>
    tpu.vector_store %arg4[%c0_9, %c0_10, %c0_11], %13 {strides = array<i32>} : memref<1x1x256xf32, #tpu.memory_space<vmem>>, vector<1x1x256xf32>,
    %14 = arith.mulf %4, %4 : vector<32x256xf32>
    %cst_12 = arith.constant dense<0.000000e+00> : vector<256xf32>
    %15 = vector.multi_reduction <add>, %14, %cst_12 [0] : vector<32x256xf32> to vector<256xf32>
    %16 = vector.shape_cast %15 : vector<256xf32> to vector<1x256xf32>
    %c0_13 = arith.constant 0 : index
    %c0_14 = arith.constant 0 : index
    %c0_15 = arith.constant 0 : index
    %17 = vector.load %arg5[%c0_13, %c0_14, %c0_15] : memref<1x1x256xf32, #tpu.memory_space<vmem>>, vector<1x1x256xf32>
    %18 = vector.shape_cast %17 : vector<1x1x256xf32> to vector<1x256xf32>
    %19 = vector.shape_cast %16 : vector<1x256xf32> to vector<1x1x256xf32>
    tpu.vector_store %arg5[%c0_13, %c0_14, %c0_15], %19 {strides = array<i32>} : memref<1x1x256xf32, #tpu.memory_space<vmem>>, vector<1x1x256xf32>,
    return
  }
  func.func @transform_0(%arg0: i32) -> (i32, i32, i32) {
    %c0_i32 = arith.constant 0 : i32
    %c0_i32_0 = arith.constant 0 : i32
    %c0_i32_1 = arith.constant 0 : i32
    return %arg0, %c0_i32, %c0_i32_0 : i32, i32, i32
  }
  func.func @transform_1(%arg0: i32) -> (i32, i32, i32) {
    %c0_i32 = arith.constant 0 : i32
    %c0_i32_0 = arith.constant 0 : i32
    %c0_i32_1 = arith.constant 0 : i32
    return %arg0, %c0_i32, %c0_i32_0 : i32, i32, i32
  }
  func.func @transform_2(%arg0: i32) -> (i32, i32, i32) {
    %c0_i32 = arith.constant 0 : i32
    %c0_i32_0 = arith.constant 0 : i32
    %c0_i32_1 = arith.constant 0 : i32
    return %arg0, %c0_i32, %c0_i32_0 : i32, i32, i32
  }
  func.func @transform_3(%arg0: i32) -> (i32, i32, i32) {
    %c0_i32 = arith.constant 0 : i32
    %c0_i32_0 = arith.constant 0 : i32
    %c0_i32_1 = arith.constant 0 : i32
    return %arg0, %c0_i32, %c0_i32_0 : i32, i32, i32
  }
  func.func @transform_4(%arg0: i32) -> (i32, i32, i32) {
    %c0_i32 = arith.constant 0 : i32
    %c0_i32_0 = arith.constant 0 : i32
    %c0_i32_1 = arith.constant 0 : i32
    return %arg0, %c0_i32, %c0_i32_0 : i32, i32, i32
  }
}

module attributes {stable_mosaic.version = 11 : i64} {
  func.func @_phase_conv_bn_kernel(%arg0: i32, %arg1: memref<1x128x1024xbf16, #tpu.memory_space<vmem>>, %arg2: memref<1x1024x128xbf16, #tpu.memory_space<vmem>>, %arg3: memref<1x128x128xbf16, #tpu.memory_space<vmem>>, %arg4: memref<1x1x128xf32, #tpu.memory_space<vmem>>, %arg5: memref<1x1x128xf32, #tpu.memory_space<vmem>>) attributes {dimension_semantics = [#tpu.dimension_semantics<parallel>], iteration_bounds = array<i64: 4>, scalar_prefetch = 0 : i64, scratch_operands = 0 : i64, tpu.core_type = #tpu.core_type<tc>, window_params = [{transform_indices = @transform_0, window_bounds = array<i64: 1, 128, 1024>}, {transform_indices = @transform_1, window_bounds = array<i64: 1, 1024, 128>}, {transform_indices = @transform_2, window_bounds = array<i64: 1, 128, 128>}, {transform_indices = @transform_3, window_bounds = array<i64: 1, 1, 128>}, {transform_indices = @transform_4, window_bounds = array<i64: 1, 1, 128>}]} {
    %c0 = arith.constant 0 : index
    %c0_0 = arith.constant 0 : index
    %c0_1 = arith.constant 0 : index
    %0 = vector.load %arg1[%c0, %c0_0, %c0_1] : memref<1x128x1024xbf16, #tpu.memory_space<vmem>>, vector<1x128x1024xbf16>
    %1 = vector.shape_cast %0 : vector<1x128x1024xbf16> to vector<128x1024xbf16>
    %c0_2 = arith.constant 0 : index
    %c0_3 = arith.constant 0 : index
    %c0_4 = arith.constant 0 : index
    %2 = vector.load %arg2[%c0_2, %c0_3, %c0_4] : memref<1x1024x128xbf16, #tpu.memory_space<vmem>>, vector<1x1024x128xbf16>
    %3 = vector.shape_cast %2 : vector<1x1024x128xbf16> to vector<1024x128xbf16>
    %cst = arith.constant dense<0.000000e+00> : vector<128x128xf32>
    %4 = tpu.matmul %1, %3, %cst {dimension_numbers = #tpu.dot_dimension_numbers<[1], [0], [0], [1], [0, 0, 1, 1], [], []>} : vector<128x1024xbf16>, vector<1024x128xbf16>, vector<128x128xf32> -> vector<128x128xf32>
    %5 = arith.truncf %4 : vector<128x128xf32> to vector<128x128xbf16>
    %c0_5 = arith.constant 0 : index
    %c0_6 = arith.constant 0 : index
    %c0_7 = arith.constant 0 : index
    %6 = vector.load %arg3[%c0_5, %c0_6, %c0_7] : memref<1x128x128xbf16, #tpu.memory_space<vmem>>, vector<1x128x128xbf16>
    %7 = vector.shape_cast %6 : vector<1x128x128xbf16> to vector<128x128xbf16>
    %8 = vector.shape_cast %5 : vector<128x128xbf16> to vector<1x128x128xbf16>
    tpu.vector_store %arg3[%c0_5, %c0_6, %c0_7], %8 {strides = array<i32>} : memref<1x128x128xbf16, #tpu.memory_space<vmem>>, vector<1x128x128xbf16>,
    %cst_8 = arith.constant dense<0.000000e+00> : vector<128xf32>
    %9 = vector.multi_reduction <add>, %4, %cst_8 [0] : vector<128x128xf32> to vector<128xf32>
    %10 = vector.shape_cast %9 : vector<128xf32> to vector<1x128xf32>
    %c0_9 = arith.constant 0 : index
    %c0_10 = arith.constant 0 : index
    %c0_11 = arith.constant 0 : index
    %11 = vector.load %arg4[%c0_9, %c0_10, %c0_11] : memref<1x1x128xf32, #tpu.memory_space<vmem>>, vector<1x1x128xf32>
    %12 = vector.shape_cast %11 : vector<1x1x128xf32> to vector<1x128xf32>
    %13 = vector.shape_cast %10 : vector<1x128xf32> to vector<1x1x128xf32>
    tpu.vector_store %arg4[%c0_9, %c0_10, %c0_11], %13 {strides = array<i32>} : memref<1x1x128xf32, #tpu.memory_space<vmem>>, vector<1x1x128xf32>,
    %14 = arith.mulf %4, %4 : vector<128x128xf32>
    %cst_12 = arith.constant dense<0.000000e+00> : vector<128xf32>
    %15 = vector.multi_reduction <add>, %14, %cst_12 [0] : vector<128x128xf32> to vector<128xf32>
    %16 = vector.shape_cast %15 : vector<128xf32> to vector<1x128xf32>
    %c0_13 = arith.constant 0 : index
    %c0_14 = arith.constant 0 : index
    %c0_15 = arith.constant 0 : index
    %17 = vector.load %arg5[%c0_13, %c0_14, %c0_15] : memref<1x1x128xf32, #tpu.memory_space<vmem>>, vector<1x1x128xf32>
    %18 = vector.shape_cast %17 : vector<1x1x128xf32> to vector<1x128xf32>
    %19 = vector.shape_cast %16 : vector<1x128xf32> to vector<1x1x128xf32>
    tpu.vector_store %arg5[%c0_13, %c0_14, %c0_15], %19 {strides = array<i32>} : memref<1x1x128xf32, #tpu.memory_space<vmem>>, vector<1x1x128xf32>,
    return
  }
  func.func @transform_0(%arg0: i32) -> (i32, i32, i32) {
    %c0_i32 = arith.constant 0 : i32
    %c0_i32_0 = arith.constant 0 : i32
    %c0_i32_1 = arith.constant 0 : i32
    return %arg0, %c0_i32, %c0_i32_0 : i32, i32, i32
  }
  func.func @transform_1(%arg0: i32) -> (i32, i32, i32) {
    %c0_i32 = arith.constant 0 : i32
    %c0_i32_0 = arith.constant 0 : i32
    %c0_i32_1 = arith.constant 0 : i32
    return %arg0, %c0_i32, %c0_i32_0 : i32, i32, i32
  }
  func.func @transform_2(%arg0: i32) -> (i32, i32, i32) {
    %c0_i32 = arith.constant 0 : i32
    %c0_i32_0 = arith.constant 0 : i32
    %c0_i32_1 = arith.constant 0 : i32
    return %arg0, %c0_i32, %c0_i32_0 : i32, i32, i32
  }
  func.func @transform_3(%arg0: i32) -> (i32, i32, i32) {
    %c0_i32 = arith.constant 0 : i32
    %c0_i32_0 = arith.constant 0 : i32
    %c0_i32_1 = arith.constant 0 : i32
    return %arg0, %c0_i32, %c0_i32_0 : i32, i32, i32
  }
  func.func @transform_4(%arg0: i32) -> (i32, i32, i32) {
    %c0_i32 = arith.constant 0 : i32
    %c0_i32_0 = arith.constant 0 : i32
    %c0_i32_1 = arith.constant 0 : i32
    return %arg0, %c0_i32, %c0_i32_0 : i32, i32, i32
  }
}

module attributes {stable_mosaic.version = 11 : i64} {
  func.func @_phase_conv_bn_kernel(%arg0: i32, %arg1: memref<1x512x512xbf16, #tpu.memory_space<vmem>>, %arg2: memref<1x512x64xbf16, #tpu.memory_space<vmem>>, %arg3: memref<1x512x64xbf16, #tpu.memory_space<vmem>>, %arg4: memref<1x1x64xf32, #tpu.memory_space<vmem>>, %arg5: memref<1x1x64xf32, #tpu.memory_space<vmem>>) attributes {dimension_semantics = [#tpu.dimension_semantics<parallel>], iteration_bounds = array<i64: 4>, scalar_prefetch = 0 : i64, scratch_operands = 0 : i64, tpu.core_type = #tpu.core_type<tc>, window_params = [{transform_indices = @transform_0, window_bounds = array<i64: 1, 512, 512>}, {transform_indices = @transform_1, window_bounds = array<i64: 1, 512, 64>}, {transform_indices = @transform_2, window_bounds = array<i64: 1, 512, 64>}, {transform_indices = @transform_3, window_bounds = array<i64: 1, 1, 64>}, {transform_indices = @transform_4, window_bounds = array<i64: 1, 1, 64>}]} {
    %c0 = arith.constant 0 : index
    %c0_0 = arith.constant 0 : index
    %c0_1 = arith.constant 0 : index
    %0 = vector.load %arg1[%c0, %c0_0, %c0_1] : memref<1x512x512xbf16, #tpu.memory_space<vmem>>, vector<1x512x512xbf16>
    %1 = vector.shape_cast %0 : vector<1x512x512xbf16> to vector<512x512xbf16>
    %c0_2 = arith.constant 0 : index
    %c0_3 = arith.constant 0 : index
    %c0_4 = arith.constant 0 : index
    %2 = vector.load %arg2[%c0_2, %c0_3, %c0_4] : memref<1x512x64xbf16, #tpu.memory_space<vmem>>, vector<1x512x64xbf16>
    %3 = vector.shape_cast %2 : vector<1x512x64xbf16> to vector<512x64xbf16>
    %cst = arith.constant dense<0.000000e+00> : vector<512x64xf32>
    %4 = tpu.matmul %1, %3, %cst {dimension_numbers = #tpu.dot_dimension_numbers<[1], [0], [0], [1], [0, 0, 1, 1], [], []>} : vector<512x512xbf16>, vector<512x64xbf16>, vector<512x64xf32> -> vector<512x64xf32>
    %5 = arith.truncf %4 : vector<512x64xf32> to vector<512x64xbf16>
    %c0_5 = arith.constant 0 : index
    %c0_6 = arith.constant 0 : index
    %c0_7 = arith.constant 0 : index
    %6 = vector.load %arg3[%c0_5, %c0_6, %c0_7] : memref<1x512x64xbf16, #tpu.memory_space<vmem>>, vector<1x512x64xbf16>
    %7 = vector.shape_cast %6 : vector<1x512x64xbf16> to vector<512x64xbf16>
    %8 = vector.shape_cast %5 : vector<512x64xbf16> to vector<1x512x64xbf16>
    tpu.vector_store %arg3[%c0_5, %c0_6, %c0_7], %8 {strides = array<i32>} : memref<1x512x64xbf16, #tpu.memory_space<vmem>>, vector<1x512x64xbf16>,
    %cst_8 = arith.constant dense<0.000000e+00> : vector<64xf32>
    %9 = vector.multi_reduction <add>, %4, %cst_8 [0] : vector<512x64xf32> to vector<64xf32>
    %10 = vector.shape_cast %9 : vector<64xf32> to vector<1x64xf32>
    %c0_9 = arith.constant 0 : index
    %c0_10 = arith.constant 0 : index
    %c0_11 = arith.constant 0 : index
    %11 = vector.load %arg4[%c0_9, %c0_10, %c0_11] : memref<1x1x64xf32, #tpu.memory_space<vmem>>, vector<1x1x64xf32>
    %12 = vector.shape_cast %11 : vector<1x1x64xf32> to vector<1x64xf32>
    %13 = vector.shape_cast %10 : vector<1x64xf32> to vector<1x1x64xf32>
    tpu.vector_store %arg4[%c0_9, %c0_10, %c0_11], %13 {strides = array<i32>} : memref<1x1x64xf32, #tpu.memory_space<vmem>>, vector<1x1x64xf32>,
    %14 = arith.mulf %4, %4 : vector<512x64xf32>
    %cst_12 = arith.constant dense<0.000000e+00> : vector<64xf32>
    %15 = vector.multi_reduction <add>, %14, %cst_12 [0] : vector<512x64xf32> to vector<64xf32>
    %16 = vector.shape_cast %15 : vector<64xf32> to vector<1x64xf32>
    %c0_13 = arith.constant 0 : index
    %c0_14 = arith.constant 0 : index
    %c0_15 = arith.constant 0 : index
    %17 = vector.load %arg5[%c0_13, %c0_14, %c0_15] : memref<1x1x64xf32, #tpu.memory_space<vmem>>, vector<1x1x64xf32>
    %18 = vector.shape_cast %17 : vector<1x1x64xf32> to vector<1x64xf32>
    %19 = vector.shape_cast %16 : vector<1x64xf32> to vector<1x1x64xf32>
    tpu.vector_store %arg5[%c0_13, %c0_14, %c0_15], %19 {strides = array<i32>} : memref<1x1x64xf32, #tpu.memory_space<vmem>>, vector<1x1x64xf32>,
    return
  }
  func.func @transform_0(%arg0: i32) -> (i32, i32, i32) {
    %c0_i32 = arith.constant 0 : i32
    %c0_i32_0 = arith.constant 0 : i32
    %c0_i32_1 = arith.constant 0 : i32
    return %arg0, %c0_i32, %c0_i32_0 : i32, i32, i32
  }
  func.func @transform_1(%arg0: i32) -> (i32, i32, i32) {
    %c0_i32 = arith.constant 0 : i32
    %c0_i32_0 = arith.constant 0 : i32
    %c0_i32_1 = arith.constant 0 : i32
    return %arg0, %c0_i32, %c0_i32_0 : i32, i32, i32
  }
  func.func @transform_2(%arg0: i32) -> (i32, i32, i32) {
    %c0_i32 = arith.constant 0 : i32
    %c0_i32_0 = arith.constant 0 : i32
    %c0_i32_1 = arith.constant 0 : i32
    return %arg0, %c0_i32, %c0_i32_0 : i32, i32, i32
  }
  func.func @transform_3(%arg0: i32) -> (i32, i32, i32) {
    %c0_i32 = arith.constant 0 : i32
    %c0_i32_0 = arith.constant 0 : i32
    %c0_i32_1 = arith.constant 0 : i32
    return %arg0, %c0_i32, %c0_i32_0 : i32, i32, i32
  }
  func.func @transform_4(%arg0: i32) -> (i32, i32, i32) {
    %c0_i32 = arith.constant 0 : i32
    %c0_i32_0 = arith.constant 0 : i32
    %c0_i32_1 = arith.constant 0 : i32
    return %arg0, %c0_i32, %c0_i32_0 : i32, i32, i32
  }
}

module attributes {stable_mosaic.version = 11 : i64} {
  func.func @_phase_conv_tanh_kernel(%arg0: i32, %arg1: memref<1x2048x256xbf16, #tpu.memory_space<vmem>>, %arg2: memref<1x256x128xbf16, #tpu.memory_space<vmem>>, %arg3: memref<1x2048x1xf32, #tpu.memory_space<vmem>>) attributes {dimension_semantics = [#tpu.dimension_semantics<parallel>], iteration_bounds = array<i64: 4>, scalar_prefetch = 0 : i64, scratch_operands = 0 : i64, tpu.core_type = #tpu.core_type<tc>, window_params = [{transform_indices = @transform_0, window_bounds = array<i64: 1, 2048, 256>}, {transform_indices = @transform_1, window_bounds = array<i64: 1, 256, 128>}, {transform_indices = @transform_2, window_bounds = array<i64: 1, 2048, 1>}]} {
    %c0 = arith.constant 0 : index
    %c0_0 = arith.constant 0 : index
    %c0_1 = arith.constant 0 : index
    %0 = vector.load %arg1[%c0, %c0_0, %c0_1] : memref<1x2048x256xbf16, #tpu.memory_space<vmem>>, vector<1x2048x256xbf16>
    %1 = vector.shape_cast %0 : vector<1x2048x256xbf16> to vector<2048x256xbf16>
    %c0_2 = arith.constant 0 : index
    %c0_3 = arith.constant 0 : index
    %c0_4 = arith.constant 0 : index
    %2 = vector.load %arg2[%c0_2, %c0_3, %c0_4] : memref<1x256x128xbf16, #tpu.memory_space<vmem>>, vector<1x256x128xbf16>
    %3 = vector.shape_cast %2 : vector<1x256x128xbf16> to vector<256x128xbf16>
    %cst = arith.constant dense<0.000000e+00> : vector<2048x128xf32>
    %4 = tpu.matmul %1, %3, %cst {dimension_numbers = #tpu.dot_dimension_numbers<[1], [0], [0], [1], [0, 0, 1, 1], [], []>} : vector<2048x256xbf16>, vector<256x128xbf16>, vector<2048x128xf32> -> vector<2048x128xf32>
    %5 = vector.extract_strided_slice %4 {offsets = [0, 0], sizes = [2048, 1], strides = [1, 1]} : vector<2048x128xf32> to vector<2048x1xf32>
    %6 = math.tanh %5 : vector<2048x1xf32>
    %c0_5 = arith.constant 0 : index
    %c0_6 = arith.constant 0 : index
    %c0_7 = arith.constant 0 : index
    %7 = vector.load %arg3[%c0_5, %c0_6, %c0_7] : memref<1x2048x1xf32, #tpu.memory_space<vmem>>, vector<1x2048x1xf32>
    %8 = vector.shape_cast %7 : vector<1x2048x1xf32> to vector<2048x1xf32>
    %9 = vector.shape_cast %6 : vector<2048x1xf32> to vector<1x2048x1xf32>
    tpu.vector_store %arg3[%c0_5, %c0_6, %c0_7], %9 {strides = array<i32>} : memref<1x2048x1xf32, #tpu.memory_space<vmem>>, vector<1x2048x1xf32>,
    return
  }
  func.func @transform_0(%arg0: i32) -> (i32, i32, i32) {
    %c0_i32 = arith.constant 0 : i32
    %c0_i32_0 = arith.constant 0 : i32
    %c0_i32_1 = arith.constant 0 : i32
    return %arg0, %c0_i32, %c0_i32_0 : i32, i32, i32
  }
  func.func @transform_1(%arg0: i32) -> (i32, i32, i32) {
    %c0_i32 = arith.constant 0 : i32
    %c0_i32_0 = arith.constant 0 : i32
    %c0_i32_1 = arith.constant 0 : i32
    return %arg0, %c0_i32, %c0_i32_0 : i32, i32, i32
  }
  func.func @transform_2(%arg0: i32) -> (i32, i32, i32) {
    %c0_i32 = arith.constant 0 : i32
    %c0_i32_0 = arith.constant 0 : i32
    %c0_i32_1 = arith.constant 0 : i32
    return %arg0, %c0_i32, %c0_i32_0 : i32, i32, i32
  }
}

</mosaic_0001>

<bundles_post_ra>
// kernel: generator_forward.5
= control target key start
LH: loop header
LB: loop body
LE: loop exit
PB: predicated region body
PF: predicated region fallthrough
CT: control target
= control target key end

     0   :  { %7 = vsyncpa [#allocation3], 0  ;;  %s5328_s9 = smov [#allocation2]   ;;  %s5522_s0 = inlined_call_operand.vmem [shape: bf16[2,128], index: 0, kind: input, shape index: {}]   ;;  %s5523_s1 = inlined_call_operand.hbm [shape: bf16[128,8192], index: 1, kind: input, shape index: {}]   ;;  %s5524_s2 = inlined_call_operand.vmem [shape: f32[2,8192], index: 2, kind: output, shape index: {}]  }
   0x1   :  { %s15_s10 = sshll.u32 %s5328_s9, 4  ;;  %s5304_s13 = scalar_lea.hbm %s5523_s1, 65536  ;;  %s16_s10 = int_to_ptr.vmem [resolvable:$true] %s15_s10 }
   0x2   :  { %p5305_p0 = scmp.ne.s32.totalorder %s5523_s1, %s5304_s13  ;;  %p5308_p1 = scmp.lt.u32.totalorder %s5304_s13, %s5523_s1 }
   0x4   :  { %p5310_p2 = pnand %p5308_p1, %p5305_p0 }
   0x6   :  { %5313 = shalt.err (!%p5310_p2)
}
   0x7   :  { %s5314_s18 = scalar_lea.vmem %s16_s10, 65536  ;;  %p5319_p4 = scmp.lt.s32.totalorder %s16_s10, %s16_s10 }
   0x8   :  { %p5315_p3 = scmp.ne.s32.totalorder %s16_s10, %s5314_s18  ;;  %p5320_p5 = scmp.lt.s32.totalorder %s5314_s18, %s5314_s18 }
   0xa   :  { %p5321_p6 = por %p5320_p5, %p5319_p4 }
   0xc   :  { %p5322_p7 = pnand %p5321_p6, %p5315_p3 }
   0xe   :  { %5325 = shalt.err (!%p5322_p7)
}
   0xf   :  { %s5329_s19 = smov 4096   ;;  %s5330_s20 = smov 256  }
  0x10   :  { %21 = dma.hbm_to_vmem [thread:$0]  %s5523_s1, 65536, %s16_s10, [#allocation3], %s5329_s19, %s5329_s19, %s5330_s20  }
  0x11   :  { %5326 = dma.done.wait [#allocation3], 65536  }
  0x12   :  { %5327 = vsyncadd [#allocation3], 4294901760  ;;  %v5331_v0 = vmov 0   ;;  %v27_v1 = vld [vmem:[#allocation2] sm:$0xff]  ;;  %v28_v3 = vld [vmem:[#allocation2 + $0x8] sm:$0xff] }
  0x13   :  { %3131 = vmatprep.mubr.bf16.mxu0 %v5331_v0  ;;  %3172 = vmatprep.mubr.bf16.mxu1 %v5331_v0  ;;  %v59_v2 = vld [vmem:[#allocation2 + $0x100] sm:$0xff]  ;;  %v60_v5 = vld [vmem:[#allocation2 + $0x108] sm:$0xff]  ;;  %v29_v63 = vld [vmem:[#allocation2 + $0x10] sm:$0xff] }
  0x14   :  { %v4785_v4 = vcombine.high %v27_v1, %v59_v2  ;;  %v4784_v6 = vcombine.low %v27_v1, %v59_v2  ;;  %v91_v7 = vld [vmem:[#allocation2 + $0x200] sm:$0xff]  ;;  %v4787_v9 = vcombine.high %v28_v3, %v60_v5  ;;  %v4786_v10 = vcombine.low %v28_v3, %v60_v5  ;;  %v92_v12 = vld [vmem:[#allocation2 + $0x208] sm:$0xff]  ;;  %v61_v1 = vld [vmem:[#allocation2 + $0x110] sm:$0xff] }
  0x15   :  { %v123_v8 = vld [vmem:[#allocation2 + $0x300] sm:$0xff]  ;;  %v124_v13 = vld [vmem:[#allocation2 + $0x308] sm:$0xff]  ;;  %v30_v2 = vld [vmem:[#allocation2 + $0x18] sm:$0xff] }
  0x16   :  { %v4849_v11 = vcombine.high %v91_v7, %v123_v8  ;;  %v155_v14 = vld [vmem:[#allocation2 + $0x400] sm:$0xff]  ;;  %3099 = vmatprep.subr.bf16.mxu0 %v4785_v4  ;;  %v4851_v15 = vcombine.high %v92_v12, %v124_v13  ;;  %v156_v17 = vld [vmem:[#allocation2 + $0x408] sm:$0xff]  ;;  %3140 = vmatprep.subr.bf16.mxu1 %v4787_v9  ;;  %v4848_v19 = vcombine.low %v91_v7, %v123_v8  ;;  %v62_v3 = vld [vmem:[#allocation2 + $0x118] sm:$0xff] }
  0x17   :  { %v187_v16 = vld [vmem:[#allocation2 + $0x500] sm:$0xff]  ;;  %v188_v18 = vld [vmem:[#allocation2 + $0x508] sm:$0xff]  ;;  %3100 = vmatpush1.bf16.msra.mxu0 %v4784_v6  ;;  %3141 = vmatpush1.bf16.msra.mxu1 %v4786_v10  ;;  %v4850_v20 = vcombine.low %v92_v12, %v124_v13  ;;  %v4789_v6 = vcombine.high %v29_v63, %v61_v1  ;;  %v4791_v7 = vcombine.high %v30_v2, %v62_v3  ;;  %v93_v8 = vld [vmem:[#allocation2 + $0x210] sm:$0xff] }
  0x18   :  { %3101 = vmatprep.subr.bf16.mxu0 %v4849_v11  ;;  %v4913_v21 = vcombine.high %v155_v14, %v187_v16  ;;  %3142 = vmatprep.subr.bf16.mxu1 %v4851_v15  ;;  %v4915_v22 = vcombine.high %v156_v17, %v188_v18  ;;  %v219_v23 = vld [vmem:[#allocation2 + $0x600] sm:$0xff]  ;;  %v220_v25 = vld [vmem:[#allocation2 + $0x608] sm:$0xff]  ;;  %v4912_v27 = vcombine.low %v155_v14, %v187_v16  ;;  %v125_v9 = vld [vmem:[#allocation2 + $0x310] sm:$0xff] }
  0x19   :  { %v251_v24 = vld [vmem:[#allocation2 + $0x700] sm:$0xff]  ;;  %v252_v26 = vld [vmem:[#allocation2 + $0x708] sm:$0xff]  ;;  %v4914_v28 = vcombine.low %v156_v17, %v188_v18  ;;  %v94_v10 = vld [vmem:[#allocation2 + $0x218] sm:$0xff]  ;;  %v4788_v13 = vcombine.low %v29_v63, %v61_v1  ;;  %v4790_v14 = vcombine.low %v30_v2, %v62_v3  ;;  %v4853_v15 = vcombine.high %v93_v8, %v125_v9 }
  0x1a   :  { %v4977_v29 = vcombine.high %v219_v23, %v251_v24  ;;  %v4979_v30 = vcombine.high %v220_v25, %v252_v26  ;;  %v283_v31 = vld [vmem:[#allocation2 + $0x800] sm:$0xff]  ;;  %v284_v33 = vld [vmem:[#allocation2 + $0x808] sm:$0xff]  ;;  %v4976_v35 = vcombine.low %v219_v23, %v251_v24  ;;  %v4978_v36 = vcombine.low %v220_v25, %v252_v26  ;;  %v126_v11 = vld [vmem:[#allocation2 + $0x318] sm:$0xff] }
  0x1b   :  { %3102 = vmatpush1.bf16.msra.mxu0 %v4848_v19  ;;  %3143 = vmatpush1.bf16.msra.mxu1 %v4850_v20  ;;  %v315_v32 = vld [vmem:[#allocation2 + $0x900] sm:$0xff]  ;;  %v316_v34 = vld [vmem:[#allocation2 + $0x908] sm:$0xff]  ;;  %v4855_v16 = vcombine.high %v94_v10, %v126_v11  ;;  %v157_v17 = vld [vmem:[#allocation2 + $0x410] sm:$0xff] }
  0x1c   :  { %3103 = vmatprep.subr.bf16.mxu0 %v4913_v21  ;;  %3144 = vmatprep.subr.bf16.mxu1 %v4915_v22  ;;  %v5041_v37 = vcombine.high %v283_v31, %v315_v32  ;;  %v5043_v38 = vcombine.high %v284_v33, %v316_v34  ;;  %v347_v39 = vld [vmem:[#allocation2 + $0xa00] sm:$0xff]  ;;  %v348_v41 = vld [vmem:[#allocation2 + $0xa08] sm:$0xff]  ;;  %v5040_v43 = vcombine.low %v283_v31, %v315_v32  ;;  %v189_v18 = vld [vmem:[#allocation2 + $0x510] sm:$0xff] }
  0x1d   :  { %v379_v40 = vld [vmem:[#allocation2 + $0xb00] sm:$0xff]  ;;  %v380_v42 = vld [vmem:[#allocation2 + $0xb08] sm:$0xff]  ;;  %v5042_v44 = vcombine.low %v284_v33, %v316_v34  ;;  %v158_v19 = vld [vmem:[#allocation2 + $0x418] sm:$0xff]  ;;  %v4852_v21 = vcombine.low %v93_v8, %v125_v9  ;;  %v4854_v22 = vcombine.low %v94_v10, %v126_v11  ;;  %v4917_v23 = vcombine.high %v157_v17, %v189_v18 }
  0x1e   :  { %v5105_v45 = vcombine.high %v347_v39, %v379_v40  ;;  %v5107_v46 = vcombine.high %v348_v41, %v380_v42  ;;  %v411_v47 = vld [vmem:[#allocation2 + $0xc00] sm:$0xff]  ;;  %v412_v49 = vld [vmem:[#allocation2 + $0xc08] sm:$0xff]  ;;  %v5104_v51 = vcombine.low %v347_v39, %v379_v40  ;;  %v5106_v52 = vcombine.low %v348_v41, %v380_v42  ;;  %v190_v20 = vld [vmem:[#allocation2 + $0x518] sm:$0xff] }
  0x1f   :  { %3104 = vmatpush1.bf16.msra.mxu0 %v4912_v27  ;;  %3145 = vmatpush1.bf16.msra.mxu1 %v4914_v28  ;;  %v443_v48 = vld [vmem:[#allocation2 + $0xd00] sm:$0xff]  ;;  %v444_v50 = vld [vmem:[#allocation2 + $0xd08] sm:$0xff]  ;;  %v4919_v24 = vcombine.high %v158_v19, %v190_v20  ;;  %v221_v25 = vld [vmem:[#allocation2 + $0x610] sm:$0xff] }
  0x20   :  { %3105 = vmatprep.subr.bf16.mxu0 %v4977_v29  ;;  %3146 = vmatprep.subr.bf16.mxu1 %v4979_v30  ;;  %v5169_v53 = vcombine.high %v411_v47, %v443_v48  ;;  %v5171_v54 = vcombine.high %v412_v49, %v444_v50  ;;  %v475_v55 = vld [vmem:[#allocation2 + $0xe00] sm:$0xff]  ;;  %v476_v57 = vld [vmem:[#allocation2 + $0xe08] sm:$0xff]  ;;  %v5168_v59 = vcombine.low %v411_v47, %v443_v48  ;;  %v253_v26 = vld [vmem:[#allocation2 + $0x710] sm:$0xff] }
  0x21   :  { %v507_v56 = vld [vmem:[#allocation2 + $0xf00] sm:$0xff]  ;;  %v508_v58 = vld [vmem:[#allocation2 + $0xf08] sm:$0xff]  ;;  %v5170_v60 = vcombine.low %v412_v49, %v444_v50  ;;  %v222_v27 = vld [vmem:[#allocation2 + $0x618] sm:$0xff]  ;;  %v4916_v29 = vcombine.low %v157_v17, %v189_v18  ;;  %v4918_v30 = vcombine.low %v158_v19, %v190_v20  ;;  %v4981_v31 = vcombine.high %v221_v25, %v253_v26 }
  0x22   :  { %v5233_v61 = vcombine.high %v475_v55, %v507_v56  ;;  %v5235_v62 = vcombine.high %v476_v57, %v508_v58  ;;  %v5232_v4 = vcombine.low %v475_v55, %v507_v56  ;;  %v5234_v5 = vcombine.low %v476_v57, %v508_v58  ;;  %v5365_v12 = vld [vmem:[%s5522_s0] sm:$0x1]  ;;  %v254_v28 = vld [vmem:[#allocation2 + $0x718] sm:$0xff]  ;;  %v285_v33 = vld [vmem:[#allocation2 + $0x810] sm:$0xff] }
  0x23   :  { %3106 = vmatpush1.bf16.msra.mxu0 %v4976_v35  ;;  %3147 = vmatpush1.bf16.msra.mxu1 %v4978_v36  ;;  %v4983_v32 = vcombine.high %v222_v27, %v254_v28  ;;  %v317_v34 = vld [vmem:[#allocation2 + $0x910] sm:$0xff]  ;;  %v286_v35 = vld [vmem:[#allocation2 + $0x818] sm:$0xff]  ;;  %v31_v2 = vld [vmem:[#allocation2 + $0x20] sm:$0xff] }
  0x24   :  { %3107 = vmatprep.subr.bf16.mxu0 %v5041_v37  ;;  %3148 = vmatprep.subr.bf16.mxu1 %v5043_v38  ;;  %v318_v36 = vld [vmem:[#allocation2 + $0x918] sm:$0xff]  ;;  %v4980_v37 = vcombine.low %v221_v25, %v253_v26  ;;  %v4982_v38 = vcombine.low %v222_v27, %v254_v28  ;;  %v5045_v39 = vcombine.high %v285_v33, %v317_v34  ;;  %v349_v41 = vld [vmem:[#allocation2 + $0xa10] sm:$0xff]  ;;  %v63_v3 = vld [vmem:[#allocation2 + $0x120] sm:$0xff] }
  0x25   :  { %v5047_v40 = vcombine.high %v286_v35, %v318_v36  ;;  %v381_v42 = vld [vmem:[#allocation2 + $0xb10] sm:$0xff]  ;;  %v4793_v8 = vcombine.high %v31_v2, %v63_v3  ;;  %v95_v10 = vld [vmem:[#allocation2 + $0x220] sm:$0xff] }
  0x26   :  { %v5109_v47 = vcombine.high %v349_v41, %v381_v42  ;;  %v413_v49 = vld [vmem:[#allocation2 + $0xc10] sm:$0xff]  ;;  %v127_v11 = vld [vmem:[#allocation2 + $0x320] sm:$0xff] }
  0x27   :  { %3108 = vmatpush1.bf16.msra.mxu0 %v5040_v43  ;;  %3149 = vmatpush1.bf16.msra.mxu1 %v5042_v44  ;;  %v350_v43 = vld [vmem:[#allocation2 + $0xa18] sm:$0xff]  ;;  %v445_v50 = vld [vmem:[#allocation2 + $0xd10] sm:$0xff]  ;;  %v4857_v17 = vcombine.high %v95_v10, %v127_v11  ;;  %v159_v19 = vld [vmem:[#allocation2 + $0x420] sm:$0xff] }
  0x28   :  { %3109 = vmatprep.subr.bf16.mxu0 %v5105_v45  ;;  %3150 = vmatprep.subr.bf16.mxu1 %v5107_v46  ;;  %v382_v44 = vld [vmem:[#allocation2 + $0xb18] sm:$0xff]  ;;  %v5044_v45 = vcombine.low %v285_v33, %v317_v34  ;;  %v5046_v46 = vcombine.low %v286_v35, %v318_v36  ;;  %v5173_v55 = vcombine.high %v413_v49, %v445_v50  ;;  %v477_v57 = vld [vmem:[#allocation2 + $0xe10] sm:$0xff]  ;;  %v191_v20 = vld [vmem:[#allocation2 + $0x520] sm:$0xff] }
  0x29   :  { %v5111_v48 = vcombine.high %v350_v43, %v382_v44  ;;  %v509_v58 = vld [vmem:[#allocation2 + $0xf10] sm:$0xff]  ;;  %v4921_v25 = vcombine.high %v159_v19, %v191_v20  ;;  %v223_v27 = vld [vmem:[#allocation2 + $0x620] sm:$0xff] }
  0x2a   :  { %v5237_v63 = vcombine.high %v477_v57, %v509_v58  ;;  %v255_v28 = vld [vmem:[#allocation2 + $0x720] sm:$0xff] }
  0x2b   :  { %3110 = vmatpush1.bf16.msra.mxu0 %v5104_v51  ;;  %3151 = vmatpush1.bf16.msra.mxu1 %v5106_v52  ;;  %v414_v51 = vld [vmem:[#allocation2 + $0xc18] sm:$0xff]  ;;  %v4985_v33 = vcombine.high %v223_v27, %v255_v28  ;;  %v287_v35 = vld [vmem:[#allocation2 + $0x820] sm:$0xff] }
  0x2c   :  { %3111 = vmatprep.subr.bf16.mxu0 %v5169_v53  ;;  %3152 = vmatprep.subr.bf16.mxu1 %v5171_v54  ;;  %v446_v52 = vld [vmem:[#allocation2 + $0xd18] sm:$0xff]  ;;  %v5108_v53 = vcombine.low %v349_v41, %v381_v42  ;;  %v5110_v54 = vcombine.low %v350_v43, %v382_v44  ;;  %v319_v36 = vld [vmem:[#allocation2 + $0x920] sm:$0xff] }
  0x2d   :  { %v5175_v56 = vcombine.high %v414_v51, %v446_v52  ;;  %v5049_v41 = vcombine.high %v287_v35, %v319_v36  ;;  %v351_v43 = vld [vmem:[#allocation2 + $0xa20] sm:$0xff] }
  0x2e   :  { %v383_v44 = vld [vmem:[#allocation2 + $0xb20] sm:$0xff] }
  0x2f   :  { %3112 = vmatpush1.bf16.msra.mxu0 %v5168_v59  ;;  %3153 = vmatpush1.bf16.msra.mxu1 %v5170_v60  ;;  %v478_v59 = vld [vmem:[#allocation2 + $0xe18] sm:$0xff] }
  0x30   :  { %3113 = vmatprep.subr.bf16.mxu0 %v5233_v61  ;;  %3154 = vmatprep.subr.bf16.mxu1 %v5235_v62  ;;  %v510_v60 = vld [vmem:[#allocation2 + $0xf18] sm:$0xff]  ;;  %v5172_v61 = vcombine.low %v413_v49, %v445_v50  ;;  %v5174_v62 = vcombine.low %v414_v51, %v446_v52  ;;  %v5113_v49 = vcombine.high %v351_v43, %v383_v44  ;;  %v415_v51 = vld [vmem:[#allocation2 + $0xc20] sm:$0xff] }
  0x31   :  { %v5239_v1 = vcombine.high %v478_v59, %v510_v60  ;;  %v447_v52 = vld [vmem:[#allocation2 + $0xd20] sm:$0xff] }
  0x33   :  { %3114 = vmatpush1.bf16.msra.mxu0 %v5232_v4  ;;  %3155 = vmatpush1.bf16.msra.mxu1 %v5234_v5  ;;  %v32_v4 = vld [vmem:[#allocation2 + $0x28] sm:$0xff] }
  0x34   :  { %3181 = vmatprep.subr.bf16.mxu0 %v4789_v6  ;;  %3222 = vmatprep.subr.bf16.mxu1 %v4791_v7  ;;  %v64_v5 = vld [vmem:[#allocation2 + $0x128] sm:$0xff]  ;;  %v5236_v6 = vcombine.low %v477_v57, %v509_v58  ;;  %v5238_v7 = vcombine.low %v478_v59, %v510_v60  ;;  %v5177_v57 = vcombine.high %v415_v51, %v447_v52  ;;  %v479_v59 = vld [vmem:[#allocation2 + $0xe20] sm:$0xff] }
  0x35   :  { %v4795_v9 = vcombine.high %v32_v4, %v64_v5  ;;  %v511_v60 = vld [vmem:[#allocation2 + $0xf20] sm:$0xff] }
  0x36   :  { %3132 = vmatmul.mubr.bf16.vlgmr.msra.gmra.mrb[0].mxu0 %v5365_v12  ;;  %3173 = vmatmul.mubr.bf16.vlgmr.msra.gmra.mrb[0].mxu1 %v5365_v12 }
  0x37   :  { %3182 = vmatpush1.bf16.msra.mxu0 %v4788_v13  ;;  %3223 = vmatpush1.bf16.msra.mxu1 %v4790_v14  ;;  %v96_v13 = vld [vmem:[#allocation2 + $0x228] sm:$0xff] }
  0x38   :  { %3183 = vmatprep.subr.bf16.mxu0 %v4853_v15  ;;  %3224 = vmatprep.subr.bf16.mxu1 %v4855_v16  ;;  %v128_v14 = vld [vmem:[#allocation2 + $0x328] sm:$0xff]  ;;  %v4792_v15 = vcombine.low %v31_v2, %v63_v3  ;;  %v4794_v16 = vcombine.low %v32_v4, %v64_v5  ;;  %v5241_v2 = vcombine.high %v479_v59, %v511_v60  ;;  %v33_v4 = vld [vmem:[#allocation2 + $0x30] sm:$0xff] }
  0x39   :  { %3213 = vmatprep.mubr.bf16.mxu0 %v5331_v0  ;;  %3254 = vmatprep.mubr.bf16.mxu1 %v5331_v0  ;;  %v4859_v18 = vcombine.high %v96_v13, %v128_v14  ;;  %v65_v5 = vld [vmem:[#allocation2 + $0x130] sm:$0xff] }
  0x3b   :  { %3184 = vmatpush1.bf16.msra.mxu0 %v4852_v21  ;;  %3225 = vmatpush1.bf16.msra.mxu1 %v4854_v22  ;;  %v160_v21 = vld [vmem:[#allocation2 + $0x428] sm:$0xff] }
  0x3c   :  { %3185 = vmatprep.subr.bf16.mxu0 %v4917_v23  ;;  %3226 = vmatprep.subr.bf16.mxu1 %v4919_v24  ;;  %v192_v22 = vld [vmem:[#allocation2 + $0x528] sm:$0xff]  ;;  %v4856_v23 = vcombine.low %v95_v10, %v127_v11  ;;  %v4858_v24 = vcombine.low %v96_v13, %v128_v14  ;;  %v4797_v10 = vcombine.high %v33_v4, %v65_v5  ;;  %v97_v13 = vld [vmem:[#allocation2 + $0x230] sm:$0xff] }
  0x3d   :  { %v4923_v26 = vcombine.high %v160_v21, %v192_v22  ;;  %v129_v14 = vld [vmem:[#allocation2 + $0x330] sm:$0xff] }
  0x3f   :  { %3186 = vmatpush1.bf16.msra.mxu0 %v4916_v29  ;;  %3227 = vmatpush1.bf16.msra.mxu1 %v4918_v30  ;;  %v224_v29 = vld [vmem:[#allocation2 + $0x628] sm:$0xff] }
  0x40   :  { %3187 = vmatprep.subr.bf16.mxu0 %v4981_v31  ;;  %3228 = vmatprep.subr.bf16.mxu1 %v4983_v32  ;;  %v256_v30 = vld [vmem:[#allocation2 + $0x728] sm:$0xff]  ;;  %v4920_v31 = vcombine.low %v159_v19, %v191_v20  ;;  %v4922_v32 = vcombine.low %v160_v21, %v192_v22  ;;  %v4861_v19 = vcombine.high %v97_v13, %v129_v14  ;;  %v161_v21 = vld [vmem:[#allocation2 + $0x430] sm:$0xff] }
  0x41   :  { %v4987_v34 = vcombine.high %v224_v29, %v256_v30  ;;  %v193_v22 = vld [vmem:[#allocation2 + $0x530] sm:$0xff] }
  0x43   :  { %3188 = vmatpush1.bf16.msra.mxu0 %v4980_v37  ;;  %3229 = vmatpush1.bf16.msra.mxu1 %v4982_v38  ;;  %v288_v37 = vld [vmem:[#allocation2 + $0x828] sm:$0xff] }
  0x44   :  { %3189 = vmatprep.subr.bf16.mxu0 %v5045_v39  ;;  %3230 = vmatprep.subr.bf16.mxu1 %v5047_v40  ;;  %v320_v38 = vld [vmem:[#allocation2 + $0x928] sm:$0xff]  ;;  %v4984_v39 = vcombine.low %v223_v27, %v255_v28  ;;  %v4986_v40 = vcombine.low %v224_v29, %v256_v30  ;;  %v4925_v27 = vcombine.high %v161_v21, %v193_v22  ;;  %v225_v29 = vld [vmem:[#allocation2 + $0x630] sm:$0xff] }
  0x45   :  { %v5051_v42 = vcombine.high %v288_v37, %v320_v38  ;;  %v257_v30 = vld [vmem:[#allocation2 + $0x730] sm:$0xff] }
  0x47   :  { %3190 = vmatpush1.bf16.msra.mxu0 %v5044_v45  ;;  %3231 = vmatpush1.bf16.msra.mxu1 %v5046_v46  ;;  %v352_v45 = vld [vmem:[#allocation2 + $0xa28] sm:$0xff] }
  0x48   :  { %3191 = vmatprep.subr.bf16.mxu0 %v5109_v47  ;;  %3232 = vmatprep.subr.bf16.mxu1 %v5111_v48  ;;  %v384_v46 = vld [vmem:[#allocation2 + $0xb28] sm:$0xff]  ;;  %v5048_v47 = vcombine.low %v287_v35, %v319_v36  ;;  %v5050_v48 = vcombine.low %v288_v37, %v320_v38  ;;  %v4989_v35 = vcombine.high %v225_v29, %v257_v30  ;;  %v289_v37 = vld [vmem:[#allocation2 + $0x830] sm:$0xff] }
  0x49   :  { %v5115_v50 = vcombine.high %v352_v45, %v384_v46  ;;  %v321_v38 = vld [vmem:[#allocation2 + $0x930] sm:$0xff] }
  0x4b   :  { %3192 = vmatpush1.bf16.msra.mxu0 %v5108_v53  ;;  %3233 = vmatpush1.bf16.msra.mxu1 %v5110_v54  ;;  %v416_v53 = vld [vmem:[#allocation2 + $0xc28] sm:$0xff] }
  0x4c   :  { %3193 = vmatprep.subr.bf16.mxu0 %v5173_v55  ;;  %3234 = vmatprep.subr.bf16.mxu1 %v5175_v56  ;;  %v448_v54 = vld [vmem:[#allocation2 + $0xd28] sm:$0xff]  ;;  %v5112_v55 = vcombine.low %v351_v43, %v383_v44  ;;  %v5114_v56 = vcombine.low %v352_v45, %v384_v46  ;;  %v5053_v43 = vcombine.high %v289_v37, %v321_v38  ;;  %v353_v45 = vld [vmem:[#allocation2 + $0xa30] sm:$0xff] }
  0x4d   :  { %v5179_v58 = vcombine.high %v416_v53, %v448_v54  ;;  %v385_v46 = vld [vmem:[#allocation2 + $0xb30] sm:$0xff] }
  0x4f   :  { %3194 = vmatpush1.bf16.msra.mxu0 %v5172_v61  ;;  %3235 = vmatpush1.bf16.msra.mxu1 %v5174_v62  ;;  %v480_v61 = vld [vmem:[#allocation2 + $0xe28] sm:$0xff] }
  0x50   :  { %3195 = vmatprep.subr.bf16.mxu0 %v5237_v63  ;;  %3236 = vmatprep.subr.bf16.mxu1 %v5239_v1  ;;  %v512_v62 = vld [vmem:[#allocation2 + $0xf28] sm:$0xff]  ;;  %v5176_v63 = vcombine.low %v415_v51, %v447_v52  ;;  %v5178_v1 = vcombine.low %v416_v53, %v448_v54  ;;  %v5117_v51 = vcombine.high %v353_v45, %v385_v46  ;;  %v417_v53 = vld [vmem:[#allocation2 + $0xc30] sm:$0xff] }
  0x51   :  { %v5243_v3 = vcombine.high %v480_v61, %v512_v62  ;;  %v449_v54 = vld [vmem:[#allocation2 + $0xd30] sm:$0xff] }
  0x53   :  { %3196 = vmatpush1.bf16.msra.mxu0 %v5236_v6  ;;  %3237 = vmatpush1.bf16.msra.mxu1 %v5238_v7  ;;  %v34_v6 = vld [vmem:[#allocation2 + $0x38] sm:$0xff] }
  0x54   :  { %3263 = vmatprep.subr.bf16.mxu0 %v4793_v8  ;;  %3304 = vmatprep.subr.bf16.mxu1 %v4795_v9  ;;  %v66_v7 = vld [vmem:[#allocation2 + $0x138] sm:$0xff]  ;;  %v5240_v8 = vcombine.low %v479_v59, %v511_v60  ;;  %v5242_v9 = vcombine.low %v480_v61, %v512_v62  ;;  %v5181_v59 = vcombine.high %v417_v53, %v449_v54  ;;  %v481_v61 = vld [vmem:[#allocation2 + $0xe30] sm:$0xff] }
  0x55   :  { %v4799_v11 = vcombine.high %v34_v6, %v66_v7  ;;  %v513_v62 = vld [vmem:[#allocation2 + $0xf30] sm:$0xff] }
  0x56   :  { %3214 = vmatmul.mubr.bf16.vlgmr.msra.gmra.mrb[4].mxu0 %v5365_v12  ;;  %3255 = vmatmul.mubr.bf16.vlgmr.msra.gmra.mrb[4].mxu1 %v5365_v12 }
  0x57   :  { %3264 = vmatpush1.bf16.msra.mxu0 %v4792_v15  ;;  %3305 = vmatpush1.bf16.msra.mxu1 %v4794_v16  ;;  %v98_v15 = vld [vmem:[#allocation2 + $0x238] sm:$0xff] }
  0x58   :  { %3265 = vmatprep.subr.bf16.mxu0 %v4857_v17  ;;  %3306 = vmatprep.subr.bf16.mxu1 %v4859_v18  ;;  %v130_v16 = vld [vmem:[#allocation2 + $0x338] sm:$0xff]  ;;  %v4796_v17 = vcombine.low %v33_v4, %v65_v5  ;;  %v4798_v18 = vcombine.low %v34_v6, %v66_v7  ;;  %v5245_v4 = vcombine.high %v481_v61, %v513_v62  ;;  %v35_v6 = vld [vmem:[#allocation2 + $0x40] sm:$0xff] }
  0x59   :  { %3295 = vmatprep.mubr.bf16.mxu0 %v5331_v0  ;;  %3336 = vmatprep.mubr.bf16.mxu1 %v5331_v0  ;;  %v4863_v20 = vcombine.high %v98_v15, %v130_v16  ;;  %v67_v7 = vld [vmem:[#allocation2 + $0x140] sm:$0xff] }
  0x5b   :  { %3266 = vmatpush1.bf16.msra.mxu0 %v4856_v23  ;;  %3307 = vmatpush1.bf16.msra.mxu1 %v4858_v24  ;;  %v162_v23 = vld [vmem:[#allocation2 + $0x438] sm:$0xff] }
  0x5c   :  { %3267 = vmatprep.subr.bf16.mxu0 %v4921_v25  ;;  %3308 = vmatprep.subr.bf16.mxu1 %v4923_v26  ;;  %v194_v24 = vld [vmem:[#allocation2 + $0x538] sm:$0xff]  ;;  %v4860_v25 = vcombine.low %v97_v13, %v129_v14  ;;  %v4862_v26 = vcombine.low %v98_v15, %v130_v16  ;;  %v4801_v13 = vcombine.high %v35_v6, %v67_v7  ;;  %v99_v15 = vld [vmem:[#allocation2 + $0x240] sm:$0xff] }
  0x5d   :  { %v4927_v28 = vcombine.high %v162_v23, %v194_v24  ;;  %v131_v16 = vld [vmem:[#allocation2 + $0x340] sm:$0xff] }
  0x5f   :  { %3268 = vmatpush1.bf16.msra.mxu0 %v4920_v31  ;;  %3309 = vmatpush1.bf16.msra.mxu1 %v4922_v32  ;;  %v226_v31 = vld [vmem:[#allocation2 + $0x638] sm:$0xff] }
  0x60   :  { %3269 = vmatprep.subr.bf16.mxu0 %v4985_v33  ;;  %3310 = vmatprep.subr.bf16.mxu1 %v4987_v34  ;;  %v258_v32 = vld [vmem:[#allocation2 + $0x738] sm:$0xff]  ;;  %v4924_v33 = vcombine.low %v161_v21, %v193_v22  ;;  %v4926_v34 = vcombine.low %v162_v23, %v194_v24  ;;  %v4865_v21 = vcombine.high %v99_v15, %v131_v16  ;;  %v163_v23 = vld [vmem:[#allocation2 + $0x440] sm:$0xff] }
  0x61   :  { %v4991_v36 = vcombine.high %v226_v31, %v258_v32  ;;  %v195_v24 = vld [vmem:[#allocation2 + $0x540] sm:$0xff] }
  0x63   :  { %3270 = vmatpush1.bf16.msra.mxu0 %v4984_v39  ;;  %3311 = vmatpush1.bf16.msra.mxu1 %v4986_v40  ;;  %v290_v39 = vld [vmem:[#allocation2 + $0x838] sm:$0xff] }
  0x64   :  { %3271 = vmatprep.subr.bf16.mxu0 %v5049_v41  ;;  %3312 = vmatprep.subr.bf16.mxu1 %v5051_v42  ;;  %v322_v40 = vld [vmem:[#allocation2 + $0x938] sm:$0xff]  ;;  %v4988_v41 = vcombine.low %v225_v29, %v257_v30  ;;  %v4990_v42 = vcombine.low %v226_v31, %v258_v32  ;;  %v4929_v29 = vcombine.high %v163_v23, %v195_v24  ;;  %v227_v31 = vld [vmem:[#allocation2 + $0x640] sm:$0xff] }
  0x65   :  { %v5055_v44 = vcombine.high %v290_v39, %v322_v40  ;;  %v259_v32 = vld [vmem:[#allocation2 + $0x740] sm:$0xff] }
  0x67   :  { %3272 = vmatpush1.bf16.msra.mxu0 %v5048_v47  ;;  %3313 = vmatpush1.bf16.msra.mxu1 %v5050_v48  ;;  %v354_v47 = vld [vmem:[#allocation2 + $0xa38] sm:$0xff] }
  0x68   :  { %3273 = vmatprep.subr.bf16.mxu0 %v5113_v49  ;;  %3314 = vmatprep.subr.bf16.mxu1 %v5115_v50  ;;  %v386_v48 = vld [vmem:[#allocation2 + $0xb38] sm:$0xff]  ;;  %v5052_v49 = vcombine.low %v289_v37, %v321_v38  ;;  %v5054_v50 = vcombine.low %v290_v39, %v322_v40  ;;  %v4993_v37 = vcombine.high %v227_v31, %v259_v32  ;;  %v291_v39 = vld [vmem:[#allocation2 + $0x840] sm:$0xff] }
  0x69   :  { %v5119_v52 = vcombine.high %v354_v47, %v386_v48  ;;  %v323_v40 = vld [vmem:[#allocation2 + $0x940] sm:$0xff] }
  0x6b   :  { %3274 = vmatpush1.bf16.msra.mxu0 %v5112_v55  ;;  %3315 = vmatpush1.bf16.msra.mxu1 %v5114_v56  ;;  %v418_v55 = vld [vmem:[#allocation2 + $0xc38] sm:$0xff] }
  0x6c   :  { %3275 = vmatprep.subr.bf16.mxu0 %v5177_v57  ;;  %3316 = vmatprep.subr.bf16.mxu1 %v5179_v58  ;;  %v450_v56 = vld [vmem:[#allocation2 + $0xd38] sm:$0xff]  ;;  %v5116_v57 = vcombine.low %v353_v45, %v385_v46  ;;  %v5118_v58 = vcombine.low %v354_v47, %v386_v48  ;;  %v5057_v45 = vcombine.high %v291_v39, %v323_v40  ;;  %v355_v47 = vld [vmem:[#allocation2 + $0xa40] sm:$0xff] }
  0x6d   :  { %v5183_v60 = vcombine.high %v418_v55, %v450_v56  ;;  %v387_v48 = vld [vmem:[#allocation2 + $0xb40] sm:$0xff] }
  0x6f   :  { %3276 = vmatpush1.bf16.msra.mxu0 %v5176_v63  ;;  %3317 = vmatpush1.bf16.msra.mxu1 %v5178_v1  ;;  %v482_v63 = vld [vmem:[#allocation2 + $0xe38] sm:$0xff] }
  0x70   :  { %3277 = vmatprep.subr.bf16.mxu0 %v5241_v2  ;;  %3318 = vmatprep.subr.bf16.mxu1 %v5243_v3  ;;  %v514_v1 = vld [vmem:[#allocation2 + $0xf38] sm:$0xff]  ;;  %v5180_v2 = vcombine.low %v417_v53, %v449_v54  ;;  %v5182_v3 = vcombine.low %v418_v55, %v450_v56  ;;  %v5121_v53 = vcombine.high %v355_v47, %v387_v48  ;;  %v419_v55 = vld [vmem:[#allocation2 + $0xc40] sm:$0xff] }
  0x71   :  { %v5247_v5 = vcombine.high %v482_v63, %v514_v1  ;;  %v451_v56 = vld [vmem:[#allocation2 + $0xd40] sm:$0xff] }
  0x73   :  { %3278 = vmatpush1.bf16.msra.mxu0 %v5240_v8  ;;  %3319 = vmatpush1.bf16.msra.mxu1 %v5242_v9  ;;  %v36_v8 = vld [vmem:[#allocation2 + $0x48] sm:$0xff] }
  0x74   :  { %3345 = vmatprep.subr.bf16.mxu0 %v4797_v10  ;;  %3386 = vmatprep.subr.bf16.mxu1 %v4799_v11  ;;  %v68_v9 = vld [vmem:[#allocation2 + $0x148] sm:$0xff]  ;;  %v5244_v10 = vcombine.low %v481_v61, %v513_v62  ;;  %v5246_v11 = vcombine.low %v482_v63, %v514_v1  ;;  %v5185_v61 = vcombine.high %v419_v55, %v451_v56  ;;  %v483_v63 = vld [vmem:[#allocation2 + $0xe40] sm:$0xff] }
  0x75   :  { %v4803_v14 = vcombine.high %v36_v8, %v68_v9  ;;  %v515_v1 = vld [vmem:[#allocation2 + $0xf40] sm:$0xff] }
  0x76   :  { %3296 = vmatmul.mubr.bf16.vlgmr.msra.gmra.mrb[8].mxu0 %v5365_v12  ;;  %3337 = vmatmul.mubr.bf16.vlgmr.msra.gmra.mrb[8].mxu1 %v5365_v12 }
  0x77   :  { %3346 = vmatpush1.bf16.msra.mxu0 %v4796_v17  ;;  %3387 = vmatpush1.bf16.msra.mxu1 %v4798_v18  ;;  %v100_v17 = vld [vmem:[#allocation2 + $0x248] sm:$0xff] }
  0x78   :  { %3347 = vmatprep.subr.bf16.mxu0 %v4861_v19  ;;  %3388 = vmatprep.subr.bf16.mxu1 %v4863_v20  ;;  %v132_v18 = vld [vmem:[#allocation2 + $0x348] sm:$0xff]  ;;  %v4800_v19 = vcombine.low %v35_v6, %v67_v7  ;;  %v4802_v20 = vcombine.low %v36_v8, %v68_v9  ;;  %v5249_v6 = vcombine.high %v483_v63, %v515_v1  ;;  %v37_v8 = vld [vmem:[#allocation2 + $0x50] sm:$0xff] }
  0x79   :  { %3377 = vmatprep.mubr.bf16.mxu0 %v5331_v0  ;;  %3418 = vmatprep.mubr.bf16.mxu1 %v5331_v0  ;;  %v4867_v22 = vcombine.high %v100_v17, %v132_v18  ;;  %v69_v9 = vld [vmem:[#allocation2 + $0x150] sm:$0xff] }
  0x7b   :  { %3348 = vmatpush1.bf16.msra.mxu0 %v4860_v25  ;;  %3389 = vmatpush1.bf16.msra.mxu1 %v4862_v26  ;;  %v164_v25 = vld [vmem:[#allocation2 + $0x448] sm:$0xff] }
  0x7c   :  { %3349 = vmatprep.subr.bf16.mxu0 %v4925_v27  ;;  %3390 = vmatprep.subr.bf16.mxu1 %v4927_v28  ;;  %v196_v26 = vld [vmem:[#allocation2 + $0x548] sm:$0xff]  ;;  %v4864_v27 = vcombine.low %v99_v15, %v131_v16  ;;  %v4866_v28 = vcombine.low %v100_v17, %v132_v18  ;;  %v4805_v15 = vcombine.high %v37_v8, %v69_v9  ;;  %v101_v17 = vld [vmem:[#allocation2 + $0x250] sm:$0xff] }
  0x7d   :  { %v4931_v30 = vcombine.high %v164_v25, %v196_v26  ;;  %v133_v18 = vld [vmem:[#allocation2 + $0x350] sm:$0xff] }
  0x7f   :  { %3350 = vmatpush1.bf16.msra.mxu0 %v4924_v33  ;;  %3391 = vmatpush1.bf16.msra.mxu1 %v4926_v34  ;;  %v228_v33 = vld [vmem:[#allocation2 + $0x648] sm:$0xff] }
  0x80   :  { %3351 = vmatprep.subr.bf16.mxu0 %v4989_v35  ;;  %3392 = vmatprep.subr.bf16.mxu1 %v4991_v36  ;;  %v260_v34 = vld [vmem:[#allocation2 + $0x748] sm:$0xff]  ;;  %v4928_v35 = vcombine.low %v163_v23, %v195_v24  ;;  %v4930_v36 = vcombine.low %v164_v25, %v196_v26  ;;  %v4869_v23 = vcombine.high %v101_v17, %v133_v18  ;;  %v165_v25 = vld [vmem:[#allocation2 + $0x450] sm:$0xff] }
  0x81   :  { %v4995_v38 = vcombine.high %v228_v33, %v260_v34  ;;  %v197_v26 = vld [vmem:[#allocation2 + $0x550] sm:$0xff] }
  0x83   :  { %3352 = vmatpush1.bf16.msra.mxu0 %v4988_v41  ;;  %3393 = vmatpush1.bf16.msra.mxu1 %v4990_v42  ;;  %v292_v41 = vld [vmem:[#allocation2 + $0x848] sm:$0xff] }
  0x84   :  { %3353 = vmatprep.subr.bf16.mxu0 %v5053_v43  ;;  %3394 = vmatprep.subr.bf16.mxu1 %v5055_v44  ;;  %v324_v42 = vld [vmem:[#allocation2 + $0x948] sm:$0xff]  ;;  %v4992_v43 = vcombine.low %v227_v31, %v259_v32  ;;  %v4994_v44 = vcombine.low %v228_v33, %v260_v34  ;;  %v4933_v31 = vcombine.high %v165_v25, %v197_v26  ;;  %v229_v33 = vld [vmem:[#allocation2 + $0x650] sm:$0xff] }
  0x85   :  { %v5059_v46 = vcombine.high %v292_v41, %v324_v42  ;;  %v261_v34 = vld [vmem:[#allocation2 + $0x750] sm:$0xff] }
  0x87   :  { %3354 = vmatpush1.bf16.msra.mxu0 %v5052_v49  ;;  %3395 = vmatpush1.bf16.msra.mxu1 %v5054_v50  ;;  %v356_v49 = vld [vmem:[#allocation2 + $0xa48] sm:$0xff] }
  0x88   :  { %3355 = vmatprep.subr.bf16.mxu0 %v5117_v51  ;;  %3396 = vmatprep.subr.bf16.mxu1 %v5119_v52  ;;  %v388_v50 = vld [vmem:[#allocation2 + $0xb48] sm:$0xff]  ;;  %v5056_v51 = vcombine.low %v291_v39, %v323_v40  ;;  %v5058_v52 = vcombine.low %v292_v41, %v324_v42  ;;  %v4997_v39 = vcombine.high %v229_v33, %v261_v34  ;;  %v293_v41 = vld [vmem:[#allocation2 + $0x850] sm:$0xff] }
  0x89   :  { %v5123_v54 = vcombine.high %v356_v49, %v388_v50  ;;  %v325_v42 = vld [vmem:[#allocation2 + $0x950] sm:$0xff] }
  0x8b   :  { %3356 = vmatpush1.bf16.msra.mxu0 %v5116_v57  ;;  %3397 = vmatpush1.bf16.msra.mxu1 %v5118_v58  ;;  %v420_v57 = vld [vmem:[#allocation2 + $0xc48] sm:$0xff] }
  0x8c   :  { %3357 = vmatprep.subr.bf16.mxu0 %v5181_v59  ;;  %3398 = vmatprep.subr.bf16.mxu1 %v5183_v60  ;;  %v452_v58 = vld [vmem:[#allocation2 + $0xd48] sm:$0xff]  ;;  %v5120_v59 = vcombine.low %v355_v47, %v387_v48  ;;  %v5122_v60 = vcombine.low %v356_v49, %v388_v50  ;;  %v5061_v47 = vcombine.high %v293_v41, %v325_v42  ;;  %v357_v49 = vld [vmem:[#allocation2 + $0xa50] sm:$0xff] }
  0x8d   :  { %v5187_v62 = vcombine.high %v420_v57, %v452_v58  ;;  %v389_v50 = vld [vmem:[#allocation2 + $0xb50] sm:$0xff] }
  0x8f   :  { %3358 = vmatpush1.bf16.msra.mxu0 %v5180_v2  ;;  %3399 = vmatpush1.bf16.msra.mxu1 %v5182_v3  ;;  %v484_v2 = vld [vmem:[#allocation2 + $0xe48] sm:$0xff] }
  0x90   :  { %3359 = vmatprep.subr.bf16.mxu0 %v5245_v4  ;;  %3400 = vmatprep.subr.bf16.mxu1 %v5247_v5  ;;  %v516_v3 = vld [vmem:[#allocation2 + $0xf48] sm:$0xff]  ;;  %v5184_v4 = vcombine.low %v419_v55, %v451_v56  ;;  %v5186_v5 = vcombine.low %v420_v57, %v452_v58  ;;  %v5125_v55 = vcombine.high %v357_v49, %v389_v50  ;;  %v421_v57 = vld [vmem:[#allocation2 + $0xc50] sm:$0xff] }
  0x91   :  { %v5251_v7 = vcombine.high %v484_v2, %v516_v3  ;;  %v453_v58 = vld [vmem:[#allocation2 + $0xd50] sm:$0xff] }
  0x93   :  { %3360 = vmatpush1.bf16.msra.mxu0 %v5244_v10  ;;  %3401 = vmatpush1.bf16.msra.mxu1 %v5246_v11  ;;  %v38_v10 = vld [vmem:[#allocation2 + $0x58] sm:$0xff] }
  0x94   :  { %3427 = vmatprep.subr.bf16.mxu0 %v4801_v13  ;;  %3468 = vmatprep.subr.bf16.mxu1 %v4803_v14  ;;  %v70_v11 = vld [vmem:[#allocation2 + $0x158] sm:$0xff]  ;;  %v5248_v13 = vcombine.low %v483_v63, %v515_v1  ;;  %v5250_v14 = vcombine.low %v484_v2, %v516_v3  ;;  %v5189_v63 = vcombine.high %v421_v57, %v453_v58  ;;  %v485_v2 = vld [vmem:[#allocation2 + $0xe50] sm:$0xff] }
  0x95   :  { %v4807_v16 = vcombine.high %v38_v10, %v70_v11  ;;  %v517_v3 = vld [vmem:[#allocation2 + $0xf50] sm:$0xff] }
  0x96   :  { %3378 = vmatmul.mubr.bf16.vlgmr.msra.gmra.mrb[12].mxu0 %v5365_v12  ;;  %3419 = vmatmul.mubr.bf16.vlgmr.msra.gmra.mrb[12].mxu1 %v5365_v12 }
  0x97   :  { %3428 = vmatpush1.bf16.msra.mxu0 %v4800_v19  ;;  %3469 = vmatpush1.bf16.msra.mxu1 %v4802_v20  ;;  %v102_v19 = vld [vmem:[#allocation2 + $0x258] sm:$0xff] }
  0x98   :  { %3429 = vmatprep.subr.bf16.mxu0 %v4865_v21  ;;  %3470 = vmatprep.subr.bf16.mxu1 %v4867_v22  ;;  %v134_v20 = vld [vmem:[#allocation2 + $0x358] sm:$0xff]  ;;  %v4804_v21 = vcombine.low %v37_v8, %v69_v9  ;;  %v4806_v22 = vcombine.low %v38_v10, %v70_v11  ;;  %v5253_v8 = vcombine.high %v485_v2, %v517_v3  ;;  %v39_v10 = vld [vmem:[#allocation2 + $0x60] sm:$0xff] }
  0x99   :  { %3459 = vmatprep.mubr.bf16.mxu0 %v5331_v0  ;;  %3500 = vmatprep.mubr.bf16.mxu1 %v5331_v0  ;;  %v4871_v24 = vcombine.high %v102_v19, %v134_v20  ;;  %v71_v11 = vld [vmem:[#allocation2 + $0x160] sm:$0xff] }
  0x9b   :  { %3430 = vmatpush1.bf16.msra.mxu0 %v4864_v27  ;;  %3471 = vmatpush1.bf16.msra.mxu1 %v4866_v28  ;;  %v166_v27 = vld [vmem:[#allocation2 + $0x458] sm:$0xff] }
  0x9c   :  { %3431 = vmatprep.subr.bf16.mxu0 %v4929_v29  ;;  %3472 = vmatprep.subr.bf16.mxu1 %v4931_v30  ;;  %v198_v28 = vld [vmem:[#allocation2 + $0x558] sm:$0xff]  ;;  %v4868_v29 = vcombine.low %v101_v17, %v133_v18  ;;  %v4870_v30 = vcombine.low %v102_v19, %v134_v20  ;;  %v4809_v17 = vcombine.high %v39_v10, %v71_v11  ;;  %v103_v19 = vld [vmem:[#allocation2 + $0x260] sm:$0xff] }
  0x9d   :  { %v4935_v32 = vcombine.high %v166_v27, %v198_v28  ;;  %v135_v20 = vld [vmem:[#allocation2 + $0x360] sm:$0xff] }
  0x9f   :  { %3432 = vmatpush1.bf16.msra.mxu0 %v4928_v35  ;;  %3473 = vmatpush1.bf16.msra.mxu1 %v4930_v36  ;;  %v230_v35 = vld [vmem:[#allocation2 + $0x658] sm:$0xff] }
  0xa0   :  { %3433 = vmatprep.subr.bf16.mxu0 %v4993_v37  ;;  %3474 = vmatprep.subr.bf16.mxu1 %v4995_v38  ;;  %v262_v36 = vld [vmem:[#allocation2 + $0x758] sm:$0xff]  ;;  %v4932_v37 = vcombine.low %v165_v25, %v197_v26  ;;  %v4934_v38 = vcombine.low %v166_v27, %v198_v28  ;;  %v4873_v25 = vcombine.high %v103_v19, %v135_v20  ;;  %v167_v27 = vld [vmem:[#allocation2 + $0x460] sm:$0xff] }
  0xa1   :  { %v4999_v40 = vcombine.high %v230_v35, %v262_v36  ;;  %v199_v28 = vld [vmem:[#allocation2 + $0x560] sm:$0xff] }
  0xa3   :  { %3434 = vmatpush1.bf16.msra.mxu0 %v4992_v43  ;;  %3475 = vmatpush1.bf16.msra.mxu1 %v4994_v44  ;;  %v294_v43 = vld [vmem:[#allocation2 + $0x858] sm:$0xff] }
  0xa4   :  { %3435 = vmatprep.subr.bf16.mxu0 %v5057_v45  ;;  %3476 = vmatprep.subr.bf16.mxu1 %v5059_v46  ;;  %v326_v44 = vld [vmem:[#allocation2 + $0x958] sm:$0xff]  ;;  %v4996_v45 = vcombine.low %v229_v33, %v261_v34  ;;  %v4998_v46 = vcombine.low %v230_v35, %v262_v36  ;;  %v4937_v34 = vcombine.high %v167_v27, %v199_v28  ;;  %v231_v36 = vld [vmem:[#allocation2 + $0x660] sm:$0xff] }
  0xa5   :  { %v5063_v48 = vcombine.high %v294_v43, %v326_v44 }
  0xa7   :  { %3436 = vmatpush1.bf16.msra.mxu0 %v5056_v51  ;;  %3477 = vmatpush1.bf16.msra.mxu1 %v5058_v52  ;;  %v358_v51 = vld [vmem:[#allocation2 + $0xa58] sm:$0xff] }
  0xa8   :  { %3437 = vmatprep.subr.bf16.mxu0 %v5121_v53  ;;  %3478 = vmatprep.subr.bf16.mxu1 %v5123_v54  ;;  %v390_v52 = vld [vmem:[#allocation2 + $0xb58] sm:$0xff]  ;;  %v5060_v53 = vcombine.low %v293_v41, %v325_v42  ;;  %v5062_v54 = vcombine.low %v294_v43, %v326_v44  ;;  %v295_v43 = vld [vmem:[#allocation2 + $0x860] sm:$0xff] }
  0xa9   :  { %v5127_v56 = vcombine.high %v358_v51, %v390_v52  ;;  %v327_v44 = vld [vmem:[#allocation2 + $0x960] sm:$0xff] }
  0xab   :  { %3438 = vmatpush1.bf16.msra.mxu0 %v5120_v59  ;;  %3479 = vmatpush1.bf16.msra.mxu1 %v5122_v60  ;;  %v422_v59 = vld [vmem:[#allocation2 + $0xc58] sm:$0xff] }
  0xac   :  { %3439 = vmatprep.subr.bf16.mxu0 %v5185_v61  ;;  %3480 = vmatprep.subr.bf16.mxu1 %v5187_v62  ;;  %v454_v60 = vld [vmem:[#allocation2 + $0xd58] sm:$0xff]  ;;  %v5124_v61 = vcombine.low %v357_v49, %v389_v50  ;;  %v5126_v62 = vcombine.low %v358_v51, %v390_v52  ;;  %v5065_v49 = vcombine.high %v295_v43, %v327_v44  ;;  %v359_v51 = vld [vmem:[#allocation2 + $0xa60] sm:$0xff] }
  0xad   :  { %v5191_v1 = vcombine.high %v422_v59, %v454_v60  ;;  %v391_v52 = vld [vmem:[#allocation2 + $0xb60] sm:$0xff] }
  0xaf   :  { %3440 = vmatpush1.bf16.msra.mxu0 %v5184_v4  ;;  %3481 = vmatpush1.bf16.msra.mxu1 %v5186_v5  ;;  %v486_v4 = vld [vmem:[#allocation2 + $0xe58] sm:$0xff] }
  0xb0   :  { %3441 = vmatprep.subr.bf16.mxu0 %v5249_v6  ;;  %3482 = vmatprep.subr.bf16.mxu1 %v5251_v7  ;;  %v518_v5 = vld [vmem:[#allocation2 + $0xf58] sm:$0xff]  ;;  %v5188_v6 = vcombine.low %v421_v57, %v453_v58  ;;  %v5190_v7 = vcombine.low %v422_v59, %v454_v60  ;;  %v5129_v57 = vcombine.high %v359_v51, %v391_v52  ;;  %v423_v59 = vld [vmem:[#allocation2 + $0xc60] sm:$0xff] }
  0xb1   :  { %v5255_v9 = vcombine.high %v486_v4, %v518_v5  ;;  %v455_v60 = vld [vmem:[#allocation2 + $0xd60] sm:$0xff] }
  0xb3   :  { %3442 = vmatpush1.bf16.msra.mxu0 %v5248_v13  ;;  %3483 = vmatpush1.bf16.msra.mxu1 %v5250_v14  ;;  %v40_v13 = vld [vmem:[#allocation2 + $0x68] sm:$0xff] }
  0xb4   :  { %3509 = vmatprep.subr.bf16.mxu0 %v4805_v15  ;;  %3550 = vmatprep.subr.bf16.mxu1 %v4807_v16  ;;  %v72_v14 = vld [vmem:[#allocation2 + $0x168] sm:$0xff]  ;;  %v5252_v15 = vcombine.low %v485_v2, %v517_v3  ;;  %v5254_v16 = vcombine.low %v486_v4, %v518_v5  ;;  %v5193_v2 = vcombine.high %v423_v59, %v455_v60  ;;  %v487_v4 = vld [vmem:[#allocation2 + $0xe60] sm:$0xff] }
  0xb5   :  { %v4811_v18 = vcombine.high %v40_v13, %v72_v14  ;;  %v519_v5 = vld [vmem:[#allocation2 + $0xf60] sm:$0xff] }
  0xb6   :  { %3460 = vmatmul.mubr.bf16.vlgmr.msra.gmra.mrb[16].mxu0 %v5365_v12  ;;  %3501 = vmatmul.mubr.bf16.vlgmr.msra.gmra.mrb[16].mxu1 %v5365_v12 }
  0xb7   :  { %3510 = vmatpush1.bf16.msra.mxu0 %v4804_v21  ;;  %3551 = vmatpush1.bf16.msra.mxu1 %v4806_v22  ;;  %v104_v21 = vld [vmem:[#allocation2 + $0x268] sm:$0xff] }
  0xb8   :  { %3511 = vmatprep.subr.bf16.mxu0 %v4869_v23  ;;  %3552 = vmatprep.subr.bf16.mxu1 %v4871_v24  ;;  %v136_v22 = vld [vmem:[#allocation2 + $0x368] sm:$0xff]  ;;  %v4808_v23 = vcombine.low %v39_v10, %v71_v11  ;;  %v4810_v24 = vcombine.low %v40_v13, %v72_v14  ;;  %v5257_v10 = vcombine.high %v487_v4, %v519_v5  ;;  %v41_v13 = vld [vmem:[#allocation2 + $0x70] sm:$0xff] }
  0xb9   :  { %3541 = vmatprep.mubr.bf16.mxu0 %v5331_v0  ;;  %3582 = vmatprep.mubr.bf16.mxu1 %v5331_v0  ;;  %v4875_v26 = vcombine.high %v104_v21, %v136_v22  ;;  %v4874_v33 = vcombine.low %v104_v21, %v136_v22  ;;  %v73_v14 = vld [vmem:[#allocation2 + $0x170] sm:$0xff] }
  0xba   :  { %v105_v21 = vld [vmem:[#allocation2 + $0x270] sm:$0xff] }
  0xbb   :  { %3512 = vmatpush1.bf16.msra.mxu0 %v4868_v29  ;;  %3553 = vmatpush1.bf16.msra.mxu1 %v4870_v30  ;;  %v168_v29 = vld [vmem:[#allocation2 + $0x468] sm:$0xff]  ;;  %v137_v22 = vld [vmem:[#allocation2 + $0x370] sm:$0xff] }
  0xbc   :  { %3513 = vmatprep.subr.bf16.mxu0 %v4933_v31  ;;  %3554 = vmatprep.subr.bf16.mxu1 %v4935_v32  ;;  %v200_v30 = vld [vmem:[#allocation2 + $0x568] sm:$0xff]  ;;  %v5391_v31 = vld [vmem:[%s5522_s0] sm:$0x1]  ;;  %v4872_v32 = vcombine.low %v103_v19, %v135_v20  ;;  %v4813_v19 = vcombine.high %v41_v13, %v73_v14 }
  0xbd   :  { %v4939_v35 = vcombine.high %v168_v29, %v200_v30 }
  0xbf   :  { %3514 = vmatpush1.bf16.msra.mxu0 %v4932_v37  ;;  %3555 = vmatpush1.bf16.msra.mxu1 %v4934_v38  ;;  %v263_v37 = vld [vmem:[#allocation2 + $0x760] sm:$0xff]  ;;  %v264_v38 = vld [vmem:[#allocation2 + $0x768] sm:$0xff] }
  0xc0   :  { %3515 = vmatprep.subr.bf16.mxu0 %v4997_v39  ;;  %3556 = vmatprep.subr.bf16.mxu1 %v4999_v40  ;;  %v4936_v39 = vcombine.low %v167_v27, %v199_v28  ;;  %v4938_v40 = vcombine.low %v168_v29, %v200_v30  ;;  %v5001_v41 = vcombine.high %v231_v36, %v263_v37  ;;  %v169_v29 = vld [vmem:[#allocation2 + $0x470] sm:$0xff] }
  0xc1   :  { %v4877_v27 = vcombine.high %v105_v21, %v137_v22  ;;  %v201_v30 = vld [vmem:[#allocation2 + $0x570] sm:$0xff] }
  0xc3   :  { %3516 = vmatpush1.bf16.msra.mxu0 %v4996_v45  ;;  %3557 = vmatpush1.bf16.msra.mxu1 %v4998_v46  ;;  %v296_v45 = vld [vmem:[#allocation2 + $0x868] sm:$0xff] }
  0xc4   :  { %3517 = vmatprep.subr.bf16.mxu0 %v5061_v47  ;;  %3558 = vmatprep.subr.bf16.mxu1 %v5063_v48  ;;  %v328_v46 = vld [vmem:[#allocation2 + $0x968] sm:$0xff]  ;;  %v5000_v47 = vcombine.low %v231_v36, %v263_v37  ;;  %v4941_v36 = vcombine.high %v169_v29, %v201_v30 }
  0xc5   :  { %v5067_v50 = vcombine.high %v296_v45, %v328_v46 }
  0xc7   :  { %3518 = vmatpush1.bf16.msra.mxu0 %v5060_v53  ;;  %3559 = vmatpush1.bf16.msra.mxu1 %v5062_v54  ;;  %v360_v53 = vld [vmem:[#allocation2 + $0xa68] sm:$0xff] }
  0xc8   :  { %3519 = vmatprep.subr.bf16.mxu0 %v5125_v55  ;;  %3560 = vmatprep.subr.bf16.mxu1 %v5127_v56  ;;  %v392_v54 = vld [vmem:[#allocation2 + $0xb68] sm:$0xff]  ;;  %v5064_v55 = vcombine.low %v295_v43, %v327_v44  ;;  %v5066_v56 = vcombine.low %v296_v45, %v328_v46  ;;  %v297_v45 = vld [vmem:[#allocation2 + $0x870] sm:$0xff] }
  0xc9   :  { %v5131_v58 = vcombine.high %v360_v53, %v392_v54  ;;  %v329_v46 = vld [vmem:[#allocation2 + $0x970] sm:$0xff] }
  0xcb   :  { %3520 = vmatpush1.bf16.msra.mxu0 %v5124_v61  ;;  %3561 = vmatpush1.bf16.msra.mxu1 %v5126_v62  ;;  %v424_v61 = vld [vmem:[#allocation2 + $0xc68] sm:$0xff] }
  0xcc   :  { %3521 = vmatprep.subr.bf16.mxu0 %v5189_v63  ;;  %3562 = vmatprep.subr.bf16.mxu1 %v5191_v1  ;;  %v456_v62 = vld [vmem:[#allocation2 + $0xd68] sm:$0xff]  ;;  %v5128_v63 = vcombine.low %v359_v51, %v391_v52  ;;  %v5130_v1 = vcombine.low %v360_v53, %v392_v54  ;;  %v5069_v51 = vcombine.high %v297_v45, %v329_v46  ;;  %v5332_v53 = vmov 1983009808  }
  0xcd   :  { %v5195_v3 = vcombine.high %v424_v61, %v456_v62  ;;  %v4478_v54 = vunpack.c.l.s4 %v5332_v53  ;;  %v204_v53 = vld [vmem:[#allocation2 + $0x588] sm:$0xff] }
  0xcf   :  { %3522 = vmatpush1.bf16.msra.mxu0 %v5188_v6  ;;  %3563 = vmatpush1.bf16.msra.mxu1 %v5190_v7  ;;  %v488_v6 = vld [vmem:[#allocation2 + $0xe68] sm:$0xff] }
  0xd0   :  { %3523 = vmatprep.subr.bf16.mxu0 %v5253_v8  ;;  %3564 = vmatprep.subr.bf16.mxu1 %v5255_v9  ;;  %v520_v7 = vld [vmem:[#allocation2 + $0xf68] sm:$0xff]  ;;  %v5192_v8 = vcombine.low %v423_v59, %v455_v60  ;;  %v5194_v9 = vcombine.low %v424_v61, %v456_v62  ;;  %v394_v59 = vld [vmem:[#allocation2 + $0xb78] sm:$0xff]  ;;  %v5068_v60 = vcombine.low %v297_v45, %v329_v46 }
  0xd1   :  { %v5259_v11 = vcombine.high %v488_v6, %v520_v7  ;;  %v140_v45 = vld [vmem:[#allocation2 + $0x388] sm:$0xff] }
  0xd3   :  { %3524 = vmatpush1.bf16.msra.mxu0 %v5252_v15  ;;  %3565 = vmatpush1.bf16.msra.mxu1 %v5254_v16  ;;  %v42_v15 = vld [vmem:[#allocation2 + $0x78] sm:$0xff] }
  0xd4   :  { %3591 = vmatprep.subr.bf16.mxu0 %v4809_v17  ;;  %3632 = vmatprep.subr.bf16.mxu1 %v4811_v18  ;;  %v74_v16 = vld [vmem:[#allocation2 + $0x178] sm:$0xff]  ;;  %v5256_v17 = vcombine.low %v487_v4, %v519_v5  ;;  %v5258_v18 = vcombine.low %v488_v6, %v520_v7  ;;  %v457_v4 = vld [vmem:[#allocation2 + $0xd70] sm:$0xff] }
  0xd5   :  { %v4815_v20 = vcombine.high %v42_v15, %v74_v16  ;;  %v426_v5 = vld [vmem:[#allocation2 + $0xc78] sm:$0xff] }
  0xd6   :  { %3542 = vmatmul.mubr.bf16.vlgmr.msra.gmra.mrb[20].mxu0 %v5365_v12  ;;  %3583 = vmatmul.mubr.bf16.vlgmr.msra.gmra.mrb[20].mxu1 %v5391_v31  ;;  %v232_v12 = vld [vmem:[#allocation2 + $0x668] sm:$0xff]  ;;  %v458_v6 = vld [vmem:[#allocation2 + $0xd78] sm:$0xff] }
  0xd7   :  { %3592 = vmatpush1.bf16.msra.mxu0 %v4808_v23  ;;  %3633 = vmatpush1.bf16.msra.mxu1 %v4810_v24  ;;  %v5003_v42 = vcombine.high %v232_v12, %v264_v38  ;;  %v5002_v48 = vcombine.low %v232_v12, %v264_v38  ;;  %v106_v23 = vld [vmem:[#allocation2 + $0x278] sm:$0xff]  ;;  %v233_v12 = vld [vmem:[#allocation2 + $0x670] sm:$0xff] }
  0xd8   :  { %3593 = vmatprep.subr.bf16.mxu0 %v4873_v25  ;;  %3634 = vmatprep.subr.bf16.mxu1 %v4875_v26  ;;  %v138_v24 = vld [vmem:[#allocation2 + $0x378] sm:$0xff]  ;;  %v4812_v25 = vcombine.low %v41_v13, %v73_v14  ;;  %v4814_v26 = vcombine.low %v42_v15, %v74_v16  ;;  %v265_v38 = vld [vmem:[#allocation2 + $0x770] sm:$0xff]  ;;  %v5199_v13 = vcombine.high %v426_v5, %v458_v6 }
  0xd9   :  { %3623 = vmatprep.mubr.bf16.mxu0 %v5331_v0  ;;  %3664 = vmatprep.mubr.bf16.mxu1 %v5331_v0  ;;  %v4879_v28 = vcombine.high %v106_v23, %v138_v24  ;;  %v5005_v43 = vcombine.high %v233_v12, %v265_v38  ;;  %v489_v14 = vld [vmem:[#allocation2 + $0xe70] sm:$0xff] }
  0xda   :  { %v521_v15 = vld [vmem:[#allocation2 + $0xf70] sm:$0xff] }
  0xdb   :  { %3594 = vmatpush1.bf16.msra.mxu0 %v4872_v32  ;;  %3635 = vmatpush1.bf16.msra.mxu1 %v4874_v33  ;;  %v170_v32 = vld [vmem:[#allocation2 + $0x478] sm:$0xff] }
  0xdc   :  { %3595 = vmatprep.subr.bf16.mxu0 %v4937_v34  ;;  %3636 = vmatprep.subr.bf16.mxu1 %v4939_v35  ;;  %v202_v33 = vld [vmem:[#allocation2 + $0x578] sm:$0xff]  ;;  %v4876_v34 = vcombine.low %v105_v21, %v137_v22  ;;  %v4878_v35 = vcombine.low %v106_v23, %v138_v24 }
  0xdd   :  { %v4943_v37 = vcombine.high %v170_v32, %v202_v33 }
  0xdf   :  { %3596 = vmatpush1.bf16.msra.mxu0 %v4936_v39  ;;  %3637 = vmatpush1.bf16.msra.mxu1 %v4938_v40  ;;  %v234_v39 = vld [vmem:[#allocation2 + $0x678] sm:$0xff] }
  0xe0   :  { %3597 = vmatprep.subr.bf16.mxu0 %v5001_v41  ;;  %3638 = vmatprep.subr.bf16.mxu1 %v5003_v42  ;;  %v266_v40 = vld [vmem:[#allocation2 + $0x778] sm:$0xff]  ;;  %v4940_v41 = vcombine.low %v169_v29, %v201_v30  ;;  %v4942_v42 = vcombine.low %v170_v32, %v202_v33  ;;  %v43_v33 = vld [vmem:[#allocation2 + $0x80] sm:$0xff] }
  0xe1   :  { %v5007_v44 = vcombine.high %v234_v39, %v266_v40 }
  0xe3   :  { %3598 = vmatpush1.bf16.msra.mxu0 %v5000_v47  ;;  %3639 = vmatpush1.bf16.msra.mxu1 %v5002_v48  ;;  %v298_v47 = vld [vmem:[#allocation2 + $0x878] sm:$0xff] }
  0xe4   :  { %3599 = vmatprep.subr.bf16.mxu0 %v5065_v49  ;;  %3640 = vmatprep.subr.bf16.mxu1 %v5067_v50  ;;  %v330_v48 = vld [vmem:[#allocation2 + $0x978] sm:$0xff]  ;;  %v5004_v49 = vcombine.low %v233_v12, %v265_v38  ;;  %v5006_v50 = vcombine.low %v234_v39, %v266_v40  ;;  %v5260_v12 = vcombine.low %v489_v14, %v521_v15 }
  0xe5   :  { %v5071_v52 = vcombine.high %v298_v47, %v330_v48  ;;  %v5070_v61 = vcombine.low %v298_v47, %v330_v48 }
  0xe7   :  { %3600 = vmatpush1.bf16.msra.mxu0 %v5064_v55  ;;  %3641 = vmatpush1.bf16.msra.mxu1 %v5066_v56  ;;  %v4480_v55 = vlaneseq  ;;  %v361_v56 = vld [vmem:[#allocation2 + $0xa70] sm:$0xff] }
  0xe8   :  { %3601 = vmatprep.subr.bf16.mxu0 %v5129_v57  ;;  %3642 = vmatprep.subr.bf16.mxu1 %v5131_v58  ;;  %v393_v57 = vld [vmem:[#allocation2 + $0xb70] sm:$0xff]  ;;  %v362_v58 = vld [vmem:[#allocation2 + $0xa78] sm:$0xff] }
  0xe9   :  { %v5133_v62 = vcombine.high %v361_v56, %v393_v57  ;;  %v5132_v7 = vcombine.low %v361_v56, %v393_v57 }
  0xeb   :  { %3602 = vmatpush1.bf16.msra.mxu0 %v5128_v63  ;;  %3643 = vmatpush1.bf16.msra.mxu1 %v5130_v1  ;;  %v4479_v63 = vunpack.c.0.s8 %v4478_v54  ;;  %v4481_v1 = vshrl.u32 %v4480_v55, 7 }
  0xec   :  { %3603 = vmatprep.subr.bf16.mxu0 %v5193_v2  ;;  %3644 = vmatprep.subr.bf16.mxu1 %v5195_v3  ;;  %v5135_v2 = vcombine.high %v362_v58, %v394_v59  ;;  %v425_v3 = vld [vmem:[#allocation2 + $0xc70] sm:$0xff] }
  0xed   :  { %v5196_v23 = vcombine.low %v425_v3, %v457_v4 }
  0xef   :  { %3604 = vmatpush1.bf16.msra.mxu0 %v5192_v8  ;;  %3645 = vmatpush1.bf16.msra.mxu1 %v5194_v9  ;;  %v5134_v8 = vcombine.low %v362_v58, %v394_v59  ;;  %v5197_v9 = vcombine.high %v425_v3, %v457_v4  ;;  %v235_v58 = vld [vmem:[#allocation2 + $0x680] sm:$0xff] }
  0xf0   :  { %3605 = vmatprep.subr.bf16.mxu0 %v5257_v10  ;;  %3646 = vmatprep.subr.bf16.mxu1 %v5259_v11  ;;  %v5400_v11 = vsub.s32 %v4479_v63, %v4481_v1  ;;  %v267_v59 = vld [vmem:[#allocation2 + $0x780] sm:$0xff] }
  0xf1   :  { %v5009_v1 = vcombine.high %v235_v58, %v267_v59  ;;  %v299_v3 = vld [vmem:[#allocation2 + $0x880] sm:$0xff] }
  0xf2   :  { %v331_v4 = vld [vmem:[#allocation2 + $0x980] sm:$0xff] }
  0xf3   :  { %3606 = vmatpush1.bf16.msra.mxu0 %v5256_v17  ;;  %3647 = vmatpush1.bf16.msra.mxu1 %v5258_v18  ;;  %v490_v18 = vld [vmem:[#allocation2 + $0xe78] sm:$0xff] }
  0xf4   :  { %3673 = vmatprep.subr.bf16.mxu0 %v4813_v19  ;;  %3714 = vmatprep.subr.bf16.mxu1 %v4815_v20  ;;  %v522_v19 = vld [vmem:[#allocation2 + $0xf78] sm:$0xff] }
  0xf5   :  { %v5263_v32 = vcombine.high %v490_v18, %v522_v19  ;;  %v5262_v39 = vcombine.low %v490_v18, %v522_v19 }
  0xf6   :  { %3624 = vmatmul.mubr.bf16.vlgmr.msra.gmra.mrb[24].mxu0 %v5391_v31  ;;  %3665 = vmatmul.mubr.bf16.vlgmr.msra.gmra.mrb[24].mxu1 %v5391_v31 }
  0xf7   :  { %3674 = vmatpush1.bf16.msra.mxu0 %v4812_v25  ;;  %3715 = vmatpush1.bf16.msra.mxu1 %v4814_v26 }
  0xf8   :  { %3675 = vmatprep.subr.bf16.mxu0 %v4877_v27  ;;  %3716 = vmatprep.subr.bf16.mxu1 %v4879_v28  ;;  %v5198_v27 = vcombine.low %v426_v5, %v458_v6  ;;  %v5261_v28 = vcombine.high %v489_v14, %v521_v15  ;;  %v300_v5 = vld [vmem:[#allocation2 + $0x888] sm:$0xff]  ;;  %v395_v14 = vld [vmem:[#allocation2 + $0xb80] sm:$0xff] }
  0xf9   :  { %3705 = vmatprep.mubr.bf16.mxu0 %v5331_v0  ;;  %3746 = vmatprep.mubr.bf16.mxu1 %v5331_v0  ;;  %v332_v6 = vld [vmem:[#allocation2 + $0x988] sm:$0xff] }
  0xfa   :  { %v364_v15 = vld [vmem:[#allocation2 + $0xa88] sm:$0xff]  ;;  %v5074_v18 = vcombine.low %v300_v5, %v332_v6 }
  0xfb   :  { %3676 = vmatpush1.bf16.msra.mxu0 %v4876_v34  ;;  %3717 = vmatpush1.bf16.msra.mxu1 %v4878_v35  ;;  %v75_v34 = vld [vmem:[#allocation2 + $0x180] sm:$0xff] }
  0xfc   :  { %3677 = vmatprep.subr.bf16.mxu0 %v4941_v36  ;;  %3718 = vmatprep.subr.bf16.mxu1 %v4943_v37  ;;  %v44_v36 = vld [vmem:[#allocation2 + $0x88] sm:$0xff]  ;;  %v4817_v40 = vcombine.high %v43_v33, %v75_v34  ;;  %v4816_v46 = vcombine.low %v43_v33, %v75_v34 }
  0xfd   :  { %v76_v37 = vld [vmem:[#allocation2 + $0x188] sm:$0xff] }
  0xfe   :  { %v4818_v47 = vcombine.low %v44_v36, %v76_v37 }
  0xff   :  { %3678 = vmatpush1.bf16.msra.mxu0 %v4940_v41  ;;  %3719 = vmatpush1.bf16.msra.mxu1 %v4942_v42  ;;  %v4819_v41 = vcombine.high %v44_v36, %v76_v37  ;;  %v107_v42 = vld [vmem:[#allocation2 + $0x280] sm:$0xff]  ;;  %v524_v36 = vld [vmem:[#allocation2 + $0xf88] sm:$0xff] }
 0x100   :  { %3679 = vmatprep.subr.bf16.mxu0 %v5005_v43  ;;  %3720 = vmatprep.subr.bf16.mxu1 %v5007_v44  ;;  %v139_v43 = vld [vmem:[#allocation2 + $0x380] sm:$0xff]  ;;  %v108_v44 = vld [vmem:[#allocation2 + $0x288] sm:$0xff] }
 0x101   :  { %v4881_v48 = vcombine.high %v107_v42, %v139_v43  ;;  %v4880_v54 = vcombine.low %v107_v42, %v139_v43  ;;  %v4882_v55 = vcombine.low %v108_v44, %v140_v45 }
 0x103   :  { %3680 = vmatpush1.bf16.msra.mxu0 %v5004_v49  ;;  %3721 = vmatpush1.bf16.msra.mxu1 %v5006_v50  ;;  %v4883_v49 = vcombine.high %v108_v44, %v140_v45  ;;  %v171_v50 = vld [vmem:[#allocation2 + $0x480] sm:$0xff] }
 0x104   :  { %3681 = vmatprep.subr.bf16.mxu0 %v5069_v51  ;;  %3722 = vmatprep.subr.bf16.mxu1 %v5071_v52  ;;  %v203_v51 = vld [vmem:[#allocation2 + $0x580] sm:$0xff]  ;;  %v172_v52 = vld [vmem:[#allocation2 + $0x488] sm:$0xff] }
 0x105   :  { %v4945_v56 = vcombine.high %v171_v50, %v203_v51  ;;  %v4947_v57 = vcombine.high %v172_v52, %v204_v53  ;;  %v4946_v63 = vcombine.low %v172_v52, %v204_v53  ;;  %v78_v52 = vld [vmem:[#allocation2 + $0x198] sm:$0xff] }
 0x107   :  { %3682 = vmatpush1.bf16.msra.mxu0 %v5068_v60  ;;  %3723 = vmatpush1.bf16.msra.mxu1 %v5070_v61  ;;  %v236_v60 = vld [vmem:[#allocation2 + $0x688] sm:$0xff] }
 0x108   :  { %3683 = vmatprep.subr.bf16.mxu0 %v5133_v62  ;;  %3724 = vmatprep.subr.bf16.mxu1 %v5135_v2  ;;  %v268_v61 = vld [vmem:[#allocation2 + $0x788] sm:$0xff]  ;;  %v4944_v62 = vcombine.low %v171_v50, %v203_v51  ;;  %v46_v51 = vld [vmem:[#allocation2 + $0x98] sm:$0xff] }
 0x109   :  { %v3133_v10 = vpop.f32.mrb[0].mxu0  ;;  %v3174_v16 = vpop.f32.mrb[0].mxu1  ;;  %v5011_v2 = vcombine.high %v236_v60, %v268_v61 }
 0x10a   :  { %v3135_v17 = vpop.f32.mrb[1].mxu0  ;;  %v3176_v21 = vpop.f32.mrb[1].mxu1 }
 0x10b   :  { %v4475_v20 = vcombine.low %v3133_v10, %v3135_v17  ;;  %v3137_v22 = vpop.f32.mrb[2].mxu0  ;;  %3684 = vmatpush1.bf16.msra.mxu0 %v5132_v7  ;;  %v4476_v24 = vcombine.low %v3174_v16, %v3176_v21  ;;  %v3178_v25 = vpop.f32.mrb[2].mxu1  ;;  %3725 = vmatpush1.bf16.msra.mxu1 %v5134_v8  ;;  %v5008_v7 = vcombine.low %v235_v58, %v267_v59  ;;  %v396_v16 = vld [vmem:[#allocation2 + $0xb88] sm:$0xff]  ;;  %v427_v21 = vld [vmem:[#allocation2 + $0xc80] sm:$0xff]  ;;  %v109_v58 = vld [vmem:[#allocation2 + $0x290] sm:$0xff] }
 0x10c   :  { %v3138_v26 = vpop.f32.mrb[3].mxu0  ;;  %3685 = vmatprep.subr.bf16.mxu0 %v5197_v9  ;;  %v3179_v30 = vpop.f32.mrb[3].mxu1  ;;  %3726 = vmatprep.subr.bf16.mxu1 %v5199_v13  ;;  %v5010_v8 = vcombine.low %v236_v60, %v268_v61  ;;  %v5073_v9 = vcombine.high %v299_v3, %v331_v4  ;;  %v5075_v10 = vcombine.high %v300_v5, %v332_v6  ;;  %v363_v13 = vld [vmem:[#allocation2 + $0xa80] sm:$0xff]  ;;  %v141_v59 = vld [vmem:[#allocation2 + $0x390] sm:$0xff]  ;;  %v110_v60 = vld [vmem:[#allocation2 + $0x298] sm:$0xff] }
 0x10d   :  { %v4483_v29 = vrot.slane %v4475_v20, %v5400_v11  ;;  %v4490_v35 = vrot.slane %v4476_v24, %v5400_v11  ;;  %v5072_v17 = vcombine.low %v299_v3, %v331_v4  ;;  %v5137_v19 = vcombine.high %v363_v13, %v395_v14  ;;  %v459_v22 = vld [vmem:[#allocation2 + $0xd80] sm:$0xff]  ;;  %v460_v24 = vld [vmem:[#allocation2 + $0xd88] sm:$0xff]  ;;  %v142_v61 = vld [vmem:[#allocation2 + $0x398] sm:$0xff] }
 0x10e   :  { %v5139_v20 = vcombine.high %v364_v15, %v396_v16  ;;  %v5136_v25 = vcombine.low %v363_v13, %v395_v14  ;;  %v5138_v26 = vcombine.low %v364_v15, %v396_v16  ;;  %v491_v30 = vld [vmem:[#allocation2 + $0xe80] sm:$0xff]  ;;  %v173_v3 = vld [vmem:[#allocation2 + $0x490] sm:$0xff]  ;;  %v174_v5 = vld [vmem:[#allocation2 + $0x498] sm:$0xff] }
 0x10f   :  { %3686 = vmatpush1.bf16.msra.mxu0 %v5196_v23  ;;  %v4491_v38 = vcombine.low %v4483_v29, %v4490_v35  ;;  %3727 = vmatpush1.bf16.msra.mxu1 %v5198_v27  ;;  %v428_v23 = vld [vmem:[#allocation2 + $0xc88] sm:$0xff]  ;;  %v5201_v27 = vcombine.high %v427_v21, %v459_v22  ;;  %v205_v4 = vld [vmem:[#allocation2 + $0x590] sm:$0xff]  ;;  %v206_v6 = vld [vmem:[#allocation2 + $0x598] sm:$0xff] }
 0x110   :  { %3687 = vmatprep.subr.bf16.mxu0 %v5261_v28  ;;  %3728 = vmatprep.subr.bf16.mxu1 %v5263_v32  ;;  %v5203_v29 = vcombine.high %v428_v23, %v460_v24  ;;  %v523_v32 = vld [vmem:[#allocation2 + $0xf80] sm:$0xff]  ;;  %v492_v35 = vld [vmem:[#allocation2 + $0xe88] sm:$0xff]  ;;  %v5202_v43 = vcombine.low %v428_v23, %v460_v24  ;;  %v237_v13 = vld [vmem:[#allocation2 + $0x690] sm:$0xff] }
 0x111   :  { %4763 = vst [vmem:[%s5524_s2] sm:$0xff] %v4491_v38  ;;  %v5265_v44 = vcombine.high %v491_v30, %v523_v32  ;;  %v5264_v53 = vcombine.low %v491_v30, %v523_v32  ;;  %v269_v14 = vld [vmem:[#allocation2 + $0x790] sm:$0xff]  ;;  %v238_v15 = vld [vmem:[#allocation2 + $0x698] sm:$0xff] }
 0x112   :  { %v270_v16 = vld [vmem:[#allocation2 + $0x798] sm:$0xff]  ;;  %v397_v30 = vld [vmem:[#allocation2 + $0xb90] sm:$0xff] }
 0x113   :  { %3688 = vmatpush1.bf16.msra.mxu0 %v5260_v12  ;;  %3729 = vmatpush1.bf16.msra.mxu1 %v5262_v39  ;;  %v5200_v39 = vcombine.low %v427_v21, %v459_v22  ;;  %v301_v21 = vld [vmem:[#allocation2 + $0x890] sm:$0xff]  ;;  %v302_v23 = vld [vmem:[#allocation2 + $0x898] sm:$0xff] }
 0x114   :  { %3755 = vmatprep.subr.bf16.mxu0 %v4817_v40  ;;  %3796 = vmatprep.subr.bf16.mxu1 %v4819_v41  ;;  %v333_v22 = vld [vmem:[#allocation2 + $0x990] sm:$0xff]  ;;  %v334_v24 = vld [vmem:[#allocation2 + $0x998] sm:$0xff] }
 0x115   :  { %v366_v32 = vld [vmem:[#allocation2 + $0xa98] sm:$0xff] }
 0x116   :  { %3706 = vmatmul.mubr.bf16.vlgmr.msra.gmra.mrb[28].mxu0 %v5391_v31  ;;  %3747 = vmatmul.mubr.bf16.vlgmr.msra.gmra.mrb[28].mxu1 %v5391_v31 }
 0x117   :  { %3756 = vmatpush1.bf16.msra.mxu0 %v4816_v46  ;;  %3797 = vmatpush1.bf16.msra.mxu1 %v4818_v47  ;;  %v5267_v47 = vcombine.high %v492_v35, %v524_v36 }
 0x118   :  { %3757 = vmatprep.subr.bf16.mxu0 %v4881_v48  ;;  %3798 = vmatprep.subr.bf16.mxu1 %v4883_v49  ;;  %v45_v48 = vld [vmem:[#allocation2 + $0x90] sm:$0xff] }
 0x119   :  { %3787 = vmatprep.mubr.bf16.mxu0 %v5331_v0  ;;  %3828 = vmatprep.mubr.bf16.mxu1 %v5331_v0  ;;  %v77_v49 = vld [vmem:[#allocation2 + $0x190] sm:$0xff] }
 0x11b   :  { %3758 = vmatpush1.bf16.msra.mxu0 %v4880_v54  ;;  %3799 = vmatpush1.bf16.msra.mxu1 %v4882_v55  ;;  %v5266_v55 = vcombine.low %v492_v35, %v524_v36  ;;  %v5078_v35 = vcombine.low %v302_v23, %v334_v24 }
 0x11c   :  { %3759 = vmatprep.subr.bf16.mxu0 %v4945_v56  ;;  %3800 = vmatprep.subr.bf16.mxu1 %v4947_v57  ;;  %v4821_v56 = vcombine.high %v45_v48, %v77_v49  ;;  %v4823_v57 = vcombine.high %v46_v51, %v78_v52 }
 0x11f   :  { %3760 = vmatpush1.bf16.msra.mxu0 %v4944_v62  ;;  %3801 = vmatpush1.bf16.msra.mxu1 %v4946_v63  ;;  %v4820_v62 = vcombine.low %v45_v48, %v77_v49  ;;  %v4822_v63 = vcombine.low %v46_v51, %v78_v52  ;;  %v526_v51 = vld [vmem:[#allocation2 + $0xf98] sm:$0xff] }
 0x120   :  { %3761 = vmatprep.subr.bf16.mxu0 %v5009_v1  ;;  %3802 = vmatprep.subr.bf16.mxu1 %v5011_v2  ;;  %v4885_v1 = vcombine.high %v109_v58, %v141_v59  ;;  %v4887_v2 = vcombine.high %v110_v60, %v142_v61 }
 0x123   :  { %3762 = vmatpush1.bf16.msra.mxu0 %v5008_v7  ;;  %3803 = vmatpush1.bf16.msra.mxu1 %v5010_v8  ;;  %v4884_v7 = vcombine.low %v109_v58, %v141_v59  ;;  %v4886_v8 = vcombine.low %v110_v60, %v142_v61 }
 0x124   :  { %3763 = vmatprep.subr.bf16.mxu0 %v5073_v9  ;;  %3804 = vmatprep.subr.bf16.mxu1 %v5075_v10  ;;  %v4949_v9 = vcombine.high %v173_v3, %v205_v4  ;;  %v4951_v10 = vcombine.high %v174_v5, %v206_v6 }
 0x127   :  { %3764 = vmatpush1.bf16.msra.mxu0 %v5072_v17  ;;  %3805 = vmatpush1.bf16.msra.mxu1 %v5074_v18  ;;  %v4948_v17 = vcombine.low %v173_v3, %v205_v4  ;;  %v4950_v18 = vcombine.low %v174_v5, %v206_v6  ;;  %v48_v4 = vld [vmem:[#allocation2 + $0xa8] sm:$0xff] }
 0x128   :  { %3765 = vmatprep.subr.bf16.mxu0 %v5137_v19  ;;  %3806 = vmatprep.subr.bf16.mxu1 %v5139_v20  ;;  %v5013_v19 = vcombine.high %v237_v13, %v269_v14  ;;  %v5015_v20 = vcombine.high %v238_v15, %v270_v16  ;;  %v80_v5 = vld [vmem:[#allocation2 + $0x1a8] sm:$0xff] }
 0x129   :  { %v3215_v28 = vpop.f32.mrb[4].mxu0  ;;  %v3256_v33 = vpop.f32.mrb[4].mxu1 }
 0x12a   :  { %v3217_v34 = vpop.f32.mrb[5].mxu0  ;;  %v3258_v12 = vpop.f32.mrb[5].mxu1 }
 0x12b   :  { %v4492_v37 = vcombine.low %v3215_v28, %v3217_v34  ;;  %v3219_v38 = vpop.f32.mrb[6].mxu0  ;;  %3766 = vmatpush1.bf16.msra.mxu0 %v5136_v25  ;;  %v4493_v40 = vcombine.low %v3256_v33, %v3258_v12  ;;  %v3260_v41 = vpop.f32.mrb[6].mxu1  ;;  %3807 = vmatpush1.bf16.msra.mxu1 %v5138_v26  ;;  %v5012_v25 = vcombine.low %v237_v13, %v269_v14  ;;  %v398_v33 = vld [vmem:[#allocation2 + $0xb98] sm:$0xff]  ;;  %v429_v12 = vld [vmem:[#allocation2 + $0xc90] sm:$0xff]  ;;  %v111_v13 = vld [vmem:[#allocation2 + $0x2a0] sm:$0xff] }
 0x12c   :  { %v3220_v42 = vpop.f32.mrb[7].mxu0  ;;  %3767 = vmatprep.subr.bf16.mxu0 %v5201_v27  ;;  %v3261_v46 = vpop.f32.mrb[7].mxu1  ;;  %3808 = vmatprep.subr.bf16.mxu1 %v5203_v29  ;;  %v5014_v26 = vcombine.low %v238_v15, %v270_v16  ;;  %v5077_v27 = vcombine.high %v301_v21, %v333_v22  ;;  %v5079_v28 = vcombine.high %v302_v23, %v334_v24  ;;  %v365_v29 = vld [vmem:[#allocation2 + $0xa90] sm:$0xff]  ;;  %v143_v14 = vld [vmem:[#allocation2 + $0x3a0] sm:$0xff]  ;;  %v112_v15 = vld [vmem:[#allocation2 + $0x2a8] sm:$0xff] }
 0x12d   :  { %v4500_v45 = vrot.slane %v4492_v37, %v5400_v11  ;;  %v4507_v50 = vrot.slane %v4493_v40, %v5400_v11  ;;  %v5076_v34 = vcombine.low %v301_v21, %v333_v22  ;;  %v5141_v36 = vcombine.high %v365_v29, %v397_v30  ;;  %v461_v38 = vld [vmem:[#allocation2 + $0xd90] sm:$0xff]  ;;  %v462_v40 = vld [vmem:[#allocation2 + $0xd98] sm:$0xff]  ;;  %v144_v16 = vld [vmem:[#allocation2 + $0x3a8] sm:$0xff] }
 0x12e   :  { %v5143_v37 = vcombine.high %v366_v32, %v398_v33  ;;  %v5140_v41 = vcombine.low %v365_v29, %v397_v30  ;;  %v5142_v42 = vcombine.low %v366_v32, %v398_v33  ;;  %v493_v46 = vld [vmem:[#allocation2 + $0xe90] sm:$0xff]  ;;  %v175_v21 = vld [vmem:[#allocation2 + $0x4a0] sm:$0xff]  ;;  %v176_v23 = vld [vmem:[#allocation2 + $0x4a8] sm:$0xff] }
 0x12f   :  { %3768 = vmatpush1.bf16.msra.mxu0 %v5200_v39  ;;  %v4508_v54 = vcombine.low %v4500_v45, %v4507_v50  ;;  %3809 = vmatpush1.bf16.msra.mxu1 %v5202_v43  ;;  %v430_v39 = vld [vmem:[#allocation2 + $0xc98] sm:$0xff]  ;;  %v5205_v43 = vcombine.high %v429_v12, %v461_v38  ;;  %v207_v22 = vld [vmem:[#allocation2 + $0x5a0] sm:$0xff]  ;;  %v208_v24 = vld [vmem:[#allocation2 + $0x5a8] sm:$0xff] }
 0x130   :  { %3769 = vmatprep.subr.bf16.mxu0 %v5265_v44  ;;  %3810 = vmatprep.subr.bf16.mxu1 %v5267_v47  ;;  %v5207_v45 = vcombine.high %v430_v39, %v462_v40  ;;  %v525_v47 = vld [vmem:[#allocation2 + $0xf90] sm:$0xff]  ;;  %v494_v50 = vld [vmem:[#allocation2 + $0xe98] sm:$0xff]  ;;  %v5206_v59 = vcombine.low %v430_v39, %v462_v40  ;;  %v239_v29 = vld [vmem:[#allocation2 + $0x6a0] sm:$0xff] }
 0x131   :  { %4764 = vst [vmem:[%s5524_s2 + $0x8] sm:$0xff] %v4508_v54  ;;  %v5269_v60 = vcombine.high %v493_v46, %v525_v47  ;;  %v5268_v6 = vcombine.low %v493_v46, %v525_v47  ;;  %v271_v30 = vld [vmem:[#allocation2 + $0x7a0] sm:$0xff]  ;;  %v240_v32 = vld [vmem:[#allocation2 + $0x6a8] sm:$0xff] }
 0x132   :  { %v272_v33 = vld [vmem:[#allocation2 + $0x7a8] sm:$0xff]  ;;  %v5016_v40 = vcombine.low %v239_v29, %v271_v30 }
 0x133   :  { %3770 = vmatpush1.bf16.msra.mxu0 %v5264_v53  ;;  %3811 = vmatpush1.bf16.msra.mxu1 %v5266_v55  ;;  %v5204_v55 = vcombine.low %v429_v12, %v461_v38  ;;  %v335_v12 = vld [vmem:[#allocation2 + $0x9a0] sm:$0xff]  ;;  %v304_v38 = vld [vmem:[#allocation2 + $0x8a8] sm:$0xff] }
 0x134   :  { %3837 = vmatprep.subr.bf16.mxu0 %v4821_v56  ;;  %3878 = vmatprep.subr.bf16.mxu1 %v4823_v57  ;;  %v336_v39 = vld [vmem:[#allocation2 + $0x9a8] sm:$0xff] }
 0x135   :  { %v368_v46 = vld [vmem:[#allocation2 + $0xaa8] sm:$0xff] }
 0x136   :  { %3788 = vmatmul.mubr.bf16.vlgmr.msra.gmra.mrb[32].mxu0 %v5391_v31  ;;  %3829 = vmatmul.mubr.bf16.vlgmr.msra.gmra.mrb[32].mxu1 %v5391_v31  ;;  %v400_v47 = vld [vmem:[#allocation2 + $0xba8] sm:$0xff] }
 0x137   :  { %3838 = vmatpush1.bf16.msra.mxu0 %v4820_v62  ;;  %3879 = vmatpush1.bf16.msra.mxu1 %v4822_v63  ;;  %v5271_v63 = vcombine.high %v494_v50, %v526_v51 }
 0x138   :  { %3839 = vmatprep.subr.bf16.mxu0 %v4885_v1  ;;  %3880 = vmatprep.subr.bf16.mxu1 %v4887_v2  ;;  %v47_v1 = vld [vmem:[#allocation2 + $0xa0] sm:$0xff] }
 0x139   :  { %3869 = vmatprep.mubr.bf16.mxu0 %v5331_v0  ;;  %3910 = vmatprep.mubr.bf16.mxu1 %v5331_v0  ;;  %v79_v2 = vld [vmem:[#allocation2 + $0x1a0] sm:$0xff] }
 0x13b   :  { %3840 = vmatpush1.bf16.msra.mxu0 %v4884_v7  ;;  %3881 = vmatpush1.bf16.msra.mxu1 %v4886_v8  ;;  %v5270_v8 = vcombine.low %v494_v50, %v526_v51  ;;  %v5147_v51 = vcombine.high %v368_v46, %v400_v47 }
 0x13c   :  { %3841 = vmatprep.subr.bf16.mxu0 %v4949_v9  ;;  %3882 = vmatprep.subr.bf16.mxu1 %v4951_v10  ;;  %v4825_v9 = vcombine.high %v47_v1, %v79_v2  ;;  %v4827_v10 = vcombine.high %v48_v4, %v80_v5 }
 0x13f   :  { %3842 = vmatpush1.bf16.msra.mxu0 %v4948_v17  ;;  %3883 = vmatpush1.bf16.msra.mxu1 %v4950_v18  ;;  %v4824_v17 = vcombine.low %v47_v1, %v79_v2  ;;  %v4826_v18 = vcombine.low %v48_v4, %v80_v5  ;;  %v496_v2 = vld [vmem:[#allocation2 + $0xea8] sm:$0xff] }
 0x140   :  { %3843 = vmatprep.subr.bf16.mxu0 %v5013_v19  ;;  %3884 = vmatprep.subr.bf16.mxu1 %v5015_v20  ;;  %v4889_v19 = vcombine.high %v111_v13, %v143_v14  ;;  %v4891_v20 = vcombine.high %v112_v15, %v144_v16 }
 0x143   :  { %3844 = vmatpush1.bf16.msra.mxu0 %v5012_v25  ;;  %3885 = vmatpush1.bf16.msra.mxu1 %v5014_v26  ;;  %v4888_v25 = vcombine.low %v111_v13, %v143_v14  ;;  %v4890_v26 = vcombine.low %v112_v15, %v144_v16 }
 0x144   :  { %3845 = vmatprep.subr.bf16.mxu0 %v5077_v27  ;;  %3886 = vmatprep.subr.bf16.mxu1 %v5079_v28  ;;  %v4953_v27 = vcombine.high %v175_v21, %v207_v22  ;;  %v4955_v28 = vcombine.high %v176_v23, %v208_v24 }
 0x147   :  { %3846 = vmatpush1.bf16.msra.mxu0 %v5076_v34  ;;  %3887 = vmatpush1.bf16.msra.mxu1 %v5078_v35  ;;  %v4952_v34 = vcombine.low %v175_v21, %v207_v22  ;;  %v5017_v35 = vcombine.high %v239_v29, %v271_v30  ;;  %v50_v21 = vld [vmem:[#allocation2 + $0xb8] sm:$0xff]  ;;  %v145_v29 = vld [vmem:[#allocation2 + $0x3b0] sm:$0xff] }
 0x148   :  { %3847 = vmatprep.subr.bf16.mxu0 %v5141_v36  ;;  %3888 = vmatprep.subr.bf16.mxu1 %v5143_v37  ;;  %v5019_v36 = vcombine.high %v240_v32, %v272_v33  ;;  %v303_v37 = vld [vmem:[#allocation2 + $0x8a0] sm:$0xff]  ;;  %v82_v22 = vld [vmem:[#allocation2 + $0x1b8] sm:$0xff] }
 0x149   :  { %v3297_v44 = vpop.f32.mrb[8].mxu0  ;;  %v3338_v48 = vpop.f32.mrb[8].mxu1  ;;  %v114_v30 = vld [vmem:[#allocation2 + $0x2b8] sm:$0xff] }
 0x14a   :  { %v3299_v49 = vpop.f32.mrb[9].mxu0  ;;  %v3340_v53 = vpop.f32.mrb[9].mxu1 }
 0x14b   :  { %v4509_v52 = vcombine.low %v3297_v44, %v3299_v49  ;;  %v3301_v54 = vpop.f32.mrb[10].mxu0  ;;  %3848 = vmatpush1.bf16.msra.mxu0 %v5140_v41  ;;  %v4510_v56 = vcombine.low %v3338_v48, %v3340_v53  ;;  %v3342_v57 = vpop.f32.mrb[10].mxu1  ;;  %3889 = vmatpush1.bf16.msra.mxu1 %v5142_v42  ;;  %v5018_v41 = vcombine.low %v240_v32, %v272_v33  ;;  %v367_v44 = vld [vmem:[#allocation2 + $0xaa0] sm:$0xff]  ;;  %v146_v32 = vld [vmem:[#allocation2 + $0x3b8] sm:$0xff] }
 0x14c   :  { %v3302_v58 = vpop.f32.mrb[11].mxu0  ;;  %3849 = vmatprep.subr.bf16.mxu0 %v5205_v43  ;;  %v3343_v62 = vpop.f32.mrb[11].mxu1  ;;  %3890 = vmatprep.subr.bf16.mxu1 %v5207_v45  ;;  %v5081_v42 = vcombine.high %v303_v37, %v335_v12  ;;  %v5083_v43 = vcombine.high %v304_v38, %v336_v39  ;;  %v399_v45 = vld [vmem:[#allocation2 + $0xba0] sm:$0xff]  ;;  %v5080_v48 = vcombine.low %v303_v37, %v335_v12  ;;  %v432_v54 = vld [vmem:[#allocation2 + $0xca8] sm:$0xff]  ;;  %v209_v37 = vld [vmem:[#allocation2 + $0x5b0] sm:$0xff] }
 0x14d   :  { %v4517_v61 = vrot.slane %v4509_v52, %v5400_v11  ;;  %v4524_v3 = vrot.slane %v4510_v56, %v5400_v11  ;;  %v5082_v49 = vcombine.low %v304_v38, %v336_v39  ;;  %v5145_v50 = vcombine.high %v367_v44, %v399_v45  ;;  %v431_v52 = vld [vmem:[#allocation2 + $0xca0] sm:$0xff]  ;;  %v178_v38 = vld [vmem:[#allocation2 + $0x4b8] sm:$0xff] }
 0x14e   :  { %v463_v53 = vld [vmem:[#allocation2 + $0xda0] sm:$0xff]  ;;  %v5144_v56 = vcombine.low %v367_v44, %v399_v45  ;;  %v5146_v57 = vcombine.low %v368_v46, %v400_v47  ;;  %v210_v39 = vld [vmem:[#allocation2 + $0x5b8] sm:$0xff]  ;;  %v241_v44 = vld [vmem:[#allocation2 + $0x6b0] sm:$0xff] }
 0x14f   :  { %3850 = vmatpush1.bf16.msra.mxu0 %v5204_v55  ;;  %v4525_v7 = vcombine.low %v4517_v61, %v4524_v3  ;;  %3891 = vmatpush1.bf16.msra.mxu1 %v5206_v59  ;;  %v464_v55 = vld [vmem:[#allocation2 + $0xda8] sm:$0xff]  ;;  %v5209_v58 = vcombine.high %v431_v52, %v463_v53  ;;  %v495_v61 = vld [vmem:[#allocation2 + $0xea0] sm:$0xff]  ;;  %v273_v45 = vld [vmem:[#allocation2 + $0x7b0] sm:$0xff] }
 0x150   :  { %3851 = vmatprep.subr.bf16.mxu0 %v5269_v60  ;;  %3892 = vmatprep.subr.bf16.mxu1 %v5271_v63  ;;  %v5211_v60 = vcombine.high %v432_v54, %v464_v55  ;;  %v527_v62 = vld [vmem:[#allocation2 + $0xfa0] sm:$0xff]  ;;  %v528_v3 = vld [vmem:[#allocation2 + $0xfa8] sm:$0xff]  ;;  %v5210_v13 = vcombine.low %v432_v54, %v464_v55  ;;  %v242_v46 = vld [vmem:[#allocation2 + $0x6b8] sm:$0xff] }
 0x151   :  { %4765 = vst [vmem:[%s5524_s2 + $0x10] sm:$0xff] %v4525_v7  ;;  %v5208_v7 = vcombine.low %v431_v52, %v463_v53  ;;  %v5273_v14 = vcombine.high %v495_v61, %v527_v62  ;;  %v5437_v12 = vld [vmem:[%s5522_s0] sm:$0x1]  ;;  %v274_v47 = vld [vmem:[#allocation2 + $0x7b8] sm:$0xff]  ;;  %v305_v52 = vld [vmem:[#allocation2 + $0x8b0] sm:$0xff] }
 0x152   :  { %v337_v53 = vld [vmem:[#allocation2 + $0x9b0] sm:$0xff]  ;;  %v306_v54 = vld [vmem:[#allocation2 + $0x8b8] sm:$0xff] }
 0x153   :  { %3852 = vmatpush1.bf16.msra.mxu0 %v5268_v6  ;;  %3893 = vmatpush1.bf16.msra.mxu1 %v5270_v8  ;;  %v338_v55 = vld [vmem:[#allocation2 + $0x9b8] sm:$0xff] }
 0x154   :  { %3919 = vmatprep.subr.bf16.mxu0 %v4825_v9  ;;  %3960 = vmatprep.subr.bf16.mxu1 %v4827_v10 }
 0x156   :  { %3870 = vmatmul.mubr.bf16.vlgmr.msra.gmra.mrb[36].mxu0 %v5391_v31  ;;  %3911 = vmatmul.mubr.bf16.vlgmr.msra.gmra.mrb[36].mxu1 %v5391_v31  ;;  %v4954_v31 = vcombine.low %v176_v23, %v208_v24  ;;  %v5272_v23 = vcombine.low %v495_v61, %v527_v62  ;;  %v401_v61 = vld [vmem:[#allocation2 + $0xbb0] sm:$0xff]  ;;  %v370_v62 = vld [vmem:[#allocation2 + $0xab8] sm:$0xff] }
 0x157   :  { %3920 = vmatpush1.bf16.msra.mxu0 %v4824_v17  ;;  %3961 = vmatpush1.bf16.msra.mxu1 %v4826_v18  ;;  %v5275_v17 = vcombine.high %v496_v2, %v528_v3  ;;  %v49_v18 = vld [vmem:[#allocation2 + $0xb0] sm:$0xff] }
 0x158   :  { %3921 = vmatprep.subr.bf16.mxu0 %v4889_v19  ;;  %3962 = vmatprep.subr.bf16.mxu1 %v4891_v20  ;;  %v81_v19 = vld [vmem:[#allocation2 + $0x1b0] sm:$0xff] }
 0x159   :  { %3951 = vmatprep.mubr.bf16.mxu0 %v5331_v0  ;;  %3992 = vmatprep.mubr.bf16.mxu1 %v5331_v0  ;;  %v4828_v33 = vcombine.low %v49_v18, %v81_v19 }
 0x15b   :  { %3922 = vmatpush1.bf16.msra.mxu0 %v4888_v25  ;;  %3963 = vmatpush1.bf16.msra.mxu1 %v4890_v26  ;;  %v5274_v25 = vcombine.low %v496_v2, %v528_v3  ;;  %v4829_v26 = vcombine.high %v49_v18, %v81_v19  ;;  %v5086_v2 = vcombine.low %v306_v54, %v338_v55 }
 0x15c   :  { %3923 = vmatprep.subr.bf16.mxu0 %v4953_v27  ;;  %3964 = vmatprep.subr.bf16.mxu1 %v4955_v28  ;;  %v4831_v27 = vcombine.high %v50_v21, %v82_v22  ;;  %v113_v28 = vld [vmem:[#allocation2 + $0x2b0] sm:$0xff] }
 0x15f   :  { %3924 = vmatpush1.bf16.msra.mxu0 %v4952_v34  ;;  %3965 = vmatpush1.bf16.msra.mxu1 %v4954_v31  ;;  %v4830_v34 = vcombine.low %v50_v21, %v82_v22  ;;  %v4893_v31 = vcombine.high %v113_v28, %v145_v29  ;;  %v530_v21 = vld [vmem:[#allocation2 + $0xfb8] sm:$0xff] }
 0x160   :  { %3925 = vmatprep.subr.bf16.mxu0 %v5017_v35  ;;  %3966 = vmatprep.subr.bf16.mxu1 %v5019_v36  ;;  %v4895_v35 = vcombine.high %v114_v30, %v146_v32  ;;  %v177_v36 = vld [vmem:[#allocation2 + $0x4b0] sm:$0xff] }
 0x163   :  { %3926 = vmatpush1.bf16.msra.mxu0 %v5016_v40  ;;  %3967 = vmatpush1.bf16.msra.mxu1 %v5018_v41  ;;  %v4892_v40 = vcombine.low %v113_v28, %v145_v29  ;;  %v4894_v41 = vcombine.low %v114_v30, %v146_v32 }
 0x164   :  { %3927 = vmatprep.subr.bf16.mxu0 %v5081_v42  ;;  %3968 = vmatprep.subr.bf16.mxu1 %v5083_v43  ;;  %v4957_v42 = vcombine.high %v177_v36, %v209_v37  ;;  %v4959_v43 = vcombine.high %v178_v38, %v210_v39 }
 0x167   :  { %3928 = vmatpush1.bf16.msra.mxu0 %v5080_v48  ;;  %3969 = vmatpush1.bf16.msra.mxu1 %v5082_v49  ;;  %v4956_v48 = vcombine.low %v177_v36, %v209_v37  ;;  %v4958_v49 = vcombine.low %v178_v38, %v210_v39  ;;  %v52_v37 = vld [vmem:[#allocation2 + $0xc8] sm:$0xff] }
 0x168   :  { %3929 = vmatprep.subr.bf16.mxu0 %v5145_v50  ;;  %3970 = vmatprep.subr.bf16.mxu1 %v5147_v51  ;;  %v5021_v50 = vcombine.high %v241_v44, %v273_v45  ;;  %v5023_v51 = vcombine.high %v242_v46, %v274_v47  ;;  %v84_v38 = vld [vmem:[#allocation2 + $0x1c8] sm:$0xff] }
 0x169   :  { %v3379_v59 = vpop.f32.mrb[12].mxu0  ;;  %v3420_v63 = vpop.f32.mrb[12].mxu1 }
 0x16a   :  { %v3381_v1 = vpop.f32.mrb[13].mxu0  ;;  %v3422_v5 = vpop.f32.mrb[13].mxu1 }
 0x16b   :  { %v4526_v4 = vcombine.low %v3379_v59, %v3381_v1  ;;  %v3383_v6 = vpop.f32.mrb[14].mxu0  ;;  %3930 = vmatpush1.bf16.msra.mxu0 %v5144_v56  ;;  %v4527_v8 = vcombine.low %v3420_v63, %v3422_v5  ;;  %v3424_v9 = vpop.f32.mrb[14].mxu1  ;;  %3971 = vmatpush1.bf16.msra.mxu1 %v5146_v57  ;;  %v5020_v56 = vcombine.low %v241_v44, %v273_v45  ;;  %v402_v63 = vld [vmem:[#allocation2 + $0xbb8] sm:$0xff]  ;;  %v433_v5 = vld [vmem:[#allocation2 + $0xcb0] sm:$0xff]  ;;  %v115_v44 = vld [vmem:[#allocation2 + $0x2c0] sm:$0xff] }
 0x16c   :  { %v3384_v10 = vpop.f32.mrb[15].mxu0  ;;  %3931 = vmatprep.subr.bf16.mxu0 %v5209_v58  ;;  %v3425_v16 = vpop.f32.mrb[15].mxu1  ;;  %3972 = vmatprep.subr.bf16.mxu1 %v5211_v60  ;;  %v5022_v57 = vcombine.low %v242_v46, %v274_v47  ;;  %v5085_v58 = vcombine.high %v305_v52, %v337_v53  ;;  %v5087_v59 = vcombine.high %v306_v54, %v338_v55  ;;  %v369_v60 = vld [vmem:[#allocation2 + $0xab0] sm:$0xff]  ;;  %v147_v45 = vld [vmem:[#allocation2 + $0x3c0] sm:$0xff]  ;;  %v116_v46 = vld [vmem:[#allocation2 + $0x2c8] sm:$0xff] }
 0x16d   :  { %v4534_v15 = vrot.slane %v4526_v4, %v5400_v11  ;;  %v4541_v20 = vrot.slane %v4527_v8, %v5400_v11  ;;  %v5084_v1 = vcombine.low %v305_v52, %v337_v53  ;;  %v5149_v3 = vcombine.high %v369_v60, %v401_v61  ;;  %v465_v6 = vld [vmem:[#allocation2 + $0xdb0] sm:$0xff]  ;;  %v466_v8 = vld [vmem:[#allocation2 + $0xdb8] sm:$0xff]  ;;  %v148_v47 = vld [vmem:[#allocation2 + $0x3c8] sm:$0xff] }
 0x16e   :  { %v5151_v4 = vcombine.high %v370_v62, %v402_v63  ;;  %v5148_v9 = vcombine.low %v369_v60, %v401_v61  ;;  %v5150_v10 = vcombine.low %v370_v62, %v402_v63  ;;  %v497_v16 = vld [vmem:[#allocation2 + $0xeb0] sm:$0xff]  ;;  %v179_v52 = vld [vmem:[#allocation2 + $0x4c0] sm:$0xff]  ;;  %v180_v54 = vld [vmem:[#allocation2 + $0x4c8] sm:$0xff] }
 0x16f   :  { %3932 = vmatpush1.bf16.msra.mxu0 %v5208_v7  ;;  %v4542_v24 = vcombine.low %v4534_v15, %v4541_v20  ;;  %3973 = vmatpush1.bf16.msra.mxu1 %v5210_v13  ;;  %v434_v7 = vld [vmem:[#allocation2 + $0xcb8] sm:$0xff]  ;;  %v5213_v13 = vcombine.high %v433_v5, %v465_v6  ;;  %v211_v53 = vld [vmem:[#allocation2 + $0x5c0] sm:$0xff]  ;;  %v212_v55 = vld [vmem:[#allocation2 + $0x5c8] sm:$0xff] }
 0x170   :  { %3933 = vmatprep.subr.bf16.mxu0 %v5273_v14  ;;  %3974 = vmatprep.subr.bf16.mxu1 %v5275_v17  ;;  %v5215_v15 = vcombine.high %v434_v7, %v466_v8  ;;  %v529_v17 = vld [vmem:[#allocation2 + $0xfb0] sm:$0xff]  ;;  %v498_v20 = vld [vmem:[#allocation2 + $0xeb8] sm:$0xff]  ;;  %v5214_v29 = vcombine.low %v434_v7, %v466_v8  ;;  %v243_v60 = vld [vmem:[#allocation2 + $0x6c0] sm:$0xff] }
 0x171   :  { %4766 = vst [vmem:[%s5524_s2 + $0x18] sm:$0xff] %v4542_v24  ;;  %v5277_v30 = vcombine.high %v497_v16, %v529_v17  ;;  %v5276_v39 = vcombine.low %v497_v16, %v529_v17  ;;  %v275_v61 = vld [vmem:[#allocation2 + $0x7c0] sm:$0xff]  ;;  %v244_v62 = vld [vmem:[#allocation2 + $0x6c8] sm:$0xff] }
 0x172   :  { %v276_v63 = vld [vmem:[#allocation2 + $0x7c8] sm:$0xff]  ;;  %v403_v16 = vld [vmem:[#allocation2 + $0xbc0] sm:$0xff] }
 0x173   :  { %3934 = vmatpush1.bf16.msra.mxu0 %v5272_v23  ;;  %3975 = vmatpush1.bf16.msra.mxu1 %v5274_v25  ;;  %v5212_v25 = vcombine.low %v433_v5, %v465_v6  ;;  %v307_v5 = vld [vmem:[#allocation2 + $0x8c0] sm:$0xff]  ;;  %v308_v7 = vld [vmem:[#allocation2 + $0x8c8] sm:$0xff] }
 0x174   :  { %4001 = vmatprep.subr.bf16.mxu0 %v4829_v26  ;;  %4042 = vmatprep.subr.bf16.mxu1 %v4831_v27  ;;  %v339_v6 = vld [vmem:[#allocation2 + $0x9c0] sm:$0xff]  ;;  %v340_v8 = vld [vmem:[#allocation2 + $0x9c8] sm:$0xff] }
 0x175   :  { %v372_v17 = vld [vmem:[#allocation2 + $0xac8] sm:$0xff] }
 0x176   :  { %3952 = vmatmul.mubr.bf16.vlgmr.msra.gmra.mrb[40].mxu0 %v5437_v12  ;;  %3993 = vmatmul.mubr.bf16.vlgmr.msra.gmra.mrb[40].mxu1 %v5437_v12 }
 0x177   :  { %4002 = vmatpush1.bf16.msra.mxu0 %v4828_v33  ;;  %4043 = vmatpush1.bf16.msra.mxu1 %v4830_v34  ;;  %v5279_v34 = vcombine.high %v498_v20, %v530_v21 }
 0x178   :  { %4003 = vmatprep.subr.bf16.mxu0 %v4893_v31  ;;  %4044 = vmatprep.subr.bf16.mxu1 %v4895_v35  ;;  %v51_v31 = vld [vmem:[#allocation2 + $0xc0] sm:$0xff] }
 0x179   :  { %4033 = vmatprep.mubr.bf16.mxu0 %v5331_v0  ;;  %4074 = vmatprep.mubr.bf16.mxu1 %v5331_v0  ;;  %v83_v35 = vld [vmem:[#allocation2 + $0x1c0] sm:$0xff] }
 0x17b   :  { %4004 = vmatpush1.bf16.msra.mxu0 %v4892_v40  ;;  %4045 = vmatpush1.bf16.msra.mxu1 %v4894_v41  ;;  %v5278_v41 = vcombine.low %v498_v20, %v530_v21  ;;  %v5090_v20 = vcombine.low %v308_v7, %v340_v8 }
 0x17c   :  { %4005 = vmatprep.subr.bf16.mxu0 %v4957_v42  ;;  %4046 = vmatprep.subr.bf16.mxu1 %v4959_v43  ;;  %v4833_v42 = vcombine.high %v51_v31, %v83_v35  ;;  %v4835_v43 = vcombine.high %v52_v37, %v84_v38 }
 0x17f   :  { %4006 = vmatpush1.bf16.msra.mxu0 %v4956_v48  ;;  %4047 = vmatpush1.bf16.msra.mxu1 %v4958_v49  ;;  %v4832_v48 = vcombine.low %v51_v31, %v83_v35  ;;  %v4834_v49 = vcombine.low %v52_v37, %v84_v38  ;;  %v532_v37 = vld [vmem:[#allocation2 + $0xfc8] sm:$0xff] }
 0x180   :  { %4007 = vmatprep.subr.bf16.mxu0 %v5021_v50  ;;  %4048 = vmatprep.subr.bf16.mxu1 %v5023_v51  ;;  %v4897_v50 = vcombine.high %v115_v44, %v147_v45  ;;  %v4899_v51 = vcombine.high %v116_v46, %v148_v47 }
 0x183   :  { %4008 = vmatpush1.bf16.msra.mxu0 %v5020_v56  ;;  %4049 = vmatpush1.bf16.msra.mxu1 %v5022_v57  ;;  %v4896_v56 = vcombine.low %v115_v44, %v147_v45  ;;  %v4898_v57 = vcombine.low %v116_v46, %v148_v47 }
 0x184   :  { %4009 = vmatprep.subr.bf16.mxu0 %v5085_v58  ;;  %4050 = vmatprep.subr.bf16.mxu1 %v5087_v59  ;;  %v4961_v58 = vcombine.high %v179_v52, %v211_v53  ;;  %v4963_v59 = vcombine.high %v180_v54, %v212_v55 }
 0x187   :  { %4010 = vmatpush1.bf16.msra.mxu0 %v5084_v1  ;;  %4051 = vmatpush1.bf16.msra.mxu1 %v5086_v2  ;;  %v4960_v1 = vcombine.low %v179_v52, %v211_v53  ;;  %v4962_v2 = vcombine.low %v180_v54, %v212_v55  ;;  %v54_v53 = vld [vmem:[#allocation2 + $0xd8] sm:$0xff] }
 0x188   :  { %4011 = vmatprep.subr.bf16.mxu0 %v5149_v3  ;;  %4052 = vmatprep.subr.bf16.mxu1 %v5151_v4  ;;  %v5025_v3 = vcombine.high %v243_v60, %v275_v61  ;;  %v5027_v4 = vcombine.high %v244_v62, %v276_v63  ;;  %v86_v54 = vld [vmem:[#allocation2 + $0x1d8] sm:$0xff] }
 0x189   :  { %v3461_v14 = vpop.f32.mrb[16].mxu0  ;;  %v3502_v18 = vpop.f32.mrb[16].mxu1 }
 0x18a   :  { %v3463_v19 = vpop.f32.mrb[17].mxu0  ;;  %v3504_v23 = vpop.f32.mrb[17].mxu1 }
 0x18b   :  { %v4543_v22 = vcombine.low %v3461_v14, %v3463_v19  ;;  %v3465_v24 = vpop.f32.mrb[18].mxu0  ;;  %4012 = vmatpush1.bf16.msra.mxu0 %v5148_v9  ;;  %v4544_v26 = vcombine.low %v3502_v18, %v3504_v23  ;;  %v3506_v27 = vpop.f32.mrb[18].mxu1  ;;  %4053 = vmatpush1.bf16.msra.mxu1 %v5150_v10  ;;  %v5024_v9 = vcombine.low %v243_v60, %v275_v61  ;;  %v404_v18 = vld [vmem:[#allocation2 + $0xbc8] sm:$0xff]  ;;  %v435_v23 = vld [vmem:[#allocation2 + $0xcc0] sm:$0xff]  ;;  %v117_v60 = vld [vmem:[#allocation2 + $0x2d0] sm:$0xff] }
 0x18c   :  { %v3466_v28 = vpop.f32.mrb[19].mxu0  ;;  %4013 = vmatprep.subr.bf16.mxu0 %v5213_v13  ;;  %v3507_v33 = vpop.f32.mrb[19].mxu1  ;;  %4054 = vmatprep.subr.bf16.mxu1 %v5215_v15  ;;  %v5026_v10 = vcombine.low %v244_v62, %v276_v63  ;;  %v5089_v13 = vcombine.high %v307_v5, %v339_v6  ;;  %v5091_v14 = vcombine.high %v308_v7, %v340_v8  ;;  %v371_v15 = vld [vmem:[#allocation2 + $0xac0] sm:$0xff]  ;;  %v149_v61 = vld [vmem:[#allocation2 + $0x3d0] sm:$0xff]  ;;  %v118_v62 = vld [vmem:[#allocation2 + $0x2d8] sm:$0xff] }
 0x18d   :  { %v4551_v32 = vrot.slane %v4543_v22, %v5400_v11  ;;  %v4558_v36 = vrot.slane %v4544_v26, %v5400_v11  ;;  %v5088_v19 = vcombine.low %v307_v5, %v339_v6  ;;  %v5153_v21 = vcombine.high %v371_v15, %v403_v16  ;;  %v467_v24 = vld [vmem:[#allocation2 + $0xdc0] sm:$0xff]  ;;  %v468_v26 = vld [vmem:[#allocation2 + $0xdc8] sm:$0xff]  ;;  %v150_v63 = vld [vmem:[#allocation2 + $0x3d8] sm:$0xff] }
 0x18e   :  { %v5155_v22 = vcombine.high %v372_v17, %v404_v18  ;;  %v5152_v27 = vcombine.low %v371_v15, %v403_v16  ;;  %v5154_v28 = vcombine.low %v372_v17, %v404_v18  ;;  %v499_v33 = vld [vmem:[#allocation2 + $0xec0] sm:$0xff]  ;;  %v181_v5 = vld [vmem:[#allocation2 + $0x4d0] sm:$0xff]  ;;  %v182_v7 = vld [vmem:[#allocation2 + $0x4d8] sm:$0xff] }
 0x18f   :  { %4014 = vmatpush1.bf16.msra.mxu0 %v5212_v25  ;;  %v4559_v40 = vcombine.low %v4551_v32, %v4558_v36  ;;  %4055 = vmatpush1.bf16.msra.mxu1 %v5214_v29  ;;  %v436_v25 = vld [vmem:[#allocation2 + $0xcc8] sm:$0xff]  ;;  %v5217_v29 = vcombine.high %v435_v23, %v467_v24  ;;  %v213_v6 = vld [vmem:[#allocation2 + $0x5d0] sm:$0xff]  ;;  %v214_v8 = vld [vmem:[#allocation2 + $0x5d8] sm:$0xff] }
 0x190   :  { %4015 = vmatprep.subr.bf16.mxu0 %v5277_v30  ;;  %4056 = vmatprep.subr.bf16.mxu1 %v5279_v34  ;;  %v5219_v32 = vcombine.high %v436_v25, %v468_v26  ;;  %v531_v34 = vld [vmem:[#allocation2 + $0xfc0] sm:$0xff]  ;;  %v500_v36 = vld [vmem:[#allocation2 + $0xec8] sm:$0xff]  ;;  %v5218_v45 = vcombine.low %v436_v25, %v468_v26  ;;  %v245_v15 = vld [vmem:[#allocation2 + $0x6d0] sm:$0xff] }
 0x191   :  { %4767 = vst [vmem:[%s5524_s2 + $0x20] sm:$0xff] %v4559_v40  ;;  %v5281_v46 = vcombine.high %v499_v33, %v531_v34  ;;  %v5280_v55 = vcombine.low %v499_v33, %v531_v34  ;;  %v277_v16 = vld [vmem:[#allocation2 + $0x7d0] sm:$0xff]  ;;  %v246_v17 = vld [vmem:[#allocation2 + $0x6d8] sm:$0xff] }
 0x192   :  { %v278_v18 = vld [vmem:[#allocation2 + $0x7d8] sm:$0xff]  ;;  %v405_v33 = vld [vmem:[#allocation2 + $0xbd0] sm:$0xff] }
 0x193   :  { %4016 = vmatpush1.bf16.msra.mxu0 %v5276_v39  ;;  %4057 = vmatpush1.bf16.msra.mxu1 %v5278_v41  ;;  %v5216_v41 = vcombine.low %v435_v23, %v467_v24  ;;  %v309_v23 = vld [vmem:[#allocation2 + $0x8d0] sm:$0xff]  ;;  %v310_v25 = vld [vmem:[#allocation2 + $0x8d8] sm:$0xff] }
 0x194   :  { %4083 = vmatprep.subr.bf16.mxu0 %v4833_v42  ;;  %4124 = vmatprep.subr.bf16.mxu1 %v4835_v43  ;;  %v341_v24 = vld [vmem:[#allocation2 + $0x9d0] sm:$0xff]  ;;  %v342_v26 = vld [vmem:[#allocation2 + $0x9d8] sm:$0xff] }
 0x195   :  { %v374_v34 = vld [vmem:[#allocation2 + $0xad8] sm:$0xff] }
 0x196   :  { %4034 = vmatmul.mubr.bf16.vlgmr.msra.gmra.mrb[44].mxu0 %v5437_v12  ;;  %4075 = vmatmul.mubr.bf16.vlgmr.msra.gmra.mrb[44].mxu1 %v5437_v12 }
 0x197   :  { %4084 = vmatpush1.bf16.msra.mxu0 %v4832_v48  ;;  %4125 = vmatpush1.bf16.msra.mxu1 %v4834_v49  ;;  %v5283_v49 = vcombine.high %v500_v36, %v532_v37 }
 0x198   :  { %4085 = vmatprep.subr.bf16.mxu0 %v4897_v50  ;;  %4126 = vmatprep.subr.bf16.mxu1 %v4899_v51  ;;  %v53_v50 = vld [vmem:[#allocation2 + $0xd0] sm:$0xff] }
 0x199   :  { %4115 = vmatprep.mubr.bf16.mxu0 %v5331_v0  ;;  %4156 = vmatprep.mubr.bf16.mxu1 %v5331_v0  ;;  %v85_v51 = vld [vmem:[#allocation2 + $0x1d0] sm:$0xff] }
 0x19b   :  { %4086 = vmatpush1.bf16.msra.mxu0 %v4896_v56  ;;  %4127 = vmatpush1.bf16.msra.mxu1 %v4898_v57  ;;  %v5282_v57 = vcombine.low %v500_v36, %v532_v37  ;;  %v5094_v36 = vcombine.low %v310_v25, %v342_v26 }
 0x19c   :  { %4087 = vmatprep.subr.bf16.mxu0 %v4961_v58  ;;  %4128 = vmatprep.subr.bf16.mxu1 %v4963_v59  ;;  %v4837_v58 = vcombine.high %v53_v50, %v85_v51  ;;  %v4839_v59 = vcombine.high %v54_v53, %v86_v54 }
 0x19f   :  { %4088 = vmatpush1.bf16.msra.mxu0 %v4960_v1  ;;  %4129 = vmatpush1.bf16.msra.mxu1 %v4962_v2  ;;  %v4836_v1 = vcombine.low %v53_v50, %v85_v51  ;;  %v4838_v2 = vcombine.low %v54_v53, %v86_v54  ;;  %v534_v53 = vld [vmem:[#allocation2 + $0xfd8] sm:$0xff] }
 0x1a0   :  { %4089 = vmatprep.subr.bf16.mxu0 %v5025_v3  ;;  %4130 = vmatprep.subr.bf16.mxu1 %v5027_v4  ;;  %v4901_v3 = vcombine.high %v117_v60, %v149_v61  ;;  %v4903_v4 = vcombine.high %v118_v62, %v150_v63 }
 0x1a3   :  { %4090 = vmatpush1.bf16.msra.mxu0 %v5024_v9  ;;  %4131 = vmatpush1.bf16.msra.mxu1 %v5026_v10  ;;  %v4900_v9 = vcombine.low %v117_v60, %v149_v61  ;;  %v4902_v10 = vcombine.low %v118_v62, %v150_v63 }
 0x1a4   :  { %4091 = vmatprep.subr.bf16.mxu0 %v5089_v13  ;;  %4132 = vmatprep.subr.bf16.mxu1 %v5091_v14  ;;  %v4965_v13 = vcombine.high %v181_v5, %v213_v6  ;;  %v4967_v14 = vcombine.high %v182_v7, %v214_v8 }
 0x1a7   :  { %4092 = vmatpush1.bf16.msra.mxu0 %v5088_v19  ;;  %4133 = vmatpush1.bf16.msra.mxu1 %v5090_v20  ;;  %v4964_v19 = vcombine.low %v181_v5, %v213_v6  ;;  %v4966_v20 = vcombine.low %v182_v7, %v214_v8  ;;  %v56_v6 = vld [vmem:[#allocation2 + $0xe8] sm:$0xff] }
 0x1a8   :  { %4093 = vmatprep.subr.bf16.mxu0 %v5153_v21  ;;  %4134 = vmatprep.subr.bf16.mxu1 %v5155_v22  ;;  %v5029_v21 = vcombine.high %v245_v15, %v277_v16  ;;  %v5031_v22 = vcombine.high %v246_v17, %v278_v18  ;;  %v88_v7 = vld [vmem:[#allocation2 + $0x1e8] sm:$0xff] }
 0x1a9   :  { %v3543_v30 = vpop.f32.mrb[20].mxu0  ;;  %v3584_v31 = vpop.f32.mrb[20].mxu1 }
 0x1aa   :  { %v3545_v35 = vpop.f32.mrb[21].mxu0  ;;  %v3586_v39 = vpop.f32.mrb[21].mxu1 }
 0x1ab   :  { %v4560_v38 = vcombine.low %v3543_v30, %v3545_v35  ;;  %v3547_v40 = vpop.f32.mrb[22].mxu0  ;;  %4094 = vmatpush1.bf16.msra.mxu0 %v5152_v27  ;;  %v4561_v42 = vcombine.low %v3584_v31, %v3586_v39  ;;  %v3588_v43 = vpop.f32.mrb[22].mxu1  ;;  %4135 = vmatpush1.bf16.msra.mxu1 %v5154_v28  ;;  %v5028_v27 = vcombine.low %v245_v15, %v277_v16  ;;  %v406_v31 = vld [vmem:[#allocation2 + $0xbd8] sm:$0xff]  ;;  %v437_v39 = vld [vmem:[#allocation2 + $0xcd0] sm:$0xff]  ;;  %v119_v15 = vld [vmem:[#allocation2 + $0x2e0] sm:$0xff] }
 0x1ac   :  { %v3548_v44 = vpop.f32.mrb[23].mxu0  ;;  %4095 = vmatprep.subr.bf16.mxu0 %v5217_v29  ;;  %v3589_v48 = vpop.f32.mrb[23].mxu1  ;;  %4136 = vmatprep.subr.bf16.mxu1 %v5219_v32  ;;  %v5030_v28 = vcombine.low %v246_v17, %v278_v18  ;;  %v5093_v29 = vcombine.high %v309_v23, %v341_v24  ;;  %v5095_v30 = vcombine.high %v310_v25, %v342_v26  ;;  %v373_v32 = vld [vmem:[#allocation2 + $0xad0] sm:$0xff]  ;;  %v151_v16 = vld [vmem:[#allocation2 + $0x3e0] sm:$0xff]  ;;  %v120_v17 = vld [vmem:[#allocation2 + $0x2e8] sm:$0xff] }
 0x1ad   :  { %v4568_v47 = vrot.slane %v4560_v38, %v5400_v11  ;;  %v4575_v52 = vrot.slane %v4561_v42, %v5400_v11  ;;  %v5092_v35 = vcombine.low %v309_v23, %v341_v24  ;;  %v5157_v37 = vcombine.high %v373_v32, %v405_v33  ;;  %v469_v40 = vld [vmem:[#allocation2 + $0xdd0] sm:$0xff]  ;;  %v470_v42 = vld [vmem:[#allocation2 + $0xdd8] sm:$0xff]  ;;  %v152_v18 = vld [vmem:[#allocation2 + $0x3e8] sm:$0xff] }
 0x1ae   :  { %v5159_v38 = vcombine.high %v374_v34, %v406_v31  ;;  %v5156_v43 = vcombine.low %v373_v32, %v405_v33  ;;  %v5158_v44 = vcombine.low %v374_v34, %v406_v31  ;;  %v501_v48 = vld [vmem:[#allocation2 + $0xed0] sm:$0xff]  ;;  %v183_v23 = vld [vmem:[#allocation2 + $0x4e0] sm:$0xff]  ;;  %v184_v25 = vld [vmem:[#allocation2 + $0x4e8] sm:$0xff] }
 0x1af   :  { %4096 = vmatpush1.bf16.msra.mxu0 %v5216_v41  ;;  %v4576_v56 = vcombine.low %v4568_v47, %v4575_v52  ;;  %4137 = vmatpush1.bf16.msra.mxu1 %v5218_v45  ;;  %v438_v41 = vld [vmem:[#allocation2 + $0xcd8] sm:$0xff]  ;;  %v5221_v45 = vcombine.high %v437_v39, %v469_v40  ;;  %v215_v24 = vld [vmem:[#allocation2 + $0x5e0] sm:$0xff]  ;;  %v216_v26 = vld [vmem:[#allocation2 + $0x5e8] sm:$0xff] }
 0x1b0   :  { %4097 = vmatprep.subr.bf16.mxu0 %v5281_v46  ;;  %4138 = vmatprep.subr.bf16.mxu1 %v5283_v49  ;;  %v5223_v47 = vcombine.high %v438_v41, %v470_v42  ;;  %v533_v49 = vld [vmem:[#allocation2 + $0xfd0] sm:$0xff]  ;;  %v502_v52 = vld [vmem:[#allocation2 + $0xed8] sm:$0xff]  ;;  %v5222_v61 = vcombine.low %v438_v41, %v470_v42  ;;  %v247_v32 = vld [vmem:[#allocation2 + $0x6e0] sm:$0xff] }
 0x1b1   :  { %4768 = vst [vmem:[%s5524_s2 + $0x28] sm:$0xff] %v4576_v56  ;;  %v5285_v62 = vcombine.high %v501_v48, %v533_v49  ;;  %v5284_v8 = vcombine.low %v501_v48, %v533_v49  ;;  %v279_v33 = vld [vmem:[#allocation2 + $0x7e0] sm:$0xff]  ;;  %v248_v34 = vld [vmem:[#allocation2 + $0x6e8] sm:$0xff] }
 0x1b2   :  { %v280_v31 = vld [vmem:[#allocation2 + $0x7e8] sm:$0xff]  ;;  %v407_v48 = vld [vmem:[#allocation2 + $0xbe0] sm:$0xff] }
 0x1b3   :  { %4098 = vmatpush1.bf16.msra.mxu0 %v5280_v55  ;;  %4139 = vmatpush1.bf16.msra.mxu1 %v5282_v57  ;;  %v5220_v57 = vcombine.low %v437_v39, %v469_v40  ;;  %v311_v39 = vld [vmem:[#allocation2 + $0x8e0] sm:$0xff]  ;;  %v312_v41 = vld [vmem:[#allocation2 + $0x8e8] sm:$0xff] }
 0x1b4   :  { %4165 = vmatprep.subr.bf16.mxu0 %v4837_v58  ;;  %4206 = vmatprep.subr.bf16.mxu1 %v4839_v59  ;;  %v343_v40 = vld [vmem:[#allocation2 + $0x9e0] sm:$0xff]  ;;  %v344_v42 = vld [vmem:[#allocation2 + $0x9e8] sm:$0xff] }
 0x1b5   :  { %v376_v49 = vld [vmem:[#allocation2 + $0xae8] sm:$0xff] }
 0x1b6   :  { %4116 = vmatmul.mubr.bf16.vlgmr.msra.gmra.mrb[48].mxu0 %v5437_v12  ;;  %4157 = vmatmul.mubr.bf16.vlgmr.msra.gmra.mrb[48].mxu1 %v5437_v12 }
 0x1b7   :  { %4166 = vmatpush1.bf16.msra.mxu0 %v4836_v1  ;;  %4207 = vmatpush1.bf16.msra.mxu1 %v4838_v2  ;;  %v5287_v2 = vcombine.high %v502_v52, %v534_v53 }
 0x1b8   :  { %4167 = vmatprep.subr.bf16.mxu0 %v4901_v3  ;;  %4208 = vmatprep.subr.bf16.mxu1 %v4903_v4  ;;  %v55_v3 = vld [vmem:[#allocation2 + $0xe0] sm:$0xff] }
 0x1b9   :  { %4197 = vmatprep.mubr.bf16.mxu0 %v5331_v0  ;;  %4238 = vmatprep.mubr.bf16.mxu1 %v5331_v0  ;;  %v87_v4 = vld [vmem:[#allocation2 + $0x1e0] sm:$0xff] }
 0x1bb   :  { %4168 = vmatpush1.bf16.msra.mxu0 %v4900_v9  ;;  %4209 = vmatpush1.bf16.msra.mxu1 %v4902_v10  ;;  %v5286_v10 = vcombine.low %v502_v52, %v534_v53  ;;  %v5098_v52 = vcombine.low %v312_v41, %v344_v42 }
 0x1bc   :  { %4169 = vmatprep.subr.bf16.mxu0 %v4965_v13  ;;  %4210 = vmatprep.subr.bf16.mxu1 %v4967_v14  ;;  %v4841_v13 = vcombine.high %v55_v3, %v87_v4  ;;  %v4843_v14 = vcombine.high %v56_v6, %v88_v7 }
 0x1bf   :  { %4170 = vmatpush1.bf16.msra.mxu0 %v4964_v19  ;;  %4211 = vmatpush1.bf16.msra.mxu1 %v4966_v20  ;;  %v4840_v19 = vcombine.low %v55_v3, %v87_v4  ;;  %v4842_v20 = vcombine.low %v56_v6, %v88_v7  ;;  %v536_v6 = vld [vmem:[#allocation2 + $0xfe8] sm:$0xff] }
 0x1c0   :  { %4171 = vmatprep.subr.bf16.mxu0 %v5029_v21  ;;  %4212 = vmatprep.subr.bf16.mxu1 %v5031_v22  ;;  %v4905_v21 = vcombine.high %v119_v15, %v151_v16  ;;  %v4907_v22 = vcombine.high %v120_v17, %v152_v18 }
 0x1c3   :  { %4172 = vmatpush1.bf16.msra.mxu0 %v5028_v27  ;;  %4213 = vmatpush1.bf16.msra.mxu1 %v5030_v28  ;;  %v4904_v27 = vcombine.low %v119_v15, %v151_v16  ;;  %v4906_v28 = vcombine.low %v120_v17, %v152_v18 }
 0x1c4   :  { %4173 = vmatprep.subr.bf16.mxu0 %v5093_v29  ;;  %4214 = vmatprep.subr.bf16.mxu1 %v5095_v30  ;;  %v4969_v29 = vcombine.high %v183_v23, %v215_v24  ;;  %v4971_v30 = vcombine.high %v184_v25, %v216_v26 }
 0x1c7   :  { %4174 = vmatpush1.bf16.msra.mxu0 %v5092_v35  ;;  %4215 = vmatpush1.bf16.msra.mxu1 %v5094_v36  ;;  %v4968_v35 = vcombine.low %v183_v23, %v215_v24  ;;  %v4970_v36 = vcombine.low %v184_v25, %v216_v26  ;;  %v58_v24 = vld [vmem:[#allocation2 + $0xf8] sm:$0xff] }
 0x1c8   :  { %4175 = vmatprep.subr.bf16.mxu0 %v5157_v37  ;;  %4216 = vmatprep.subr.bf16.mxu1 %v5159_v38  ;;  %v5033_v37 = vcombine.high %v247_v32, %v279_v33  ;;  %v5035_v38 = vcombine.high %v248_v34, %v280_v31  ;;  %v90_v25 = vld [vmem:[#allocation2 + $0x1f8] sm:$0xff] }
 0x1c9   :  { %v3625_v46 = vpop.f32.mrb[24].mxu0  ;;  %v3666_v50 = vpop.f32.mrb[24].mxu1 }
 0x1ca   :  { %v3627_v51 = vpop.f32.mrb[25].mxu0  ;;  %v3668_v55 = vpop.f32.mrb[25].mxu1 }
 0x1cb   :  { %v4577_v54 = vcombine.low %v3625_v46, %v3627_v51  ;;  %v3629_v56 = vpop.f32.mrb[26].mxu0  ;;  %4176 = vmatpush1.bf16.msra.mxu0 %v5156_v43  ;;  %v4578_v58 = vcombine.low %v3666_v50, %v3668_v55  ;;  %v3670_v59 = vpop.f32.mrb[26].mxu1  ;;  %4217 = vmatpush1.bf16.msra.mxu1 %v5158_v44  ;;  %v5032_v43 = vcombine.low %v247_v32, %v279_v33  ;;  %v408_v50 = vld [vmem:[#allocation2 + $0xbe8] sm:$0xff]  ;;  %v439_v55 = vld [vmem:[#allocation2 + $0xce0] sm:$0xff]  ;;  %v121_v32 = vld [vmem:[#allocation2 + $0x2f0] sm:$0xff] }
 0x1cc   :  { %v3630_v60 = vpop.f32.mrb[27].mxu0  ;;  %4177 = vmatprep.subr.bf16.mxu0 %v5221_v45  ;;  %v3671_v1 = vpop.f32.mrb[27].mxu1  ;;  %4218 = vmatprep.subr.bf16.mxu1 %v5223_v47  ;;  %v5034_v44 = vcombine.low %v248_v34, %v280_v31  ;;  %v5097_v45 = vcombine.high %v311_v39, %v343_v40  ;;  %v5099_v46 = vcombine.high %v312_v41, %v344_v42  ;;  %v375_v47 = vld [vmem:[#allocation2 + $0xae0] sm:$0xff]  ;;  %v153_v33 = vld [vmem:[#allocation2 + $0x3f0] sm:$0xff]  ;;  %v122_v34 = vld [vmem:[#allocation2 + $0x2f8] sm:$0xff] }
 0x1cd   :  { %v4585_v63 = vrot.slane %v4577_v54, %v5400_v11  ;;  %v4592_v5 = vrot.slane %v4578_v58, %v5400_v11  ;;  %v5096_v51 = vcombine.low %v311_v39, %v343_v40  ;;  %v5161_v53 = vcombine.high %v375_v47, %v407_v48  ;;  %v471_v56 = vld [vmem:[#allocation2 + $0xde0] sm:$0xff]  ;;  %v472_v58 = vld [vmem:[#allocation2 + $0xde8] sm:$0xff]  ;;  %v154_v31 = vld [vmem:[#allocation2 + $0x3f8] sm:$0xff] }
 0x1ce   :  { %v5163_v54 = vcombine.high %v376_v49, %v408_v50  ;;  %v5160_v59 = vcombine.low %v375_v47, %v407_v48  ;;  %v5162_v60 = vcombine.low %v376_v49, %v408_v50  ;;  %v503_v1 = vld [vmem:[#allocation2 + $0xee0] sm:$0xff]  ;;  %v185_v39 = vld [vmem:[#allocation2 + $0x4f0] sm:$0xff]  ;;  %v186_v41 = vld [vmem:[#allocation2 + $0x4f8] sm:$0xff] }
 0x1cf   :  { %4178 = vmatpush1.bf16.msra.mxu0 %v5220_v57  ;;  %v4593_v9 = vcombine.low %v4585_v63, %v4592_v5  ;;  %4219 = vmatpush1.bf16.msra.mxu1 %v5222_v61  ;;  %v440_v57 = vld [vmem:[#allocation2 + $0xce8] sm:$0xff]  ;;  %v5225_v61 = vcombine.high %v439_v55, %v471_v56  ;;  %v217_v40 = vld [vmem:[#allocation2 + $0x5f0] sm:$0xff]  ;;  %v218_v42 = vld [vmem:[#allocation2 + $0x5f8] sm:$0xff] }
 0x1d0   :  { %4179 = vmatprep.subr.bf16.mxu0 %v5285_v62  ;;  %4220 = vmatprep.subr.bf16.mxu1 %v5287_v2  ;;  %v5227_v63 = vcombine.high %v440_v57, %v472_v58  ;;  %v535_v2 = vld [vmem:[#allocation2 + $0xfe0] sm:$0xff]  ;;  %v504_v5 = vld [vmem:[#allocation2 + $0xee8] sm:$0xff]  ;;  %v5226_v16 = vcombine.low %v440_v57, %v472_v58  ;;  %v249_v47 = vld [vmem:[#allocation2 + $0x6f0] sm:$0xff] }
 0x1d1   :  { %4769 = vst [vmem:[%s5524_s2 + $0x30] sm:$0xff] %v4593_v9  ;;  %v5289_v17 = vcombine.high %v503_v1, %v535_v2  ;;  %v5288_v26 = vcombine.low %v503_v1, %v535_v2  ;;  %v281_v48 = vld [vmem:[#allocation2 + $0x7f0] sm:$0xff]  ;;  %v250_v49 = vld [vmem:[#allocation2 + $0x6f8] sm:$0xff] }
 0x1d2   :  { %v282_v50 = vld [vmem:[#allocation2 + $0x7f8] sm:$0xff]  ;;  %v5036_v58 = vcombine.low %v249_v47, %v281_v48 }
 0x1d3   :  { %4180 = vmatpush1.bf16.msra.mxu0 %v5284_v8  ;;  %4221 = vmatpush1.bf16.msra.mxu1 %v5286_v10  ;;  %v5224_v10 = vcombine.low %v439_v55, %v471_v56  ;;  %v345_v55 = vld [vmem:[#allocation2 + $0x9f0] sm:$0xff]  ;;  %v314_v56 = vld [vmem:[#allocation2 + $0x8f8] sm:$0xff] }
 0x1d4   :  { %4247 = vmatprep.subr.bf16.mxu0 %v4841_v13  ;;  %4288 = vmatprep.subr.bf16.mxu1 %v4843_v14  ;;  %v346_v57 = vld [vmem:[#allocation2 + $0x9f8] sm:$0xff] }
 0x1d5   :  { %v410_v1 = vld [vmem:[#allocation2 + $0xbf8] sm:$0xff] }
 0x1d6   :  { %4198 = vmatmul.mubr.bf16.vlgmr.msra.gmra.mrb[52].mxu0 %v5437_v12  ;;  %4239 = vmatmul.mubr.bf16.vlgmr.msra.gmra.mrb[52].mxu1 %v5437_v12 }
 0x1d7   :  { %4248 = vmatpush1.bf16.msra.mxu0 %v4840_v19  ;;  %4289 = vmatpush1.bf16.msra.mxu1 %v4842_v20  ;;  %v5291_v20 = vcombine.high %v504_v5, %v536_v6 }
 0x1d8   :  { %4249 = vmatprep.subr.bf16.mxu0 %v4905_v21  ;;  %4290 = vmatprep.subr.bf16.mxu1 %v4907_v22  ;;  %v57_v21 = vld [vmem:[#allocation2 + $0xf0] sm:$0xff] }
 0x1d9   :  { %4279 = vmatprep.mubr.bf16.mxu0 %v5331_v0  ;;  %4320 = vmatprep.mubr.bf16.mxu1 %v5331_v0  ;;  %v89_v22 = vld [vmem:[#allocation2 + $0x1f0] sm:$0xff] }
 0x1db   :  { %4250 = vmatpush1.bf16.msra.mxu0 %v4904_v27  ;;  %4291 = vmatpush1.bf16.msra.mxu1 %v4906_v28  ;;  %v5290_v28 = vcombine.low %v504_v5, %v536_v6  ;;  %v441_v6 = vld [vmem:[#allocation2 + $0xcf0] sm:$0xff] }
 0x1dc   :  { %4251 = vmatprep.subr.bf16.mxu0 %v4969_v29  ;;  %4292 = vmatprep.subr.bf16.mxu1 %v4971_v30  ;;  %v4845_v29 = vcombine.high %v57_v21, %v89_v22  ;;  %v4847_v30 = vcombine.high %v58_v24, %v90_v25 }
 0x1df   :  { %4252 = vmatpush1.bf16.msra.mxu0 %v4968_v35  ;;  %4293 = vmatpush1.bf16.msra.mxu1 %v4970_v36  ;;  %v4844_v35 = vcombine.low %v57_v21, %v89_v22  ;;  %v4846_v36 = vcombine.low %v58_v24, %v90_v25  ;;  %v506_v21 = vld [vmem:[#allocation2 + $0xef8] sm:$0xff] }
 0x1e0   :  { %4253 = vmatprep.subr.bf16.mxu0 %v5033_v37  ;;  %4294 = vmatprep.subr.bf16.mxu1 %v5035_v38  ;;  %v4909_v37 = vcombine.high %v121_v32, %v153_v33  ;;  %v4911_v38 = vcombine.high %v122_v34, %v154_v31  ;;  %v538_v22 = vld [vmem:[#allocation2 + $0xff8] sm:$0xff] }
 0x1e3   :  { %4254 = vmatpush1.bf16.msra.mxu0 %v5032_v43  ;;  %4295 = vmatpush1.bf16.msra.mxu1 %v5034_v44  ;;  %v4908_v43 = vcombine.low %v121_v32, %v153_v33  ;;  %v4910_v44 = vcombine.low %v122_v34, %v154_v31  ;;  %v5295_v31 = vcombine.high %v506_v21, %v538_v22 }
 0x1e4   :  { %4255 = vmatprep.subr.bf16.mxu0 %v5097_v45  ;;  %4296 = vmatprep.subr.bf16.mxu1 %v5099_v46  ;;  %v4973_v45 = vcombine.high %v185_v39, %v217_v40  ;;  %v4975_v46 = vcombine.high %v186_v41, %v218_v42 }
 0x1e7   :  { %4256 = vmatpush1.bf16.msra.mxu0 %v5096_v51  ;;  %4297 = vmatpush1.bf16.msra.mxu1 %v5098_v52  ;;  %v4972_v51 = vcombine.low %v185_v39, %v217_v40  ;;  %v5037_v52 = vcombine.high %v249_v47, %v281_v48  ;;  %v5303_v39 = vld [vmem:[%s5522_s0] sm:$0x1] }
 0x1e8   :  { %4257 = vmatprep.subr.bf16.mxu0 %v5161_v53  ;;  %4298 = vmatprep.subr.bf16.mxu1 %v5163_v54  ;;  %v5039_v53 = vcombine.high %v250_v49, %v282_v50  ;;  %v313_v54 = vld [vmem:[#allocation2 + $0x8f0] sm:$0xff] }
 0x1e9   :  { %v3707_v62 = vpop.f32.mrb[28].mxu0  ;;  %v3748_v3 = vpop.f32.mrb[28].mxu1  ;;  %v5100_v2 = vcombine.low %v313_v54, %v345_v55 }
 0x1ea   :  { %v3709_v4 = vpop.f32.mrb[29].mxu0  ;;  %v3750_v8 = vpop.f32.mrb[29].mxu1 }
 0x1eb   :  { %v4594_v7 = vcombine.low %v3707_v62, %v3709_v4  ;;  %v3711_v9 = vpop.f32.mrb[30].mxu0  ;;  %4258 = vmatpush1.bf16.msra.mxu0 %v5160_v59  ;;  %v4595_v13 = vcombine.low %v3748_v3, %v3750_v8  ;;  %v3752_v14 = vpop.f32.mrb[30].mxu1  ;;  %4299 = vmatpush1.bf16.msra.mxu1 %v5162_v60  ;;  %v5038_v59 = vcombine.low %v250_v49, %v282_v50  ;;  %v409_v62 = vld [vmem:[#allocation2 + $0xbf0] sm:$0xff]  ;;  %v442_v8 = vld [vmem:[#allocation2 + $0xcf8] sm:$0xff] }
 0x1ec   :  { %v3712_v15 = vpop.f32.mrb[31].mxu0  ;;  %4259 = vmatprep.subr.bf16.mxu0 %v5225_v61  ;;  %v3753_v19 = vpop.f32.mrb[31].mxu1  ;;  %4300 = vmatprep.subr.bf16.mxu1 %v5227_v63  ;;  %v5101_v60 = vcombine.high %v313_v54, %v345_v55  ;;  %v377_v61 = vld [vmem:[#allocation2 + $0xaf0] sm:$0xff]  ;;  %v378_v63 = vld [vmem:[#allocation2 + $0xaf8] sm:$0xff]  ;;  %v5102_v3 = vcombine.low %v314_v56, %v346_v57 }
 0x1ed   :  { %v4602_v18 = vrot.slane %v4594_v7, %v5400_v11  ;;  %v4609_v23 = vrot.slane %v4595_v13, %v5400_v11  ;;  %v5165_v4 = vcombine.high %v377_v61, %v409_v62  ;;  %v5167_v5 = vcombine.high %v378_v63, %v410_v1  ;;  %v473_v7 = vld [vmem:[#allocation2 + $0xdf0] sm:$0xff]  ;;  %v474_v9 = vld [vmem:[#allocation2 + $0xdf8] sm:$0xff] }
 0x1ee   :  { %v5166_v13 = vcombine.low %v378_v63, %v410_v1  ;;  %v5229_v14 = vcombine.high %v441_v6, %v473_v7 }
 0x1ef   :  { %4260 = vmatpush1.bf16.msra.mxu0 %v5224_v10  ;;  %v4610_v27 = vcombine.low %v4602_v18, %v4609_v23  ;;  %4301 = vmatpush1.bf16.msra.mxu1 %v5226_v16  ;;  %v5164_v10 = vcombine.low %v377_v61, %v409_v62  ;;  %v5231_v16 = vcombine.high %v442_v8, %v474_v9  ;;  %v537_v18 = vld [vmem:[#allocation2 + $0xff0] sm:$0xff] }
 0x1f0   :  { %4261 = vmatprep.subr.bf16.mxu0 %v5289_v17  ;;  %4302 = vmatprep.subr.bf16.mxu1 %v5291_v20  ;;  %v505_v17 = vld [vmem:[#allocation2 + $0xef0] sm:$0xff] }
 0x1f1   :  { %4770 = vst [vmem:[%s5524_s2 + $0x38] sm:$0xff] %v4610_v27  ;;  %v5293_v32 = vcombine.high %v505_v17, %v537_v18 }
 0x1f3   :  { %4262 = vmatpush1.bf16.msra.mxu0 %v5288_v26  ;;  %4303 = vmatpush1.bf16.msra.mxu1 %v5290_v28  ;;  %v5228_v26 = vcombine.low %v441_v6, %v473_v7 }
 0x1f4   :  { %4329 = vmatprep.subr.bf16.mxu0 %v4845_v29  ;;  %4370 = vmatprep.subr.bf16.mxu1 %v4847_v30  ;;  %v5230_v30 = vcombine.low %v442_v8, %v474_v9 }
 0x1f6   :  { %4280 = vmatmul.mubr.bf16.vlgmr.msra.gmra.mrb[56].mxu0 %v5437_v12  ;;  %4321 = vmatmul.mubr.bf16.vlgmr.msra.gmra.mrb[56].mxu1 %v5437_v12  ;;  %v4974_v12 = vcombine.low %v186_v41, %v218_v42 }
 0x1f7   :  { %4330 = vmatpush1.bf16.msra.mxu0 %v4844_v35  ;;  %4371 = vmatpush1.bf16.msra.mxu1 %v4846_v36  ;;  %v5292_v36 = vcombine.low %v505_v17, %v537_v18 }
 0x1f8   :  { %4331 = vmatprep.subr.bf16.mxu0 %v4909_v37  ;;  %4372 = vmatprep.subr.bf16.mxu1 %v4911_v38  ;;  %v5294_v38 = vcombine.low %v506_v21, %v538_v22 }
 0x1f9   :  { %4361 = vmatprep.mubr.bf16.mxu0 %v5331_v0  ;;  %4402 = vmatprep.mubr.bf16.mxu1 %v5331_v0  ;;  %v5103_v0 = vcombine.high %v314_v56, %v346_v57 }
 0x1fb   :  { %4332 = vmatpush1.bf16.msra.mxu0 %v4908_v43  ;;  %4373 = vmatpush1.bf16.msra.mxu1 %v4910_v44 }
 0x1fc   :  { %4333 = vmatprep.subr.bf16.mxu0 %v4973_v45  ;;  %4374 = vmatprep.subr.bf16.mxu1 %v4975_v46 }
 0x1ff   :  { %4334 = vmatpush1.bf16.msra.mxu0 %v4972_v51  ;;  %4375 = vmatpush1.bf16.msra.mxu1 %v4974_v12 }
 0x200   :  { %4335 = vmatprep.subr.bf16.mxu0 %v5037_v52  ;;  %4376 = vmatprep.subr.bf16.mxu1 %v5039_v53 }
 0x203   :  { %4336 = vmatpush1.bf16.msra.mxu0 %v5036_v58  ;;  %4377 = vmatpush1.bf16.msra.mxu1 %v5038_v59 }
 0x204   :  { %4337 = vmatprep.subr.bf16.mxu0 %v5101_v60  ;;  %4378 = vmatprep.subr.bf16.mxu1 %v5103_v0 }
 0x207   :  { %4338 = vmatpush1.bf16.msra.mxu0 %v5100_v2  ;;  %4379 = vmatpush1.bf16.msra.mxu1 %v5102_v3 }
 0x208   :  { %4339 = vmatprep.subr.bf16.mxu0 %v5165_v4  ;;  %4380 = vmatprep.subr.bf16.mxu1 %v5167_v5 }
 0x209   :  { %v3789_v15 = vpop.f32.mrb[32].mxu0  ;;  %v3830_v19 = vpop.f32.mrb[32].mxu1 }
 0x20a   :  { %v3791_v20 = vpop.f32.mrb[33].mxu0  ;;  %v3832_v24 = vpop.f32.mrb[33].mxu1 }
 0x20b   :  { %v4611_v23 = vcombine.low %v3789_v15, %v3791_v20  ;;  %v3793_v25 = vpop.f32.mrb[34].mxu0  ;;  %4340 = vmatpush1.bf16.msra.mxu0 %v5164_v10  ;;  %v4612_v27 = vcombine.low %v3830_v19, %v3832_v24  ;;  %v3834_v28 = vpop.f32.mrb[34].mxu1  ;;  %4381 = vmatpush1.bf16.msra.mxu1 %v5166_v13 }
 0x20c   :  { %v3794_v29 = vpop.f32.mrb[35].mxu0  ;;  %4341 = vmatprep.subr.bf16.mxu0 %v5229_v14  ;;  %v3835_v34 = vpop.f32.mrb[35].mxu1  ;;  %4382 = vmatprep.subr.bf16.mxu1 %v5231_v16 }
 0x20d   :  { %v4619_v33 = vrot.slane %v4611_v23, %v5400_v11  ;;  %v4626_v35 = vrot.slane %v4612_v27, %v5400_v11 }
 0x20f   :  { %4342 = vmatpush1.bf16.msra.mxu0 %v5228_v26  ;;  %v4627_v37 = vcombine.low %v4619_v33, %v4626_v35  ;;  %4383 = vmatpush1.bf16.msra.mxu1 %v5230_v30 }
 0x210   :  { %4343 = vmatprep.subr.bf16.mxu0 %v5293_v32  ;;  %4384 = vmatprep.subr.bf16.mxu1 %v5295_v31 }
 0x211   :  { %4771 = vst [vmem:[%s5524_s2 + $0x40] sm:$0xff] %v4627_v37 }
 0x213   :  { %4344 = vmatpush1.bf16.msra.mxu0 %v5292_v36  ;;  %4385 = vmatpush1.bf16.msra.mxu1 %v5294_v38 }
 0x216   :  { %4362 = vmatmul.mubr.bf16.vlgmr.msra.gmra.mrb[60].mxu0 %v5303_v39  ;;  %4403 = vmatmul.mubr.bf16.vlgmr.msra.gmra.mrb[60].mxu1 %v5303_v39 }
 0x229   :  { %v3871_v40 = vpop.f32.mrb[36].mxu0  ;;  %v3912_v41 = vpop.f32.mrb[36].mxu1 }
 0x22a   :  { %v3873_v42 = vpop.f32.mrb[37].mxu0  ;;  %v3914_v44 = vpop.f32.mrb[37].mxu1 }
 0x22b   :  { %v4628_v43 = vcombine.low %v3871_v40, %v3873_v42  ;;  %v3875_v45 = vpop.f32.mrb[38].mxu0  ;;  %v4629_v46 = vcombine.low %v3912_v41, %v3914_v44  ;;  %v3916_v47 = vpop.f32.mrb[38].mxu1 }
 0x22c   :  { %v3876_v48 = vpop.f32.mrb[39].mxu0  ;;  %v3917_v50 = vpop.f32.mrb[39].mxu1 }
 0x22d   :  { %v4636_v49 = vrot.slane %v4628_v43, %v5400_v11  ;;  %v4643_v51 = vrot.slane %v4629_v46, %v5400_v11 }
 0x22f   :  { %v4644_v12 = vcombine.low %v4636_v49, %v4643_v51 }
 0x231   :  { %4772 = vst [vmem:[%s5524_s2 + $0x48] sm:$0xff] %v4644_v12 }
 0x249   :  { %v3953_v52 = vpop.f32.mrb[40].mxu0  ;;  %v3994_v53 = vpop.f32.mrb[40].mxu1 }
 0x24a   :  { %v3955_v54 = vpop.f32.mrb[41].mxu0  ;;  %v3996_v56 = vpop.f32.mrb[41].mxu1 }
 0x24b   :  { %v4645_v55 = vcombine.low %v3953_v52, %v3955_v54  ;;  %v3957_v57 = vpop.f32.mrb[42].mxu0  ;;  %v4646_v58 = vcombine.low %v3994_v53, %v3996_v56  ;;  %v3998_v59 = vpop.f32.mrb[42].mxu1 }
 0x24c   :  { %v3958_v60 = vpop.f32.mrb[43].mxu0  ;;  %v3999_v61 = vpop.f32.mrb[43].mxu1 }
 0x24d   :  { %v4653_v0 = vrot.slane %v4645_v55, %v5400_v11  ;;  %v4660_v62 = vrot.slane %v4646_v58, %v5400_v11 }
 0x24f   :  { %v4661_v63 = vcombine.low %v4653_v0, %v4660_v62 }
 0x251   :  { %4773 = vst [vmem:[%s5524_s2 + $0x50] sm:$0xff] %v4661_v63 }
 0x269   :  { %v4035_v1 = vpop.f32.mrb[44].mxu0  ;;  %v4076_v2 = vpop.f32.mrb[44].mxu1 }
 0x26a   :  { %v4037_v3 = vpop.f32.mrb[45].mxu0  ;;  %v4078_v5 = vpop.f32.mrb[45].mxu1 }
 0x26b   :  { %v4662_v4 = vcombine.low %v4035_v1, %v4037_v3  ;;  %v4039_v6 = vpop.f32.mrb[46].mxu0  ;;  %v4663_v7 = vcombine.low %v4076_v2, %v4078_v5  ;;  %v4080_v8 = vpop.f32.mrb[46].mxu1 }
 0x26c   :  { %v4040_v9 = vpop.f32.mrb[47].mxu0  ;;  %v4081_v13 = vpop.f32.mrb[47].mxu1 }
 0x26d   :  { %v4670_v10 = vrot.slane %v4662_v4, %v5400_v11  ;;  %v4677_v14 = vrot.slane %v4663_v7, %v5400_v11 }
 0x26f   :  { %v4678_v15 = vcombine.low %v4670_v10, %v4677_v14 }
 0x271   :  { %4774 = vst [vmem:[%s5524_s2 + $0x58] sm:$0xff] %v4678_v15 }
 0x289   :  { %v4117_v16 = vpop.f32.mrb[48].mxu0  ;;  %v4158_v17 = vpop.f32.mrb[48].mxu1 }
 0x28a   :  { %v4119_v18 = vpop.f32.mrb[49].mxu0  ;;  %v4160_v20 = vpop.f32.mrb[49].mxu1 }
 0x28b   :  { %v4679_v19 = vcombine.low %v4117_v16, %v4119_v18  ;;  %v4121_v21 = vpop.f32.mrb[50].mxu0  ;;  %v4680_v22 = vcombine.low %v4158_v17, %v4160_v20  ;;  %v4162_v23 = vpop.f32.mrb[50].mxu1 }
 0x28c   :  { %v4122_v24 = vpop.f32.mrb[51].mxu0  ;;  %v4163_v26 = vpop.f32.mrb[51].mxu1 }
 0x28d   :  { %v4687_v25 = vrot.slane %v4679_v19, %v5400_v11  ;;  %v4694_v27 = vrot.slane %v4680_v22, %v5400_v11 }
 0x28f   :  { %v4695_v28 = vcombine.low %v4687_v25, %v4694_v27 }
 0x291   :  { %4775 = vst [vmem:[%s5524_s2 + $0x60] sm:$0xff] %v4695_v28 }
 0x2a9   :  { %v4199_v29 = vpop.f32.mrb[52].mxu0  ;;  %v4240_v30 = vpop.f32.mrb[52].mxu1 }
 0x2aa   :  { %v4201_v32 = vpop.f32.mrb[53].mxu0  ;;  %v4242_v34 = vpop.f32.mrb[53].mxu1 }
 0x2ab   :  { %v4696_v33 = vcombine.low %v4199_v29, %v4201_v32  ;;  %v4203_v31 = vpop.f32.mrb[54].mxu0  ;;  %v4697_v35 = vcombine.low %v4240_v30, %v4242_v34  ;;  %v4244_v36 = vpop.f32.mrb[54].mxu1 }
 0x2ac   :  { %v4204_v37 = vpop.f32.mrb[55].mxu0  ;;  %v4245_v39 = vpop.f32.mrb[55].mxu1 }
 0x2ad   :  { %v4704_v38 = vrot.slane %v4696_v33, %v5400_v11  ;;  %v4711_v40 = vrot.slane %v4697_v35, %v5400_v11 }
 0x2af   :  { %v4712_v41 = vcombine.low %v4704_v38, %v4711_v40 }
 0x2b1   :  { %4776 = vst [vmem:[%s5524_s2 + $0x68] sm:$0xff] %v4712_v41 }
 0x2c9   :  { %v4281_v42 = vpop.f32.mrb[56].mxu0  ;;  %v4322_v43 = vpop.f32.mrb[56].mxu1 }
 0x2ca   :  { %v4283_v44 = vpop.f32.mrb[57].mxu0  ;;  %v4324_v46 = vpop.f32.mrb[57].mxu1 }
 0x2cb   :  { %v4713_v45 = vcombine.low %v4281_v42, %v4283_v44  ;;  %v4285_v47 = vpop.f32.mrb[58].mxu0  ;;  %v4714_v48 = vcombine.low %v4322_v43, %v4324_v46  ;;  %v4326_v49 = vpop.f32.mrb[58].mxu1 }
 0x2cc   :  { %v4286_v50 = vpop.f32.mrb[59].mxu0  ;;  %v4327_v12 = vpop.f32.mrb[59].mxu1 }
 0x2cd   :  { %v4721_v51 = vrot.slane %v4713_v45, %v5400_v11  ;;  %v4728_v52 = vrot.slane %v4714_v48, %v5400_v11 }
 0x2cf   :  { %v4729_v53 = vcombine.low %v4721_v51, %v4728_v52 }
 0x2d1   :  { %4777 = vst [vmem:[%s5524_s2 + $0x70] sm:$0xff] %v4729_v53 }
 0x2e9   :  { %v4363_v54 = vpop.f32.mrb[60].mxu0  ;;  %v4404_v55 = vpop.f32.mrb[60].mxu1 }
 0x2ea   :  { %v4365_v56 = vpop.f32.mrb[61].mxu0  ;;  %v4406_v58 = vpop.f32.mrb[61].mxu1 }
 0x2eb   :  { %v4730_v57 = vcombine.low %v4363_v54, %v4365_v56  ;;  %v4367_v59 = vpop.f32.mrb[62].mxu0  ;;  %v4731_v60 = vcombine.low %v4404_v55, %v4406_v58  ;;  %v4408_v0 = vpop.f32.mrb[62].mxu1 }
 0x2ec   :  { %v4368_v61 = vpop.f32.mrb[63].mxu0  ;;  %v4409_v63 = vpop.f32.mrb[63].mxu1 }
 0x2ed   :  { %v4738_v62 = vrot.slane %v4730_v57, %v5400_v11  ;;  %v4745_v1 = vrot.slane %v4731_v60, %v5400_v11 }
 0x2ef   :  { %v4746_v2 = vcombine.low %v4738_v62, %v4745_v1 }
 0x2f1   :  { %4778 = vst [vmem:[%s5524_s2 + $0x78] sm:$0xff] %v4746_v2 }
 0x2f2   :  { %4783 = vsyncpa [#allocation3], 1 }

// kernel: generator_forward.6
= control target key start
LH: loop header
LB: loop body
LE: loop exit
PB: predicated region body
PF: predicated region fallthrough
CT: control target
= control target key end

     0   :  { %s3431_s15 = smov 0   ;;  %s3809_s0 = inlined_call_operand.vmem [shape: bf16[4,32,2048], index: 0, kind: input, shape index: {}]   ;;  %s3810_s1 = inlined_call_operand.vmem [shape: bf16[4,2048,256], index: 1, kind: input, shape index: {}]   ;;  %s3811_s2 = inlined_call_operand.vmem [shape: bf16[4,32,256], index: 2, kind: output, shape index: {0}]   ;;  %s3812_s3 = inlined_call_operand.vmem [shape: f32[4,1,256], index: 3, kind: output, shape index: {1}]   ;;  %s3813_s4 = inlined_call_operand.vmem [shape: f32[4,1,256], index: 4, kind: output, shape index: {2}]  }
   0x1 LB: > { %s2634_s16 = sadd.s32 4294967295, %s3403_s15   ;;  %p2638_p0 = scmp.ge.s32.totalorder %s3403_s15, 1  ;;  %s3403_s15 = sphi %s3431_s15, %s15_s15  }
   0x2   : > { %p177_p1 = scmp.lt.s32.totalorder %s3403_s15, 5 }
   0x4   : > { %p178_p2 = pnand %p2638_p0, %p177_p1 }
   0x5   : > { %p216_p3 = scmp.lt.s32.totalorder (!%p178_p2), %s2634_s16, 3 }
   0x6   : > { %181 = sbr.rel (%p178_p2) target bundleno = 522 (0x20a), region = 28 }
   0xd   : > { %s3815_s16 = smov (!%p216_p3, %s2634_s16), 3 }
   0xe   : > { %s2942_s17 = sshll.u32 %s3815_s16, 11  ;;  %s2941_s21 = sshll.u32 %s3815_s16, 8 }
   0xf   : > { %s3445_s20 = scalar_lea.vmem %s3810_s1, %s2942_s17  ;;  %s3495_s24 = scalar_lea.vmem %s3809_s0, %s2941_s21 }
  0x10   : > { %v3013_v0 = vld [vmem:[%s3445_s20 + $0x4] ss:$8 sps:$4 sm:$0xff]   ;;  %v3017_v2 = vld [vmem:[%s3445_s20] ss:$8 sps:$4 sm:$0xff]   ;;  %v3019_v4 = vld [vmem:[%s3445_s20 + $0x14] ss:$8 sps:$4 sm:$0xff]  }
  0x11   : > { %v3015_v1 = vld [vmem:[%s3445_s20 + $0x404] ss:$8 sps:$4 sm:$0xff]   ;;  %1967 = vmatprep.subr.bf16.mxu1 %v3013_v0  ;;  %v3018_v3 = vld [vmem:[%s3445_s20 + $0x400] ss:$8 sps:$4 sm:$0xff]   ;;  %v3021_v5 = vld [vmem:[%s3445_s20 + $0x414] ss:$8 sps:$4 sm:$0xff]  }
  0x12   : > { %2179 = vmatprep.subr.bf16.mxu0 %v3015_v1  ;;  %1968 = vmatpush1.bf16.msra.mxu1 %v3017_v2  ;;  %v3023_v6 = vld [vmem:[%s3445_s20 + $0x10] ss:$8 sps:$4 sm:$0xff]   ;;  %v3025_v8 = vld [vmem:[%s3445_s20 + $0x24] ss:$8 sps:$4 sm:$0xff]   ;;  %v3029_v10 = vld [vmem:[%s3445_s20 + $0x20] ss:$8 sps:$4 sm:$0xff]  }
  0x13   : > { %2180 = vmatpush1.bf16.msra.mxu0 %v3018_v3  ;;  %1969 = vmatprep.subr.bf16.mxu1 %v3019_v4  ;;  %v3024_v7 = vld [vmem:[%s3445_s20 + $0x410] ss:$8 sps:$4 sm:$0xff]   ;;  %v3027_v9 = vld [vmem:[%s3445_s20 + $0x424] ss:$8 sps:$4 sm:$0xff]   ;;  %v3030_v11 = vld [vmem:[%s3445_s20 + $0x420] ss:$8 sps:$4 sm:$0xff]  }
  0x14   : > { %2181 = vmatprep.subr.bf16.mxu0 %v3021_v5  ;;  %v3031_v12 = vld [vmem:[%s3445_s20 + $0x34] ss:$8 sps:$4 sm:$0xff]   ;;  %v3035_v14 = vld [vmem:[%s3445_s20 + $0x30] ss:$8 sps:$4 sm:$0xff]   ;;  %v3037_v16 = vld [vmem:[%s3445_s20 + $0x44] ss:$8 sps:$4 sm:$0xff]  }
  0x15   : > { %v3033_v13 = vld [vmem:[%s3445_s20 + $0x434] ss:$8 sps:$4 sm:$0xff]   ;;  %v3036_v15 = vld [vmem:[%s3445_s20 + $0x430] ss:$8 sps:$4 sm:$0xff]   ;;  %v3039_v17 = vld [vmem:[%s3445_s20 + $0x444] ss:$8 sps:$4 sm:$0xff]  }
  0x16   : > { %1970 = vmatpush1.bf16.msra.mxu1 %v3023_v6  ;;  %v3041_v18 = vld [vmem:[%s3445_s20 + $0x40] ss:$8 sps:$4 sm:$0xff]   ;;  %v3043_v20 = vld [vmem:[%s3445_s20 + $0x54] ss:$8 sps:$4 sm:$0xff]   ;;  %v3047_v22 = vld [vmem:[%s3445_s20 + $0x50] ss:$8 sps:$4 sm:$0xff]  }
  0x17   : > { %2182 = vmatpush1.bf16.msra.mxu0 %v3024_v7  ;;  %1971 = vmatprep.subr.bf16.mxu1 %v3025_v8  ;;  %v3042_v19 = vld [vmem:[%s3445_s20 + $0x440] ss:$8 sps:$4 sm:$0xff]   ;;  %v3045_v21 = vld [vmem:[%s3445_s20 + $0x454] ss:$8 sps:$4 sm:$0xff]   ;;  %v3048_v23 = vld [vmem:[%s3445_s20 + $0x450] ss:$8 sps:$4 sm:$0xff]  }
  0x18   : > { %2183 = vmatprep.subr.bf16.mxu0 %v3027_v9  ;;  %v3049_v24 = vld [vmem:[%s3445_s20 + $0x64] ss:$8 sps:$4 sm:$0xff]   ;;  %v3053_v26 = vld [vmem:[%s3445_s20 + $0x60] ss:$8 sps:$4 sm:$0xff]   ;;  %v3055_v28 = vld [vmem:[%s3445_s20 + $0x74] ss:$8 sps:$4 sm:$0xff]  }
  0x19   : > { %v3051_v25 = vld [vmem:[%s3445_s20 + $0x464] ss:$8 sps:$4 sm:$0xff]   ;;  %v3054_v27 = vld [vmem:[%s3445_s20 + $0x460] ss:$8 sps:$4 sm:$0xff]   ;;  %v3057_v29 = vld [vmem:[%s3445_s20 + $0x474] ss:$8 sps:$4 sm:$0xff]  }
  0x1a   : > { %1972 = vmatpush1.bf16.msra.mxu1 %v3029_v10  ;;  %v3059_v30 = vld [vmem:[%s3445_s20 + $0x70] ss:$8 sps:$4 sm:$0xff]   ;;  %v3061_v32 = vld [vmem:[%s3445_s20 + $0x84] ss:$8 sps:$4 sm:$0xff]   ;;  %v3065_v34 = vld [vmem:[%s3445_s20 + $0x80] ss:$8 sps:$4 sm:$0xff]  }
  0x1b   : > { %2184 = vmatpush1.bf16.msra.mxu0 %v3030_v11  ;;  %1973 = vmatprep.subr.bf16.mxu1 %v3031_v12  ;;  %v3060_v31 = vld [vmem:[%s3445_s20 + $0x470] ss:$8 sps:$4 sm:$0xff]   ;;  %v3063_v33 = vld [vmem:[%s3445_s20 + $0x484] ss:$8 sps:$4 sm:$0xff]   ;;  %v3066_v35 = vld [vmem:[%s3445_s20 + $0x480] ss:$8 sps:$4 sm:$0xff]  }
  0x1c   : > { %2185 = vmatprep.subr.bf16.mxu0 %v3033_v13  ;;  %v3067_v36 = vld [vmem:[%s3445_s20 + $0x94] ss:$8 sps:$4 sm:$0xff]   ;;  %v3071_v38 = vld [vmem:[%s3445_s20 + $0x90] ss:$8 sps:$4 sm:$0xff]   ;;  %v3073_v40 = vld [vmem:[%s3445_s20 + $0xa4] ss:$8 sps:$4 sm:$0xff]  }
  0x1d   : > { %v3069_v37 = vld [vmem:[%s3445_s20 + $0x494] ss:$8 sps:$4 sm:$0xff]   ;;  %v3072_v39 = vld [vmem:[%s3445_s20 + $0x490] ss:$8 sps:$4 sm:$0xff]   ;;  %v3075_v41 = vld [vmem:[%s3445_s20 + $0x4a4] ss:$8 sps:$4 sm:$0xff]  }
  0x1e   : > { %1974 = vmatpush1.bf16.msra.mxu1 %v3035_v14  ;;  %v3077_v42 = vld [vmem:[%s3445_s20 + $0xa0] ss:$8 sps:$4 sm:$0xff]   ;;  %v3079_v44 = vld [vmem:[%s3445_s20 + $0xb4] ss:$8 sps:$4 sm:$0xff]   ;;  %v3083_v46 = vld [vmem:[%s3445_s20 + $0xb0] ss:$8 sps:$4 sm:$0xff]  }
  0x1f   : > { %2186 = vmatpush1.bf16.msra.mxu0 %v3036_v15  ;;  %1975 = vmatprep.subr.bf16.mxu1 %v3037_v16  ;;  %v3078_v43 = vld [vmem:[%s3445_s20 + $0x4a0] ss:$8 sps:$4 sm:$0xff]   ;;  %v3081_v45 = vld [vmem:[%s3445_s20 + $0x4b4] ss:$8 sps:$4 sm:$0xff]   ;;  %v3084_v47 = vld [vmem:[%s3445_s20 + $0x4b0] ss:$8 sps:$4 sm:$0xff]  }
  0x20   : > { %2187 = vmatprep.subr.bf16.mxu0 %v3039_v17  ;;  %v239_v48 = vld [vmem:[%s3495_s24] sm:$0xff]  ;;  %v3091_v58 = vld [vmem:[%s3445_s20 + $0xd4] ss:$8 sps:$4 sm:$0xff]   ;;  %v3095_v60 = vld [vmem:[%s3445_s20 + $0xd0] ss:$8 sps:$4 sm:$0xff]   ;;  %s2943_s25 = sshll.u32 %s3815_s16, 5 }
  0x21   : > { %v247_v49 = vld [vmem:[%s3495_s24 + $0x40] sm:$0xff]  ;;  %v3093_v59 = vld [vmem:[%s3445_s20 + $0x4d4] ss:$8 sps:$4 sm:$0xff]   ;;  %v3096_v61 = vld [vmem:[%s3445_s20 + $0x4d0] ss:$8 sps:$4 sm:$0xff]   ;;  %s3793_s28 = scalar_lea.vmem %s3811_s2, %s2943_s25  ;;  %s2645_s29 = sshll.u32 %s3815_s16, 1 }
  0x22   : > { %1976 = vmatpush1.bf16.msra.mxu1 %v3041_v18  ;;  %v3085_v50 = vld [vmem:[%s3445_s20 + $0xc4] ss:$8 sps:$4 sm:$0xff]   ;;  %v2648_v52 = vcombine.high %v239_v48, %v247_v49  ;;  %v3089_v56 = vld [vmem:[%s3445_s20 + $0xc0] ss:$8 sps:$4 sm:$0xff]   ;;  %v3103_v2 = vld [vmem:[%s3445_s20 + $0xf4] ss:$8 sps:$4 sm:$0xff]   ;;  %v2647_v8 = vcombine.low %v239_v48, %v247_v49  ;;  %s234_s6 = scalar_lea.vmem %s3812_s3, %s2645_s29  ;;  %s238_s9 = scalar_lea.vmem %s3813_s4, %s2645_s29 }
  0x23   : > { %2188 = vmatpush1.bf16.msra.mxu0 %v3042_v19  ;;  %1977 = vmatprep.subr.bf16.mxu1 %v3043_v20  ;;  %v3087_v51 = vld [vmem:[%s3445_s20 + $0x4c4] ss:$8 sps:$4 sm:$0xff]   ;;  %v3090_v57 = vld [vmem:[%s3445_s20 + $0x4c0] ss:$8 sps:$4 sm:$0xff]   ;;  %v3105_v3 = vld [vmem:[%s3445_s20 + $0x4f4] ss:$8 sps:$4 sm:$0xff]  }
  0x24   : > { %2189 = vmatprep.subr.bf16.mxu0 %v3045_v21  ;;  %v243_v53 = vld [vmem:[%s3495_s24 + $0x20] sm:$0xff]  ;;  %1999 = vmatprep.mubr.bf16.mxu1 %v2648_v52  ;;  %v3107_v4 = vld [vmem:[%s3445_s20 + $0xf0] ss:$8 sps:$4 sm:$0xff]   ;;  %v3117_v12 = vld [vmem:[%s3445_s20 + $0x114] ss:$8 sps:$4 sm:$0xff]  }
  0x25   : > { %v251_v54 = vld [vmem:[%s3495_s24 + $0x60] sm:$0xff]  ;;  %v3108_v5 = vld [vmem:[%s3445_s20 + $0x4f0] ss:$8 sps:$4 sm:$0xff]   ;;  %v3120_v13 = vld [vmem:[%s3445_s20 + $0x514] ss:$8 sps:$4 sm:$0xff]  }
  0x26   : > { %1978 = vmatpush1.bf16.msra.mxu1 %v3047_v22  ;;  %v2656_v55 = vcombine.high %v243_v53, %v251_v54  ;;  %v3097_v62 = vld [vmem:[%s3445_s20 + $0xe4] ss:$8 sps:$4 sm:$0xff]   ;;  %v3101_v0 = vld [vmem:[%s3445_s20 + $0xe0] ss:$8 sps:$4 sm:$0xff]   ;;  %v2655_v10 = vcombine.low %v243_v53, %v251_v54  ;;  %v3115_v14 = vld [vmem:[%s3445_s20 + $0x110] ss:$8 sps:$4 sm:$0xff]  }
  0x27   : > { %2190 = vmatpush1.bf16.msra.mxu0 %v3048_v23  ;;  %1979 = vmatprep.subr.bf16.mxu1 %v3049_v24  ;;  %v3099_v63 = vld [vmem:[%s3445_s20 + $0x4e4] ss:$8 sps:$4 sm:$0xff]   ;;  %v3102_v1 = vld [vmem:[%s3445_s20 + $0x4e0] ss:$8 sps:$4 sm:$0xff]   ;;  %v3118_v15 = vld [vmem:[%s3445_s20 + $0x510] ss:$8 sps:$4 sm:$0xff]  }
  0x28   : > { %2191 = vmatprep.subr.bf16.mxu0 %v3051_v25  ;;  %2211 = vmatprep.mubr.bf16.mxu0 %v2656_v55  ;;  %v3111_v6 = vld [vmem:[%s3445_s20 + $0x104] ss:$8 sps:$4 sm:$0xff]   ;;  %v3109_v9 = vld [vmem:[%s3445_s20 + $0x100] ss:$8 sps:$4 sm:$0xff]   ;;  %v3129_v20 = vld [vmem:[%s3445_s20 + $0x134] ss:$8 sps:$4 sm:$0xff]  }
  0x29   : > { %v3114_v7 = vld [vmem:[%s3445_s20 + $0x504] ss:$8 sps:$4 sm:$0xff]   ;;  %v3112_v11 = vld [vmem:[%s3445_s20 + $0x500] ss:$8 sps:$4 sm:$0xff]   ;;  %v3132_v21 = vld [vmem:[%s3445_s20 + $0x534] ss:$8 sps:$4 sm:$0xff]  }
  0x2a   : > { %1980 = vmatpush1.bf16.msra.mxu1 %v3053_v26  ;;  %v3123_v16 = vld [vmem:[%s3445_s20 + $0x124] ss:$8 sps:$4 sm:$0xff]   ;;  %v3121_v18 = vld [vmem:[%s3445_s20 + $0x120] ss:$8 sps:$4 sm:$0xff]   ;;  %v3127_v22 = vld [vmem:[%s3445_s20 + $0x130] ss:$8 sps:$4 sm:$0xff]  }
  0x2b   : > { %2192 = vmatpush1.bf16.msra.mxu0 %v3054_v27  ;;  %1981 = vmatprep.subr.bf16.mxu1 %v3055_v28  ;;  %v3126_v17 = vld [vmem:[%s3445_s20 + $0x524] ss:$8 sps:$4 sm:$0xff]   ;;  %v3124_v19 = vld [vmem:[%s3445_s20 + $0x520] ss:$8 sps:$4 sm:$0xff]   ;;  %v3130_v23 = vld [vmem:[%s3445_s20 + $0x530] ss:$8 sps:$4 sm:$0xff]  }
  0x2c   : > { %2193 = vmatprep.subr.bf16.mxu0 %v3057_v29  ;;  %v3135_v24 = vld [vmem:[%s3445_s20 + $0x144] ss:$8 sps:$4 sm:$0xff]   ;;  %v3133_v26 = vld [vmem:[%s3445_s20 + $0x140] ss:$8 sps:$4 sm:$0xff]   ;;  %v3141_v28 = vld [vmem:[%s3445_s20 + $0x154] ss:$8 sps:$4 sm:$0xff]  }
  0x2d   : > { %v3138_v25 = vld [vmem:[%s3445_s20 + $0x544] ss:$8 sps:$4 sm:$0xff]   ;;  %v3136_v27 = vld [vmem:[%s3445_s20 + $0x540] ss:$8 sps:$4 sm:$0xff]   ;;  %v3144_v29 = vld [vmem:[%s3445_s20 + $0x554] ss:$8 sps:$4 sm:$0xff]  }
  0x2e   : > { %1982 = vmatpush1.bf16.msra.mxu1 %v3059_v30  ;;  %v255_v30 = vld [vmem:[%s3495_s24 + $0x80] sm:$0xff]  ;;  %v3564_v49 = vld [vmem:[%s3495_s24 + $0x28] sm:$0xff]  ;;  %v3154_v52 = vld [vmem:[%s3445_s20 + $0x570] ss:$8 sps:$4 sm:$0xff]  }
  0x2f   : > { %2194 = vmatpush1.bf16.msra.mxu0 %v3060_v31  ;;  %1983 = vmatprep.subr.bf16.mxu1 %v3061_v32  ;;  %v263_v31 = vld [vmem:[%s3495_s24 + $0xc0] sm:$0xff]  ;;  %v3139_v32 = vld [vmem:[%s3445_s20 + $0x150] ss:$8 sps:$4 sm:$0xff]  }
  0x30   : > { %2195 = vmatprep.subr.bf16.mxu0 %v3063_v33  ;;  %v2664_v33 = vcombine.high %v255_v30, %v263_v31  ;;  %v3159_v54 = vld [vmem:[%s3445_s20 + $0x184] ss:$8 sps:$4 sm:$0xff]  }
  0x31   : > { %v3162_v55 = vld [vmem:[%s3445_s20 + $0x584] ss:$8 sps:$4 sm:$0xff]  }
  0x32   : > { %1984 = vmatpush1.bf16.msra.mxu1 %v3065_v34  ;;  %v3142_v34 = vld [vmem:[%s3445_s20 + $0x550] ss:$8 sps:$4 sm:$0xff]  }
  0x33   : > { %2196 = vmatpush1.bf16.msra.mxu0 %v3066_v35  ;;  %1985 = vmatprep.subr.bf16.mxu1 %v3067_v36  ;;  %v259_v35 = vld [vmem:[%s3495_s24 + $0xa0] sm:$0xff] }
  0x34   : > { %2197 = vmatprep.subr.bf16.mxu0 %v3069_v37  ;;  %v267_v36 = vld [vmem:[%s3495_s24 + $0xe0] sm:$0xff]  ;;  %v2663_v37 = vcombine.low %v255_v30, %v263_v31  ;;  %v3213_v30 = vld [vmem:[%s3445_s20 + $0x214] ss:$8 sps:$4 sm:$0xff]  }
  0x35   : > { %v3216_v31 = vld [vmem:[%s3445_s20 + $0x614] ss:$8 sps:$4 sm:$0xff]  }
  0x36   : > { %1986 = vmatpush1.bf16.msra.mxu1 %v3071_v38  ;;  %v3147_v38 = vld [vmem:[%s3445_s20 + $0x164] ss:$8 sps:$4 sm:$0xff]  }
  0x37   : > { %2198 = vmatpush1.bf16.msra.mxu0 %v3072_v39  ;;  %1987 = vmatprep.subr.bf16.mxu1 %v3073_v40  ;;  %v2672_v39 = vcombine.high %v259_v35, %v267_v36  ;;  %v2671_v40 = vcombine.low %v259_v35, %v267_v36  ;;  %v3211_v36 = vld [vmem:[%s3445_s20 + $0x210] ss:$8 sps:$4 sm:$0xff]  }
  0x38   : > { %2199 = vmatprep.subr.bf16.mxu0 %v3075_v41  ;;  %v3150_v41 = vld [vmem:[%s3445_s20 + $0x564] ss:$8 sps:$4 sm:$0xff]  }
  0x3a   : > { %1988 = vmatpush1.bf16.msra.mxu1 %v3077_v42  ;;  %v3145_v42 = vld [vmem:[%s3445_s20 + $0x160] ss:$8 sps:$4 sm:$0xff]  }
  0x3b   : > { %2200 = vmatpush1.bf16.msra.mxu0 %v3078_v43  ;;  %1989 = vmatprep.subr.bf16.mxu1 %v3079_v44  ;;  %v3148_v43 = vld [vmem:[%s3445_s20 + $0x560] ss:$8 sps:$4 sm:$0xff]  }
  0x3c   : > { %2201 = vmatprep.subr.bf16.mxu0 %v3081_v45  ;;  %v3554_v44 = vld [vmem:[%s3495_s24 + $0x8] sm:$0xff] }
  0x3d   : > { %v3557_v45 = vld [vmem:[%s3495_s24 + $0x48] sm:$0xff] }
  0x3e   : > { %1990 = vmatpush1.bf16.msra.mxu1 %v3083_v46  ;;  %v3153_v46 = vld [vmem:[%s3445_s20 + $0x174] ss:$8 sps:$4 sm:$0xff]   ;;  %v2650_v48 = vcombine.high %v3554_v44, %v3557_v45 }
  0x3f   : > { %2202 = vmatpush1.bf16.msra.mxu0 %v3084_v47  ;;  %1991 = vmatprep.subr.bf16.mxu1 %v3085_v50  ;;  %v3156_v47 = vld [vmem:[%s3445_s20 + $0x574] ss:$8 sps:$4 sm:$0xff]   ;;  %v3567_v50 = vld [vmem:[%s3495_s24 + $0x68] sm:$0xff] }
  0x40   : > { %2203 = vmatprep.subr.bf16.mxu0 %v3087_v51  ;;  %v3151_v51 = vld [vmem:[%s3445_s20 + $0x170] ss:$8 sps:$4 sm:$0xff]   ;;  %v2658_v53 = vcombine.high %v3564_v49, %v3567_v50 }
  0x42   : > { %1992 = vmatpush1.bf16.msra.mxu1 %v3089_v56  ;;  %v3157_v56 = vld [vmem:[%s3445_s20 + $0x180] ss:$8 sps:$4 sm:$0xff]  }
  0x43   : > { %2204 = vmatpush1.bf16.msra.mxu0 %v3090_v57  ;;  %1993 = vmatprep.subr.bf16.mxu1 %v3091_v58  ;;  %v3160_v57 = vld [vmem:[%s3445_s20 + $0x580] ss:$8 sps:$4 sm:$0xff]   ;;  %v3165_v58 = vld [vmem:[%s3445_s20 + $0x194] ss:$8 sps:$4 sm:$0xff]  }
  0x44   : > { %2205 = vmatprep.subr.bf16.mxu0 %v3093_v59  ;;  %v3168_v59 = vld [vmem:[%s3445_s20 + $0x594] ss:$8 sps:$4 sm:$0xff]  }
  0x46   : > { %1994 = vmatpush1.bf16.msra.mxu1 %v3095_v60  ;;  %v3163_v60 = vld [vmem:[%s3445_s20 + $0x190] ss:$8 sps:$4 sm:$0xff]  }
  0x47   : > { %2206 = vmatpush1.bf16.msra.mxu0 %v3096_v61  ;;  %1995 = vmatprep.subr.bf16.mxu1 %v3097_v62  ;;  %v3166_v61 = vld [vmem:[%s3445_s20 + $0x590] ss:$8 sps:$4 sm:$0xff]   ;;  %v3171_v62 = vld [vmem:[%s3445_s20 + $0x1a4] ss:$8 sps:$4 sm:$0xff]  }
  0x48   : > { %2207 = vmatprep.subr.bf16.mxu0 %v3099_v63  ;;  %v3174_v63 = vld [vmem:[%s3445_s20 + $0x5a4] ss:$8 sps:$4 sm:$0xff]  }
  0x4a   : > { %1996 = vmatpush1.bf16.msra.mxu1 %v3101_v0  ;;  %v3169_v0 = vld [vmem:[%s3445_s20 + $0x1a0] ss:$8 sps:$4 sm:$0xff]  }
  0x4b   : > { %2208 = vmatpush1.bf16.msra.mxu0 %v3102_v1  ;;  %1997 = vmatprep.subr.bf16.mxu1 %v3103_v2  ;;  %v3172_v1 = vld [vmem:[%s3445_s20 + $0x5a0] ss:$8 sps:$4 sm:$0xff]   ;;  %v3177_v2 = vld [vmem:[%s3445_s20 + $0x1b4] ss:$8 sps:$4 sm:$0xff]  }
  0x4c   : > { %2209 = vmatprep.subr.bf16.mxu0 %v3105_v3  ;;  %v3180_v3 = vld [vmem:[%s3445_s20 + $0x5b4] ss:$8 sps:$4 sm:$0xff]  }
  0x4e   : > { %1998 = vmatpush1.bf16.msra.mxu1 %v3107_v4  ;;  %v3175_v4 = vld [vmem:[%s3445_s20 + $0x1b0] ss:$8 sps:$4 sm:$0xff]  }
  0x4f   : > { %2210 = vmatpush1.bf16.msra.mxu0 %v3108_v5  ;;  %2020 = vmatprep.subr.bf16.mxu1 %v3111_v6  ;;  %v3178_v5 = vld [vmem:[%s3445_s20 + $0x5b0] ss:$8 sps:$4 sm:$0xff]   ;;  %v3183_v6 = vld [vmem:[%s3445_s20 + $0x1c4] ss:$8 sps:$4 sm:$0xff]  }
  0x50   : > { %2232 = vmatprep.subr.bf16.mxu0 %v3114_v7  ;;  %v3186_v7 = vld [vmem:[%s3445_s20 + $0x5c4] ss:$8 sps:$4 sm:$0xff]  }
  0x51   : > { %2000 = vmatmul.mubr.bf16.vlgmr.msra.gmra.mrb[0].mxu1 %v2647_v8  ;;  %v3181_v8 = vld [vmem:[%s3445_s20 + $0x1c0] ss:$8 sps:$4 sm:$0xff]  }
  0x52   : > { %2212 = vmatmul.mubr.bf16.vlgmr.msra.gmra.mrb[0].mxu0 %v2655_v10  ;;  %2021 = vmatpush1.bf16.msra.mxu1 %v3109_v9  ;;  %v3184_v9 = vld [vmem:[%s3445_s20 + $0x5c0] ss:$8 sps:$4 sm:$0xff]   ;;  %v3189_v10 = vld [vmem:[%s3445_s20 + $0x1d4] ss:$8 sps:$4 sm:$0xff]  }
  0x53   : > { %2233 = vmatpush1.bf16.msra.mxu0 %v3112_v11  ;;  %2022 = vmatprep.subr.bf16.mxu1 %v3117_v12  ;;  %v3192_v11 = vld [vmem:[%s3445_s20 + $0x5d4] ss:$8 sps:$4 sm:$0xff]   ;;  %v3187_v12 = vld [vmem:[%s3445_s20 + $0x1d0] ss:$8 sps:$4 sm:$0xff]  }
  0x54   : > { %2234 = vmatprep.subr.bf16.mxu0 %v3120_v13  ;;  %2009 = vmatprep.mubr.bf16.mxu1 %v2664_v33  ;;  %v3190_v13 = vld [vmem:[%s3445_s20 + $0x5d0] ss:$8 sps:$4 sm:$0xff]   ;;  %v268_v33 = vld [vmem:[%s3495_s24 + $0xe8] sm:$0xff] }
  0x55   : > { %2221 = vmatprep.mubr.bf16.mxu0 %v2672_v39  ;;  %v3222_v39 = vld [vmem:[%s3445_s20 + $0x624] ss:$8 sps:$4 sm:$0xff]  }
  0x56   : > { %2023 = vmatpush1.bf16.msra.mxu1 %v3115_v14  ;;  %v3195_v14 = vld [vmem:[%s3445_s20 + $0x1e4] ss:$8 sps:$4 sm:$0xff]  }
  0x57   : > { %2235 = vmatpush1.bf16.msra.mxu0 %v3118_v15  ;;  %2024 = vmatprep.subr.bf16.mxu1 %v3123_v16  ;;  %v3198_v15 = vld [vmem:[%s3445_s20 + $0x5e4] ss:$8 sps:$4 sm:$0xff]   ;;  %v3193_v16 = vld [vmem:[%s3445_s20 + $0x1e0] ss:$8 sps:$4 sm:$0xff]  }
  0x58   : > { %2236 = vmatprep.subr.bf16.mxu0 %v3126_v17  ;;  %v3196_v17 = vld [vmem:[%s3445_s20 + $0x5e0] ss:$8 sps:$4 sm:$0xff]  }
  0x59   : > { %2010 = vmatmul.mubr.bf16.gmra.mrb[4].mxu1 %v2663_v37  ;;  %v3214_v37 = vld [vmem:[%s3445_s20 + $0x610] ss:$8 sps:$4 sm:$0xff]  }
  0x5a   : > { %2025 = vmatpush1.bf16.msra.mxu1 %v3121_v18  ;;  %2222 = vmatmul.mubr.bf16.gmra.mrb[4].mxu0 %v2671_v40  ;;  %v3201_v18 = vld [vmem:[%s3445_s20 + $0x1f4] ss:$8 sps:$4 sm:$0xff]   ;;  %v3217_v40 = vld [vmem:[%s3445_s20 + $0x220] ss:$8 sps:$4 sm:$0xff]  }
  0x5b   : > { %2237 = vmatpush1.bf16.msra.mxu0 %v3124_v19  ;;  %2026 = vmatprep.subr.bf16.mxu1 %v3129_v20  ;;  %v3204_v19 = vld [vmem:[%s3445_s20 + $0x5f4] ss:$8 sps:$4 sm:$0xff]   ;;  %v3199_v20 = vld [vmem:[%s3445_s20 + $0x1f0] ss:$8 sps:$4 sm:$0xff]  }
  0x5c   : > { %2238 = vmatprep.subr.bf16.mxu0 %v3132_v21  ;;  %2052 = vmatprep.mubr.bf16.mxu1 %v2650_v48  ;;  %v3202_v21 = vld [vmem:[%s3445_s20 + $0x5f0] ss:$8 sps:$4 sm:$0xff]   ;;  %v3225_v48 = vld [vmem:[%s3445_s20 + $0x234] ss:$8 sps:$4 sm:$0xff]  }
  0x5d   : > { %2264 = vmatprep.mubr.bf16.mxu0 %v2658_v53  ;;  %v3226_v53 = vld [vmem:[%s3445_s20 + $0x630] ss:$8 sps:$4 sm:$0xff]  }
  0x5e   : > { %2027 = vmatpush1.bf16.msra.mxu1 %v3127_v22  ;;  %v3207_v22 = vld [vmem:[%s3445_s20 + $0x204] ss:$8 sps:$4 sm:$0xff]  }
  0x5f   : > { %2239 = vmatpush1.bf16.msra.mxu0 %v3130_v23  ;;  %2028 = vmatprep.subr.bf16.mxu1 %v3135_v24  ;;  %v3210_v23 = vld [vmem:[%s3445_s20 + $0x604] ss:$8 sps:$4 sm:$0xff]   ;;  %v3205_v24 = vld [vmem:[%s3445_s20 + $0x200] ss:$8 sps:$4 sm:$0xff]  }
  0x60   : > { %2240 = vmatprep.subr.bf16.mxu0 %v3138_v25  ;;  %v3208_v25 = vld [vmem:[%s3445_s20 + $0x600] ss:$8 sps:$4 sm:$0xff]  }
  0x62   : > { %2029 = vmatpush1.bf16.msra.mxu1 %v3133_v26  ;;  %v256_v26 = vld [vmem:[%s3495_s24 + $0x88] sm:$0xff] }
  0x63   : > { %2241 = vmatpush1.bf16.msra.mxu0 %v3136_v27  ;;  %2030 = vmatprep.subr.bf16.mxu1 %v3141_v28  ;;  %v2649_v27 = vcombine.low %v3554_v44, %v3557_v45  ;;  %v2657_v28 = vcombine.low %v3564_v49, %v3567_v50  ;;  %v3629_v45 = vld [vmem:[%s3495_s24 + $0x50] sm:$0xff] }
  0x64   : > { %2242 = vmatprep.subr.bf16.mxu0 %v3144_v29  ;;  %v264_v29 = vld [vmem:[%s3495_s24 + $0xc8] sm:$0xff]  ;;  %v3228_v49 = vld [vmem:[%s3445_s20 + $0x634] ss:$8 sps:$4 sm:$0xff]  }
  0x66   : > { %2031 = vmatpush1.bf16.msra.mxu1 %v3139_v32  ;;  %v260_v32 = vld [vmem:[%s3495_s24 + $0xa8] sm:$0xff] }
  0x67   : > { %2243 = vmatpush1.bf16.msra.mxu0 %v3142_v34  ;;  %2032 = vmatprep.subr.bf16.mxu1 %v3147_v38  ;;  %v2666_v34 = vcombine.high %v256_v26, %v264_v29  ;;  %v2674_v35 = vcombine.high %v260_v32, %v268_v33  ;;  %v3219_v38 = vld [vmem:[%s3445_s20 + $0x224] ss:$8 sps:$4 sm:$0xff]   ;;  %v2673_v44 = vcombine.low %v260_v32, %v268_v33  ;;  %v3289_v32 = vld [vmem:[%s3445_s20 + $0x2e0] ss:$8 sps:$4 sm:$0xff]  }
  0x68   : > { %2244 = vmatprep.subr.bf16.mxu0 %v3150_v41  ;;  %v3220_v41 = vld [vmem:[%s3445_s20 + $0x620] ss:$8 sps:$4 sm:$0xff]  }
  0x69   : > { %v3292_v33 = vld [vmem:[%s3445_s20 + $0x6e0] ss:$8 sps:$4 sm:$0xff]  }
  0x6a   : > { %2033 = vmatpush1.bf16.msra.mxu1 %v3145_v42  ;;  %v3626_v42 = vld [vmem:[%s3495_s24 + $0x10] sm:$0xff] }
  0x6b   : > { %2245 = vmatpush1.bf16.msra.mxu0 %v3148_v43  ;;  %2034 = vmatprep.subr.bf16.mxu1 %v3153_v46  ;;  %v2665_v43 = vcombine.low %v256_v26, %v264_v29  ;;  %v3632_v46 = vld [vmem:[%s3495_s24 + $0x30] sm:$0xff]  ;;  %v2652_v50 = vcombine.high %v3626_v42, %v3629_v45 }
  0x6c   : > { %2246 = vmatprep.subr.bf16.mxu0 %v3156_v47  ;;  %v3635_v47 = vld [vmem:[%s3495_s24 + $0x70] sm:$0xff] }
  0x6d   : > { %v3285_v26 = vld [vmem:[%s3445_s20 + $0x2d4] ss:$8 sps:$4 sm:$0xff]   ;;  %v3286_v29 = vld [vmem:[%s3445_s20 + $0x6d0] ss:$8 sps:$4 sm:$0xff]  }
  0x6e   : > { %2035 = vmatpush1.bf16.msra.mxu1 %v3151_v51  ;;  %v2660_v51 = vcombine.high %v3632_v46, %v3635_v47 }
  0x6f   : > { %2247 = vmatpush1.bf16.msra.mxu0 %v3154_v52  ;;  %2036 = vmatprep.subr.bf16.mxu1 %v3159_v54  ;;  %v3223_v52 = vld [vmem:[%s3445_s20 + $0x230] ss:$8 sps:$4 sm:$0xff]   ;;  %v3231_v54 = vld [vmem:[%s3445_s20 + $0x244] ss:$8 sps:$4 sm:$0xff]  }
  0x70   : > { %2248 = vmatprep.subr.bf16.mxu0 %v3162_v55  ;;  %v3234_v55 = vld [vmem:[%s3445_s20 + $0x644] ss:$8 sps:$4 sm:$0xff]  }
  0x72   : > { %2037 = vmatpush1.bf16.msra.mxu1 %v3157_v56  ;;  %v3229_v56 = vld [vmem:[%s3445_s20 + $0x240] ss:$8 sps:$4 sm:$0xff]  }
  0x73   : > { %2249 = vmatpush1.bf16.msra.mxu0 %v3160_v57  ;;  %2038 = vmatprep.subr.bf16.mxu1 %v3165_v58  ;;  %v3232_v57 = vld [vmem:[%s3445_s20 + $0x640] ss:$8 sps:$4 sm:$0xff]   ;;  %v3237_v58 = vld [vmem:[%s3445_s20 + $0x254] ss:$8 sps:$4 sm:$0xff]  }
  0x74   : > { %2250 = vmatprep.subr.bf16.mxu0 %v3168_v59  ;;  %v3240_v59 = vld [vmem:[%s3445_s20 + $0x654] ss:$8 sps:$4 sm:$0xff]  }
  0x76   : > { %2039 = vmatpush1.bf16.msra.mxu1 %v3163_v60  ;;  %v3235_v60 = vld [vmem:[%s3445_s20 + $0x250] ss:$8 sps:$4 sm:$0xff]  }
  0x77   : > { %2251 = vmatpush1.bf16.msra.mxu0 %v3166_v61  ;;  %2040 = vmatprep.subr.bf16.mxu1 %v3171_v62  ;;  %v3238_v61 = vld [vmem:[%s3445_s20 + $0x650] ss:$8 sps:$4 sm:$0xff]   ;;  %v3243_v62 = vld [vmem:[%s3445_s20 + $0x264] ss:$8 sps:$4 sm:$0xff]  }
  0x78   : > { %2252 = vmatprep.subr.bf16.mxu0 %v3174_v63  ;;  %v3246_v63 = vld [vmem:[%s3445_s20 + $0x664] ss:$8 sps:$4 sm:$0xff]  }
  0x7a   : > { %2041 = vmatpush1.bf16.msra.mxu1 %v3169_v0  ;;  %v3241_v0 = vld [vmem:[%s3445_s20 + $0x260] ss:$8 sps:$4 sm:$0xff]  }
  0x7b   : > { %2253 = vmatpush1.bf16.msra.mxu0 %v3172_v1  ;;  %2042 = vmatprep.subr.bf16.mxu1 %v3177_v2  ;;  %v3244_v1 = vld [vmem:[%s3445_s20 + $0x660] ss:$8 sps:$4 sm:$0xff]   ;;  %v3249_v2 = vld [vmem:[%s3445_s20 + $0x274] ss:$8 sps:$4 sm:$0xff]  }
  0x7c   : > { %2254 = vmatprep.subr.bf16.mxu0 %v3180_v3  ;;  %v3252_v3 = vld [vmem:[%s3445_s20 + $0x674] ss:$8 sps:$4 sm:$0xff]  }
  0x7e   : > { %2043 = vmatpush1.bf16.msra.mxu1 %v3175_v4  ;;  %v3247_v4 = vld [vmem:[%s3445_s20 + $0x270] ss:$8 sps:$4 sm:$0xff]  }
  0x7f   : > { %2255 = vmatpush1.bf16.msra.mxu0 %v3178_v5  ;;  %2044 = vmatprep.subr.bf16.mxu1 %v3183_v6  ;;  %v3250_v5 = vld [vmem:[%s3445_s20 + $0x670] ss:$8 sps:$4 sm:$0xff]   ;;  %v3255_v6 = vld [vmem:[%s3445_s20 + $0x284] ss:$8 sps:$4 sm:$0xff]  }
  0x80   : > { %2256 = vmatprep.subr.bf16.mxu0 %v3186_v7  ;;  %v3258_v7 = vld [vmem:[%s3445_s20 + $0x684] ss:$8 sps:$4 sm:$0xff]  }
  0x82   : > { %2045 = vmatpush1.bf16.msra.mxu1 %v3181_v8  ;;  %v3253_v8 = vld [vmem:[%s3445_s20 + $0x280] ss:$8 sps:$4 sm:$0xff]  }
  0x83   : > { %2257 = vmatpush1.bf16.msra.mxu0 %v3184_v9  ;;  %2046 = vmatprep.subr.bf16.mxu1 %v3189_v10  ;;  %v3256_v9 = vld [vmem:[%s3445_s20 + $0x680] ss:$8 sps:$4 sm:$0xff]   ;;  %v3261_v10 = vld [vmem:[%s3445_s20 + $0x294] ss:$8 sps:$4 sm:$0xff]  }
  0x84   : > { %2258 = vmatprep.subr.bf16.mxu0 %v3192_v11  ;;  %v3264_v11 = vld [vmem:[%s3445_s20 + $0x694] ss:$8 sps:$4 sm:$0xff]  }
  0x86   : > { %2047 = vmatpush1.bf16.msra.mxu1 %v3187_v12  ;;  %v3259_v12 = vld [vmem:[%s3445_s20 + $0x290] ss:$8 sps:$4 sm:$0xff]  }
  0x87   : > { %2259 = vmatpush1.bf16.msra.mxu0 %v3190_v13  ;;  %2048 = vmatprep.subr.bf16.mxu1 %v3195_v14  ;;  %v3262_v13 = vld [vmem:[%s3445_s20 + $0x690] ss:$8 sps:$4 sm:$0xff]   ;;  %v3267_v14 = vld [vmem:[%s3445_s20 + $0x2a4] ss:$8 sps:$4 sm:$0xff]  }
  0x88   : > { %2260 = vmatprep.subr.bf16.mxu0 %v3198_v15  ;;  %v3270_v15 = vld [vmem:[%s3445_s20 + $0x6a4] ss:$8 sps:$4 sm:$0xff]  }
  0x8a   : > { %2049 = vmatpush1.bf16.msra.mxu1 %v3193_v16  ;;  %v3265_v16 = vld [vmem:[%s3445_s20 + $0x2a0] ss:$8 sps:$4 sm:$0xff]  }
  0x8b   : > { %2261 = vmatpush1.bf16.msra.mxu0 %v3196_v17  ;;  %2050 = vmatprep.subr.bf16.mxu1 %v3201_v18  ;;  %v3268_v17 = vld [vmem:[%s3445_s20 + $0x6a0] ss:$8 sps:$4 sm:$0xff]   ;;  %v3273_v18 = vld [vmem:[%s3445_s20 + $0x2b4] ss:$8 sps:$4 sm:$0xff]  }
  0x8c   : > { %2262 = vmatprep.subr.bf16.mxu0 %v3204_v19  ;;  %v3276_v19 = vld [vmem:[%s3445_s20 + $0x6b4] ss:$8 sps:$4 sm:$0xff]  }
  0x8e   : > { %2051 = vmatpush1.bf16.msra.mxu1 %v3199_v20  ;;  %v3271_v20 = vld [vmem:[%s3445_s20 + $0x2b0] ss:$8 sps:$4 sm:$0xff]  }
  0x8f   : > { %2263 = vmatpush1.bf16.msra.mxu0 %v3202_v21  ;;  %2073 = vmatprep.subr.bf16.mxu1 %v3207_v22  ;;  %v3274_v21 = vld [vmem:[%s3445_s20 + $0x6b0] ss:$8 sps:$4 sm:$0xff]   ;;  %v3279_v22 = vld [vmem:[%s3445_s20 + $0x2c4] ss:$8 sps:$4 sm:$0xff]  }
  0x90   : > { %2285 = vmatprep.subr.bf16.mxu0 %v3210_v23  ;;  %v3282_v23 = vld [vmem:[%s3445_s20 + $0x6c4] ss:$8 sps:$4 sm:$0xff]  }
  0x91   : > { %2053 = vmatmul.mubr.bf16.vlgmr.msra.gmra.mrb[0].mxu1 %v2649_v27  ;;  %v3288_v27 = vld [vmem:[%s3445_s20 + $0x6d4] ss:$8 sps:$4 sm:$0xff]  }
  0x92   : > { %2265 = vmatmul.mubr.bf16.vlgmr.msra.gmra.mrb[0].mxu0 %v2657_v28  ;;  %2074 = vmatpush1.bf16.msra.mxu1 %v3205_v24  ;;  %v3277_v24 = vld [vmem:[%s3445_s20 + $0x2c0] ss:$8 sps:$4 sm:$0xff]   ;;  %v3283_v28 = vld [vmem:[%s3445_s20 + $0x2d0] ss:$8 sps:$4 sm:$0xff]  }
  0x93   : > { %2286 = vmatpush1.bf16.msra.mxu0 %v3208_v25  ;;  %2075 = vmatprep.subr.bf16.mxu1 %v3213_v30  ;;  %v3280_v25 = vld [vmem:[%s3445_s20 + $0x6c0] ss:$8 sps:$4 sm:$0xff]   ;;  %v3291_v30 = vld [vmem:[%s3445_s20 + $0x2e4] ss:$8 sps:$4 sm:$0xff]  }
  0x94   : > { %2287 = vmatprep.subr.bf16.mxu0 %v3216_v31  ;;  %2062 = vmatprep.mubr.bf16.mxu1 %v2666_v34  ;;  %v3294_v31 = vld [vmem:[%s3445_s20 + $0x6e4] ss:$8 sps:$4 sm:$0xff]   ;;  %v3297_v34 = vld [vmem:[%s3445_s20 + $0x2f4] ss:$8 sps:$4 sm:$0xff]  }
  0x95   : > { %2274 = vmatprep.mubr.bf16.mxu0 %v2674_v35  ;;  %v3300_v35 = vld [vmem:[%s3445_s20 + $0x6f4] ss:$8 sps:$4 sm:$0xff]  }
  0x96   : > { %2076 = vmatpush1.bf16.msra.mxu1 %v3211_v36  ;;  %v3295_v36 = vld [vmem:[%s3445_s20 + $0x2f0] ss:$8 sps:$4 sm:$0xff]  }
  0x97   : > { %2288 = vmatpush1.bf16.msra.mxu0 %v3214_v37  ;;  %2077 = vmatprep.subr.bf16.mxu1 %v3219_v38  ;;  %v3298_v37 = vld [vmem:[%s3445_s20 + $0x6f0] ss:$8 sps:$4 sm:$0xff]   ;;  %v3303_v38 = vld [vmem:[%s3445_s20 + $0x304] ss:$8 sps:$4 sm:$0xff]  }
  0x98   : > { %2289 = vmatprep.subr.bf16.mxu0 %v3222_v39  ;;  %v3306_v39 = vld [vmem:[%s3445_s20 + $0x704] ss:$8 sps:$4 sm:$0xff]  }
  0x99   : > { %2063 = vmatmul.mubr.bf16.gmra.mrb[4].mxu1 %v2665_v43  ;;  %v2659_v43 = vcombine.low %v3632_v46, %v3635_v47  ;;  %v3307_v46 = vld [vmem:[%s3445_s20 + $0x310] ss:$8 sps:$4 sm:$0xff]  }
  0x9a   : > { %2275 = vmatmul.mubr.bf16.gmra.mrb[4].mxu0 %v2673_v44  ;;  %2078 = vmatpush1.bf16.msra.mxu1 %v3217_v40  ;;  %v257_v40 = vld [vmem:[%s3495_s24 + $0x90] sm:$0xff] }
  0x9b   : > { %2290 = vmatpush1.bf16.msra.mxu0 %v3220_v41  ;;  %2079 = vmatprep.subr.bf16.mxu1 %v3225_v48  ;;  %v2651_v41 = vcombine.low %v3626_v42, %v3629_v45  ;;  %v265_v44 = vld [vmem:[%s3495_s24 + $0xd0] sm:$0xff] }
  0x9c   : > { %2291 = vmatprep.subr.bf16.mxu0 %v3228_v49  ;;  %2105 = vmatprep.mubr.bf16.mxu1 %v2652_v50  ;;  %v261_v48 = vld [vmem:[%s3495_s24 + $0xb0] sm:$0xff]  ;;  %v3301_v50 = vld [vmem:[%s3445_s20 + $0x300] ss:$8 sps:$4 sm:$0xff]   ;;  %v2668_v42 = vcombine.high %v257_v40, %v265_v44 }
  0x9d   : > { %2317 = vmatprep.mubr.bf16.mxu0 %v2660_v51  ;;  %v269_v49 = vld [vmem:[%s3495_s24 + $0xf0] sm:$0xff]  ;;  %v3304_v51 = vld [vmem:[%s3445_s20 + $0x700] ss:$8 sps:$4 sm:$0xff]  }
  0x9e   : > { %2080 = vmatpush1.bf16.msra.mxu1 %v3223_v52  ;;  %v3309_v52 = vld [vmem:[%s3445_s20 + $0x314] ss:$8 sps:$4 sm:$0xff]   ;;  %v2676_v45 = vcombine.high %v261_v48, %v269_v49  ;;  %v3310_v47 = vld [vmem:[%s3445_s20 + $0x710] ss:$8 sps:$4 sm:$0xff]  }
  0x9f   : > { %2292 = vmatpush1.bf16.msra.mxu0 %v3226_v53  ;;  %2081 = vmatprep.subr.bf16.mxu1 %v3231_v54  ;;  %v3312_v53 = vld [vmem:[%s3445_s20 + $0x714] ss:$8 sps:$4 sm:$0xff]   ;;  %v3315_v54 = vld [vmem:[%s3445_s20 + $0x324] ss:$8 sps:$4 sm:$0xff]  }
  0xa0   : > { %2293 = vmatprep.subr.bf16.mxu0 %v3234_v55  ;;  %v3318_v55 = vld [vmem:[%s3445_s20 + $0x724] ss:$8 sps:$4 sm:$0xff]  }
  0xa2   : > { %2082 = vmatpush1.bf16.msra.mxu1 %v3229_v56  ;;  %v3712_v56 = vld [vmem:[%s3495_s24 + $0x18] sm:$0xff] }
  0xa3   : > { %2294 = vmatpush1.bf16.msra.mxu0 %v3232_v57  ;;  %2083 = vmatprep.subr.bf16.mxu1 %v3237_v58  ;;  %v2667_v57 = vcombine.low %v257_v40, %v265_v44  ;;  %v2675_v58 = vcombine.low %v261_v48, %v269_v49  ;;  %v3373_v40 = vld [vmem:[%s3445_s20 + $0x3c0] ss:$8 sps:$4 sm:$0xff]   ;;  %v3384_v44 = vld [vmem:[%s3445_s20 + $0x7d4] ss:$8 sps:$4 sm:$0xff]   ;;  %v3379_v48 = vld [vmem:[%s3445_s20 + $0x3d0] ss:$8 sps:$4 sm:$0xff]  }
  0xa4   : > { %2295 = vmatprep.subr.bf16.mxu0 %v3240_v59  ;;  %v3715_v59 = vld [vmem:[%s3495_s24 + $0x58] sm:$0xff] }
  0xa5   : > { %v3382_v49 = vld [vmem:[%s3445_s20 + $0x7d0] ss:$8 sps:$4 sm:$0xff]  }
  0xa6   : > { %2084 = vmatpush1.bf16.msra.mxu1 %v3235_v60  ;;  %v3718_v60 = vld [vmem:[%s3495_s24 + $0x38] sm:$0xff] }
  0xa7   : > { %2296 = vmatpush1.bf16.msra.mxu0 %v3238_v61  ;;  %2085 = vmatprep.subr.bf16.mxu1 %v3243_v62  ;;  %v3721_v61 = vld [vmem:[%s3495_s24 + $0x78] sm:$0xff]  ;;  %v3313_v62 = vld [vmem:[%s3445_s20 + $0x320] ss:$8 sps:$4 sm:$0xff]  }
  0xa8   : > { %2297 = vmatprep.subr.bf16.mxu0 %v3246_v63  ;;  %v3316_v63 = vld [vmem:[%s3445_s20 + $0x720] ss:$8 sps:$4 sm:$0xff]  }
  0xaa   : > { %2086 = vmatpush1.bf16.msra.mxu1 %v3241_v0  ;;  %v3321_v0 = vld [vmem:[%s3445_s20 + $0x334] ss:$8 sps:$4 sm:$0xff]  }
  0xab   : > { %2298 = vmatpush1.bf16.msra.mxu0 %v3244_v1  ;;  %2087 = vmatprep.subr.bf16.mxu1 %v3249_v2  ;;  %v3324_v1 = vld [vmem:[%s3445_s20 + $0x734] ss:$8 sps:$4 sm:$0xff]   ;;  %v2654_v2 = vcombine.high %v3712_v56, %v3715_v59 }
  0xac   : > { %2299 = vmatprep.subr.bf16.mxu0 %v3252_v3  ;;  %v2662_v3 = vcombine.high %v3718_v60, %v3721_v61 }
  0xae   : > { %2088 = vmatpush1.bf16.msra.mxu1 %v3247_v4  ;;  %v3319_v4 = vld [vmem:[%s3445_s20 + $0x330] ss:$8 sps:$4 sm:$0xff]  }
  0xaf   : > { %2300 = vmatpush1.bf16.msra.mxu0 %v3250_v5  ;;  %2089 = vmatprep.subr.bf16.mxu1 %v3255_v6  ;;  %v3322_v5 = vld [vmem:[%s3445_s20 + $0x730] ss:$8 sps:$4 sm:$0xff]   ;;  %v3327_v6 = vld [vmem:[%s3445_s20 + $0x344] ss:$8 sps:$4 sm:$0xff]  }
  0xb0   : > { %2301 = vmatprep.subr.bf16.mxu0 %v3258_v7  ;;  %v3330_v7 = vld [vmem:[%s3445_s20 + $0x744] ss:$8 sps:$4 sm:$0xff]  }
  0xb2   : > { %2090 = vmatpush1.bf16.msra.mxu1 %v3253_v8  ;;  %v3325_v8 = vld [vmem:[%s3445_s20 + $0x340] ss:$8 sps:$4 sm:$0xff]  }
  0xb3   : > { %2302 = vmatpush1.bf16.msra.mxu0 %v3256_v9  ;;  %2091 = vmatprep.subr.bf16.mxu1 %v3261_v10  ;;  %v3328_v9 = vld [vmem:[%s3445_s20 + $0x740] ss:$8 sps:$4 sm:$0xff]   ;;  %v3333_v10 = vld [vmem:[%s3445_s20 + $0x354] ss:$8 sps:$4 sm:$0xff]  }
  0xb4   : > { %2303 = vmatprep.subr.bf16.mxu0 %v3264_v11  ;;  %v3336_v11 = vld [vmem:[%s3445_s20 + $0x754] ss:$8 sps:$4 sm:$0xff]  }
  0xb6   : > { %2092 = vmatpush1.bf16.msra.mxu1 %v3259_v12  ;;  %v3331_v12 = vld [vmem:[%s3445_s20 + $0x350] ss:$8 sps:$4 sm:$0xff]  }
  0xb7   : > { %2304 = vmatpush1.bf16.msra.mxu0 %v3262_v13  ;;  %2093 = vmatprep.subr.bf16.mxu1 %v3267_v14  ;;  %v3334_v13 = vld [vmem:[%s3445_s20 + $0x750] ss:$8 sps:$4 sm:$0xff]   ;;  %v3339_v14 = vld [vmem:[%s3445_s20 + $0x364] ss:$8 sps:$4 sm:$0xff]  }
  0xb8   : > { %2305 = vmatprep.subr.bf16.mxu0 %v3270_v15  ;;  %v3342_v15 = vld [vmem:[%s3445_s20 + $0x764] ss:$8 sps:$4 sm:$0xff]  }
  0xba   : > { %2094 = vmatpush1.bf16.msra.mxu1 %v3265_v16  ;;  %v3337_v16 = vld [vmem:[%s3445_s20 + $0x360] ss:$8 sps:$4 sm:$0xff]  }
  0xbb   : > { %2306 = vmatpush1.bf16.msra.mxu0 %v3268_v17  ;;  %2095 = vmatprep.subr.bf16.mxu1 %v3273_v18  ;;  %v3340_v17 = vld [vmem:[%s3445_s20 + $0x760] ss:$8 sps:$4 sm:$0xff]   ;;  %v3345_v18 = vld [vmem:[%s3445_s20 + $0x374] ss:$8 sps:$4 sm:$0xff]  }
  0xbc   : > { %2307 = vmatprep.subr.bf16.mxu0 %v3276_v19  ;;  %v3348_v19 = vld [vmem:[%s3445_s20 + $0x774] ss:$8 sps:$4 sm:$0xff]  }
  0xbe   : > { %2096 = vmatpush1.bf16.msra.mxu1 %v3271_v20  ;;  %v3343_v20 = vld [vmem:[%s3445_s20 + $0x370] ss:$8 sps:$4 sm:$0xff]  }
  0xbf   : > { %2308 = vmatpush1.bf16.msra.mxu0 %v3274_v21  ;;  %2097 = vmatprep.subr.bf16.mxu1 %v3279_v22  ;;  %v3346_v21 = vld [vmem:[%s3445_s20 + $0x770] ss:$8 sps:$4 sm:$0xff]   ;;  %v3351_v22 = vld [vmem:[%s3445_s20 + $0x384] ss:$8 sps:$4 sm:$0xff]  }
  0xc0   : > { %2309 = vmatprep.subr.bf16.mxu0 %v3282_v23  ;;  %v3354_v23 = vld [vmem:[%s3445_s20 + $0x784] ss:$8 sps:$4 sm:$0xff]  }
  0xc2   : > { %2098 = vmatpush1.bf16.msra.mxu1 %v3277_v24  ;;  %v3349_v24 = vld [vmem:[%s3445_s20 + $0x380] ss:$8 sps:$4 sm:$0xff]  }
  0xc3   : > { %2310 = vmatpush1.bf16.msra.mxu0 %v3280_v25  ;;  %2099 = vmatprep.subr.bf16.mxu1 %v3285_v26  ;;  %v3352_v25 = vld [vmem:[%s3445_s20 + $0x780] ss:$8 sps:$4 sm:$0xff]   ;;  %v3357_v26 = vld [vmem:[%s3445_s20 + $0x394] ss:$8 sps:$4 sm:$0xff]  }
  0xc4   : > { %2311 = vmatprep.subr.bf16.mxu0 %v3288_v27  ;;  %v3360_v27 = vld [vmem:[%s3445_s20 + $0x794] ss:$8 sps:$4 sm:$0xff]  }
  0xc6   : > { %2100 = vmatpush1.bf16.msra.mxu1 %v3283_v28  ;;  %v3355_v28 = vld [vmem:[%s3445_s20 + $0x390] ss:$8 sps:$4 sm:$0xff]  }
  0xc7   : > { %2312 = vmatpush1.bf16.msra.mxu0 %v3286_v29  ;;  %2101 = vmatprep.subr.bf16.mxu1 %v3291_v30  ;;  %v3358_v29 = vld [vmem:[%s3445_s20 + $0x790] ss:$8 sps:$4 sm:$0xff]   ;;  %v3363_v30 = vld [vmem:[%s3445_s20 + $0x3a4] ss:$8 sps:$4 sm:$0xff]  }
  0xc8   : > { %2313 = vmatprep.subr.bf16.mxu0 %v3294_v31  ;;  %v3366_v31 = vld [vmem:[%s3445_s20 + $0x7a4] ss:$8 sps:$4 sm:$0xff]  }
  0xca   : > { %2102 = vmatpush1.bf16.msra.mxu1 %v3289_v32  ;;  %v3361_v32 = vld [vmem:[%s3445_s20 + $0x3a0] ss:$8 sps:$4 sm:$0xff]  }
  0xcb   : > { %2314 = vmatpush1.bf16.msra.mxu0 %v3292_v33  ;;  %2103 = vmatprep.subr.bf16.mxu1 %v3297_v34  ;;  %v3364_v33 = vld [vmem:[%s3445_s20 + $0x7a0] ss:$8 sps:$4 sm:$0xff]   ;;  %v3369_v34 = vld [vmem:[%s3445_s20 + $0x3b4] ss:$8 sps:$4 sm:$0xff]  }
  0xcc   : > { %2315 = vmatprep.subr.bf16.mxu0 %v3300_v35  ;;  %v3372_v35 = vld [vmem:[%s3445_s20 + $0x7b4] ss:$8 sps:$4 sm:$0xff]  }
  0xce   : > { %2104 = vmatpush1.bf16.msra.mxu1 %v3295_v36  ;;  %v3367_v36 = vld [vmem:[%s3445_s20 + $0x3b0] ss:$8 sps:$4 sm:$0xff]  }
  0xcf   : > { %2316 = vmatpush1.bf16.msra.mxu0 %v3298_v37  ;;  %2126 = vmatprep.subr.bf16.mxu1 %v3303_v38  ;;  %v3370_v37 = vld [vmem:[%s3445_s20 + $0x7b0] ss:$8 sps:$4 sm:$0xff]   ;;  %v3375_v38 = vld [vmem:[%s3445_s20 + $0x3c4] ss:$8 sps:$4 sm:$0xff]  }
  0xd0   : > { %2338 = vmatprep.subr.bf16.mxu0 %v3306_v39  ;;  %v3378_v39 = vld [vmem:[%s3445_s20 + $0x7c4] ss:$8 sps:$4 sm:$0xff]  }
  0xd1   : > { %2106 = vmatmul.mubr.bf16.vlgmr.msra.gmra.mrb[0].mxu1 %v2651_v41  ;;  %v3376_v41 = vld [vmem:[%s3445_s20 + $0x7c0] ss:$8 sps:$4 sm:$0xff]  }
  0xd2   : > { %2318 = vmatmul.mubr.bf16.vlgmr.msra.gmra.mrb[0].mxu0 %v2659_v43  ;;  %2127 = vmatpush1.bf16.msra.mxu1 %v3301_v50  ;;  %v3381_v43 = vld [vmem:[%s3445_s20 + $0x3d4] ss:$8 sps:$4 sm:$0xff]   ;;  %v3387_v50 = vld [vmem:[%s3445_s20 + $0x3e4] ss:$8 sps:$4 sm:$0xff]  }
  0xd3   : > { %2339 = vmatpush1.bf16.msra.mxu0 %v3304_v51  ;;  %2128 = vmatprep.subr.bf16.mxu1 %v3309_v52  ;;  %v3390_v51 = vld [vmem:[%s3445_s20 + $0x7e4] ss:$8 sps:$4 sm:$0xff]   ;;  %v3385_v52 = vld [vmem:[%s3445_s20 + $0x3e0] ss:$8 sps:$4 sm:$0xff]  }
  0xd4   : > { %2340 = vmatprep.subr.bf16.mxu0 %v3312_v53  ;;  %2115 = vmatprep.mubr.bf16.mxu1 %v2668_v42  ;;  %v3388_v53 = vld [vmem:[%s3445_s20 + $0x7e0] ss:$8 sps:$4 sm:$0xff]   ;;  %v3393_v42 = vld [vmem:[%s3445_s20 + $0x3f4] ss:$8 sps:$4 sm:$0xff]  }
  0xd5   : > { %2327 = vmatprep.mubr.bf16.mxu0 %v2676_v45  ;;  %v3396_v45 = vld [vmem:[%s3445_s20 + $0x7f4] ss:$8 sps:$4 sm:$0xff]  }
  0xd6   : > { %2129 = vmatpush1.bf16.msra.mxu1 %v3307_v46  ;;  %v3391_v46 = vld [vmem:[%s3445_s20 + $0x3f0] ss:$8 sps:$4 sm:$0xff]  }
  0xd7   : > { %2341 = vmatpush1.bf16.msra.mxu0 %v3310_v47  ;;  %2130 = vmatprep.subr.bf16.mxu1 %v3315_v54  ;;  %v3394_v47 = vld [vmem:[%s3445_s20 + $0x7f0] ss:$8 sps:$4 sm:$0xff]  }
  0xd8   : > { %2342 = vmatprep.subr.bf16.mxu0 %v3318_v55  ;;  %v258_v54 = vld [vmem:[%s3495_s24 + $0x98] sm:$0xff] }
  0xd9   : > { %2116 = vmatmul.mubr.bf16.gmra.mrb[4].mxu1 %v2667_v57  ;;  %v266_v55 = vld [vmem:[%s3495_s24 + $0xd8] sm:$0xff] }
  0xda   : > { %2328 = vmatmul.mubr.bf16.gmra.mrb[4].mxu0 %v2675_v58  ;;  %2131 = vmatpush1.bf16.msra.mxu1 %v3313_v62  ;;  %v262_v57 = vld [vmem:[%s3495_s24 + $0xb8] sm:$0xff]  ;;  %v2653_v62 = vcombine.low %v3712_v56, %v3715_v59 }
  0xdb   : > { %2343 = vmatpush1.bf16.msra.mxu0 %v3316_v63  ;;  %2132 = vmatprep.subr.bf16.mxu1 %v3321_v0  ;;  %v270_v58 = vld [vmem:[%s3495_s24 + $0xf8] sm:$0xff]  ;;  %v2661_v63 = vcombine.low %v3718_v60, %v3721_v61  ;;  %v2670_v0 = vcombine.high %v258_v54, %v266_v55 }
  0xdc   : > { %2344 = vmatprep.subr.bf16.mxu0 %v3324_v1  ;;  %2158 = vmatprep.mubr.bf16.mxu1 %v2654_v2  ;;  %v2678_v1 = vcombine.high %v262_v57, %v270_v58  ;;  %v2669_v2 = vcombine.low %v258_v54, %v266_v55  ;;  %v2443_v55 = vlaneseq }
  0xdd   : > { %2370 = vmatprep.mubr.bf16.mxu0 %v2662_v3  ;;  %v2677_v3 = vcombine.low %v262_v57, %v270_v58 }
  0xde   : > { %2133 = vmatpush1.bf16.msra.mxu1 %v3319_v4  ;;  %vm2457_vm0 = vcmp.lt.s32.totalorder %v2443_v55, 256 }
  0xdf   : > { %2345 = vmatpush1.bf16.msra.mxu0 %v3322_v5  ;;  %2134 = vmatprep.subr.bf16.mxu1 %v3327_v6 }
  0xe0   : > { %2346 = vmatprep.subr.bf16.mxu0 %v3330_v7 }
  0xe2   : > { %2135 = vmatpush1.bf16.msra.mxu1 %v3325_v8 }
  0xe3   : > { %2347 = vmatpush1.bf16.msra.mxu0 %v3328_v9  ;;  %2136 = vmatprep.subr.bf16.mxu1 %v3333_v10 }
  0xe4   : > { %2348 = vmatprep.subr.bf16.mxu0 %v3336_v11 }
  0xe6   : > { %2137 = vmatpush1.bf16.msra.mxu1 %v3331_v12 }
  0xe7   : > { %2349 = vmatpush1.bf16.msra.mxu0 %v3334_v13  ;;  %2138 = vmatprep.subr.bf16.mxu1 %v3339_v14 }
  0xe8   : > { %2350 = vmatprep.subr.bf16.mxu0 %v3342_v15 }
  0xea   : > { %2139 = vmatpush1.bf16.msra.mxu1 %v3337_v16 }
  0xeb   : > { %2351 = vmatpush1.bf16.msra.mxu0 %v3340_v17  ;;  %2140 = vmatprep.subr.bf16.mxu1 %v3345_v18 }
  0xec   : > { %2352 = vmatprep.subr.bf16.mxu0 %v3348_v19 }
  0xee   : > { %2141 = vmatpush1.bf16.msra.mxu1 %v3343_v20 }
  0xef   : > { %2353 = vmatpush1.bf16.msra.mxu0 %v3346_v21  ;;  %2142 = vmatprep.subr.bf16.mxu1 %v3351_v22 }
  0xf0   : > { %2354 = vmatprep.subr.bf16.mxu0 %v3354_v23 }
  0xf2   : > { %2143 = vmatpush1.bf16.msra.mxu1 %v3349_v24 }
  0xf3   : > { %2355 = vmatpush1.bf16.msra.mxu0 %v3352_v25  ;;  %2144 = vmatprep.subr.bf16.mxu1 %v3357_v26 }
  0xf4   : > { %2356 = vmatprep.subr.bf16.mxu0 %v3360_v27 }
  0xf6   : > { %2145 = vmatpush1.bf16.msra.mxu1 %v3355_v28 }
  0xf7   : > { %2357 = vmatpush1.bf16.msra.mxu0 %v3358_v29  ;;  %2146 = vmatprep.subr.bf16.mxu1 %v3363_v30 }
  0xf8   : > { %2358 = vmatprep.subr.bf16.mxu0 %v3366_v31 }
  0xfa   : > { %2147 = vmatpush1.bf16.msra.mxu1 %v3361_v32 }
  0xfb   : > { %2359 = vmatpush1.bf16.msra.mxu0 %v3364_v33  ;;  %2148 = vmatprep.subr.bf16.mxu1 %v3369_v34 }
  0xfc   : > { %2360 = vmatprep.subr.bf16.mxu0 %v3372_v35 }
  0xfe   : > { %2149 = vmatpush1.bf16.msra.mxu1 %v3367_v36 }
  0xff   : > { %2361 = vmatpush1.bf16.msra.mxu0 %v3370_v37  ;;  %2150 = vmatprep.subr.bf16.mxu1 %v3375_v38 }
 0x100   : > { %2362 = vmatprep.subr.bf16.mxu0 %v3378_v39 }
 0x102   : > { %2151 = vmatpush1.bf16.msra.mxu1 %v3373_v40 }
 0x103   : > { %2363 = vmatpush1.bf16.msra.mxu0 %v3376_v41  ;;  %2152 = vmatprep.subr.bf16.mxu1 %v3381_v43 }
 0x104   : > { %2364 = vmatprep.subr.bf16.mxu0 %v3384_v44 }
 0x106   : > { %2153 = vmatpush1.bf16.msra.mxu1 %v3379_v48 }
 0x107   : > { %2365 = vmatpush1.bf16.msra.mxu0 %v3382_v49  ;;  %2154 = vmatprep.subr.bf16.mxu1 %v3387_v50 }
 0x108   : > { %2366 = vmatprep.subr.bf16.mxu0 %v3390_v51 }
 0x10a   : > { %2155 = vmatpush1.bf16.msra.mxu1 %v3385_v52 }
 0x10b   : > { %2367 = vmatpush1.bf16.msra.mxu0 %v3388_v53  ;;  %2156 = vmatprep.subr.bf16.mxu1 %v3393_v42 }
 0x10c   : > { %2368 = vmatprep.subr.bf16.mxu0 %v3396_v45 }
 0x10e   : > { %2157 = vmatpush1.bf16.msra.mxu1 %v3391_v46 }
 0x10f   : > { %2369 = vmatpush1.bf16.msra.mxu0 %v3394_v47  ;;  %v3405_v47 = vmov 1966171168  }
 0x110   : > { %v2441_v54 = vunpack.c.l.s4 %v3405_v47 }
 0x111   : > { %2159 = vmatmul.mubr.bf16.vlgmr.msra.gmra.mrb[0].mxu1 %v2653_v62 }
 0x112   : > { %2371 = vmatmul.mubr.bf16.vlgmr.msra.gmra.mrb[0].mxu0 %v2661_v63  ;;  %2168 = vmatprep.mubr.bf16.mxu1 %v2670_v0 }
 0x113   : > { %2380 = vmatprep.mubr.bf16.mxu0 %v2678_v1 }
 0x119   : > { %2169 = vmatmul.mubr.bf16.gmra.mrb[4].mxu1 %v2669_v2 }
 0x11a   : > { %2381 = vmatmul.mubr.bf16.gmra.mrb[4].mxu0 %v2677_v3 }
 0x1e4   : > { %v2160_v4 = vpop.f32.mrb[0].mxu1 }
 0x1e5   : > { %v2372_v5 = vpop.f32.mrb[0].mxu0  ;;  %v2162_v59 = vpop.f32.mrb[1].mxu1 }
 0x1e6   : > { %v2948_v56 = vadd.f32 %v2372_v5, %v2160_v4  ;;  %v2374_v6 = vpop.f32.mrb[1].mxu0  ;;  %v2164_v60 = vpop.f32.mrb[2].mxu1  ;;  %v2442_v4 = vunpack.c.0.s8 %v2441_v54  ;;  %v2444_v5 = vshrl.u32 %v2443_v55, 7 }
 0x1e7   : > { %v2949_v7 = vadd.f32 %v2374_v6, %v2162_v59  ;;  %v2376_v61 = vpop.f32.mrb[2].mxu0  ;;  %v2166_v9 = vpop.f32.mrb[3].mxu1 }
 0x1e8   : > { %v2950_v8 = vadd.f32 %v2376_v61, %v2164_v60  ;;  %v2378_v10 = vpop.f32.mrb[3].mxu0  ;;  %v2460_v13 = vmul.f32 %v2948_v56, %v2948_v56 }
 0x1e9   : > { %v2944_v11 = vpack.c.bf16 %v2949_v7, %v2948_v56  ;;  %v2951_v12 = vadd.f32 %v2378_v10, %v2166_v9  ;;  %v2461_v16 = vmul.f32 %v2949_v7, %v2949_v7  ;;  %v2445_v10 = vsub.s32 %v2442_v4, %v2444_v5 }
 0x1ea   : > { %v2419_v14 = vadd.f32 %v2950_v8, %v2948_v56  ;;  %v2462_v15 = vmul.f32 %v2950_v8, %v2950_v8 }
 0x1eb   : > { %2415 = vst [vmem:[%s3793_s28] sm:$0xff] %v2944_v11  ;;  %v2945_v17 = vpack.c.bf16 %v2951_v12, %v2950_v8  ;;  %v2428_v18 = vadd.f32 %v2951_v12, %v2949_v7  ;;  %v2463_v19 = vmul.f32 %v2951_v12, %v2951_v12 }
 0x1ec   : > { %v2468_v20 = vadd.f32 %v2462_v15, %v2460_v13  ;;  %v2170_v22 = vpop.f32.mrb[4].mxu1 }
 0x1ed   : > { %2416 = vst [vmem:[%s3793_s28 + $0x8] sm:$0xff] %v2945_v17  ;;  %v2477_v21 = vadd.f32 %v2463_v19, %v2461_v16  ;;  %v2382_v23 = vpop.f32.mrb[4].mxu0  ;;  %v2172_v25 = vpop.f32.mrb[5].mxu1 }
 0x1ee   : > { %v2952_v24 = vadd.f32 %v2382_v23, %v2170_v22  ;;  %v2384_v26 = vpop.f32.mrb[5].mxu0  ;;  %v2174_v28 = vpop.f32.mrb[6].mxu1 }
 0x1ef   : > { %v2953_v27 = vadd.f32 %v2384_v26, %v2172_v25  ;;  %v2386_v29 = vpop.f32.mrb[6].mxu0  ;;  %v2176_v33 = vpop.f32.mrb[7].mxu1 }
 0x1f0   : > { %v2420_v30 = vadd.f32 %v2952_v24, %v2419_v14  ;;  %v2464_v31 = vmul.f32 %v2952_v24, %v2952_v24  ;;  %v2954_v32 = vadd.f32 %v2386_v29, %v2174_v28  ;;  %v2388_v34 = vpop.f32.mrb[7].mxu0 }
 0x1f1   : > { %v2946_v35 = vpack.c.bf16 %v2953_v27, %v2952_v24  ;;  %v2429_v36 = vadd.f32 %v2953_v27, %v2428_v18  ;;  %v2465_v37 = vmul.f32 %v2953_v27, %v2953_v27  ;;  %v2955_v38 = vadd.f32 %v2388_v34, %v2176_v33 }
 0x1f2   : > { %v2469_v39 = vadd.f32 %v2468_v20, %v2464_v31  ;;  %v2421_v40 = vadd.f32 %v2954_v32, %v2420_v30  ;;  %v2466_v41 = vmul.f32 %v2954_v32, %v2954_v32 }
 0x1f3   : > { %2417 = vst [vmem:[%s3793_s28 + $0x10] sm:$0xff] %v2946_v35  ;;  %v2478_v43 = vadd.f32 %v2477_v21, %v2465_v37  ;;  %v2947_v44 = vpack.c.bf16 %v2955_v38, %v2954_v32  ;;  %v2430_v48 = vadd.f32 %v2955_v38, %v2429_v36  ;;  %v2467_v49 = vmul.f32 %v2955_v38, %v2955_v38 }
 0x1f4   : > { %v2422_v50 = vrot.slane %v2421_v40, 4  ;;  %v2470_v51 = vadd.f32 %v2469_v39, %v2466_v41 }
 0x1f5   : > { %2418 = vst [vmem:[%s3793_s28 + $0x18] sm:$0xff] %v2947_v44  ;;  %v2431_v52 = vrot.slane %v2430_v48, 4  ;;  %v2479_v53 = vadd.f32 %v2478_v43, %v2467_v49 }
 0x1f6   : > { %v2423_v42 = vadd.f32 %v2422_v50, %v2421_v40  ;;  %v2471_v45 = vrot.slane %v2470_v51, 4 }
 0x1f7   : > { %v2432_v46 = vadd.f32 %v2431_v52, %v2430_v48  ;;  %v2480_v57 = vrot.slane %v2479_v53, 4 }
 0x1f8   : > { %v2424_v58 = vrot.slane %v2423_v42, 2  ;;  %v2472_v62 = vadd.f32 %v2471_v45, %v2470_v51 }
 0x1f9   : > { %v2433_v63 = vrot.slane %v2432_v46, 2  ;;  %v2481_v0 = vadd.f32 %v2480_v57, %v2479_v53 }
 0x1fa   : > { %v2425_v1 = vadd.f32 %v2424_v58, %v2423_v42  ;;  %v2473_v2 = vrot.slane %v2472_v62, 2 }
 0x1fb   : > { %v2434_v3 = vadd.f32 %v2433_v63, %v2432_v46  ;;  %v2482_v56 = vrot.slane %v2481_v0, 2 }
 0x1fc   : > { %v2426_v59 = vrot.slane %v2425_v1, 1  ;;  %v2474_v6 = vadd.f32 %v2473_v2, %v2472_v62 }
 0x1fd   : > { %v2435_v7 = vrot.slane %v2434_v3, 1  ;;  %v2483_v60 = vadd.f32 %v2482_v56, %v2481_v0 }
 0x1fe   : > { %v2427_v61 = vadd.f32 %v2426_v59, %v2425_v1  ;;  %v2475_v8 = vrot.slane %v2474_v6, 1 }
 0x1ff   : > { %v2436_v9 = vadd.f32 %v2435_v7, %v2434_v3  ;;  %v2484_v11 = vrot.slane %v2483_v60, 1 }
 0x200   : > { %v2476_v12 = vadd.f32 %v2475_v8, %v2474_v6 }
 0x201   : > { %v2439_v13 = vcombine.low %v2427_v61, %v2436_v9  ;;  %v2485_v14 = vadd.f32 %v2484_v11, %v2483_v60 }
 0x203   : > { %v2446_v15 = vrot.slane %v2439_v13, %v2445_v10  ;;  %v2488_v16 = vcombine.low %v2476_v12, %v2485_v14 }
 0x205   : > { %v2453_v17 = vrot.slane %v2446_v15, %v2445_v10  ;;  %v2495_v18 = vrot.slane %v2488_v16, %v2445_v10 }
 0x207   : > { %2459 = vst.msk [vmem:[%s234_s6] sm:$0x3] %vm2457_vm0, %v2453_v17  ;;  %v2502_v19 = vrot.slane %v2495_v18, %v2445_v10 }
 0x209   : > { %2504 = vst.msk [vmem:[%s238_s9] sm:$0x3] %vm2457_vm0, %v2502_v19 }
 0x20a PF: > { %s15_s15 = sadd.s32 1, %s3403_s15  }
 0x20b   : > { %p12_p4 = scmp.ge.s32.totalorder %s15_s15, 6  }
 0x20d   :  { %14 = sbr.rel (!%p12_p4) target bundleno = 1 (0x1), region = 85 }

// kernel: generator_forward.7
= control target key start
LH: loop header
LB: loop body
LE: loop exit
PB: predicated region body
PF: predicated region fallthrough
CT: control target
= control target key end

     0   :  { %s2361_s15 = smov 0   ;;  %s2587_s0 = inlined_call_operand.vmem [shape: bf16[4,128,1024], index: 0, kind: input, shape index: {}]   ;;  %s2588_s1 = inlined_call_operand.vmem [shape: bf16[4,1024,128], index: 1, kind: input, shape index: {}]   ;;  %s2589_s2 = inlined_call_operand.vmem [shape: bf16[4,128,128], index: 2, kind: output, shape index: {0}]   ;;  %s2590_s3 = inlined_call_operand.vmem [shape: f32[4,1,128], index: 3, kind: output, shape index: {1}]   ;;  %s2591_s4 = inlined_call_operand.vmem [shape: f32[4,1,128], index: 4, kind: output, shape index: {2}]  }
   0x1 LB: > { %s1777_s16 = sadd.s32 4294967295, %s2334_s15   ;;  %p1781_p0 = scmp.ge.s32.totalorder %s2334_s15, 1  ;;  %s2334_s15 = sphi %s2361_s15, %s15_s15  }
   0x2   : > { %p177_p1 = scmp.lt.s32.totalorder %s2334_s15, 5 }
   0x4   : > { %p178_p2 = pnand %p1781_p0, %p177_p1 }
   0x5   : > { %p214_p3 = scmp.lt.s32.totalorder (!%p178_p2), %s1777_s16, 3 }
   0x6   : > { %181 = sbr.rel (%p178_p2) target bundleno = 408 (0x198), region = 28 }
   0xd   : > { %s2593_s16 = smov (!%p214_p3, %s1777_s16), 3 }
   0xe   : > { %s1934_s17 = sshll.u32 %s2593_s16, 9  ;;  %s1936_s24 = sshll.u32 %s2593_s16, 6 }
   0xf   : > { %s2377_s20 = scalar_lea.vmem %s2588_s1, %s1934_s17  ;;  %s2414_s23 = scalar_lea.vmem %s2587_s0, %s1934_s17 }
  0x10   : > { %v2264_v0 = vld [vmem:[%s2377_s20 + $0x40] sm:$0xff]   ;;  %v2268_v4 = vld [vmem:[%s2377_s20 + $0x48] sm:$0xff]   ;;  %v2272_v8 = vld [vmem:[%s2377_s20 + $0x50] sm:$0xff]   ;;  %s2552_s27 = scalar_lea.vmem %s2589_s2, %s1936_s24  ;;  %s231_s30 = scalar_lea.vmem %s2590_s3, %s2593_s16 }
  0x11   : > { %v2265_v1 = vld [vmem:[%s2377_s20 + $0xc0] sm:$0xff]   ;;  %2000 = vmatprep.subr.bf16.mxu0 %v2264_v0  ;;  %v2269_v5 = vld [vmem:[%s2377_s20 + $0xc8] sm:$0xff]   ;;  %v2273_v9 = vld [vmem:[%s2377_s20 + $0xd0] sm:$0xff]   ;;  %s234_s7 = scalar_lea.vmem %s2591_s4, %s2593_s16 }
  0x12   : > { %v2266_v2 = vld [vmem:[%s2377_s20] sm:$0xff]   ;;  %2064 = vmatprep.subr.bf16.mxu1 %v2265_v1  ;;  %v2270_v6 = vld [vmem:[%s2377_s20 + $0x8] sm:$0xff]   ;;  %v2274_v10 = vld [vmem:[%s2377_s20 + $0x10] sm:$0xff]  }
  0x13   : > { %v2267_v3 = vld [vmem:[%s2377_s20 + $0x80] sm:$0xff]   ;;  %2001 = vmatpush3.bf16.msra.mxu0 %v2266_v2  ;;  %v2271_v7 = vld [vmem:[%s2377_s20 + $0x88] sm:$0xff]   ;;  %v2275_v11 = vld [vmem:[%s2377_s20 + $0x90] sm:$0xff]  }
  0x14   : > { %2065 = vmatpush3.bf16.msra.mxu1 %v2267_v3  ;;  %2002 = vmatprep.subr.bf16.mxu0 %v2268_v4  ;;  %v2276_v12 = vld [vmem:[%s2377_s20 + $0x58] sm:$0xff]   ;;  %v2280_v16 = vld [vmem:[%s2377_s20 + $0x60] sm:$0xff]   ;;  %v2284_v20 = vld [vmem:[%s2377_s20 + $0x68] sm:$0xff]  }
  0x15   : > { %2066 = vmatprep.subr.bf16.mxu1 %v2269_v5  ;;  %v2277_v13 = vld [vmem:[%s2377_s20 + $0xd8] sm:$0xff]   ;;  %v2281_v17 = vld [vmem:[%s2377_s20 + $0xe0] sm:$0xff]   ;;  %v2285_v21 = vld [vmem:[%s2377_s20 + $0xe8] sm:$0xff]  }
  0x16   : > { %v2278_v14 = vld [vmem:[%s2377_s20 + $0x18] sm:$0xff]   ;;  %v2282_v18 = vld [vmem:[%s2377_s20 + $0x20] sm:$0xff]   ;;  %v2286_v22 = vld [vmem:[%s2377_s20 + $0x28] sm:$0xff]  }
  0x17   : > { %2003 = vmatpush3.bf16.msra.mxu0 %v2270_v6  ;;  %v2279_v15 = vld [vmem:[%s2377_s20 + $0x98] sm:$0xff]   ;;  %v2283_v19 = vld [vmem:[%s2377_s20 + $0xa0] sm:$0xff]   ;;  %v2287_v23 = vld [vmem:[%s2377_s20 + $0xa8] sm:$0xff]  }
  0x18   : > { %2067 = vmatpush3.bf16.msra.mxu1 %v2271_v7  ;;  %2004 = vmatprep.subr.bf16.mxu0 %v2272_v8  ;;  %v2288_v24 = vld [vmem:[%s2377_s20 + $0x70] sm:$0xff]   ;;  %v2292_v28 = vld [vmem:[%s2377_s20 + $0x78] sm:$0xff]   ;;  %v236_v32 = vld [vmem:[%s2414_s23] sm:$0xff] }
  0x19   : > { %2068 = vmatprep.subr.bf16.mxu1 %v2273_v9  ;;  %v2289_v25 = vld [vmem:[%s2377_s20 + $0xf0] sm:$0xff]   ;;  %v2293_v29 = vld [vmem:[%s2377_s20 + $0xf8] sm:$0xff]   ;;  %v240_v33 = vld [vmem:[%s2414_s23 + $0x20] sm:$0xff] }
  0x1a   : > { %v2290_v26 = vld [vmem:[%s2377_s20 + $0x30] sm:$0xff]   ;;  %v2294_v30 = vld [vmem:[%s2377_s20 + $0x38] sm:$0xff]   ;;  %v237_v34 = vld [vmem:[%s2414_s23 + $0x8] sm:$0xff]  ;;  %v1788_v35 = vcombine.low %v236_v32, %v240_v33  ;;  %v1789_v36 = vcombine.high %v236_v32, %v240_v33 }
  0x1b   : > { %2005 = vmatpush3.bf16.msra.mxu0 %v2274_v10  ;;  %v2291_v27 = vld [vmem:[%s2377_s20 + $0xb0] sm:$0xff]   ;;  %v2295_v31 = vld [vmem:[%s2377_s20 + $0xb8] sm:$0xff]   ;;  %v241_v37 = vld [vmem:[%s2414_s23 + $0x28] sm:$0xff] }
  0x1c   : > { %2069 = vmatpush3.bf16.msra.mxu1 %v2275_v11  ;;  %2006 = vmatprep.subr.bf16.mxu0 %v2276_v12  ;;  %v1790_v38 = vcombine.low %v237_v34, %v241_v37  ;;  %v1791_v39 = vcombine.high %v237_v34, %v241_v37  ;;  %v2296_v40 = vld [vmem:[%s2377_s20 + $0x140] sm:$0xff]   ;;  %v245_v47 = vld [vmem:[%s2414_s23 + $0x48] sm:$0xff]  ;;  %v2304_v62 = vld [vmem:[%s2377_s20 + $0x150] sm:$0xff]  }
  0x1d   : > { %2070 = vmatprep.subr.bf16.mxu1 %v2277_v13  ;;  %1164 = vmatprep.mubr.bf16.mxu0 %v1789_v36  ;;  %v2297_v41 = vld [vmem:[%s2377_s20 + $0x100] sm:$0xff]   ;;  %v249_v48 = vld [vmem:[%s2414_s23 + $0x68] sm:$0xff]  ;;  %v2305_v63 = vld [vmem:[%s2377_s20 + $0x110] sm:$0xff]  }
  0x1e   : > { %1261 = vmatprep.mubr.bf16.mxu1 %v1791_v39  ;;  %v2298_v42 = vld [vmem:[%s2377_s20 + $0x1c0] sm:$0xff]   ;;  %v1799_v49 = vcombine.high %v245_v47, %v249_v48  ;;  %v2300_v50 = vld [vmem:[%s2377_s20 + $0x148] sm:$0xff]   ;;  %v1798_v53 = vcombine.low %v245_v47, %v249_v48  ;;  %v2306_v0 = vld [vmem:[%s2377_s20 + $0x1d0] sm:$0xff]  }
  0x1f   : > { %2007 = vmatpush3.bf16.msra.mxu0 %v2278_v14  ;;  %v2299_v43 = vld [vmem:[%s2377_s20 + $0x180] sm:$0xff]   ;;  %v2301_v52 = vld [vmem:[%s2377_s20 + $0x108] sm:$0xff]   ;;  %v2307_v1 = vld [vmem:[%s2377_s20 + $0x190] sm:$0xff]  }
  0x20   : > { %2071 = vmatpush3.bf16.msra.mxu1 %v2279_v15  ;;  %2008 = vmatprep.subr.bf16.mxu0 %v2280_v16  ;;  %v244_v44 = vld [vmem:[%s2414_s23 + $0x40] sm:$0xff]  ;;  %v2302_v54 = vld [vmem:[%s2377_s20 + $0x1c8] sm:$0xff]   ;;  %v2308_v10 = vld [vmem:[%s2377_s20 + $0x158] sm:$0xff]  }
  0x21   : > { %2072 = vmatprep.subr.bf16.mxu1 %v2281_v17  ;;  %v248_v45 = vld [vmem:[%s2414_s23 + $0x60] sm:$0xff]  ;;  %v2303_v55 = vld [vmem:[%s2377_s20 + $0x188] sm:$0xff]   ;;  %v2309_v11 = vld [vmem:[%s2377_s20 + $0x118] sm:$0xff]  }
  0x22   : > { %v1797_v46 = vcombine.high %v244_v44, %v248_v45  ;;  %v1796_v51 = vcombine.low %v244_v44, %v248_v45  ;;  %v252_v56 = vld [vmem:[%s2414_s23 + $0x80] sm:$0xff]  ;;  %v253_v58 = vld [vmem:[%s2414_s23 + $0x88] sm:$0xff]  ;;  %v2310_v12 = vld [vmem:[%s2377_s20 + $0x1d8] sm:$0xff]  }
  0x23   : > { %2009 = vmatpush3.bf16.msra.mxu0 %v2282_v18  ;;  %v256_v57 = vld [vmem:[%s2414_s23 + $0xa0] sm:$0xff]  ;;  %v257_v59 = vld [vmem:[%s2414_s23 + $0xa8] sm:$0xff]  ;;  %v2311_v13 = vld [vmem:[%s2377_s20 + $0x198] sm:$0xff]  }
  0x24   : > { %2073 = vmatpush3.bf16.msra.mxu1 %v2283_v19  ;;  %2010 = vmatprep.subr.bf16.mxu0 %v2284_v20  ;;  %v1805_v60 = vcombine.high %v252_v56, %v256_v57  ;;  %v1807_v61 = vcombine.high %v253_v58, %v257_v59  ;;  %v1804_v2 = vcombine.low %v252_v56, %v256_v57  ;;  %v260_v3 = vld [vmem:[%s2414_s23 + $0xc0] sm:$0xff]  ;;  %v261_v5 = vld [vmem:[%s2414_s23 + $0xc8] sm:$0xff]  ;;  %v2321_v39 = vld [vmem:[%s2377_s20 + $0x130] sm:$0xff]  }
  0x25   : > { %2074 = vmatprep.subr.bf16.mxu1 %v2285_v21  ;;  %v264_v4 = vld [vmem:[%s2414_s23 + $0xe0] sm:$0xff]  ;;  %v1806_v6 = vcombine.low %v253_v58, %v257_v59  ;;  %v265_v8 = vld [vmem:[%s2414_s23 + $0xe8] sm:$0xff]  ;;  %v2325_v48 = vld [vmem:[%s2377_s20 + $0x138] sm:$0xff]  }
  0x26   : > { %v1813_v7 = vcombine.high %v260_v3, %v264_v4  ;;  %v1815_v9 = vcombine.high %v261_v5, %v265_v8  ;;  %v268_v14 = vld [vmem:[%s2414_s23 + $0x100] sm:$0xff]  ;;  %v269_v16 = vld [vmem:[%s2414_s23 + $0x108] sm:$0xff]  ;;  %v1812_v19 = vcombine.low %v260_v3, %v264_v4  ;;  %v1814_v21 = vcombine.low %v261_v5, %v265_v8  ;;  %v247_v8 = vld [vmem:[%s2414_s23 + $0x58] sm:$0xff] }
  0x27   : > { %2011 = vmatpush3.bf16.msra.mxu0 %v2286_v22  ;;  %v272_v15 = vld [vmem:[%s2414_s23 + $0x120] sm:$0xff]  ;;  %v273_v17 = vld [vmem:[%s2414_s23 + $0x128] sm:$0xff] }
  0x28   : > { %2075 = vmatpush3.bf16.msra.mxu1 %v2287_v23  ;;  %2012 = vmatprep.subr.bf16.mxu0 %v2288_v24  ;;  %v2312_v18 = vld [vmem:[%s2377_s20 + $0x160] sm:$0xff]   ;;  %v1821_v22 = vcombine.high %v268_v14, %v272_v15  ;;  %v1823_v24 = vcombine.high %v269_v16, %v273_v17  ;;  %v2318_v32 = vld [vmem:[%s2377_s20 + $0x1e8] sm:$0xff]   ;;  %v1820_v34 = vcombine.low %v268_v14, %v272_v15  ;;  %v254_v14 = vld [vmem:[%s2414_s23 + $0x90] sm:$0xff] }
  0x29   : > { %2076 = vmatprep.subr.bf16.mxu1 %v2289_v25  ;;  %v2313_v20 = vld [vmem:[%s2377_s20 + $0x120] sm:$0xff]   ;;  %v2319_v33 = vld [vmem:[%s2377_s20 + $0x1a8] sm:$0xff]   ;;  %v258_v15 = vld [vmem:[%s2414_s23 + $0xb0] sm:$0xff] }
  0x2a   : > { %v2314_v23 = vld [vmem:[%s2377_s20 + $0x1e0] sm:$0xff]   ;;  %v285_v44 = vld [vmem:[%s2414_s23 + $0x188] sm:$0xff] }
  0x2b   : > { %2013 = vmatpush3.bf16.msra.mxu0 %v2290_v26  ;;  %v2315_v25 = vld [vmem:[%s2377_s20 + $0x1a0] sm:$0xff]   ;;  %v289_v45 = vld [vmem:[%s2414_s23 + $0x1a8] sm:$0xff] }
  0x2c   : > { %2077 = vmatpush3.bf16.msra.mxu1 %v2291_v27  ;;  %2014 = vmatprep.subr.bf16.mxu0 %v2292_v28  ;;  %v276_v26 = vld [vmem:[%s2414_s23 + $0x140] sm:$0xff]  ;;  %v2316_v28 = vld [vmem:[%s2377_s20 + $0x168] sm:$0xff]   ;;  %v1838_v59 = vcombine.low %v285_v44, %v289_v45 }
  0x2d   : > { %2078 = vmatprep.subr.bf16.mxu1 %v2293_v29  ;;  %v280_v27 = vld [vmem:[%s2414_s23 + $0x160] sm:$0xff]  ;;  %v277_v29 = vld [vmem:[%s2414_s23 + $0x148] sm:$0xff] }
  0x2e   : > { %v1829_v36 = vcombine.high %v276_v26, %v280_v27  ;;  %v1828_v47 = vcombine.low %v276_v26, %v280_v27  ;;  %v293_v56 = vld [vmem:[%s2414_s23 + $0x1c8] sm:$0xff]  ;;  %v1808_v26 = vcombine.low %v254_v14, %v258_v15 }
  0x2f   : > { %2015 = vmatpush3.bf16.msra.mxu0 %v2294_v30  ;;  %v281_v30 = vld [vmem:[%s2414_s23 + $0x168] sm:$0xff] }
  0x30   : > { %2079 = vmatpush3.bf16.msra.mxu1 %v2295_v31  ;;  %2128 = vmatprep.subr.bf16.mxu0 %v2296_v40  ;;  %v2317_v31 = vld [vmem:[%s2377_s20 + $0x128] sm:$0xff]   ;;  %v1831_v37 = vcombine.high %v277_v29, %v281_v30  ;;  %v2322_v40 = vld [vmem:[%s2377_s20 + $0x1f0] sm:$0xff]  }
  0x31   : > { %2192 = vmatprep.subr.bf16.mxu1 %v2298_v42  ;;  %v288_v42 = vld [vmem:[%s2414_s23 + $0x1a0] sm:$0xff]  ;;  %v297_v57 = vld [vmem:[%s2414_s23 + $0x1e8] sm:$0xff] }
  0x32   : > { %1165 = vmatmul.mubr.bf16.vlgmr.msra.gmra.mrb[0].mxu0 %v1788_v35  ;;  %v1822_v35 = vcombine.low %v269_v16, %v273_v17  ;;  %v1846_v3 = vcombine.low %v293_v56, %v297_v57  ;;  %v255_v16 = vld [vmem:[%s2414_s23 + $0x98] sm:$0xff] }
  0x33   : > { %1262 = vmatmul.mubr.bf16.vlgmr.msra.gmra.mrb[0].mxu1 %v1790_v38  ;;  %2129 = vmatpush3.bf16.msra.mxu0 %v2297_v41  ;;  %v2320_v38 = vld [vmem:[%s2377_s20 + $0x170] sm:$0xff]   ;;  %v284_v41 = vld [vmem:[%s2414_s23 + $0x180] sm:$0xff]  ;;  %v259_v17 = vld [vmem:[%s2414_s23 + $0xb8] sm:$0xff] }
  0x34   : > { %2193 = vmatpush3.bf16.msra.mxu1 %v2299_v43  ;;  %1172 = vmatprep.mubr.bf16.mxu0 %v1797_v46  ;;  %v2323_v43 = vld [vmem:[%s2377_s20 + $0x1b0] sm:$0xff]   ;;  %v2324_v46 = vld [vmem:[%s2377_s20 + $0x178] sm:$0xff]   ;;  %v1836_v58 = vcombine.low %v284_v41, %v288_v42  ;;  %v1810_v27 = vcombine.low %v255_v16, %v259_v17 }
  0x35   : > { %1269 = vmatprep.mubr.bf16.mxu1 %v1799_v49  ;;  %2130 = vmatprep.subr.bf16.mxu0 %v2300_v50  ;;  %v1830_v49 = vcombine.low %v277_v29, %v281_v30  ;;  %v1837_v50 = vcombine.high %v284_v41, %v288_v42  ;;  %v270_v30 = vld [vmem:[%s2414_s23 + $0x110] sm:$0xff]  ;;  %v283_v41 = vld [vmem:[%s2414_s23 + $0x178] sm:$0xff] }
  0x36   : > { %2194 = vmatprep.subr.bf16.mxu1 %v2302_v54  ;;  %v292_v54 = vld [vmem:[%s2414_s23 + $0x1c0] sm:$0xff] }
  0x37   : > { %2131 = vmatpush3.bf16.msra.mxu0 %v2301_v52  ;;  %v1839_v52 = vcombine.high %v285_v44, %v289_v45 }
  0x38   : > { %2195 = vmatpush3.bf16.msra.mxu1 %v2303_v55  ;;  %2132 = vmatprep.subr.bf16.mxu0 %v2304_v62  ;;  %v296_v55 = vld [vmem:[%s2414_s23 + $0x1e0] sm:$0xff]  ;;  %v238_v62 = vld [vmem:[%s2414_s23 + $0x10] sm:$0xff] }
  0x39   : > { %2196 = vmatprep.subr.bf16.mxu1 %v2306_v0  ;;  %v239_v0 = vld [vmem:[%s2414_s23 + $0x18] sm:$0xff] }
  0x3a   : > { %1173 = vmatmul.mubr.bf16.gmra.mrb[4].mxu0 %v1796_v51  ;;  %v2326_v51 = vld [vmem:[%s2377_s20 + $0x1f8] sm:$0xff]  }
  0x3b   : > { %1270 = vmatmul.mubr.bf16.gmra.mrb[4].mxu1 %v1798_v53  ;;  %1180 = vmatprep.mubr.bf16.mxu0 %v1805_v60  ;;  %v2327_v53 = vld [vmem:[%s2377_s20 + $0x1b8] sm:$0xff]   ;;  %v1845_v60 = vcombine.high %v292_v54, %v296_v55 }
  0x3c   : > { %1277 = vmatprep.mubr.bf16.mxu1 %v1807_v61  ;;  %2133 = vmatpush3.bf16.msra.mxu0 %v2305_v63  ;;  %v1847_v61 = vcombine.high %v293_v56, %v297_v57  ;;  %v242_v63 = vld [vmem:[%s2414_s23 + $0x30] sm:$0xff]  ;;  %v295_v56 = vld [vmem:[%s2414_s23 + $0x1d8] sm:$0xff] }
  0x3d   : > { %2197 = vmatpush3.bf16.msra.mxu1 %v2307_v1  ;;  %2134 = vmatprep.subr.bf16.mxu0 %v2308_v10  ;;  %v243_v1 = vld [vmem:[%s2414_s23 + $0x38] sm:$0xff]  ;;  %v1793_v4 = vcombine.high %v238_v62, %v242_v63  ;;  %v1792_v10 = vcombine.low %v238_v62, %v242_v63 }
  0x3e   : > { %2198 = vmatprep.subr.bf16.mxu1 %v2310_v12  ;;  %v1795_v5 = vcombine.high %v239_v0, %v243_v1  ;;  %v299_v57 = vld [vmem:[%s2414_s23 + $0x1f8] sm:$0xff] }
  0x3f   : > { %v1850_v63 = vcombine.low %v295_v56, %v299_v57 }
  0x40   : > { %2135 = vmatpush3.bf16.msra.mxu0 %v2309_v11  ;;  %v1794_v11 = vcombine.low %v239_v0, %v243_v1 }
  0x41   : > { %2199 = vmatpush3.bf16.msra.mxu1 %v2311_v13  ;;  %2136 = vmatprep.subr.bf16.mxu0 %v2312_v18 }
  0x42   : > { %1181 = vmatmul.mubr.bf16.gmra.mrb[8].mxu0 %v1804_v2  ;;  %2200 = vmatprep.subr.bf16.mxu1 %v2314_v23  ;;  %v1844_v2 = vcombine.low %v292_v54, %v296_v55  ;;  %v266_v23 = vld [vmem:[%s2414_s23 + $0xf0] sm:$0xff] }
  0x43   : > { %1278 = vmatmul.mubr.bf16.gmra.mrb[8].mxu1 %v1806_v6  ;;  %1188 = vmatprep.mubr.bf16.mxu0 %v1813_v7  ;;  %v246_v6 = vld [vmem:[%s2414_s23 + $0x50] sm:$0xff] }
  0x44   : > { %1285 = vmatprep.mubr.bf16.mxu1 %v1815_v9  ;;  %2137 = vmatpush3.bf16.msra.mxu0 %v2313_v20  ;;  %v250_v7 = vld [vmem:[%s2414_s23 + $0x70] sm:$0xff]  ;;  %v251_v9 = vld [vmem:[%s2414_s23 + $0x78] sm:$0xff]  ;;  %v1809_v20 = vcombine.high %v254_v14, %v258_v15 }
  0x45   : > { %2201 = vmatpush3.bf16.msra.mxu1 %v2315_v25  ;;  %2138 = vmatprep.subr.bf16.mxu0 %v2316_v28  ;;  %v1801_v12 = vcombine.high %v246_v6, %v250_v7  ;;  %v1803_v13 = vcombine.high %v247_v8, %v251_v9  ;;  %v1800_v18 = vcombine.low %v246_v6, %v250_v7  ;;  %v267_v25 = vld [vmem:[%s2414_s23 + $0xf8] sm:$0xff]  ;;  %v294_v54 = vld [vmem:[%s2414_s23 + $0x1d0] sm:$0xff] }
  0x46   : > { %2202 = vmatprep.subr.bf16.mxu1 %v2318_v32  ;;  %v271_v32 = vld [vmem:[%s2414_s23 + $0x118] sm:$0xff]  ;;  %v298_v55 = vld [vmem:[%s2414_s23 + $0x1f0] sm:$0xff] }
  0x47   : > { %v1848_v62 = vcombine.low %v294_v54, %v298_v55 }
  0x48   : > { %2139 = vmatpush3.bf16.msra.mxu0 %v2317_v31  ;;  %v274_v31 = vld [vmem:[%s2414_s23 + $0x130] sm:$0xff] }
  0x49   : > { %2203 = vmatpush3.bf16.msra.mxu1 %v2319_v33  ;;  %2140 = vmatprep.subr.bf16.mxu0 %v2320_v38  ;;  %v275_v33 = vld [vmem:[%s2414_s23 + $0x138] sm:$0xff]  ;;  %v278_v38 = vld [vmem:[%s2414_s23 + $0x150] sm:$0xff]  ;;  %v1824_v42 = vcombine.low %v270_v30, %v274_v31 }
  0x4a   : > { %1189 = vmatmul.mubr.bf16.gmra.mrb[12].mxu0 %v1812_v19  ;;  %2204 = vmatprep.subr.bf16.mxu1 %v2322_v40  ;;  %v1802_v19 = vcombine.low %v247_v8, %v251_v9  ;;  %v279_v40 = vld [vmem:[%s2414_s23 + $0x158] sm:$0xff] }
  0x4b   : > { %1286 = vmatmul.mubr.bf16.gmra.mrb[12].mxu1 %v1814_v21  ;;  %1196 = vmatprep.mubr.bf16.mxu0 %v1821_v22  ;;  %v1811_v21 = vcombine.high %v255_v16, %v259_v17  ;;  %v262_v22 = vld [vmem:[%s2414_s23 + $0xd0] sm:$0xff]  ;;  %v1835_v45 = vcombine.high %v279_v40, %v283_v41 }
  0x4c   : > { %1293 = vmatprep.mubr.bf16.mxu1 %v1823_v24  ;;  %2141 = vmatpush3.bf16.msra.mxu0 %v2321_v39  ;;  %v263_v24 = vld [vmem:[%s2414_s23 + $0xd8] sm:$0xff]  ;;  %v1817_v28 = vcombine.high %v262_v22, %v266_v23  ;;  %v282_v39 = vld [vmem:[%s2414_s23 + $0x170] sm:$0xff] }
  0x4d   : > { %2205 = vmatpush3.bf16.msra.mxu1 %v2323_v43  ;;  %2142 = vmatprep.subr.bf16.mxu0 %v2324_v46  ;;  %v1819_v29 = vcombine.high %v263_v24, %v267_v25  ;;  %v1826_v43 = vcombine.low %v271_v32, %v275_v33  ;;  %v1833_v44 = vcombine.high %v278_v38, %v282_v39  ;;  %v286_v46 = vld [vmem:[%s2414_s23 + $0x190] sm:$0xff] }
  0x4e   : > { %2206 = vmatprep.subr.bf16.mxu1 %v2326_v51  ;;  %v1834_v51 = vcombine.low %v279_v40, %v283_v41 }
  0x50   : > { %2143 = vmatpush3.bf16.msra.mxu0 %v2325_v48  ;;  %v287_v48 = vld [vmem:[%s2414_s23 + $0x198] sm:$0xff] }
  0x51   : > { %2207 = vmatpush3.bf16.msra.mxu1 %v2327_v53 }
  0x52   : > { %1197 = vmatmul.mubr.bf16.gmra.mrb[16].mxu0 %v1820_v34  ;;  %v1816_v34 = vcombine.low %v262_v22, %v266_v23 }
  0x53   : > { %1294 = vmatmul.mubr.bf16.gmra.mrb[16].mxu1 %v1822_v35  ;;  %1204 = vmatprep.mubr.bf16.mxu0 %v1829_v36  ;;  %v1818_v35 = vcombine.low %v263_v24, %v267_v25  ;;  %v1825_v36 = vcombine.high %v270_v30, %v274_v31 }
  0x54   : > { %1301 = vmatprep.mubr.bf16.mxu1 %v1831_v37  ;;  %v1827_v37 = vcombine.high %v271_v32, %v275_v33 }
  0x5a   : > { %1205 = vmatmul.mubr.bf16.gmra.mrb[20].mxu0 %v1828_v47  ;;  %v290_v47 = vld [vmem:[%s2414_s23 + $0x1b0] sm:$0xff] }
  0x5b   : > { %1302 = vmatmul.mubr.bf16.gmra.mrb[20].mxu1 %v1830_v49  ;;  %1212 = vmatprep.mubr.bf16.mxu0 %v1837_v50  ;;  %v291_v49 = vld [vmem:[%s2414_s23 + $0x1b8] sm:$0xff]  ;;  %v1832_v50 = vcombine.low %v278_v38, %v282_v39 }
  0x5c   : > { %1309 = vmatprep.mubr.bf16.mxu1 %v1839_v52  ;;  %v1841_v52 = vcombine.high %v286_v46, %v290_v47  ;;  %v1843_v53 = vcombine.high %v287_v48, %v291_v49 }
  0x62   : > { %1213 = vmatmul.mubr.bf16.gmra.mrb[24].mxu0 %v1836_v58  ;;  %v1840_v58 = vcombine.low %v286_v46, %v290_v47 }
  0x63   : > { %1310 = vmatmul.mubr.bf16.gmra.mrb[24].mxu1 %v1838_v59  ;;  %1220 = vmatprep.mubr.bf16.mxu0 %v1845_v60  ;;  %v1842_v59 = vcombine.low %v287_v48, %v291_v49  ;;  %v1849_v60 = vcombine.high %v294_v54, %v298_v55 }
  0x64   : > { %1317 = vmatprep.mubr.bf16.mxu1 %v1847_v61  ;;  %v1851_v61 = vcombine.high %v295_v56, %v299_v57 }
  0x6a   : > { %1221 = vmatmul.mubr.bf16.gmra.mrb[28].mxu0 %v1844_v2 }
  0x6b   : > { %1318 = vmatmul.mubr.bf16.gmra.mrb[28].mxu1 %v1846_v3  ;;  %1358 = vmatprep.mubr.bf16.mxu0 %v1793_v4 }
  0x6c   : > { %1455 = vmatprep.mubr.bf16.mxu1 %v1795_v5 }
  0x72   : > { %1359 = vmatmul.mubr.bf16.vlgmr.msra.gmra.mrb[32].mxu0 %v1792_v10 }
  0x73   : > { %1456 = vmatmul.mubr.bf16.vlgmr.msra.gmra.mrb[32].mxu1 %v1794_v11  ;;  %1366 = vmatprep.mubr.bf16.mxu0 %v1801_v12 }
  0x74   : > { %1463 = vmatprep.mubr.bf16.mxu1 %v1803_v13 }
  0x7a   : > { %1367 = vmatmul.mubr.bf16.gmra.mrb[36].mxu0 %v1800_v18 }
  0x7b   : > { %1464 = vmatmul.mubr.bf16.gmra.mrb[36].mxu1 %v1802_v19  ;;  %1374 = vmatprep.mubr.bf16.mxu0 %v1809_v20 }
  0x7c   : > { %1471 = vmatprep.mubr.bf16.mxu1 %v1811_v21 }
  0x82   : > { %1375 = vmatmul.mubr.bf16.gmra.mrb[40].mxu0 %v1808_v26 }
  0x83   : > { %1472 = vmatmul.mubr.bf16.gmra.mrb[40].mxu1 %v1810_v27  ;;  %1382 = vmatprep.mubr.bf16.mxu0 %v1817_v28 }
  0x84   : > { %1479 = vmatprep.mubr.bf16.mxu1 %v1819_v29 }
  0x8a   : > { %1383 = vmatmul.mubr.bf16.gmra.mrb[44].mxu0 %v1816_v34 }
  0x8b   : > { %1480 = vmatmul.mubr.bf16.gmra.mrb[44].mxu1 %v1818_v35  ;;  %1390 = vmatprep.mubr.bf16.mxu0 %v1825_v36 }
  0x8c   : > { %1487 = vmatprep.mubr.bf16.mxu1 %v1827_v37 }
  0x92   : > { %1391 = vmatmul.mubr.bf16.gmra.mrb[48].mxu0 %v1824_v42 }
  0x93   : > { %1488 = vmatmul.mubr.bf16.gmra.mrb[48].mxu1 %v1826_v43  ;;  %1398 = vmatprep.mubr.bf16.mxu0 %v1833_v44 }
  0x94   : > { %1495 = vmatprep.mubr.bf16.mxu1 %v1835_v45 }
  0x9a   : > { %1399 = vmatmul.mubr.bf16.gmra.mrb[52].mxu0 %v1832_v50 }
  0x9b   : > { %1496 = vmatmul.mubr.bf16.gmra.mrb[52].mxu1 %v1834_v51  ;;  %1406 = vmatprep.mubr.bf16.mxu0 %v1841_v52 }
  0x9c   : > { %1503 = vmatprep.mubr.bf16.mxu1 %v1843_v53 }
  0xa2   : > { %1407 = vmatmul.mubr.bf16.gmra.mrb[56].mxu0 %v1840_v58 }
  0xa3   : > { %1504 = vmatmul.mubr.bf16.gmra.mrb[56].mxu1 %v1842_v59  ;;  %1414 = vmatprep.mubr.bf16.mxu0 %v1849_v60 }
  0xa4   : > { %1511 = vmatprep.mubr.bf16.mxu1 %v1851_v61 }
  0xaa   : > { %1415 = vmatmul.mubr.bf16.gmra.mrb[60].mxu0 %v1848_v62 }
  0xab   : > { %1512 = vmatmul.mubr.bf16.gmra.mrb[60].mxu1 %v1850_v63 }
 0x105   : > { %v2016_v0 = vpop.f32.mrb[0].mxu0 }
 0x106   : > { %v2080_v1 = vpop.f32.mrb[0].mxu1  ;;  %v2017_v2 = vpop.f32.mrb[1].mxu0 }
 0x107   : > { %v2018_v3 = vadd.f32 %v2017_v2, %v2016_v0  ;;  %v2081_v4 = vpop.f32.mrb[1].mxu1  ;;  %v2019_v5 = vpop.f32.mrb[2].mxu0 }
 0x108   : > { %v2082_v6 = vadd.f32 %v2081_v4, %v2080_v1  ;;  %v2083_v7 = vpop.f32.mrb[2].mxu1  ;;  %v2020_v8 = vpop.f32.mrb[3].mxu0 }
 0x109   : > { %v2021_v9 = vadd.f32 %v2020_v8, %v2019_v5  ;;  %v2084_v10 = vpop.f32.mrb[3].mxu1 }
 0x10a   : > { %v2514_v11 = vadd.f32 %v2082_v6, %v2018_v3  ;;  %v2085_v12 = vadd.f32 %v2084_v10, %v2083_v7 }
 0x10c   : > { %v2516_v13 = vadd.f32 %v2085_v12, %v2021_v9 }
 0x10d   : > { %v2022_v14 = vpop.f32.mrb[4].mxu0 }
 0x10e   : > { %v2086_v15 = vpop.f32.mrb[4].mxu1  ;;  %v2023_v16 = vpop.f32.mrb[5].mxu0 }
 0x10f   : > { %v2024_v17 = vadd.f32 %v2023_v16, %v2022_v14  ;;  %v2087_v18 = vpop.f32.mrb[5].mxu1  ;;  %v2025_v19 = vpop.f32.mrb[6].mxu0 }
 0x110   : > { %v2088_v20 = vadd.f32 %v2087_v18, %v2086_v15  ;;  %v2089_v21 = vpop.f32.mrb[6].mxu1  ;;  %v2026_v22 = vpop.f32.mrb[7].mxu0 }
 0x111   : > { %v2027_v23 = vadd.f32 %v2026_v22, %v2025_v19  ;;  %v2090_v24 = vpop.f32.mrb[7].mxu1 }
 0x112   : > { %v2518_v25 = vadd.f32 %v2088_v20, %v2024_v17  ;;  %v2091_v26 = vadd.f32 %v2090_v24, %v2089_v21 }
 0x114   : > { %v2520_v27 = vadd.f32 %v2091_v26, %v2027_v23 }
 0x115   : > { %v2028_v28 = vpop.f32.mrb[8].mxu0 }
 0x116   : > { %v2092_v29 = vpop.f32.mrb[8].mxu1  ;;  %v2029_v30 = vpop.f32.mrb[9].mxu0 }
 0x117   : > { %v2030_v31 = vadd.f32 %v2029_v30, %v2028_v28  ;;  %v2093_v32 = vpop.f32.mrb[9].mxu1  ;;  %v2031_v33 = vpop.f32.mrb[10].mxu0 }
 0x118   : > { %v2094_v34 = vadd.f32 %v2093_v32, %v2092_v29  ;;  %v2095_v35 = vpop.f32.mrb[10].mxu1  ;;  %v2032_v36 = vpop.f32.mrb[11].mxu0 }
 0x119   : > { %v2033_v37 = vadd.f32 %v2032_v36, %v2031_v33  ;;  %v2096_v38 = vpop.f32.mrb[11].mxu1 }
 0x11a   : > { %v2522_v39 = vadd.f32 %v2094_v34, %v2030_v31  ;;  %v2097_v40 = vadd.f32 %v2096_v38, %v2095_v35 }
 0x11c   : > { %v2524_v41 = vadd.f32 %v2097_v40, %v2033_v37 }
 0x11d   : > { %v2034_v42 = vpop.f32.mrb[12].mxu0 }
 0x11e   : > { %v2098_v43 = vpop.f32.mrb[12].mxu1  ;;  %v2035_v44 = vpop.f32.mrb[13].mxu0 }
 0x11f   : > { %v2036_v45 = vadd.f32 %v2035_v44, %v2034_v42  ;;  %v2099_v46 = vpop.f32.mrb[13].mxu1  ;;  %v2037_v47 = vpop.f32.mrb[14].mxu0 }
 0x120   : > { %v2100_v48 = vadd.f32 %v2099_v46, %v2098_v43  ;;  %v2101_v49 = vpop.f32.mrb[14].mxu1  ;;  %v2038_v50 = vpop.f32.mrb[15].mxu0 }
 0x121   : > { %v2039_v51 = vadd.f32 %v2038_v50, %v2037_v47  ;;  %v2102_v52 = vpop.f32.mrb[15].mxu1 }
 0x122   : > { %v2526_v53 = vadd.f32 %v2100_v48, %v2036_v45  ;;  %v2103_v54 = vadd.f32 %v2102_v52, %v2101_v49 }
 0x124   : > { %v2528_v55 = vadd.f32 %v2103_v54, %v2039_v51 }
 0x125   : > { %v2040_v56 = vpop.f32.mrb[16].mxu0 }
 0x126   : > { %v2104_v57 = vpop.f32.mrb[16].mxu1  ;;  %v2041_v58 = vpop.f32.mrb[17].mxu0 }
 0x127   : > { %v2042_v59 = vadd.f32 %v2041_v58, %v2040_v56  ;;  %v2105_v60 = vpop.f32.mrb[17].mxu1  ;;  %v2043_v61 = vpop.f32.mrb[18].mxu0 }
 0x128   : > { %v2106_v62 = vadd.f32 %v2105_v60, %v2104_v57  ;;  %v2107_v63 = vpop.f32.mrb[18].mxu1  ;;  %v2044_v0 = vpop.f32.mrb[19].mxu0 }
 0x129   : > { %v2045_v1 = vadd.f32 %v2044_v0, %v2043_v61  ;;  %v2108_v2 = vpop.f32.mrb[19].mxu1 }
 0x12a   : > { %v2530_v3 = vadd.f32 %v2106_v62, %v2042_v59  ;;  %v2109_v4 = vadd.f32 %v2108_v2, %v2107_v63 }
 0x12c   : > { %v2532_v5 = vadd.f32 %v2109_v4, %v2045_v1 }
 0x12d   : > { %v2046_v6 = vpop.f32.mrb[20].mxu0 }
 0x12e   : > { %v2110_v7 = vpop.f32.mrb[20].mxu1  ;;  %v2047_v8 = vpop.f32.mrb[21].mxu0 }
 0x12f   : > { %v2048_v9 = vadd.f32 %v2047_v8, %v2046_v6  ;;  %v2111_v10 = vpop.f32.mrb[21].mxu1  ;;  %v2049_v12 = vpop.f32.mrb[22].mxu0 }
 0x130   : > { %v2112_v14 = vadd.f32 %v2111_v10, %v2110_v7  ;;  %v2113_v15 = vpop.f32.mrb[22].mxu1  ;;  %v2050_v16 = vpop.f32.mrb[23].mxu0 }
 0x131   : > { %v2051_v17 = vadd.f32 %v2050_v16, %v2049_v12  ;;  %v2114_v18 = vpop.f32.mrb[23].mxu1 }
 0x132   : > { %v2534_v19 = vadd.f32 %v2112_v14, %v2048_v9  ;;  %v2115_v20 = vadd.f32 %v2114_v18, %v2113_v15 }
 0x134   : > { %v2536_v21 = vadd.f32 %v2115_v20, %v2051_v17 }
 0x135   : > { %v2052_v22 = vpop.f32.mrb[24].mxu0 }
 0x136   : > { %v2116_v23 = vpop.f32.mrb[24].mxu1  ;;  %v2053_v24 = vpop.f32.mrb[25].mxu0 }
 0x137   : > { %v2054_v26 = vadd.f32 %v2053_v24, %v2052_v22  ;;  %v2117_v28 = vpop.f32.mrb[25].mxu1  ;;  %v2055_v29 = vpop.f32.mrb[26].mxu0 }
 0x138   : > { %v2118_v30 = vadd.f32 %v2117_v28, %v2116_v23  ;;  %v2119_v31 = vpop.f32.mrb[26].mxu1  ;;  %v2056_v32 = vpop.f32.mrb[27].mxu0 }
 0x139   : > { %v2057_v33 = vadd.f32 %v2056_v32, %v2055_v29  ;;  %v2120_v34 = vpop.f32.mrb[27].mxu1 }
 0x13a   : > { %v2538_v35 = vadd.f32 %v2118_v30, %v2054_v26  ;;  %v2121_v36 = vadd.f32 %v2120_v34, %v2119_v31 }
 0x13c   : > { %v2540_v37 = vadd.f32 %v2121_v36, %v2057_v33 }
 0x13d   : > { %v2058_v38 = vpop.f32.mrb[28].mxu0 }
 0x13e   : > { %v2122_v40 = vpop.f32.mrb[28].mxu1  ;;  %v2059_v42 = vpop.f32.mrb[29].mxu0 }
 0x13f   : > { %v2060_v43 = vadd.f32 %v2059_v42, %v2058_v38  ;;  %v2123_v44 = vpop.f32.mrb[29].mxu1  ;;  %v2061_v45 = vpop.f32.mrb[30].mxu0 }
 0x140   : > { %v2124_v46 = vadd.f32 %v2123_v44, %v2122_v40  ;;  %v2125_v47 = vpop.f32.mrb[30].mxu1  ;;  %v2062_v48 = vpop.f32.mrb[31].mxu0 }
 0x141   : > { %v2063_v49 = vadd.f32 %v2062_v48, %v2061_v45  ;;  %v2126_v50 = vpop.f32.mrb[31].mxu1 }
 0x142   : > { %v2542_v51 = vadd.f32 %v2124_v46, %v2060_v43  ;;  %v2127_v52 = vadd.f32 %v2126_v50, %v2125_v47 }
 0x144   : > { %v2544_v54 = vadd.f32 %v2127_v52, %v2063_v49 }
 0x145   : > { %v2144_v56 = vpop.f32.mrb[32].mxu0 }
 0x146   : > { %v2208_v57 = vpop.f32.mrb[32].mxu1  ;;  %v2145_v58 = vpop.f32.mrb[33].mxu0 }
 0x147   : > { %v2146_v59 = vadd.f32 %v2145_v58, %v2144_v56  ;;  %v2209_v60 = vpop.f32.mrb[33].mxu1  ;;  %v2147_v61 = vpop.f32.mrb[34].mxu0 }
 0x148   : > { %v2210_v62 = vadd.f32 %v2209_v60, %v2208_v57  ;;  %v2211_v63 = vpop.f32.mrb[34].mxu1  ;;  %v2148_v0 = vpop.f32.mrb[35].mxu0 }
 0x149   : > { %v1361_v1 = vadd.f32 %v2146_v59, %v2514_v11  ;;  %v2149_v2 = vadd.f32 %v2148_v0, %v2147_v61  ;;  %v2212_v4 = vpop.f32.mrb[35].mxu1 }
 0x14a   : > { %v2213_v6 = vadd.f32 %v2212_v4, %v2211_v63 }
 0x14b   : > { %v1458_v7 = vadd.f32 %v2210_v62, %v1361_v1  ;;  %v1364_v8 = vadd.f32 %v2149_v2, %v2516_v13 }
 0x14d   : > { %v1461_v9 = vadd.f32 %v2213_v6, %v1364_v8  ;;  %v2150_v10 = vpop.f32.mrb[36].mxu0  ;;  %v1622_v12 = vmul.f32 %v1458_v7, %v1458_v7 }
 0x14e   : > { %v2214_v14 = vpop.f32.mrb[36].mxu1  ;;  %v2151_v15 = vpop.f32.mrb[37].mxu0 }
 0x14f   : > { %v1956_v16 = vpack.c.bf16 %v1461_v9, %v1458_v7  ;;  %v1600_v11 = vadd.f32 %v1461_v9, %v1458_v7  ;;  %v1623_v17 = vmul.f32 %v1461_v9, %v1461_v9  ;;  %v2152_v18 = vadd.f32 %v2151_v15, %v2150_v10  ;;  %v2215_v20 = vpop.f32.mrb[37].mxu1  ;;  %v2153_v22 = vpop.f32.mrb[38].mxu0 }
 0x150   : > { %v2216_v23 = vadd.f32 %v2215_v20, %v2214_v14  ;;  %v2217_v13 = vpop.f32.mrb[38].mxu1  ;;  %v2154_v24 = vpop.f32.mrb[39].mxu0 }
 0x151   : > { %1957 = vst [vmem:[%s2552_s27] sm:$0xff] %v1956_v16   ;;  %v1638_v26 = vadd.f32 %v1623_v17, %v1622_v12  ;;  %v1369_v28 = vadd.f32 %v2152_v18, %v2518_v25  ;;  %v2155_v29 = vadd.f32 %v2154_v24, %v2153_v22  ;;  %v2218_v30 = vpop.f32.mrb[39].mxu1 }
 0x152   : > { %v2219_v31 = vadd.f32 %v2218_v30, %v2217_v13 }
 0x153   : > { %v1466_v32 = vadd.f32 %v2216_v23, %v1369_v28  ;;  %v1372_v33 = vadd.f32 %v2155_v29, %v2520_v27 }
 0x155   : > { %v1601_v34 = vadd.f32 %v1600_v11, %v1466_v32  ;;  %v1624_v36 = vmul.f32 %v1466_v32, %v1466_v32  ;;  %v1469_v38 = vadd.f32 %v2219_v31, %v1372_v33  ;;  %v2156_v40 = vpop.f32.mrb[40].mxu0 }
 0x156   : > { %v2220_v42 = vpop.f32.mrb[40].mxu1  ;;  %v2157_v43 = vpop.f32.mrb[41].mxu0 }
 0x157   : > { %v1639_v44 = vadd.f32 %v1638_v26, %v1624_v36  ;;  %v1961_v45 = vpack.c.bf16 %v1469_v38, %v1466_v32  ;;  %v1602_v46 = vadd.f32 %v1601_v34, %v1469_v38  ;;  %v1625_v47 = vmul.f32 %v1469_v38, %v1469_v38  ;;  %v2221_v48 = vpop.f32.mrb[41].mxu1  ;;  %v2159_v49 = vpop.f32.mrb[42].mxu0 }
 0x158   : > { %v2158_v25 = vadd.f32 %v2157_v43, %v2156_v40  ;;  %v2222_v50 = vadd.f32 %v2221_v48, %v2220_v42  ;;  %v2223_v52 = vpop.f32.mrb[42].mxu1  ;;  %v2160_v56 = vpop.f32.mrb[43].mxu0 }
 0x159   : > { %1993 = vst [vmem:[%s2552_s27 + $0x8] sm:$0xff] %v1961_v45   ;;  %v1640_v57 = vadd.f32 %v1639_v44, %v1625_v47  ;;  %v2161_v27 = vadd.f32 %v2160_v56, %v2159_v49  ;;  %v2224_v58 = vpop.f32.mrb[43].mxu1 }
 0x15a   : > { %v1377_v59 = vadd.f32 %v2158_v25, %v2522_v39  ;;  %v2225_v60 = vadd.f32 %v2224_v58, %v2223_v52 }
 0x15b   : > { %v1380_v61 = vadd.f32 %v2161_v27, %v2524_v41 }
 0x15c   : > { %v1474_v62 = vadd.f32 %v2222_v50, %v1377_v59 }
 0x15d   : > { %v1477_v63 = vadd.f32 %v2225_v60, %v1380_v61  ;;  %v2162_v0 = vpop.f32.mrb[44].mxu0 }
 0x15e   : > { %v1603_v1 = vadd.f32 %v1602_v46, %v1474_v62  ;;  %v1626_v2 = vmul.f32 %v1474_v62, %v1474_v62  ;;  %v2226_v4 = vpop.f32.mrb[44].mxu1  ;;  %v2163_v6 = vpop.f32.mrb[45].mxu0 }
 0x15f   : > { %v1966_v7 = vpack.c.bf16 %v1477_v63, %v1474_v62  ;;  %v1627_v8 = vmul.f32 %v1477_v63, %v1477_v63  ;;  %v2164_v9 = vadd.f32 %v2163_v6, %v2162_v0  ;;  %v2227_v10 = vpop.f32.mrb[45].mxu1  ;;  %v2165_v12 = vpop.f32.mrb[46].mxu0 }
 0x160   : > { %v1641_v14 = vadd.f32 %v1640_v57, %v1626_v2  ;;  %v1604_v15 = vadd.f32 %v1603_v1, %v1477_v63  ;;  %v2228_v16 = vadd.f32 %v2227_v10, %v2226_v4  ;;  %v2229_v39 = vpop.f32.mrb[46].mxu1  ;;  %v2166_v11 = vpop.f32.mrb[47].mxu0 }
 0x161   : > { %1994 = vst [vmem:[%s2552_s27 + $0x10] sm:$0xff] %v1966_v7   ;;  %v1385_v41 = vadd.f32 %v2164_v9, %v2526_v53  ;;  %v2167_v17 = vadd.f32 %v2166_v11, %v2165_v12  ;;  %v2230_v18 = vpop.f32.mrb[47].mxu1 }
 0x162   : > { %v1642_v20 = vadd.f32 %v1641_v14, %v1627_v8  ;;  %v2231_v22 = vadd.f32 %v2230_v18, %v2229_v39 }
 0x163   : > { %v1482_v23 = vadd.f32 %v2228_v16, %v1385_v41  ;;  %v1388_v13 = vadd.f32 %v2167_v17, %v2528_v55 }
 0x165   : > { %v1605_v24 = vadd.f32 %v1604_v15, %v1482_v23  ;;  %v1628_v26 = vmul.f32 %v1482_v23, %v1482_v23  ;;  %v1485_v28 = vadd.f32 %v2231_v22, %v1388_v13  ;;  %v2168_v29 = vpop.f32.mrb[48].mxu0 }
 0x166   : > { %v2232_v30 = vpop.f32.mrb[48].mxu1  ;;  %v2169_v31 = vpop.f32.mrb[49].mxu0 }
 0x167   : > { %v1643_v32 = vadd.f32 %v1642_v20, %v1628_v26  ;;  %v1971_v33 = vpack.c.bf16 %v1485_v28, %v1482_v23  ;;  %v1606_v34 = vadd.f32 %v1605_v24, %v1485_v28  ;;  %v1629_v36 = vmul.f32 %v1485_v28, %v1485_v28  ;;  %v2233_v38 = vpop.f32.mrb[49].mxu1  ;;  %v2171_v53 = vpop.f32.mrb[50].mxu0 }
 0x168   : > { %v2170_v40 = vadd.f32 %v2169_v31, %v2168_v29  ;;  %v2234_v42 = vadd.f32 %v2233_v38, %v2232_v30  ;;  %v2235_v43 = vpop.f32.mrb[50].mxu1  ;;  %v2172_v44 = vpop.f32.mrb[51].mxu0 }
 0x169   : > { %1995 = vst [vmem:[%s2552_s27 + $0x18] sm:$0xff] %v1971_v33   ;;  %v1644_v45 = vadd.f32 %v1643_v32, %v1629_v36  ;;  %v2173_v55 = vadd.f32 %v2172_v44, %v2171_v53  ;;  %v2236_v46 = vpop.f32.mrb[51].mxu1 }
 0x16a   : > { %v1393_v47 = vadd.f32 %v2170_v40, %v2530_v3  ;;  %v2237_v48 = vadd.f32 %v2236_v46, %v2235_v43 }
 0x16b   : > { %v1396_v49 = vadd.f32 %v2173_v55, %v2532_v5 }
 0x16c   : > { %v1490_v25 = vadd.f32 %v2234_v42, %v1393_v47 }
 0x16d   : > { %v1493_v50 = vadd.f32 %v2237_v48, %v1396_v49  ;;  %v2174_v52 = vpop.f32.mrb[52].mxu0 }
 0x16e   : > { %v1607_v56 = vadd.f32 %v1606_v34, %v1490_v25  ;;  %v1630_v57 = vmul.f32 %v1490_v25, %v1490_v25  ;;  %v2238_v27 = vpop.f32.mrb[52].mxu1  ;;  %v2175_v58 = vpop.f32.mrb[53].mxu0 }
 0x16f   : > { %v1976_v59 = vpack.c.bf16 %v1493_v50, %v1490_v25  ;;  %v1631_v60 = vmul.f32 %v1493_v50, %v1493_v50  ;;  %v2176_v61 = vadd.f32 %v2175_v58, %v2174_v52  ;;  %v2239_v62 = vpop.f32.mrb[53].mxu1  ;;  %v2177_v63 = vpop.f32.mrb[54].mxu0 }
 0x170   : > { %v1645_v0 = vadd.f32 %v1644_v45, %v1630_v57  ;;  %v1608_v1 = vadd.f32 %v1607_v56, %v1493_v50  ;;  %v2240_v2 = vadd.f32 %v2239_v62, %v2238_v27  ;;  %v2241_v3 = vpop.f32.mrb[54].mxu1  ;;  %v2178_v4 = vpop.f32.mrb[55].mxu0 }
 0x171   : > { %1996 = vst [vmem:[%s2552_s27 + $0x20] sm:$0xff] %v1976_v59   ;;  %v1401_v5 = vadd.f32 %v2176_v61, %v2534_v19  ;;  %v2179_v6 = vadd.f32 %v2178_v4, %v2177_v63  ;;  %v2242_v7 = vpop.f32.mrb[55].mxu1 }
 0x172   : > { %v1646_v8 = vadd.f32 %v1645_v0, %v1631_v60  ;;  %v2243_v9 = vadd.f32 %v2242_v7, %v2241_v3 }
 0x173   : > { %v1498_v10 = vadd.f32 %v2240_v2, %v1401_v5  ;;  %v1404_v12 = vadd.f32 %v2179_v6, %v2536_v21 }
 0x175   : > { %v1609_v14 = vadd.f32 %v1608_v1, %v1498_v10  ;;  %v1632_v15 = vmul.f32 %v1498_v10, %v1498_v10  ;;  %v1501_v16 = vadd.f32 %v2243_v9, %v1404_v12  ;;  %v2180_v39 = vpop.f32.mrb[56].mxu0 }
 0x176   : > { %v2244_v11 = vpop.f32.mrb[56].mxu1  ;;  %v2181_v41 = vpop.f32.mrb[57].mxu0 }
 0x177   : > { %v1647_v17 = vadd.f32 %v1646_v8, %v1632_v15  ;;  %v1981_v18 = vpack.c.bf16 %v1501_v16, %v1498_v10  ;;  %v1610_v20 = vadd.f32 %v1609_v14, %v1501_v16  ;;  %v1633_v22 = vmul.f32 %v1501_v16, %v1501_v16  ;;  %v2245_v23 = vpop.f32.mrb[57].mxu1  ;;  %v2183_v19 = vpop.f32.mrb[58].mxu0 }
 0x178   : > { %v2182_v13 = vadd.f32 %v2181_v41, %v2180_v39  ;;  %v2246_v24 = vadd.f32 %v2245_v23, %v2244_v11  ;;  %v2247_v26 = vpop.f32.mrb[58].mxu1  ;;  %v2184_v28 = vpop.f32.mrb[59].mxu0 }
 0x179   : > { %1997 = vst [vmem:[%s2552_s27 + $0x28] sm:$0xff] %v1981_v18   ;;  %v1648_v29 = vadd.f32 %v1647_v17, %v1633_v22  ;;  %v2185_v21 = vadd.f32 %v2184_v28, %v2183_v19  ;;  %v2248_v30 = vpop.f32.mrb[59].mxu1 }
 0x17a   : > { %v1409_v31 = vadd.f32 %v2182_v13, %v2538_v35  ;;  %v2249_v32 = vadd.f32 %v2248_v30, %v2247_v26 }
 0x17b   : > { %v1412_v33 = vadd.f32 %v2185_v21, %v2540_v37 }
 0x17c   : > { %v1506_v34 = vadd.f32 %v2246_v24, %v1409_v31 }
 0x17d   : > { %v1509_v36 = vadd.f32 %v2249_v32, %v1412_v33  ;;  %v2186_v38 = vpop.f32.mrb[60].mxu0 }
 0x17e   : > { %v1611_v53 = vadd.f32 %v1610_v20, %v1506_v34  ;;  %v1634_v40 = vmul.f32 %v1506_v34, %v1506_v34  ;;  %v2250_v42 = vpop.f32.mrb[60].mxu1  ;;  %v2187_v43 = vpop.f32.mrb[61].mxu0 }
 0x17f   : > { %v1986_v44 = vpack.c.bf16 %v1509_v36, %v1506_v34  ;;  %v1635_v45 = vmul.f32 %v1509_v36, %v1509_v36  ;;  %v2188_v55 = vadd.f32 %v2187_v43, %v2186_v38  ;;  %v2251_v46 = vpop.f32.mrb[61].mxu1  ;;  %v2189_v47 = vpop.f32.mrb[62].mxu0 }
 0x180   : > { %v1649_v48 = vadd.f32 %v1648_v29, %v1634_v40  ;;  %v1612_v49 = vadd.f32 %v1611_v53, %v1509_v36  ;;  %v2252_v25 = vadd.f32 %v2251_v46, %v2250_v42  ;;  %v2253_v35 = vpop.f32.mrb[62].mxu1  ;;  %v2190_v50 = vpop.f32.mrb[63].mxu0 }
 0x181   : > { %1998 = vst [vmem:[%s2552_s27 + $0x30] sm:$0xff] %v1986_v44   ;;  %v1417_v37 = vadd.f32 %v2188_v55, %v2542_v51  ;;  %v2191_v52 = vadd.f32 %v2190_v50, %v2189_v47  ;;  %v2254_v56 = vpop.f32.mrb[63].mxu1 }
 0x182   : > { %v1650_v57 = vadd.f32 %v1649_v48, %v1635_v45  ;;  %v2255_v27 = vadd.f32 %v2254_v56, %v2253_v35 }
 0x183   : > { %v1514_v58 = vadd.f32 %v2252_v25, %v1417_v37  ;;  %v1420_v59 = vadd.f32 %v2191_v52, %v2544_v54 }
 0x185   : > { %v1613_v60 = vadd.f32 %v1612_v49, %v1514_v58  ;;  %v1636_v61 = vmul.f32 %v1514_v58, %v1514_v58  ;;  %v1517_v62 = vadd.f32 %v2255_v27, %v1420_v59 }
 0x187   : > { %v1651_v63 = vadd.f32 %v1650_v57, %v1636_v61  ;;  %v1991_v0 = vpack.c.bf16 %v1517_v62, %v1514_v58  ;;  %v1614_v1 = vadd.f32 %v1613_v60, %v1517_v62  ;;  %v1637_v2 = vmul.f32 %v1517_v62, %v1517_v62 }
 0x189   : > { %1999 = vst [vmem:[%s2552_s27 + $0x38] sm:$0xff] %v1991_v0   ;;  %v1615_v3 = vrot.slane %v1614_v1, 4  ;;  %v1652_v4 = vadd.f32 %v1651_v63, %v1637_v2 }
 0x18b   : > { %v1616_v51 = vadd.f32 %v1615_v3, %v1614_v1  ;;  %v1653_v5 = vrot.slane %v1652_v4, 4 }
 0x18d   : > { %v1617_v6 = vrot.slane %v1616_v51, 2  ;;  %v1654_v7 = vadd.f32 %v1653_v5, %v1652_v4 }
 0x18f   : > { %v1618_v8 = vadd.f32 %v1617_v6, %v1616_v51  ;;  %v1655_v9 = vrot.slane %v1654_v7, 2 }
 0x191   : > { %v1619_v10 = vrot.slane %v1618_v8, 1  ;;  %v1656_v54 = vadd.f32 %v1655_v9, %v1654_v7 }
 0x193   : > { %v1620_v12 = vadd.f32 %v1619_v10, %v1618_v8  ;;  %v1657_v14 = vrot.slane %v1656_v54, 1 }
 0x195   : > { %1621 = vst [vmem:[%s231_s30] sm:$0x1] %v1620_v12  ;;  %v1658_v15 = vadd.f32 %v1657_v14, %v1656_v54 }
 0x197   : > { %1659 = vst [vmem:[%s234_s7] sm:$0x1] %v1658_v15 }
 0x198 PF: > { %s15_s15 = sadd.s32 1, %s2334_s15  }
 0x199   : > { %p12_p4 = scmp.ge.s32.totalorder %s15_s15, 6  }
 0x19b   :  { %14 = sbr.rel (!%p12_p4) target bundleno = 1 (0x1), region = 85 }

// kernel: generator_forward.8
= control target key start
LH: loop header
LB: loop body
LE: loop exit
PB: predicated region body
PF: predicated region fallthrough
CT: control target
= control target key end

     0   :  { %s3245_s15 = smov 0   ;;  %s3735_s0 = inlined_call_operand.vmem [shape: bf16[4,512,512], index: 0, kind: input, shape index: {}]   ;;  %s3736_s1 = inlined_call_operand.vmem [shape: bf16[4,512,64], index: 1, kind: input, shape index: {}]   ;;  %s3737_s2 = inlined_call_operand.vmem [shape: bf16[4,512,64], index: 2, kind: output, shape index: {0}]   ;;  %s3738_s3 = inlined_call_operand.vmem [shape: f32[4,1,64], index: 3, kind: output, shape index: {1}]   ;;  %s3739_s4 = inlined_call_operand.vmem [shape: f32[4,1,64], index: 4, kind: output, shape index: {2}]  }
   0x1 LB: > { %s2610_s16 = sadd.s32 4294967295, %s3217_s15   ;;  %p2614_p0 = scmp.ge.s32.totalorder %s3217_s15, 1  ;;  %s3217_s15 = sphi %s3245_s15, %s15_s15  }
   0x2   : > { %p177_p1 = scmp.lt.s32.totalorder %s3217_s15, 5 }
   0x4   : > { %p178_p2 = pnand %p2614_p0, %p177_p1 }
   0x5   : > { %p214_p3 = scmp.lt.s32.totalorder (!%p178_p2), %s2610_s16, 3  ;;  %v3219_v0 = vmov (!%p178_p2), 0   ;;  %vm2094_vm0 = vcmask (!%p178_p2), 519168   ;;  %vm2159_vm1 = vcmask (!%p178_p2), 523264   ;;  %vm2293_vm2 = vcmask (!%p178_p2), 516096  }
   0x6   : > { %181 = sbr.rel (%p178_p2) target bundleno = 563 (0x233), region = 28  ;;  %1260 = vmatprep.subr.bf16.mxu1 (!%p178_p2), %v3219_v0  ;;  %1549 = vmatprep.subr.bf16.mxu0 (!%p178_p2), %v3219_v0 }
   0xd   : > { %s3741_s16 = smov (!%p214_p3, %s2610_s16), 3 }
   0xe   : > { %s2848_s17 = sshll.u32 %s3741_s16, 8  ;;  %s2847_s21 = sshll.u32 %s3741_s16, 10 }
   0xf   : > { %s3263_s20 = scalar_lea.vmem %s3736_s1, %s2848_s17  ;;  %s3299_s24 = scalar_lea.vmem %s3735_s0, %s2847_s21 }
  0x10   : > { %v2987_v1 = vld [vmem:[%s3263_s20] sm:$0xff]   ;;  %v2989_v3 = vld [vmem:[%s3263_s20 + $0x8] sm:$0xff]   ;;  %v2991_v5 = vld [vmem:[%s3263_s20 + $0x10] sm:$0xff]   ;;  %s3451_s27 = scalar_lea.vmem %s3737_s2, %s2848_s17  ;;  %s231_s30 = scalar_lea.vmem %s3738_s3, %s3741_s16 }
  0x11   : > { %v2988_v2 = vld [vmem:[%s3263_s20 + $0x80] sm:$0xff]   ;;  %1261 = vmatpush1.bf16.msra.mxu1 %v2987_v1  ;;  %v2990_v4 = vld [vmem:[%s3263_s20 + $0x88] sm:$0xff]   ;;  %v2992_v6 = vld [vmem:[%s3263_s20 + $0x90] sm:$0xff]   ;;  %s234_s7 = scalar_lea.vmem %s3739_s4, %s3741_s16 }
  0x12   : > { %1550 = vmatpush1.bf16.msra.mxu0 %v2988_v2  ;;  %1262 = vmatprep.subr.bf16.mxu1 %v3219_v0  ;;  %v2993_v7 = vld [vmem:[%s3263_s20 + $0x18] sm:$0xff]   ;;  %v2995_v9 = vld [vmem:[%s3263_s20 + $0x20] sm:$0xff]   ;;  %v2997_v11 = vld [vmem:[%s3263_s20 + $0x28] sm:$0xff]  }
  0x13   : > { %1551 = vmatprep.subr.bf16.mxu0 %v3219_v0  ;;  %v2994_v8 = vld [vmem:[%s3263_s20 + $0x98] sm:$0xff]   ;;  %v2996_v10 = vld [vmem:[%s3263_s20 + $0xa0] sm:$0xff]   ;;  %v2998_v12 = vld [vmem:[%s3263_s20 + $0xa8] sm:$0xff]  }
  0x14   : > { %v2999_v13 = vld [vmem:[%s3263_s20 + $0x30] sm:$0xff]   ;;  %v3001_v15 = vld [vmem:[%s3263_s20 + $0x38] sm:$0xff]   ;;  %v3003_v17 = vld [vmem:[%s3263_s20 + $0x40] sm:$0xff]  }
  0x15   : > { %1263 = vmatpush1.bf16.msra.mxu1 %v2989_v3  ;;  %v3000_v14 = vld [vmem:[%s3263_s20 + $0xb0] sm:$0xff]   ;;  %v3002_v16 = vld [vmem:[%s3263_s20 + $0xb8] sm:$0xff]   ;;  %v3004_v18 = vld [vmem:[%s3263_s20 + $0xc0] sm:$0xff]  }
  0x16   : > { %1552 = vmatpush1.bf16.msra.mxu0 %v2990_v4  ;;  %1264 = vmatprep.subr.bf16.mxu1 %v3219_v0  ;;  %v3021_v19 = vld [vmem:[%s3299_s24 + $0x4] ss:$16 sps:$4 sm:$0xff]   ;;  %v3005_v20 = vld [vmem:[%s3263_s20 + $0x48] sm:$0xff]   ;;  %v3009_v25 = vld [vmem:[%s3263_s20 + $0x58] sm:$0xff]  }
  0x17   : > { %1553 = vmatprep.subr.bf16.mxu0 %v3219_v0  ;;  %v3024_v21 = vld [vmem:[%s3299_s24 + $0xc] ss:$16 sps:$4 sm:$0xff]   ;;  %1292 = vmatprep.mubr.bf16.mxu1 %v3021_v19  ;;  %v3007_v23 = vld [vmem:[%s3263_s20 + $0x50] sm:$0xff]   ;;  %v3011_v27 = vld [vmem:[%s3263_s20 + $0x60] sm:$0xff]  }
  0x18   : > { %v3006_v22 = vld [vmem:[%s3263_s20 + $0xc8] sm:$0xff]   ;;  %1581 = vmatprep.mubr.bf16.mxu0 %v3024_v21  ;;  %v3008_v24 = vld [vmem:[%s3263_s20 + $0xd0] sm:$0xff]   ;;  %v3010_v26 = vld [vmem:[%s3263_s20 + $0xd8] sm:$0xff]  }
  0x19   : > { %1265 = vmatpush1.bf16.msra.mxu1 %v2991_v5  ;;  %v3012_v28 = vld [vmem:[%s3263_s20 + $0xe0] sm:$0xff]   ;;  %v3013_v29 = vld [vmem:[%s3263_s20 + $0x68] sm:$0xff]   ;;  %v3015_v31 = vld [vmem:[%s3263_s20 + $0x70] sm:$0xff]  }
  0x1a   : > { %1554 = vmatpush1.bf16.msra.mxu0 %v2992_v6  ;;  %1266 = vmatprep.subr.bf16.mxu1 %v3219_v0  ;;  %v3014_v30 = vld [vmem:[%s3263_s20 + $0xe8] sm:$0xff]   ;;  %v3016_v32 = vld [vmem:[%s3263_s20 + $0xf0] sm:$0xff]   ;;  %v3017_v33 = vld [vmem:[%s3263_s20 + $0x78] sm:$0xff]  }
  0x1b   : > { %1555 = vmatprep.subr.bf16.mxu0 %v3219_v0  ;;  %v3018_v34 = vld [vmem:[%s3263_s20 + $0xf8] sm:$0xff]   ;;  %v3019_v35 = vld [vmem:[%s3299_s24] ss:$16 sps:$4 sm:$0xff]   ;;  %v3025_v37 = vld [vmem:[%s3299_s24 + $0x24] ss:$16 sps:$4 sm:$0xff]  }
  0x1c   : > { %v3022_v36 = vld [vmem:[%s3299_s24 + $0x8] ss:$16 sps:$4 sm:$0xff]   ;;  %v3027_v38 = vld [vmem:[%s3299_s24 + $0x2c] ss:$16 sps:$4 sm:$0xff]   ;;  %v3029_v39 = vld [vmem:[%s3299_s24 + $0x20] ss:$16 sps:$4 sm:$0xff]  }
  0x1d   : > { %1267 = vmatpush1.bf16.msra.mxu1 %v2993_v7  ;;  %v3030_v40 = vld [vmem:[%s3299_s24 + $0x28] ss:$16 sps:$4 sm:$0xff]   ;;  %v3031_v41 = vld [vmem:[%s3299_s24 + $0x44] ss:$16 sps:$4 sm:$0xff]   ;;  %v3033_v42 = vld [vmem:[%s3299_s24 + $0x4c] ss:$16 sps:$4 sm:$0xff]  }
  0x1e   : > { %1556 = vmatpush1.bf16.msra.mxu0 %v2994_v8  ;;  %1268 = vmatprep.subr.bf16.mxu1 %v3219_v0  ;;  %v3035_v43 = vld [vmem:[%s3299_s24 + $0x40] ss:$16 sps:$4 sm:$0xff]   ;;  %v3036_v44 = vld [vmem:[%s3299_s24 + $0x48] ss:$16 sps:$4 sm:$0xff]   ;;  %v3037_v45 = vld [vmem:[%s3299_s24 + $0x64] ss:$16 sps:$4 sm:$0xff]  }
  0x1f   : > { %1557 = vmatprep.subr.bf16.mxu0 %v3219_v0  ;;  %v3039_v46 = vld [vmem:[%s3299_s24 + $0x6c] ss:$16 sps:$4 sm:$0xff]   ;;  %v3041_v47 = vld [vmem:[%s3299_s24 + $0x60] ss:$16 sps:$4 sm:$0xff]   ;;  %v3042_v48 = vld [vmem:[%s3299_s24 + $0x68] ss:$16 sps:$4 sm:$0xff]  }
  0x20   : > { %v3043_v49 = vld [vmem:[%s3299_s24 + $0x84] ss:$16 sps:$4 sm:$0xff]   ;;  %v3045_v50 = vld [vmem:[%s3299_s24 + $0x8c] ss:$16 sps:$4 sm:$0xff]   ;;  %v3047_v51 = vld [vmem:[%s3299_s24 + $0x80] ss:$16 sps:$4 sm:$0xff]  }
  0x21   : > { %1269 = vmatpush1.bf16.msra.mxu1 %v2995_v9  ;;  %v3048_v52 = vld [vmem:[%s3299_s24 + $0x88] ss:$16 sps:$4 sm:$0xff]   ;;  %v3049_v53 = vld [vmem:[%s3299_s24 + $0xa4] ss:$16 sps:$4 sm:$0xff]   ;;  %v3051_v54 = vld [vmem:[%s3299_s24 + $0xac] ss:$16 sps:$4 sm:$0xff]  }
  0x22   : > { %1558 = vmatpush1.bf16.msra.mxu0 %v2996_v10  ;;  %1270 = vmatprep.subr.bf16.mxu1 %v3219_v0  ;;  %v3053_v55 = vld [vmem:[%s3299_s24 + $0xa0] ss:$16 sps:$4 sm:$0xff]   ;;  %v3054_v56 = vld [vmem:[%s3299_s24 + $0xa8] ss:$16 sps:$4 sm:$0xff]   ;;  %v3055_v57 = vld [vmem:[%s3299_s24 + $0xc4] ss:$16 sps:$4 sm:$0xff]  }
  0x23   : > { %1559 = vmatprep.subr.bf16.mxu0 %v3219_v0  ;;  %v3057_v58 = vld [vmem:[%s3299_s24 + $0xcc] ss:$16 sps:$4 sm:$0xff]   ;;  %v3059_v59 = vld [vmem:[%s3299_s24 + $0xc0] ss:$16 sps:$4 sm:$0xff]   ;;  %v3060_v60 = vld [vmem:[%s3299_s24 + $0xc8] ss:$16 sps:$4 sm:$0xff]  }
  0x24   : > { %v3061_v61 = vld [vmem:[%s3299_s24 + $0xe4] ss:$16 sps:$4 sm:$0xff]   ;;  %v3063_v62 = vld [vmem:[%s3299_s24 + $0xec] ss:$16 sps:$4 sm:$0xff]   ;;  %v3065_v63 = vld [vmem:[%s3299_s24 + $0xe0] ss:$16 sps:$4 sm:$0xff]  }
  0x25   : > { %1271 = vmatpush1.bf16.msra.mxu1 %v2997_v11  ;;  %v3067_v1 = vld [vmem:[%s3299_s24 + $0x104] ss:$16 sps:$4 sm:$0xff]   ;;  %v3069_v2 = vld [vmem:[%s3299_s24 + $0x10c] ss:$16 sps:$4 sm:$0xff]   ;;  %v3071_v3 = vld [vmem:[%s3299_s24 + $0x100] ss:$16 sps:$4 sm:$0xff]  }
  0x26   : > { %1560 = vmatpush1.bf16.msra.mxu0 %v2998_v12  ;;  %1272 = vmatprep.subr.bf16.mxu1 %v3219_v0  ;;  %v3072_v4 = vld [vmem:[%s3299_s24 + $0x108] ss:$16 sps:$4 sm:$0xff]   ;;  %v3073_v5 = vld [vmem:[%s3299_s24 + $0x124] ss:$16 sps:$4 sm:$0xff]   ;;  %v3075_v6 = vld [vmem:[%s3299_s24 + $0x12c] ss:$16 sps:$4 sm:$0xff]  }
  0x27   : > { %1561 = vmatprep.subr.bf16.mxu0 %v3219_v0  ;;  %v3077_v7 = vld [vmem:[%s3299_s24 + $0x120] ss:$16 sps:$4 sm:$0xff]   ;;  %v3078_v8 = vld [vmem:[%s3299_s24 + $0x128] ss:$16 sps:$4 sm:$0xff]   ;;  %v3079_v9 = vld [vmem:[%s3299_s24 + $0x144] ss:$16 sps:$4 sm:$0xff]  }
  0x28   : > { %v3081_v10 = vld [vmem:[%s3299_s24 + $0x14c] ss:$16 sps:$4 sm:$0xff]   ;;  %v3083_v11 = vld [vmem:[%s3299_s24 + $0x140] ss:$16 sps:$4 sm:$0xff]   ;;  %v3084_v12 = vld [vmem:[%s3299_s24 + $0x148] ss:$16 sps:$4 sm:$0xff]  }
  0x29   : > { %1273 = vmatpush1.bf16.msra.mxu1 %v2999_v13  ;;  %v3085_v13 = vld [vmem:[%s3299_s24 + $0x164] ss:$16 sps:$4 sm:$0xff]   ;;  %v3095_v19 = vld [vmem:[%s3299_s24 + $0x180] ss:$16 sps:$4 sm:$0xff]  }
  0x2a   : > { %1562 = vmatpush1.bf16.msra.mxu0 %v3000_v14  ;;  %1274 = vmatprep.subr.bf16.mxu1 %v3219_v0  ;;  %v3087_v14 = vld [vmem:[%s3299_s24 + $0x16c] ss:$16 sps:$4 sm:$0xff]   ;;  %v3097_v21 = vld [vmem:[%s3299_s24 + $0x1a4] ss:$16 sps:$4 sm:$0xff]  }
  0x2b   : > { %1563 = vmatprep.subr.bf16.mxu0 %v3219_v0 }
  0x2d   : > { %1275 = vmatpush1.bf16.msra.mxu1 %v3001_v15  ;;  %v3089_v15 = vld [vmem:[%s3299_s24 + $0x160] ss:$16 sps:$4 sm:$0xff]  }
  0x2e   : > { %1564 = vmatpush1.bf16.msra.mxu0 %v3002_v16  ;;  %1276 = vmatprep.subr.bf16.mxu1 %v3219_v0  ;;  %v3090_v16 = vld [vmem:[%s3299_s24 + $0x168] ss:$16 sps:$4 sm:$0xff]  }
  0x2f   : > { %1565 = vmatprep.subr.bf16.mxu0 %v3219_v0 }
  0x31   : > { %1277 = vmatpush1.bf16.msra.mxu1 %v3003_v17  ;;  %v3091_v17 = vld [vmem:[%s3299_s24 + $0x184] ss:$16 sps:$4 sm:$0xff]  }
  0x32   : > { %1566 = vmatpush1.bf16.msra.mxu0 %v3004_v18  ;;  %1278 = vmatprep.subr.bf16.mxu1 %v3219_v0  ;;  %v3093_v18 = vld [vmem:[%s3299_s24 + $0x18c] ss:$16 sps:$4 sm:$0xff]  }
  0x33   : > { %1567 = vmatprep.subr.bf16.mxu0 %v3219_v0 }
  0x35   : > { %1279 = vmatpush1.bf16.msra.mxu1 %v3005_v20  ;;  %v3096_v20 = vld [vmem:[%s3299_s24 + $0x188] ss:$16 sps:$4 sm:$0xff]  }
  0x36   : > { %1568 = vmatpush1.bf16.msra.mxu0 %v3006_v22  ;;  %1280 = vmatprep.subr.bf16.mxu1 %v3219_v0  ;;  %v3099_v22 = vld [vmem:[%s3299_s24 + $0x1ac] ss:$16 sps:$4 sm:$0xff]  }
  0x37   : > { %1569 = vmatprep.subr.bf16.mxu0 %v3219_v0 }
  0x39   : > { %1281 = vmatpush1.bf16.msra.mxu1 %v3007_v23  ;;  %v3101_v23 = vld [vmem:[%s3299_s24 + $0x1a0] ss:$16 sps:$4 sm:$0xff]  }
  0x3a   : > { %1570 = vmatpush1.bf16.msra.mxu0 %v3008_v24  ;;  %1282 = vmatprep.subr.bf16.mxu1 %v3219_v0  ;;  %v3102_v24 = vld [vmem:[%s3299_s24 + $0x1a8] ss:$16 sps:$4 sm:$0xff]  }
  0x3b   : > { %1571 = vmatprep.subr.bf16.mxu0 %v3219_v0 }
  0x3d   : > { %1283 = vmatpush1.bf16.msra.mxu1 %v3009_v25  ;;  %v3103_v25 = vld [vmem:[%s3299_s24 + $0x1c4] ss:$16 sps:$4 sm:$0xff]  }
  0x3e   : > { %1572 = vmatpush1.bf16.msra.mxu0 %v3010_v26  ;;  %1284 = vmatprep.subr.bf16.mxu1 %v3219_v0  ;;  %v3105_v26 = vld [vmem:[%s3299_s24 + $0x1cc] ss:$16 sps:$4 sm:$0xff]  }
  0x3f   : > { %1573 = vmatprep.subr.bf16.mxu0 %v3219_v0 }
  0x41   : > { %1285 = vmatpush1.bf16.msra.mxu1 %v3011_v27  ;;  %v3107_v27 = vld [vmem:[%s3299_s24 + $0x1c0] ss:$16 sps:$4 sm:$0xff]  }
  0x42   : > { %1574 = vmatpush1.bf16.msra.mxu0 %v3012_v28  ;;  %1286 = vmatprep.subr.bf16.mxu1 %v3219_v0  ;;  %v3108_v28 = vld [vmem:[%s3299_s24 + $0x1c8] ss:$16 sps:$4 sm:$0xff]  }
  0x43   : > { %1575 = vmatprep.subr.bf16.mxu0 %v3219_v0 }
  0x45   : > { %1287 = vmatpush1.bf16.msra.mxu1 %v3013_v29  ;;  %v3109_v29 = vld [vmem:[%s3299_s24 + $0x1e4] ss:$16 sps:$4 sm:$0xff]  }
  0x46   : > { %1576 = vmatpush1.bf16.msra.mxu0 %v3014_v30  ;;  %1288 = vmatprep.subr.bf16.mxu1 %v3219_v0  ;;  %v3111_v30 = vld [vmem:[%s3299_s24 + $0x1ec] ss:$16 sps:$4 sm:$0xff]  }
  0x47   : > { %1577 = vmatprep.subr.bf16.mxu0 %v3219_v0 }
  0x49   : > { %1289 = vmatpush1.bf16.msra.mxu1 %v3015_v31  ;;  %v3113_v31 = vld [vmem:[%s3299_s24 + $0x1e0] ss:$16 sps:$4 sm:$0xff]  }
  0x4a   : > { %1578 = vmatpush1.bf16.msra.mxu0 %v3016_v32  ;;  %1290 = vmatprep.subr.bf16.mxu1 %v3219_v0  ;;  %v3114_v32 = vld [vmem:[%s3299_s24 + $0x1e8] ss:$16 sps:$4 sm:$0xff]  }
  0x4b   : > { %1579 = vmatprep.subr.bf16.mxu0 %v3219_v0  ;;  %v3066_v0 = vld [vmem:[%s3299_s24 + $0xe8] ss:$16 sps:$4 sm:$0xff]  }
  0x4d   : > { %1291 = vmatpush1.bf16.msra.mxu1 %v3017_v33  ;;  %v3115_v33 = vld [vmem:[%s3299_s24 + $0x204] ss:$16 sps:$4 sm:$0xff]  }
  0x4e   : > { %1580 = vmatpush1.bf16.msra.mxu0 %v3018_v34  ;;  %v3117_v34 = vld [vmem:[%s3299_s24 + $0x20c] ss:$16 sps:$4 sm:$0xff]  }
  0x50   : > { %1293 = vmatmul.mubr.bf16.vlgmr.msra.gmra.mrb[0].mxu1 %v3019_v35  ;;  %v3119_v35 = vld [vmem:[%s3299_s24 + $0x200] ss:$16 sps:$4 sm:$0xff]  }
  0x51   : > { %1582 = vmatmul.mubr.bf16.vlgmr.msra.gmra.mrb[0].mxu0 %v3022_v36  ;;  %1300 = vmatprep.mubr.bf16.mxu1 %v3025_v37  ;;  %v3120_v36 = vld [vmem:[%s3299_s24 + $0x208] ss:$16 sps:$4 sm:$0xff]   ;;  %v3121_v37 = vld [vmem:[%s3299_s24 + $0x224] ss:$16 sps:$4 sm:$0xff]  }
  0x52   : > { %1589 = vmatprep.mubr.bf16.mxu0 %v3027_v38  ;;  %v3123_v38 = vld [vmem:[%s3299_s24 + $0x22c] ss:$16 sps:$4 sm:$0xff]  }
  0x58   : > { %1301 = vmatmul.mubr.bf16.gmra.mrb[4].mxu1 %v3029_v39  ;;  %v3125_v39 = vld [vmem:[%s3299_s24 + $0x220] ss:$16 sps:$4 sm:$0xff]  }
  0x59   : > { %1590 = vmatmul.mubr.bf16.gmra.mrb[4].mxu0 %v3030_v40  ;;  %1308 = vmatprep.mubr.bf16.mxu1 %v3031_v41  ;;  %v3126_v40 = vld [vmem:[%s3299_s24 + $0x228] ss:$16 sps:$4 sm:$0xff]   ;;  %v3127_v41 = vld [vmem:[%s3299_s24 + $0x244] ss:$16 sps:$4 sm:$0xff]  }
  0x5a   : > { %1597 = vmatprep.mubr.bf16.mxu0 %v3033_v42  ;;  %v3129_v42 = vld [vmem:[%s3299_s24 + $0x24c] ss:$16 sps:$4 sm:$0xff]  }
  0x60   : > { %1309 = vmatmul.mubr.bf16.gmra.mrb[8].mxu1 %v3035_v43  ;;  %v3131_v43 = vld [vmem:[%s3299_s24 + $0x240] ss:$16 sps:$4 sm:$0xff]  }
  0x61   : > { %1598 = vmatmul.mubr.bf16.gmra.mrb[8].mxu0 %v3036_v44  ;;  %1316 = vmatprep.mubr.bf16.mxu1 %v3037_v45  ;;  %v3132_v44 = vld [vmem:[%s3299_s24 + $0x248] ss:$16 sps:$4 sm:$0xff]   ;;  %v3133_v45 = vld [vmem:[%s3299_s24 + $0x264] ss:$16 sps:$4 sm:$0xff]  }
  0x62   : > { %1605 = vmatprep.mubr.bf16.mxu0 %v3039_v46  ;;  %v3135_v46 = vld [vmem:[%s3299_s24 + $0x26c] ss:$16 sps:$4 sm:$0xff]  }
  0x68   : > { %1317 = vmatmul.mubr.bf16.gmra.mrb[12].mxu1 %v3041_v47  ;;  %v3137_v47 = vld [vmem:[%s3299_s24 + $0x260] ss:$16 sps:$4 sm:$0xff]  }
  0x69   : > { %1606 = vmatmul.mubr.bf16.gmra.mrb[12].mxu0 %v3042_v48  ;;  %1324 = vmatprep.mubr.bf16.mxu1 %v3043_v49  ;;  %v3138_v48 = vld [vmem:[%s3299_s24 + $0x268] ss:$16 sps:$4 sm:$0xff]   ;;  %v3139_v49 = vld [vmem:[%s3299_s24 + $0x284] ss:$16 sps:$4 sm:$0xff]  }
  0x6a   : > { %1613 = vmatprep.mubr.bf16.mxu0 %v3045_v50  ;;  %v3141_v50 = vld [vmem:[%s3299_s24 + $0x28c] ss:$16 sps:$4 sm:$0xff]  }
  0x70   : > { %1325 = vmatmul.mubr.bf16.gmra.mrb[16].mxu1 %v3047_v51  ;;  %v3143_v51 = vld [vmem:[%s3299_s24 + $0x280] ss:$16 sps:$4 sm:$0xff]  }
  0x71   : > { %1614 = vmatmul.mubr.bf16.gmra.mrb[16].mxu0 %v3048_v52  ;;  %1332 = vmatprep.mubr.bf16.mxu1 %v3049_v53  ;;  %v3144_v52 = vld [vmem:[%s3299_s24 + $0x288] ss:$16 sps:$4 sm:$0xff]   ;;  %v3145_v53 = vld [vmem:[%s3299_s24 + $0x2a4] ss:$16 sps:$4 sm:$0xff]  }
  0x72   : > { %1621 = vmatprep.mubr.bf16.mxu0 %v3051_v54  ;;  %v3147_v54 = vld [vmem:[%s3299_s24 + $0x2ac] ss:$16 sps:$4 sm:$0xff]  }
  0x78   : > { %1333 = vmatmul.mubr.bf16.gmra.mrb[20].mxu1 %v3053_v55  ;;  %v3149_v55 = vld [vmem:[%s3299_s24 + $0x2a0] ss:$16 sps:$4 sm:$0xff]  }
  0x79   : > { %1622 = vmatmul.mubr.bf16.gmra.mrb[20].mxu0 %v3054_v56  ;;  %1340 = vmatprep.mubr.bf16.mxu1 %v3055_v57  ;;  %v3150_v56 = vld [vmem:[%s3299_s24 + $0x2a8] ss:$16 sps:$4 sm:$0xff]   ;;  %v3151_v57 = vld [vmem:[%s3299_s24 + $0x2c4] ss:$16 sps:$4 sm:$0xff]  }
  0x7a   : > { %1629 = vmatprep.mubr.bf16.mxu0 %v3057_v58  ;;  %v3153_v58 = vld [vmem:[%s3299_s24 + $0x2cc] ss:$16 sps:$4 sm:$0xff]  }
  0x80   : > { %1341 = vmatmul.mubr.bf16.gmra.mrb[24].mxu1 %v3059_v59  ;;  %v3155_v59 = vld [vmem:[%s3299_s24 + $0x2c0] ss:$16 sps:$4 sm:$0xff]  }
  0x81   : > { %1630 = vmatmul.mubr.bf16.gmra.mrb[24].mxu0 %v3060_v60  ;;  %1348 = vmatprep.mubr.bf16.mxu1 %v3061_v61  ;;  %v3156_v60 = vld [vmem:[%s3299_s24 + $0x2c8] ss:$16 sps:$4 sm:$0xff]   ;;  %v3157_v61 = vld [vmem:[%s3299_s24 + $0x2e4] ss:$16 sps:$4 sm:$0xff]  }
  0x82   : > { %1637 = vmatprep.mubr.bf16.mxu0 %v3063_v62  ;;  %v3159_v62 = vld [vmem:[%s3299_s24 + $0x2ec] ss:$16 sps:$4 sm:$0xff]  }
  0x88   : > { %1349 = vmatmul.mubr.bf16.gmra.mrb[28].mxu1 %v3065_v63  ;;  %v3161_v63 = vld [vmem:[%s3299_s24 + $0x2e0] ss:$16 sps:$4 sm:$0xff]  }
  0x89   : > { %1638 = vmatmul.mubr.bf16.gmra.mrb[28].mxu0 %v3066_v0  ;;  %1356 = vmatprep.mubr.bf16.mxu1 %v3067_v1  ;;  %v3162_v0 = vld [vmem:[%s3299_s24 + $0x2e8] ss:$16 sps:$4 sm:$0xff]   ;;  %v3163_v1 = vld [vmem:[%s3299_s24 + $0x304] ss:$16 sps:$4 sm:$0xff]  }
  0x8a   : > { %1645 = vmatprep.mubr.bf16.mxu0 %v3069_v2  ;;  %v3165_v2 = vld [vmem:[%s3299_s24 + $0x30c] ss:$16 sps:$4 sm:$0xff]  }
  0x90   : > { %1357 = vmatmul.mubr.bf16.gmra.mrb[32].mxu1 %v3071_v3  ;;  %v3167_v3 = vld [vmem:[%s3299_s24 + $0x300] ss:$16 sps:$4 sm:$0xff]  }
  0x91   : > { %1646 = vmatmul.mubr.bf16.gmra.mrb[32].mxu0 %v3072_v4  ;;  %1364 = vmatprep.mubr.bf16.mxu1 %v3073_v5  ;;  %v3168_v4 = vld [vmem:[%s3299_s24 + $0x308] ss:$16 sps:$4 sm:$0xff]   ;;  %v3169_v5 = vld [vmem:[%s3299_s24 + $0x324] ss:$16 sps:$4 sm:$0xff]  }
  0x92   : > { %1653 = vmatprep.mubr.bf16.mxu0 %v3075_v6  ;;  %v3171_v6 = vld [vmem:[%s3299_s24 + $0x32c] ss:$16 sps:$4 sm:$0xff]  }
  0x98   : > { %1365 = vmatmul.mubr.bf16.gmra.mrb[36].mxu1 %v3077_v7  ;;  %v3173_v7 = vld [vmem:[%s3299_s24 + $0x320] ss:$16 sps:$4 sm:$0xff]  }
  0x99   : > { %1654 = vmatmul.mubr.bf16.gmra.mrb[36].mxu0 %v3078_v8  ;;  %1372 = vmatprep.mubr.bf16.mxu1 %v3079_v9  ;;  %v3174_v8 = vld [vmem:[%s3299_s24 + $0x328] ss:$16 sps:$4 sm:$0xff]   ;;  %v3175_v9 = vld [vmem:[%s3299_s24 + $0x344] ss:$16 sps:$4 sm:$0xff]  }
  0x9a   : > { %1661 = vmatprep.mubr.bf16.mxu0 %v3081_v10  ;;  %v3177_v10 = vld [vmem:[%s3299_s24 + $0x34c] ss:$16 sps:$4 sm:$0xff]  }
  0xa0   : > { %1373 = vmatmul.mubr.bf16.gmra.mrb[40].mxu1 %v3083_v11  ;;  %v3179_v11 = vld [vmem:[%s3299_s24 + $0x340] ss:$16 sps:$4 sm:$0xff]  }
  0xa1   : > { %1662 = vmatmul.mubr.bf16.gmra.mrb[40].mxu0 %v3084_v12  ;;  %1380 = vmatprep.mubr.bf16.mxu1 %v3085_v13  ;;  %v3180_v12 = vld [vmem:[%s3299_s24 + $0x348] ss:$16 sps:$4 sm:$0xff]   ;;  %v3181_v13 = vld [vmem:[%s3299_s24 + $0x364] ss:$16 sps:$4 sm:$0xff]  }
  0xa2   : > { %1669 = vmatprep.mubr.bf16.mxu0 %v3087_v14  ;;  %v3183_v14 = vld [vmem:[%s3299_s24 + $0x36c] ss:$16 sps:$4 sm:$0xff]  }
  0xa8   : > { %1381 = vmatmul.mubr.bf16.gmra.mrb[44].mxu1 %v3089_v15 }
  0xa9   : > { %1670 = vmatmul.mubr.bf16.gmra.mrb[44].mxu0 %v3090_v16  ;;  %1388 = vmatprep.mubr.bf16.mxu1 %v3091_v17 }
  0xaa   : > { %1677 = vmatprep.mubr.bf16.mxu0 %v3093_v18  ;;  %v3185_v18 = vld [vmem:[%s3299_s24 + $0x360] ss:$16 sps:$4 sm:$0xff]  }
  0xb0   : > { %1389 = vmatmul.mubr.bf16.gmra.mrb[48].mxu1 %v3095_v19 }
  0xb1   : > { %1678 = vmatmul.mubr.bf16.gmra.mrb[48].mxu0 %v3096_v20  ;;  %1396 = vmatprep.mubr.bf16.mxu1 %v3097_v21 }
  0xb2   : > { %1685 = vmatprep.mubr.bf16.mxu0 %v3099_v22  ;;  %v3186_v22 = vld [vmem:[%s3299_s24 + $0x368] ss:$16 sps:$4 sm:$0xff]  }
  0xb8   : > { %1397 = vmatmul.mubr.bf16.gmra.mrb[52].mxu1 %v3101_v23  ;;  %v3187_v23 = vld [vmem:[%s3299_s24 + $0x384] ss:$16 sps:$4 sm:$0xff]  }
  0xb9   : > { %1686 = vmatmul.mubr.bf16.gmra.mrb[52].mxu0 %v3102_v24  ;;  %1404 = vmatprep.mubr.bf16.mxu1 %v3103_v25 }
  0xba   : > { %1693 = vmatprep.mubr.bf16.mxu0 %v3105_v26  ;;  %v3189_v26 = vld [vmem:[%s3299_s24 + $0x38c] ss:$16 sps:$4 sm:$0xff]  }
  0xc0   : > { %1405 = vmatmul.mubr.bf16.gmra.mrb[56].mxu1 %v3107_v27 }
  0xc1   : > { %1694 = vmatmul.mubr.bf16.gmra.mrb[56].mxu0 %v3108_v28  ;;  %1412 = vmatprep.mubr.bf16.mxu1 %v3109_v29 }
  0xc2   : > { %1701 = vmatprep.mubr.bf16.mxu0 %v3111_v30 }
  0xc8   : > { %1413 = vmatmul.mubr.bf16.gmra.mrb[60].mxu1 %v3113_v31 }
  0xc9   : > { %1702 = vmatmul.mubr.bf16.gmra.mrb[60].mxu0 %v3114_v32  ;;  %1420 = vmatprep.mubr.bf16.mxu1 %v3115_v33 }
  0xca   : > { %1709 = vmatprep.mubr.bf16.mxu0 %v3117_v34 }
  0xd0   : > { %1421 = vmatmul.mubr.bf16.gmra.mrb[64].mxu1 %v3119_v35 }
  0xd1   : > { %1710 = vmatmul.mubr.bf16.gmra.mrb[64].mxu0 %v3120_v36  ;;  %1428 = vmatprep.mubr.bf16.mxu1 %v3121_v37 }
  0xd2   : > { %1717 = vmatprep.mubr.bf16.mxu0 %v3123_v38 }
  0xd8   : > { %1429 = vmatmul.mubr.bf16.gmra.mrb[68].mxu1 %v3125_v39 }
  0xd9   : > { %1718 = vmatmul.mubr.bf16.gmra.mrb[68].mxu0 %v3126_v40  ;;  %1436 = vmatprep.mubr.bf16.mxu1 %v3127_v41 }
  0xda   : > { %1725 = vmatprep.mubr.bf16.mxu0 %v3129_v42  ;;  %v3191_v42 = vld [vmem:[%s3299_s24 + $0x380] ss:$16 sps:$4 sm:$0xff]  }
  0xe0   : > { %1437 = vmatmul.mubr.bf16.gmra.mrb[72].mxu1 %v3131_v43 }
  0xe1   : > { %1726 = vmatmul.mubr.bf16.gmra.mrb[72].mxu0 %v3132_v44  ;;  %1444 = vmatprep.mubr.bf16.mxu1 %v3133_v45 }
  0xe2   : > { %1733 = vmatprep.mubr.bf16.mxu0 %v3135_v46  ;;  %v3192_v46 = vld [vmem:[%s3299_s24 + $0x388] ss:$16 sps:$4 sm:$0xff]  }
  0xe8   : > { %1445 = vmatmul.mubr.bf16.gmra.mrb[76].mxu1 %v3137_v47  ;;  %v3193_v47 = vld [vmem:[%s3299_s24 + $0x3a4] ss:$16 sps:$4 sm:$0xff]  }
  0xe9   : > { %1734 = vmatmul.mubr.bf16.gmra.mrb[76].mxu0 %v3138_v48  ;;  %1452 = vmatprep.mubr.bf16.mxu1 %v3139_v49 }
  0xea   : > { %1741 = vmatprep.mubr.bf16.mxu0 %v3141_v50  ;;  %v3195_v50 = vld [vmem:[%s3299_s24 + $0x3ac] ss:$16 sps:$4 sm:$0xff]  }
  0xf0   : > { %1453 = vmatmul.mubr.bf16.gmra.mrb[80].mxu1 %v3143_v51 }
  0xf1   : > { %1742 = vmatmul.mubr.bf16.gmra.mrb[80].mxu0 %v3144_v52  ;;  %1460 = vmatprep.mubr.bf16.mxu1 %v3145_v53 }
  0xf2   : > { %1749 = vmatprep.mubr.bf16.mxu0 %v3147_v54 }
  0xf8   : > { %1461 = vmatmul.mubr.bf16.gmra.mrb[84].mxu1 %v3149_v55 }
  0xf9   : > { %1750 = vmatmul.mubr.bf16.gmra.mrb[84].mxu0 %v3150_v56  ;;  %1468 = vmatprep.mubr.bf16.mxu1 %v3151_v57 }
  0xfa   : > { %1757 = vmatprep.mubr.bf16.mxu0 %v3153_v58 }
 0x100   : > { %1469 = vmatmul.mubr.bf16.gmra.mrb[88].mxu1 %v3155_v59 }
 0x101   : > { %1758 = vmatmul.mubr.bf16.gmra.mrb[88].mxu0 %v3156_v60  ;;  %1476 = vmatprep.mubr.bf16.mxu1 %v3157_v61 }
 0x102   : > { %1765 = vmatprep.mubr.bf16.mxu0 %v3159_v62 }
 0x108   : > { %1477 = vmatmul.mubr.bf16.gmra.mrb[92].mxu1 %v3161_v63 }
 0x109   : > { %1766 = vmatmul.mubr.bf16.gmra.mrb[92].mxu0 %v3162_v0  ;;  %1484 = vmatprep.mubr.bf16.mxu1 %v3163_v1 }
 0x10a   : > { %1773 = vmatprep.mubr.bf16.mxu0 %v3165_v2 }
 0x110   : > { %1485 = vmatmul.mubr.bf16.gmra.mrb[96].mxu1 %v3167_v3 }
 0x111   : > { %1774 = vmatmul.mubr.bf16.gmra.mrb[96].mxu0 %v3168_v4  ;;  %1492 = vmatprep.mubr.bf16.mxu1 %v3169_v5  ;;  %v3197_v4 = vld [vmem:[%s3299_s24 + $0x3a0] ss:$16 sps:$4 sm:$0xff]  }
 0x112   : > { %1781 = vmatprep.mubr.bf16.mxu0 %v3171_v6 }
 0x118   : > { %1493 = vmatmul.mubr.bf16.gmra.mrb[100].mxu1 %v3173_v7 }
 0x119   : > { %1782 = vmatmul.mubr.bf16.gmra.mrb[100].mxu0 %v3174_v8  ;;  %1500 = vmatprep.mubr.bf16.mxu1 %v3175_v9  ;;  %v3198_v8 = vld [vmem:[%s3299_s24 + $0x3a8] ss:$16 sps:$4 sm:$0xff]   ;;  %v3199_v9 = vld [vmem:[%s3299_s24 + $0x3c4] ss:$16 sps:$4 sm:$0xff]  }
 0x11a   : > { %1789 = vmatprep.mubr.bf16.mxu0 %v3177_v10 }
 0x120   : > { %1501 = vmatmul.mubr.bf16.gmra.mrb[104].mxu1 %v3179_v11 }
 0x121   : > { %1790 = vmatmul.mubr.bf16.gmra.mrb[104].mxu0 %v3180_v12  ;;  %1508 = vmatprep.mubr.bf16.mxu1 %v3181_v13  ;;  %v3201_v12 = vld [vmem:[%s3299_s24 + $0x3cc] ss:$16 sps:$4 sm:$0xff]  }
 0x122   : > { %1797 = vmatprep.mubr.bf16.mxu0 %v3183_v14 }
 0x123   : > { %v1294_v15 = vpop.f32.mrb[0].mxu1 }
 0x124   : > { %v1583_v16 = vpop.f32.mrb[0].mxu0  ;;  %v1296_v17 = vpop.f32.mrb[1].mxu1 }
 0x125   : > { %v1584_v19 = vadd.f32 %v1583_v16, %v1294_v15  ;;  %v1585_v20 = vpop.f32.mrb[1].mxu0  ;;  %v1297_v21 = vpop.f32.mrb[2].mxu1 }
 0x126   : > { %v1586_v24 = vpop.f32.mrb[2].mxu0  ;;  %v1299_v25 = vpop.f32.mrb[3].mxu1 }
 0x127   : > { %v2850_v27 = vpack.c.bf16 %v1584_v19, %v1584_v19  ;;  %v2295_v28 = vmul.f32 %v1584_v19, %v1584_v19  ;;  %v1587_v29 = vadd.f32 %v1586_v24, %v1297_v21  ;;  %v1588_v30 = vpop.f32.mrb[3].mxu0  ;;  %v2160_v31 = vsel %vm2159_vm1, %v1584_v19, 0.0 }
 0x128   : > { %1509 = vmatmul.mubr.bf16.gmra.mrb[108].mxu1 %v3185_v18  ;;  %v3203_v30 = vld [vmem:[%s3299_s24 + $0x3c0] ss:$16 sps:$4 sm:$0xff]  }
 0x129   : > { %2095 = vst.msk [vmem:[%s3451_s27] sm:$0xf] %vm2094_vm0, %v2850_v27  ;;  %v2851_v32 = vpack.c.bf16 %v1587_v29, %v1587_v29  ;;  %v2161_v33 = vsel %vm2159_vm1, %v1587_v29, 0.0  ;;  %v2296_v34 = vmul.f32 %v1587_v29, %v1587_v29  ;;  %1798 = vmatmul.mubr.bf16.gmra.mrb[108].mxu0 %v3186_v22  ;;  %1516 = vmatprep.mubr.bf16.mxu1 %v3187_v23  ;;  %v2359_v36 = vsel %vm2159_vm1, %v2295_v28, 0.0 }
 0x12a   : > { %v2162_v35 = vadd.f32 %v2161_v33, %v2160_v31  ;;  %1805 = vmatprep.mubr.bf16.mxu0 %v3189_v26 }
 0x12b   : > { %2096 = vst.msk [vmem:[%s3451_s27 + $0x4] sm:$0xf] %vm2094_vm0, %v2851_v32  ;;  %v2360_v37 = vsel %vm2159_vm1, %v2296_v34, 0.0  ;;  %v1302_v38 = vpop.f32.mrb[4].mxu1  ;;  %v3204_v34 = vld [vmem:[%s3299_s24 + $0x3c8] ss:$16 sps:$4 sm:$0xff]  }
 0x12c   : > { %v2361_v39 = vadd.f32 %v2360_v37, %v2359_v36  ;;  %v1591_v40 = vpop.f32.mrb[4].mxu0  ;;  %v1304_v41 = vpop.f32.mrb[5].mxu1 }
 0x12d   : > { %v1592_v43 = vadd.f32 %v1591_v40, %v1302_v38  ;;  %v1593_v44 = vpop.f32.mrb[5].mxu0  ;;  %v1305_v45 = vpop.f32.mrb[6].mxu1  ;;  %v3207_v38 = vld [vmem:[%s3299_s24 + $0x3ec] ss:$16 sps:$4 sm:$0xff]  }
 0x12e   : > { %v1594_v48 = vpop.f32.mrb[6].mxu0  ;;  %v1307_v49 = vpop.f32.mrb[7].mxu1 }
 0x12f   : > { %v2852_v51 = vpack.c.bf16 %v1592_v43, %v1592_v43  ;;  %v2163_v52 = vsel %vm2159_vm1, %v1592_v43, 0.0  ;;  %v2297_v53 = vmul.f32 %v1592_v43, %v1592_v43  ;;  %v1595_v54 = vadd.f32 %v1594_v48, %v1305_v45  ;;  %v1596_v55 = vpop.f32.mrb[7].mxu0 }
 0x130   : > { %v2164_v56 = vadd.f32 %v2163_v52, %v2162_v35  ;;  %1517 = vmatmul.mubr.bf16.gmra.mrb[112].mxu1 %v3191_v42  ;;  %v3205_v35 = vld [vmem:[%s3299_s24 + $0x3e4] ss:$16 sps:$4 sm:$0xff]  }
 0x131   : > { %2097 = vst.msk [vmem:[%s3451_s27 + $0x8] sm:$0xf] %vm2094_vm0, %v2852_v51  ;;  %v2362_v57 = vsel %vm2159_vm1, %v2297_v53, 0.0  ;;  %v2853_v58 = vpack.c.bf16 %v1595_v54, %v1595_v54  ;;  %v2165_v59 = vsel %vm2159_vm1, %v1595_v54, 0.0  ;;  %v2298_v60 = vmul.f32 %v1595_v54, %v1595_v54  ;;  %1806 = vmatmul.mubr.bf16.gmra.mrb[112].mxu0 %v3192_v46  ;;  %1524 = vmatprep.mubr.bf16.mxu1 %v3193_v47 }
 0x132   : > { %v2363_v61 = vadd.f32 %v2362_v57, %v2361_v39  ;;  %v2166_v62 = vadd.f32 %v2165_v59, %v2164_v56  ;;  %1813 = vmatprep.mubr.bf16.mxu0 %v3195_v50  ;;  %v3209_v56 = vld [vmem:[%s3299_s24 + $0x3e0] ss:$16 sps:$4 sm:$0xff]  }
 0x133   : > { %2098 = vst.msk [vmem:[%s3451_s27 + $0xc] sm:$0xf] %vm2094_vm0, %v2853_v58  ;;  %v2364_v63 = vsel %vm2159_vm1, %v2298_v60, 0.0  ;;  %v1310_v0 = vpop.f32.mrb[8].mxu1  ;;  %v3210_v60 = vld [vmem:[%s3299_s24 + $0x3e8] ss:$16 sps:$4 sm:$0xff]  }
 0x134   : > { %v2365_v1 = vadd.f32 %v2364_v63, %v2363_v61  ;;  %v1599_v2 = vpop.f32.mrb[8].mxu0  ;;  %v1312_v3 = vpop.f32.mrb[9].mxu1 }
 0x135   : > { %v1600_v5 = vadd.f32 %v1599_v2, %v1310_v0  ;;  %v1601_v6 = vpop.f32.mrb[9].mxu0  ;;  %v1313_v7 = vpop.f32.mrb[10].mxu1 }
 0x136   : > { %v1602_v10 = vpop.f32.mrb[10].mxu0  ;;  %v1315_v11 = vpop.f32.mrb[11].mxu1 }
 0x137   : > { %v2854_v13 = vpack.c.bf16 %v1600_v5, %v1600_v5  ;;  %v2167_v14 = vsel %vm2159_vm1, %v1600_v5, 0.0  ;;  %v2299_v15 = vmul.f32 %v1600_v5, %v1600_v5  ;;  %v1603_v16 = vadd.f32 %v1602_v10, %v1313_v7  ;;  %v1604_v17 = vpop.f32.mrb[11].mxu0 }
 0x138   : > { %v2168_v18 = vadd.f32 %v2167_v14, %v2166_v62  ;;  %1525 = vmatmul.mubr.bf16.gmra.mrb[116].mxu1 %v3197_v4 }
 0x139   : > { %2099 = vst.msk [vmem:[%s3451_s27 + $0x10] sm:$0xf] %vm2094_vm0, %v2854_v13  ;;  %v2366_v19 = vsel %vm2159_vm1, %v2299_v15, 0.0  ;;  %v2855_v20 = vpack.c.bf16 %v1603_v16, %v1603_v16  ;;  %v2169_v21 = vsel %vm2159_vm1, %v1603_v16, 0.0  ;;  %v2300_v22 = vmul.f32 %v1603_v16, %v1603_v16  ;;  %1814 = vmatmul.mubr.bf16.gmra.mrb[116].mxu0 %v3198_v8  ;;  %1532 = vmatprep.mubr.bf16.mxu1 %v3199_v9 }
 0x13a   : > { %v2367_v23 = vadd.f32 %v2366_v19, %v2365_v1  ;;  %v2170_v24 = vadd.f32 %v2169_v21, %v2168_v18  ;;  %1821 = vmatprep.mubr.bf16.mxu0 %v3201_v12 }
 0x13b   : > { %2100 = vst.msk [vmem:[%s3451_s27 + $0x14] sm:$0xf] %vm2094_vm0, %v2855_v20  ;;  %v2368_v25 = vsel %vm2159_vm1, %v2300_v22, 0.0  ;;  %v1318_v26 = vpop.f32.mrb[12].mxu1 }
 0x13c   : > { %v2369_v27 = vadd.f32 %v2368_v25, %v2367_v23  ;;  %v1607_v28 = vpop.f32.mrb[12].mxu0  ;;  %v1320_v29 = vpop.f32.mrb[13].mxu1 }
 0x13d   : > { %v1608_v31 = vadd.f32 %v1607_v28, %v1318_v26  ;;  %v1609_v32 = vpop.f32.mrb[13].mxu0  ;;  %v1321_v33 = vpop.f32.mrb[14].mxu1 }
 0x13e   : > { %v1610_v36 = vpop.f32.mrb[14].mxu0  ;;  %v1323_v37 = vpop.f32.mrb[15].mxu1 }
 0x13f   : > { %v2856_v39 = vpack.c.bf16 %v1608_v31, %v1608_v31  ;;  %v2171_v40 = vsel %vm2159_vm1, %v1608_v31, 0.0  ;;  %v2301_v41 = vmul.f32 %v1608_v31, %v1608_v31  ;;  %v1611_v42 = vadd.f32 %v1610_v36, %v1321_v33  ;;  %v1612_v43 = vpop.f32.mrb[15].mxu0 }
 0x140   : > { %v2172_v44 = vadd.f32 %v2171_v40, %v2170_v24  ;;  %1533 = vmatmul.mubr.bf16.gmra.mrb[120].mxu1 %v3203_v30 }
 0x141   : > { %2101 = vst.msk [vmem:[%s3451_s27 + $0x18] sm:$0xf] %vm2094_vm0, %v2856_v39  ;;  %v2370_v45 = vsel %vm2159_vm1, %v2301_v41, 0.0  ;;  %v2857_v46 = vpack.c.bf16 %v1611_v42, %v1611_v42  ;;  %v2173_v47 = vsel %vm2159_vm1, %v1611_v42, 0.0  ;;  %v2302_v48 = vmul.f32 %v1611_v42, %v1611_v42  ;;  %1822 = vmatmul.mubr.bf16.gmra.mrb[120].mxu0 %v3204_v34  ;;  %1540 = vmatprep.mubr.bf16.mxu1 %v3205_v35 }
 0x142   : > { %v2371_v49 = vadd.f32 %v2370_v45, %v2369_v27  ;;  %v2174_v50 = vadd.f32 %v2173_v47, %v2172_v44  ;;  %1829 = vmatprep.mubr.bf16.mxu0 %v3207_v38 }
 0x143   : > { %2102 = vst.msk [vmem:[%s3451_s27 + $0x1c] sm:$0xf] %vm2094_vm0, %v2857_v46  ;;  %v2372_v51 = vsel %vm2159_vm1, %v2302_v48, 0.0  ;;  %v1326_v52 = vpop.f32.mrb[16].mxu1 }
 0x144   : > { %v2373_v53 = vadd.f32 %v2372_v51, %v2371_v49  ;;  %v1615_v54 = vpop.f32.mrb[16].mxu0  ;;  %v1328_v55 = vpop.f32.mrb[17].mxu1 }
 0x145   : > { %v1616_v57 = vadd.f32 %v1615_v54, %v1326_v52  ;;  %v1617_v58 = vpop.f32.mrb[17].mxu0  ;;  %v1329_v59 = vpop.f32.mrb[18].mxu1 }
 0x146   : > { %v1618_v61 = vpop.f32.mrb[18].mxu0  ;;  %v1331_v62 = vpop.f32.mrb[19].mxu1 }
 0x147   : > { %v2858_v63 = vpack.c.bf16 %v1616_v57, %v1616_v57  ;;  %v2175_v0 = vsel %vm2159_vm1, %v1616_v57, 0.0  ;;  %v2303_v1 = vmul.f32 %v1616_v57, %v1616_v57  ;;  %v1619_v2 = vadd.f32 %v1618_v61, %v1329_v59  ;;  %v1620_v3 = vpop.f32.mrb[19].mxu0 }
 0x148   : > { %v2176_v4 = vadd.f32 %v2175_v0, %v2174_v50  ;;  %1541 = vmatmul.mubr.bf16.gmra.mrb[124].mxu1 %v3209_v56 }
 0x149   : > { %2103 = vst.msk [vmem:[%s3451_s27 + $0x20] sm:$0xf] %vm2094_vm0, %v2858_v63  ;;  %v2374_v5 = vsel %vm2159_vm1, %v2303_v1, 0.0  ;;  %v2859_v6 = vpack.c.bf16 %v1619_v2, %v1619_v2  ;;  %v2177_v7 = vsel %vm2159_vm1, %v1619_v2, 0.0  ;;  %v2304_v8 = vmul.f32 %v1619_v2, %v1619_v2  ;;  %1830 = vmatmul.mubr.bf16.gmra.mrb[124].mxu0 %v3210_v60 }
 0x14a   : > { %v2375_v9 = vadd.f32 %v2374_v5, %v2373_v53  ;;  %v2178_v10 = vadd.f32 %v2177_v7, %v2176_v4 }
 0x14b   : > { %2104 = vst.msk [vmem:[%s3451_s27 + $0x24] sm:$0xf] %vm2094_vm0, %v2859_v6  ;;  %v2376_v11 = vsel %vm2159_vm1, %v2304_v8, 0.0  ;;  %v1334_v12 = vpop.f32.mrb[20].mxu1 }
 0x14c   : > { %v2377_v13 = vadd.f32 %v2376_v11, %v2375_v9  ;;  %v1623_v14 = vpop.f32.mrb[20].mxu0  ;;  %v1336_v15 = vpop.f32.mrb[21].mxu1 }
 0x14d   : > { %v1624_v16 = vadd.f32 %v1623_v14, %v1334_v12  ;;  %v1625_v17 = vpop.f32.mrb[21].mxu0  ;;  %v1337_v18 = vpop.f32.mrb[22].mxu1 }
 0x14e   : > { %v1626_v19 = vpop.f32.mrb[22].mxu0  ;;  %v1339_v20 = vpop.f32.mrb[23].mxu1 }
 0x14f   : > { %v2860_v21 = vpack.c.bf16 %v1624_v16, %v1624_v16  ;;  %v2179_v22 = vsel %vm2159_vm1, %v1624_v16, 0.0  ;;  %v2305_v23 = vmul.f32 %v1624_v16, %v1624_v16  ;;  %v1627_v24 = vadd.f32 %v1626_v19, %v1337_v18  ;;  %v1628_v25 = vpop.f32.mrb[23].mxu0 }
 0x150   : > { %v2180_v26 = vadd.f32 %v2179_v22, %v2178_v10 }
 0x151   : > { %2105 = vst.msk [vmem:[%s3451_s27 + $0x28] sm:$0xf] %vm2094_vm0, %v2860_v21  ;;  %v2378_v27 = vsel %vm2159_vm1, %v2305_v23, 0.0  ;;  %v2861_v28 = vpack.c.bf16 %v1627_v24, %v1627_v24  ;;  %v2181_v29 = vsel %vm2159_vm1, %v1627_v24, 0.0  ;;  %v2306_v30 = vmul.f32 %v1627_v24, %v1627_v24 }
 0x152   : > { %v2379_v31 = vadd.f32 %v2378_v27, %v2377_v13  ;;  %v2182_v32 = vadd.f32 %v2181_v29, %v2180_v26 }
 0x153   : > { %2106 = vst.msk [vmem:[%s3451_s27 + $0x2c] sm:$0xf] %vm2094_vm0, %v2861_v28  ;;  %v2380_v33 = vsel %vm2159_vm1, %v2306_v30, 0.0  ;;  %v1342_v34 = vpop.f32.mrb[24].mxu1 }
 0x154   : > { %v2381_v35 = vadd.f32 %v2380_v33, %v2379_v31  ;;  %v1631_v36 = vpop.f32.mrb[24].mxu0  ;;  %v1344_v37 = vpop.f32.mrb[25].mxu1 }
 0x155   : > { %v1632_v38 = vadd.f32 %v1631_v36, %v1342_v34  ;;  %v1633_v39 = vpop.f32.mrb[25].mxu0  ;;  %v1345_v40 = vpop.f32.mrb[26].mxu1 }
 0x156   : > { %v1634_v41 = vpop.f32.mrb[26].mxu0  ;;  %v1347_v42 = vpop.f32.mrb[27].mxu1 }
 0x157   : > { %v2862_v43 = vpack.c.bf16 %v1632_v38, %v1632_v38  ;;  %v2183_v44 = vsel %vm2159_vm1, %v1632_v38, 0.0  ;;  %v2307_v45 = vmul.f32 %v1632_v38, %v1632_v38  ;;  %v1635_v46 = vadd.f32 %v1634_v41, %v1345_v40  ;;  %v1636_v47 = vpop.f32.mrb[27].mxu0 }
 0x158   : > { %v2184_v48 = vadd.f32 %v2183_v44, %v2182_v32 }
 0x159   : > { %2107 = vst.msk [vmem:[%s3451_s27 + $0x30] sm:$0xf] %vm2094_vm0, %v2862_v43  ;;  %v2382_v49 = vsel %vm2159_vm1, %v2307_v45, 0.0  ;;  %v2863_v50 = vpack.c.bf16 %v1635_v46, %v1635_v46  ;;  %v2185_v51 = vsel %vm2159_vm1, %v1635_v46, 0.0  ;;  %v2308_v52 = vmul.f32 %v1635_v46, %v1635_v46 }
 0x15a   : > { %v2383_v53 = vadd.f32 %v2382_v49, %v2381_v35  ;;  %v2186_v54 = vadd.f32 %v2185_v51, %v2184_v48 }
 0x15b   : > { %2108 = vst.msk [vmem:[%s3451_s27 + $0x34] sm:$0xf] %vm2094_vm0, %v2863_v50  ;;  %v2384_v55 = vsel %vm2159_vm1, %v2308_v52, 0.0  ;;  %v1350_v56 = vpop.f32.mrb[28].mxu1 }
 0x15c   : > { %v2385_v57 = vadd.f32 %v2384_v55, %v2383_v53  ;;  %v1639_v58 = vpop.f32.mrb[28].mxu0  ;;  %v1352_v59 = vpop.f32.mrb[29].mxu1 }
 0x15d   : > { %v1640_v60 = vadd.f32 %v1639_v58, %v1350_v56  ;;  %v1641_v61 = vpop.f32.mrb[29].mxu0  ;;  %v1353_v62 = vpop.f32.mrb[30].mxu1 }
 0x15e   : > { %v1642_v63 = vpop.f32.mrb[30].mxu0  ;;  %v1355_v0 = vpop.f32.mrb[31].mxu1 }
 0x15f   : > { %v2864_v1 = vpack.c.bf16 %v1640_v60, %v1640_v60  ;;  %v2187_v2 = vsel %vm2159_vm1, %v1640_v60, 0.0  ;;  %v2309_v3 = vmul.f32 %v1640_v60, %v1640_v60  ;;  %v1643_v4 = vadd.f32 %v1642_v63, %v1353_v62  ;;  %v1644_v5 = vpop.f32.mrb[31].mxu0 }
 0x160   : > { %v2188_v6 = vadd.f32 %v2187_v2, %v2186_v54 }
 0x161   : > { %2109 = vst.msk [vmem:[%s3451_s27 + $0x38] sm:$0xf] %vm2094_vm0, %v2864_v1  ;;  %v2386_v7 = vsel %vm2159_vm1, %v2309_v3, 0.0  ;;  %v2865_v8 = vpack.c.bf16 %v1643_v4, %v1643_v4  ;;  %v2189_v9 = vsel %vm2159_vm1, %v1643_v4, 0.0  ;;  %v2310_v10 = vmul.f32 %v1643_v4, %v1643_v4 }
 0x162   : > { %v2387_v11 = vadd.f32 %v2386_v7, %v2385_v57  ;;  %v2190_v12 = vadd.f32 %v2189_v9, %v2188_v6 }
 0x163   : > { %2110 = vst.msk [vmem:[%s3451_s27 + $0x3c] sm:$0xf] %vm2094_vm0, %v2865_v8  ;;  %v2388_v13 = vsel %vm2159_vm1, %v2310_v10, 0.0  ;;  %v1358_v14 = vpop.f32.mrb[32].mxu1 }
 0x164   : > { %v2389_v15 = vadd.f32 %v2388_v13, %v2387_v11  ;;  %v1647_v16 = vpop.f32.mrb[32].mxu0  ;;  %v1360_v17 = vpop.f32.mrb[33].mxu1 }
 0x165   : > { %v1648_v18 = vadd.f32 %v1647_v16, %v1358_v14  ;;  %v1649_v19 = vpop.f32.mrb[33].mxu0  ;;  %v1361_v20 = vpop.f32.mrb[34].mxu1 }
 0x166   : > { %v1650_v21 = vpop.f32.mrb[34].mxu0  ;;  %v1363_v22 = vpop.f32.mrb[35].mxu1 }
 0x167   : > { %v2866_v23 = vpack.c.bf16 %v1648_v18, %v1648_v18  ;;  %v2191_v24 = vsel %vm2159_vm1, %v1648_v18, 0.0  ;;  %v2311_v25 = vmul.f32 %v1648_v18, %v1648_v18  ;;  %v1651_v26 = vadd.f32 %v1650_v21, %v1361_v20  ;;  %v1652_v27 = vpop.f32.mrb[35].mxu0 }
 0x168   : > { %v2192_v28 = vadd.f32 %v2191_v24, %v2190_v12 }
 0x169   : > { %2111 = vst.msk [vmem:[%s3451_s27 + $0x40] sm:$0xf] %vm2094_vm0, %v2866_v23  ;;  %v2390_v29 = vsel %vm2159_vm1, %v2311_v25, 0.0  ;;  %v2867_v30 = vpack.c.bf16 %v1651_v26, %v1651_v26  ;;  %v2193_v31 = vsel %vm2159_vm1, %v1651_v26, 0.0  ;;  %v2312_v32 = vmul.f32 %v1651_v26, %v1651_v26 }
 0x16a   : > { %v2391_v33 = vadd.f32 %v2390_v29, %v2389_v15  ;;  %v2194_v34 = vadd.f32 %v2193_v31, %v2192_v28 }
 0x16b   : > { %2112 = vst.msk [vmem:[%s3451_s27 + $0x44] sm:$0xf] %vm2094_vm0, %v2867_v30  ;;  %v2392_v35 = vsel %vm2159_vm1, %v2312_v32, 0.0  ;;  %v1366_v36 = vpop.f32.mrb[36].mxu1 }
 0x16c   : > { %v2393_v37 = vadd.f32 %v2392_v35, %v2391_v33  ;;  %v1655_v38 = vpop.f32.mrb[36].mxu0  ;;  %v1368_v39 = vpop.f32.mrb[37].mxu1 }
 0x16d   : > { %v1656_v40 = vadd.f32 %v1655_v38, %v1366_v36  ;;  %v1657_v41 = vpop.f32.mrb[37].mxu0  ;;  %v1369_v42 = vpop.f32.mrb[38].mxu1 }
 0x16e   : > { %v1658_v43 = vpop.f32.mrb[38].mxu0  ;;  %v1371_v44 = vpop.f32.mrb[39].mxu1 }
 0x16f   : > { %v2868_v45 = vpack.c.bf16 %v1656_v40, %v1656_v40  ;;  %v2195_v46 = vsel %vm2159_vm1, %v1656_v40, 0.0  ;;  %v2313_v47 = vmul.f32 %v1656_v40, %v1656_v40  ;;  %v1659_v48 = vadd.f32 %v1658_v43, %v1369_v42  ;;  %v1660_v49 = vpop.f32.mrb[39].mxu0 }
 0x170   : > { %v2196_v50 = vadd.f32 %v2195_v46, %v2194_v34 }
 0x171   : > { %2113 = vst.msk [vmem:[%s3451_s27 + $0x48] sm:$0xf] %vm2094_vm0, %v2868_v45  ;;  %v2394_v51 = vsel %vm2159_vm1, %v2313_v47, 0.0  ;;  %v2869_v52 = vpack.c.bf16 %v1659_v48, %v1659_v48  ;;  %v2197_v53 = vsel %vm2159_vm1, %v1659_v48, 0.0  ;;  %v2314_v54 = vmul.f32 %v1659_v48, %v1659_v48 }
 0x172   : > { %v2395_v55 = vadd.f32 %v2394_v51, %v2393_v37  ;;  %v2198_v56 = vadd.f32 %v2197_v53, %v2196_v50 }
 0x173   : > { %2114 = vst.msk [vmem:[%s3451_s27 + $0x4c] sm:$0xf] %vm2094_vm0, %v2869_v52  ;;  %v2396_v57 = vsel %vm2159_vm1, %v2314_v54, 0.0  ;;  %v1374_v58 = vpop.f32.mrb[40].mxu1 }
 0x174   : > { %v2397_v59 = vadd.f32 %v2396_v57, %v2395_v55  ;;  %v1663_v60 = vpop.f32.mrb[40].mxu0  ;;  %v1376_v61 = vpop.f32.mrb[41].mxu1 }
 0x175   : > { %v1664_v62 = vadd.f32 %v1663_v60, %v1374_v58  ;;  %v1665_v63 = vpop.f32.mrb[41].mxu0  ;;  %v1377_v0 = vpop.f32.mrb[42].mxu1 }
 0x176   : > { %v1666_v1 = vpop.f32.mrb[42].mxu0  ;;  %v1379_v2 = vpop.f32.mrb[43].mxu1 }
 0x177   : > { %v2870_v3 = vpack.c.bf16 %v1664_v62, %v1664_v62  ;;  %v2199_v4 = vsel %vm2159_vm1, %v1664_v62, 0.0  ;;  %v2315_v5 = vmul.f32 %v1664_v62, %v1664_v62  ;;  %v1667_v6 = vadd.f32 %v1666_v1, %v1377_v0  ;;  %v1668_v7 = vpop.f32.mrb[43].mxu0 }
 0x178   : > { %v2200_v8 = vadd.f32 %v2199_v4, %v2198_v56 }
 0x179   : > { %2115 = vst.msk [vmem:[%s3451_s27 + $0x50] sm:$0xf] %vm2094_vm0, %v2870_v3  ;;  %v2398_v9 = vsel %vm2159_vm1, %v2315_v5, 0.0  ;;  %v2871_v10 = vpack.c.bf16 %v1667_v6, %v1667_v6  ;;  %v2201_v11 = vsel %vm2159_vm1, %v1667_v6, 0.0  ;;  %v2316_v12 = vmul.f32 %v1667_v6, %v1667_v6 }
 0x17a   : > { %v2399_v13 = vadd.f32 %v2398_v9, %v2397_v59  ;;  %v2202_v14 = vadd.f32 %v2201_v11, %v2200_v8 }
 0x17b   : > { %2116 = vst.msk [vmem:[%s3451_s27 + $0x54] sm:$0xf] %vm2094_vm0, %v2871_v10  ;;  %v2400_v15 = vsel %vm2159_vm1, %v2316_v12, 0.0  ;;  %v1382_v16 = vpop.f32.mrb[44].mxu1 }
 0x17c   : > { %v2401_v17 = vadd.f32 %v2400_v15, %v2399_v13  ;;  %v1671_v18 = vpop.f32.mrb[44].mxu0  ;;  %v1384_v19 = vpop.f32.mrb[45].mxu1 }
 0x17d   : > { %v1672_v20 = vadd.f32 %v1671_v18, %v1382_v16  ;;  %v1673_v21 = vpop.f32.mrb[45].mxu0  ;;  %v1385_v22 = vpop.f32.mrb[46].mxu1 }
 0x17e   : > { %v1674_v23 = vpop.f32.mrb[46].mxu0  ;;  %v1387_v24 = vpop.f32.mrb[47].mxu1 }
 0x17f   : > { %v2872_v25 = vpack.c.bf16 %v1672_v20, %v1672_v20  ;;  %v2203_v26 = vsel %vm2159_vm1, %v1672_v20, 0.0  ;;  %v2317_v27 = vmul.f32 %v1672_v20, %v1672_v20  ;;  %v1675_v28 = vadd.f32 %v1674_v23, %v1385_v22  ;;  %v1676_v29 = vpop.f32.mrb[47].mxu0 }
 0x180   : > { %v2204_v30 = vadd.f32 %v2203_v26, %v2202_v14 }
 0x181   : > { %2117 = vst.msk [vmem:[%s3451_s27 + $0x58] sm:$0xf] %vm2094_vm0, %v2872_v25  ;;  %v2402_v31 = vsel %vm2159_vm1, %v2317_v27, 0.0  ;;  %v2873_v32 = vpack.c.bf16 %v1675_v28, %v1675_v28  ;;  %v2205_v33 = vsel %vm2159_vm1, %v1675_v28, 0.0  ;;  %v2318_v34 = vmul.f32 %v1675_v28, %v1675_v28 }
 0x182   : > { %v2403_v35 = vadd.f32 %v2402_v31, %v2401_v17  ;;  %v2206_v36 = vadd.f32 %v2205_v33, %v2204_v30 }
 0x183   : > { %2118 = vst.msk [vmem:[%s3451_s27 + $0x5c] sm:$0xf] %vm2094_vm0, %v2873_v32  ;;  %v2404_v37 = vsel %vm2159_vm1, %v2318_v34, 0.0  ;;  %v1390_v38 = vpop.f32.mrb[48].mxu1 }
 0x184   : > { %v2405_v39 = vadd.f32 %v2404_v37, %v2403_v35  ;;  %v1679_v40 = vpop.f32.mrb[48].mxu0  ;;  %v1392_v41 = vpop.f32.mrb[49].mxu1 }
 0x185   : > { %v1680_v42 = vadd.f32 %v1679_v40, %v1390_v38  ;;  %v1681_v43 = vpop.f32.mrb[49].mxu0  ;;  %v1393_v44 = vpop.f32.mrb[50].mxu1 }
 0x186   : > { %v1682_v45 = vpop.f32.mrb[50].mxu0  ;;  %v1395_v46 = vpop.f32.mrb[51].mxu1 }
 0x187   : > { %v2874_v47 = vpack.c.bf16 %v1680_v42, %v1680_v42  ;;  %v2207_v48 = vsel %vm2159_vm1, %v1680_v42, 0.0  ;;  %v2319_v49 = vmul.f32 %v1680_v42, %v1680_v42  ;;  %v1683_v50 = vadd.f32 %v1682_v45, %v1393_v44  ;;  %v1684_v51 = vpop.f32.mrb[51].mxu0 }
 0x188   : > { %v2208_v52 = vadd.f32 %v2207_v48, %v2206_v36 }
 0x189   : > { %2119 = vst.msk [vmem:[%s3451_s27 + $0x60] sm:$0xf] %vm2094_vm0, %v2874_v47  ;;  %v2406_v53 = vsel %vm2159_vm1, %v2319_v49, 0.0  ;;  %v2875_v54 = vpack.c.bf16 %v1683_v50, %v1683_v50  ;;  %v2209_v55 = vsel %vm2159_vm1, %v1683_v50, 0.0  ;;  %v2320_v56 = vmul.f32 %v1683_v50, %v1683_v50 }
 0x18a   : > { %v2407_v57 = vadd.f32 %v2406_v53, %v2405_v39  ;;  %v2210_v58 = vadd.f32 %v2209_v55, %v2208_v52 }
 0x18b   : > { %2120 = vst.msk [vmem:[%s3451_s27 + $0x64] sm:$0xf] %vm2094_vm0, %v2875_v54  ;;  %v2408_v59 = vsel %vm2159_vm1, %v2320_v56, 0.0  ;;  %v1398_v60 = vpop.f32.mrb[52].mxu1 }
 0x18c   : > { %v2409_v61 = vadd.f32 %v2408_v59, %v2407_v57  ;;  %v1687_v62 = vpop.f32.mrb[52].mxu0  ;;  %v1400_v63 = vpop.f32.mrb[53].mxu1 }
 0x18d   : > { %v1688_v0 = vadd.f32 %v1687_v62, %v1398_v60  ;;  %v1689_v1 = vpop.f32.mrb[53].mxu0  ;;  %v1401_v2 = vpop.f32.mrb[54].mxu1 }
 0x18e   : > { %v1690_v3 = vpop.f32.mrb[54].mxu0  ;;  %v1403_v4 = vpop.f32.mrb[55].mxu1 }
 0x18f   : > { %v2876_v5 = vpack.c.bf16 %v1688_v0, %v1688_v0  ;;  %v2211_v6 = vsel %vm2159_vm1, %v1688_v0, 0.0  ;;  %v2321_v7 = vmul.f32 %v1688_v0, %v1688_v0  ;;  %v1691_v8 = vadd.f32 %v1690_v3, %v1401_v2  ;;  %v1692_v9 = vpop.f32.mrb[55].mxu0 }
 0x190   : > { %v2212_v10 = vadd.f32 %v2211_v6, %v2210_v58 }
 0x191   : > { %2121 = vst.msk [vmem:[%s3451_s27 + $0x68] sm:$0xf] %vm2094_vm0, %v2876_v5  ;;  %v2410_v11 = vsel %vm2159_vm1, %v2321_v7, 0.0  ;;  %v2877_v12 = vpack.c.bf16 %v1691_v8, %v1691_v8  ;;  %v2213_v13 = vsel %vm2159_vm1, %v1691_v8, 0.0  ;;  %v2322_v14 = vmul.f32 %v1691_v8, %v1691_v8 }
 0x192   : > { %v2411_v15 = vadd.f32 %v2410_v11, %v2409_v61  ;;  %v2214_v16 = vadd.f32 %v2213_v13, %v2212_v10 }
 0x193   : > { %2122 = vst.msk [vmem:[%s3451_s27 + $0x6c] sm:$0xf] %vm2094_vm0, %v2877_v12  ;;  %v2412_v17 = vsel %vm2159_vm1, %v2322_v14, 0.0  ;;  %v1406_v18 = vpop.f32.mrb[56].mxu1 }
 0x194   : > { %v2413_v19 = vadd.f32 %v2412_v17, %v2411_v15  ;;  %v1695_v20 = vpop.f32.mrb[56].mxu0  ;;  %v1408_v21 = vpop.f32.mrb[57].mxu1 }
 0x195   : > { %v1696_v22 = vadd.f32 %v1695_v20, %v1406_v18  ;;  %v1697_v23 = vpop.f32.mrb[57].mxu0  ;;  %v1409_v24 = vpop.f32.mrb[58].mxu1 }
 0x196   : > { %v1698_v25 = vpop.f32.mrb[58].mxu0  ;;  %v1411_v26 = vpop.f32.mrb[59].mxu1 }
 0x197   : > { %v2878_v27 = vpack.c.bf16 %v1696_v22, %v1696_v22  ;;  %v2215_v28 = vsel %vm2159_vm1, %v1696_v22, 0.0  ;;  %v2323_v29 = vmul.f32 %v1696_v22, %v1696_v22  ;;  %v1699_v30 = vadd.f32 %v1698_v25, %v1409_v24  ;;  %v1700_v31 = vpop.f32.mrb[59].mxu0 }
 0x198   : > { %v2216_v32 = vadd.f32 %v2215_v28, %v2214_v16 }
 0x199   : > { %2123 = vst.msk [vmem:[%s3451_s27 + $0x70] sm:$0xf] %vm2094_vm0, %v2878_v27  ;;  %v2414_v33 = vsel %vm2159_vm1, %v2323_v29, 0.0  ;;  %v2879_v34 = vpack.c.bf16 %v1699_v30, %v1699_v30  ;;  %v2217_v35 = vsel %vm2159_vm1, %v1699_v30, 0.0  ;;  %v2324_v36 = vmul.f32 %v1699_v30, %v1699_v30 }
 0x19a   : > { %v2415_v37 = vadd.f32 %v2414_v33, %v2413_v19  ;;  %v2218_v38 = vadd.f32 %v2217_v35, %v2216_v32 }
 0x19b   : > { %2124 = vst.msk [vmem:[%s3451_s27 + $0x74] sm:$0xf] %vm2094_vm0, %v2879_v34  ;;  %v2416_v39 = vsel %vm2159_vm1, %v2324_v36, 0.0  ;;  %v1414_v40 = vpop.f32.mrb[60].mxu1 }
 0x19c   : > { %v2417_v41 = vadd.f32 %v2416_v39, %v2415_v37  ;;  %v1703_v42 = vpop.f32.mrb[60].mxu0  ;;  %v1416_v43 = vpop.f32.mrb[61].mxu1 }
 0x19d   : > { %v1704_v44 = vadd.f32 %v1703_v42, %v1414_v40  ;;  %v1705_v45 = vpop.f32.mrb[61].mxu0  ;;  %v1417_v46 = vpop.f32.mrb[62].mxu1 }
 0x19e   : > { %v1706_v47 = vpop.f32.mrb[62].mxu0  ;;  %v1419_v48 = vpop.f32.mrb[63].mxu1 }
 0x19f   : > { %v2880_v49 = vpack.c.bf16 %v1704_v44, %v1704_v44  ;;  %v2219_v50 = vsel %vm2159_vm1, %v1704_v44, 0.0  ;;  %v2325_v51 = vmul.f32 %v1704_v44, %v1704_v44  ;;  %v1707_v52 = vadd.f32 %v1706_v47, %v1417_v46  ;;  %v1708_v53 = vpop.f32.mrb[63].mxu0 }
 0x1a0   : > { %v2220_v54 = vadd.f32 %v2219_v50, %v2218_v38 }
 0x1a1   : > { %2125 = vst.msk [vmem:[%s3451_s27 + $0x78] sm:$0xf] %vm2094_vm0, %v2880_v49  ;;  %v2418_v55 = vsel %vm2159_vm1, %v2325_v51, 0.0  ;;  %v2881_v56 = vpack.c.bf16 %v1707_v52, %v1707_v52  ;;  %v2221_v57 = vsel %vm2159_vm1, %v1707_v52, 0.0  ;;  %v2326_v58 = vmul.f32 %v1707_v52, %v1707_v52 }
 0x1a2   : > { %v2419_v59 = vadd.f32 %v2418_v55, %v2417_v41  ;;  %v2222_v60 = vadd.f32 %v2221_v57, %v2220_v54 }
 0x1a3   : > { %2126 = vst.msk [vmem:[%s3451_s27 + $0x7c] sm:$0xf] %vm2094_vm0, %v2881_v56  ;;  %v2420_v61 = vsel %vm2159_vm1, %v2326_v58, 0.0  ;;  %v1422_v62 = vpop.f32.mrb[64].mxu1 }
 0x1a4   : > { %v2421_v63 = vadd.f32 %v2420_v61, %v2419_v59  ;;  %v1711_v0 = vpop.f32.mrb[64].mxu0  ;;  %v1424_v1 = vpop.f32.mrb[65].mxu1 }
 0x1a5   : > { %v1712_v2 = vadd.f32 %v1711_v0, %v1422_v62  ;;  %v1713_v3 = vpop.f32.mrb[65].mxu0  ;;  %v1425_v4 = vpop.f32.mrb[66].mxu1 }
 0x1a6   : > { %v1714_v5 = vpop.f32.mrb[66].mxu0  ;;  %v1427_v6 = vpop.f32.mrb[67].mxu1 }
 0x1a7   : > { %v2882_v7 = vpack.c.bf16 %v1712_v2, %v1712_v2  ;;  %v2223_v8 = vsel %vm2159_vm1, %v1712_v2, 0.0  ;;  %v2327_v9 = vmul.f32 %v1712_v2, %v1712_v2  ;;  %v1715_v10 = vadd.f32 %v1714_v5, %v1425_v4  ;;  %v1716_v11 = vpop.f32.mrb[67].mxu0 }
 0x1a8   : > { %v2224_v12 = vadd.f32 %v2223_v8, %v2222_v60 }
 0x1a9   : > { %2127 = vst.msk [vmem:[%s3451_s27 + $0x80] sm:$0xf] %vm2094_vm0, %v2882_v7  ;;  %v2422_v13 = vsel %vm2159_vm1, %v2327_v9, 0.0  ;;  %v2883_v14 = vpack.c.bf16 %v1715_v10, %v1715_v10  ;;  %v2225_v15 = vsel %vm2159_vm1, %v1715_v10, 0.0  ;;  %v2328_v16 = vmul.f32 %v1715_v10, %v1715_v10 }
 0x1aa   : > { %v2423_v17 = vadd.f32 %v2422_v13, %v2421_v63  ;;  %v2226_v18 = vadd.f32 %v2225_v15, %v2224_v12 }
 0x1ab   : > { %2128 = vst.msk [vmem:[%s3451_s27 + $0x84] sm:$0xf] %vm2094_vm0, %v2883_v14  ;;  %v2424_v19 = vsel %vm2159_vm1, %v2328_v16, 0.0  ;;  %v1430_v20 = vpop.f32.mrb[68].mxu1 }
 0x1ac   : > { %v2425_v21 = vadd.f32 %v2424_v19, %v2423_v17  ;;  %v1719_v22 = vpop.f32.mrb[68].mxu0  ;;  %v1432_v23 = vpop.f32.mrb[69].mxu1 }
 0x1ad   : > { %v1720_v24 = vadd.f32 %v1719_v22, %v1430_v20  ;;  %v1721_v25 = vpop.f32.mrb[69].mxu0  ;;  %v1433_v26 = vpop.f32.mrb[70].mxu1 }
 0x1ae   : > { %v1722_v27 = vpop.f32.mrb[70].mxu0  ;;  %v1435_v28 = vpop.f32.mrb[71].mxu1 }
 0x1af   : > { %v2884_v29 = vpack.c.bf16 %v1720_v24, %v1720_v24  ;;  %v2227_v30 = vsel %vm2159_vm1, %v1720_v24, 0.0  ;;  %v2329_v31 = vmul.f32 %v1720_v24, %v1720_v24  ;;  %v1723_v32 = vadd.f32 %v1722_v27, %v1433_v26  ;;  %v1724_v33 = vpop.f32.mrb[71].mxu0 }
 0x1b0   : > { %v2228_v34 = vadd.f32 %v2227_v30, %v2226_v18 }
 0x1b1   : > { %2129 = vst.msk [vmem:[%s3451_s27 + $0x88] sm:$0xf] %vm2094_vm0, %v2884_v29  ;;  %v2426_v35 = vsel %vm2159_vm1, %v2329_v31, 0.0  ;;  %v2885_v36 = vpack.c.bf16 %v1723_v32, %v1723_v32  ;;  %v2229_v37 = vsel %vm2159_vm1, %v1723_v32, 0.0  ;;  %v2330_v38 = vmul.f32 %v1723_v32, %v1723_v32 }
 0x1b2   : > { %v2427_v39 = vadd.f32 %v2426_v35, %v2425_v21  ;;  %v2230_v40 = vadd.f32 %v2229_v37, %v2228_v34 }
 0x1b3   : > { %2130 = vst.msk [vmem:[%s3451_s27 + $0x8c] sm:$0xf] %vm2094_vm0, %v2885_v36  ;;  %v2428_v41 = vsel %vm2159_vm1, %v2330_v38, 0.0  ;;  %v1438_v42 = vpop.f32.mrb[72].mxu1 }
 0x1b4   : > { %v2429_v43 = vadd.f32 %v2428_v41, %v2427_v39  ;;  %v1727_v44 = vpop.f32.mrb[72].mxu0  ;;  %v1440_v45 = vpop.f32.mrb[73].mxu1 }
 0x1b5   : > { %v1728_v46 = vadd.f32 %v1727_v44, %v1438_v42  ;;  %v1729_v47 = vpop.f32.mrb[73].mxu0  ;;  %v1441_v48 = vpop.f32.mrb[74].mxu1 }
 0x1b6   : > { %v1730_v49 = vpop.f32.mrb[74].mxu0  ;;  %v1443_v50 = vpop.f32.mrb[75].mxu1 }
 0x1b7   : > { %v2886_v51 = vpack.c.bf16 %v1728_v46, %v1728_v46  ;;  %v2231_v52 = vsel %vm2159_vm1, %v1728_v46, 0.0  ;;  %v2331_v53 = vmul.f32 %v1728_v46, %v1728_v46  ;;  %v1731_v54 = vadd.f32 %v1730_v49, %v1441_v48  ;;  %v1732_v55 = vpop.f32.mrb[75].mxu0 }
 0x1b8   : > { %v2232_v56 = vadd.f32 %v2231_v52, %v2230_v40 }
 0x1b9   : > { %2131 = vst.msk [vmem:[%s3451_s27 + $0x90] sm:$0xf] %vm2094_vm0, %v2886_v51  ;;  %v2430_v57 = vsel %vm2159_vm1, %v2331_v53, 0.0  ;;  %v2887_v58 = vpack.c.bf16 %v1731_v54, %v1731_v54  ;;  %v2233_v59 = vsel %vm2159_vm1, %v1731_v54, 0.0  ;;  %v2332_v60 = vmul.f32 %v1731_v54, %v1731_v54 }
 0x1ba   : > { %v2431_v61 = vadd.f32 %v2430_v57, %v2429_v43  ;;  %v2234_v62 = vadd.f32 %v2233_v59, %v2232_v56 }
 0x1bb   : > { %2132 = vst.msk [vmem:[%s3451_s27 + $0x94] sm:$0xf] %vm2094_vm0, %v2887_v58  ;;  %v2432_v63 = vsel %vm2159_vm1, %v2332_v60, 0.0  ;;  %v1446_v0 = vpop.f32.mrb[76].mxu1 }
 0x1bc   : > { %v2433_v1 = vadd.f32 %v2432_v63, %v2431_v61  ;;  %v1735_v2 = vpop.f32.mrb[76].mxu0  ;;  %v1448_v3 = vpop.f32.mrb[77].mxu1 }
 0x1bd   : > { %v1736_v4 = vadd.f32 %v1735_v2, %v1446_v0  ;;  %v1737_v5 = vpop.f32.mrb[77].mxu0  ;;  %v1449_v6 = vpop.f32.mrb[78].mxu1 }
 0x1be   : > { %v1738_v7 = vpop.f32.mrb[78].mxu0  ;;  %v1451_v8 = vpop.f32.mrb[79].mxu1 }
 0x1bf   : > { %v2888_v9 = vpack.c.bf16 %v1736_v4, %v1736_v4  ;;  %v2235_v10 = vsel %vm2159_vm1, %v1736_v4, 0.0  ;;  %v2333_v11 = vmul.f32 %v1736_v4, %v1736_v4  ;;  %v1739_v12 = vadd.f32 %v1738_v7, %v1449_v6  ;;  %v1740_v13 = vpop.f32.mrb[79].mxu0 }
 0x1c0   : > { %v2236_v14 = vadd.f32 %v2235_v10, %v2234_v62 }
 0x1c1   : > { %2133 = vst.msk [vmem:[%s3451_s27 + $0x98] sm:$0xf] %vm2094_vm0, %v2888_v9  ;;  %v2434_v15 = vsel %vm2159_vm1, %v2333_v11, 0.0  ;;  %v2889_v16 = vpack.c.bf16 %v1739_v12, %v1739_v12  ;;  %v2237_v17 = vsel %vm2159_vm1, %v1739_v12, 0.0  ;;  %v2334_v18 = vmul.f32 %v1739_v12, %v1739_v12 }
 0x1c2   : > { %v2435_v19 = vadd.f32 %v2434_v15, %v2433_v1  ;;  %v2238_v20 = vadd.f32 %v2237_v17, %v2236_v14 }
 0x1c3   : > { %2134 = vst.msk [vmem:[%s3451_s27 + $0x9c] sm:$0xf] %vm2094_vm0, %v2889_v16  ;;  %v2436_v21 = vsel %vm2159_vm1, %v2334_v18, 0.0  ;;  %v1454_v22 = vpop.f32.mrb[80].mxu1 }
 0x1c4   : > { %v2437_v23 = vadd.f32 %v2436_v21, %v2435_v19  ;;  %v1743_v24 = vpop.f32.mrb[80].mxu0  ;;  %v1456_v25 = vpop.f32.mrb[81].mxu1 }
 0x1c5   : > { %v1744_v26 = vadd.f32 %v1743_v24, %v1454_v22  ;;  %v1745_v27 = vpop.f32.mrb[81].mxu0  ;;  %v1457_v28 = vpop.f32.mrb[82].mxu1 }
 0x1c6   : > { %v1746_v29 = vpop.f32.mrb[82].mxu0  ;;  %v1459_v30 = vpop.f32.mrb[83].mxu1 }
 0x1c7   : > { %v2890_v31 = vpack.c.bf16 %v1744_v26, %v1744_v26  ;;  %v2239_v32 = vsel %vm2159_vm1, %v1744_v26, 0.0  ;;  %v2335_v33 = vmul.f32 %v1744_v26, %v1744_v26  ;;  %v1747_v34 = vadd.f32 %v1746_v29, %v1457_v28  ;;  %v1748_v35 = vpop.f32.mrb[83].mxu0 }
 0x1c8   : > { %v2240_v36 = vadd.f32 %v2239_v32, %v2238_v20 }
 0x1c9   : > { %2135 = vst.msk [vmem:[%s3451_s27 + $0xa0] sm:$0xf] %vm2094_vm0, %v2890_v31  ;;  %v2438_v37 = vsel %vm2159_vm1, %v2335_v33, 0.0  ;;  %v2891_v38 = vpack.c.bf16 %v1747_v34, %v1747_v34  ;;  %v2241_v39 = vsel %vm2159_vm1, %v1747_v34, 0.0  ;;  %v2336_v40 = vmul.f32 %v1747_v34, %v1747_v34 }
 0x1ca   : > { %v2439_v41 = vadd.f32 %v2438_v37, %v2437_v23  ;;  %v2242_v42 = vadd.f32 %v2241_v39, %v2240_v36 }
 0x1cb   : > { %2136 = vst.msk [vmem:[%s3451_s27 + $0xa4] sm:$0xf] %vm2094_vm0, %v2891_v38  ;;  %v2440_v43 = vsel %vm2159_vm1, %v2336_v40, 0.0  ;;  %v1462_v44 = vpop.f32.mrb[84].mxu1 }
 0x1cc   : > { %v2441_v45 = vadd.f32 %v2440_v43, %v2439_v41  ;;  %v1751_v46 = vpop.f32.mrb[84].mxu0  ;;  %v1464_v47 = vpop.f32.mrb[85].mxu1 }
 0x1cd   : > { %v1752_v48 = vadd.f32 %v1751_v46, %v1462_v44  ;;  %v1753_v49 = vpop.f32.mrb[85].mxu0  ;;  %v1465_v50 = vpop.f32.mrb[86].mxu1 }
 0x1ce   : > { %v1754_v51 = vpop.f32.mrb[86].mxu0  ;;  %v1467_v52 = vpop.f32.mrb[87].mxu1 }
 0x1cf   : > { %v2892_v53 = vpack.c.bf16 %v1752_v48, %v1752_v48  ;;  %v2243_v54 = vsel %vm2159_vm1, %v1752_v48, 0.0  ;;  %v2337_v55 = vmul.f32 %v1752_v48, %v1752_v48  ;;  %v1755_v56 = vadd.f32 %v1754_v51, %v1465_v50  ;;  %v1756_v57 = vpop.f32.mrb[87].mxu0 }
 0x1d0   : > { %v2244_v58 = vadd.f32 %v2243_v54, %v2242_v42 }
 0x1d1   : > { %2137 = vst.msk [vmem:[%s3451_s27 + $0xa8] sm:$0xf] %vm2094_vm0, %v2892_v53  ;;  %v2442_v59 = vsel %vm2159_vm1, %v2337_v55, 0.0  ;;  %v2893_v60 = vpack.c.bf16 %v1755_v56, %v1755_v56  ;;  %v2245_v61 = vsel %vm2159_vm1, %v1755_v56, 0.0  ;;  %v2338_v62 = vmul.f32 %v1755_v56, %v1755_v56 }
 0x1d2   : > { %v2443_v63 = vadd.f32 %v2442_v59, %v2441_v45  ;;  %v2246_v0 = vadd.f32 %v2245_v61, %v2244_v58 }
 0x1d3   : > { %2138 = vst.msk [vmem:[%s3451_s27 + $0xac] sm:$0xf] %vm2094_vm0, %v2893_v60  ;;  %v2444_v1 = vsel %vm2159_vm1, %v2338_v62, 0.0  ;;  %v1470_v2 = vpop.f32.mrb[88].mxu1 }
 0x1d4   : > { %v2445_v3 = vadd.f32 %v2444_v1, %v2443_v63  ;;  %v1759_v4 = vpop.f32.mrb[88].mxu0  ;;  %v1472_v5 = vpop.f32.mrb[89].mxu1 }
 0x1d5   : > { %v1760_v6 = vadd.f32 %v1759_v4, %v1470_v2  ;;  %v1761_v7 = vpop.f32.mrb[89].mxu0  ;;  %v1473_v8 = vpop.f32.mrb[90].mxu1 }
 0x1d6   : > { %v1762_v9 = vpop.f32.mrb[90].mxu0  ;;  %v1475_v10 = vpop.f32.mrb[91].mxu1 }
 0x1d7   : > { %v2894_v11 = vpack.c.bf16 %v1760_v6, %v1760_v6  ;;  %v2247_v12 = vsel %vm2159_vm1, %v1760_v6, 0.0  ;;  %v2339_v13 = vmul.f32 %v1760_v6, %v1760_v6  ;;  %v1763_v14 = vadd.f32 %v1762_v9, %v1473_v8  ;;  %v1764_v15 = vpop.f32.mrb[91].mxu0 }
 0x1d8   : > { %v2248_v16 = vadd.f32 %v2247_v12, %v2246_v0 }
 0x1d9   : > { %2139 = vst.msk [vmem:[%s3451_s27 + $0xb0] sm:$0xf] %vm2094_vm0, %v2894_v11  ;;  %v2446_v17 = vsel %vm2159_vm1, %v2339_v13, 0.0  ;;  %v2895_v18 = vpack.c.bf16 %v1763_v14, %v1763_v14  ;;  %v2249_v19 = vsel %vm2159_vm1, %v1763_v14, 0.0  ;;  %v2340_v20 = vmul.f32 %v1763_v14, %v1763_v14 }
 0x1da   : > { %v2447_v21 = vadd.f32 %v2446_v17, %v2445_v3  ;;  %v2250_v22 = vadd.f32 %v2249_v19, %v2248_v16 }
 0x1db   : > { %2140 = vst.msk [vmem:[%s3451_s27 + $0xb4] sm:$0xf] %vm2094_vm0, %v2895_v18  ;;  %v2448_v23 = vsel %vm2159_vm1, %v2340_v20, 0.0  ;;  %v1478_v24 = vpop.f32.mrb[92].mxu1 }
 0x1dc   : > { %v2449_v25 = vadd.f32 %v2448_v23, %v2447_v21  ;;  %v1767_v26 = vpop.f32.mrb[92].mxu0  ;;  %v1480_v27 = vpop.f32.mrb[93].mxu1 }
 0x1dd   : > { %v1768_v28 = vadd.f32 %v1767_v26, %v1478_v24  ;;  %v1769_v29 = vpop.f32.mrb[93].mxu0  ;;  %v1481_v30 = vpop.f32.mrb[94].mxu1 }
 0x1de   : > { %v1770_v31 = vpop.f32.mrb[94].mxu0  ;;  %v1483_v32 = vpop.f32.mrb[95].mxu1 }
 0x1df   : > { %v2896_v33 = vpack.c.bf16 %v1768_v28, %v1768_v28  ;;  %v2251_v34 = vsel %vm2159_vm1, %v1768_v28, 0.0  ;;  %v2341_v35 = vmul.f32 %v1768_v28, %v1768_v28  ;;  %v1771_v36 = vadd.f32 %v1770_v31, %v1481_v30  ;;  %v1772_v37 = vpop.f32.mrb[95].mxu0 }
 0x1e0   : > { %v2252_v38 = vadd.f32 %v2251_v34, %v2250_v22 }
 0x1e1   : > { %2141 = vst.msk [vmem:[%s3451_s27 + $0xb8] sm:$0xf] %vm2094_vm0, %v2896_v33  ;;  %v2450_v39 = vsel %vm2159_vm1, %v2341_v35, 0.0  ;;  %v2897_v40 = vpack.c.bf16 %v1771_v36, %v1771_v36  ;;  %v2253_v41 = vsel %vm2159_vm1, %v1771_v36, 0.0  ;;  %v2342_v42 = vmul.f32 %v1771_v36, %v1771_v36 }
 0x1e2   : > { %v2451_v43 = vadd.f32 %v2450_v39, %v2449_v25  ;;  %v2254_v44 = vadd.f32 %v2253_v41, %v2252_v38 }
 0x1e3   : > { %2142 = vst.msk [vmem:[%s3451_s27 + $0xbc] sm:$0xf] %vm2094_vm0, %v2897_v40  ;;  %v2452_v45 = vsel %vm2159_vm1, %v2342_v42, 0.0  ;;  %v1486_v46 = vpop.f32.mrb[96].mxu1 }
 0x1e4   : > { %v2453_v47 = vadd.f32 %v2452_v45, %v2451_v43  ;;  %v1775_v48 = vpop.f32.mrb[96].mxu0  ;;  %v1488_v49 = vpop.f32.mrb[97].mxu1 }
 0x1e5   : > { %v1776_v50 = vadd.f32 %v1775_v48, %v1486_v46  ;;  %v1777_v51 = vpop.f32.mrb[97].mxu0  ;;  %v1489_v52 = vpop.f32.mrb[98].mxu1 }
 0x1e6   : > { %v1778_v53 = vpop.f32.mrb[98].mxu0  ;;  %v1491_v54 = vpop.f32.mrb[99].mxu1 }
 0x1e7   : > { %v2898_v55 = vpack.c.bf16 %v1776_v50, %v1776_v50  ;;  %v2255_v56 = vsel %vm2159_vm1, %v1776_v50, 0.0  ;;  %v2343_v57 = vmul.f32 %v1776_v50, %v1776_v50  ;;  %v1779_v58 = vadd.f32 %v1778_v53, %v1489_v52  ;;  %v1780_v59 = vpop.f32.mrb[99].mxu0 }
 0x1e8   : > { %v2256_v60 = vadd.f32 %v2255_v56, %v2254_v44 }
 0x1e9   : > { %2143 = vst.msk [vmem:[%s3451_s27 + $0xc0] sm:$0xf] %vm2094_vm0, %v2898_v55  ;;  %v2454_v61 = vsel %vm2159_vm1, %v2343_v57, 0.0  ;;  %v2899_v62 = vpack.c.bf16 %v1779_v58, %v1779_v58  ;;  %v2257_v63 = vsel %vm2159_vm1, %v1779_v58, 0.0  ;;  %v2344_v0 = vmul.f32 %v1779_v58, %v1779_v58 }
 0x1ea   : > { %v2455_v1 = vadd.f32 %v2454_v61, %v2453_v47  ;;  %v2258_v2 = vadd.f32 %v2257_v63, %v2256_v60 }
 0x1eb   : > { %2144 = vst.msk [vmem:[%s3451_s27 + $0xc4] sm:$0xf] %vm2094_vm0, %v2899_v62  ;;  %v2456_v3 = vsel %vm2159_vm1, %v2344_v0, 0.0  ;;  %v1494_v4 = vpop.f32.mrb[100].mxu1 }
 0x1ec   : > { %v2457_v5 = vadd.f32 %v2456_v3, %v2455_v1  ;;  %v1783_v6 = vpop.f32.mrb[100].mxu0  ;;  %v1496_v7 = vpop.f32.mrb[101].mxu1 }
 0x1ed   : > { %v1784_v8 = vadd.f32 %v1783_v6, %v1494_v4  ;;  %v1785_v9 = vpop.f32.mrb[101].mxu0  ;;  %v1497_v10 = vpop.f32.mrb[102].mxu1 }
 0x1ee   : > { %v1786_v11 = vpop.f32.mrb[102].mxu0  ;;  %v1499_v12 = vpop.f32.mrb[103].mxu1 }
 0x1ef   : > { %v2900_v13 = vpack.c.bf16 %v1784_v8, %v1784_v8  ;;  %v2259_v14 = vsel %vm2159_vm1, %v1784_v8, 0.0  ;;  %v2345_v15 = vmul.f32 %v1784_v8, %v1784_v8  ;;  %v1787_v16 = vadd.f32 %v1786_v11, %v1497_v10  ;;  %v1788_v17 = vpop.f32.mrb[103].mxu0 }
 0x1f0   : > { %v2260_v18 = vadd.f32 %v2259_v14, %v2258_v2 }
 0x1f1   : > { %2145 = vst.msk [vmem:[%s3451_s27 + $0xc8] sm:$0xf] %vm2094_vm0, %v2900_v13  ;;  %v2458_v19 = vsel %vm2159_vm1, %v2345_v15, 0.0  ;;  %v2901_v20 = vpack.c.bf16 %v1787_v16, %v1787_v16  ;;  %v2261_v21 = vsel %vm2159_vm1, %v1787_v16, 0.0  ;;  %v2346_v22 = vmul.f32 %v1787_v16, %v1787_v16 }
 0x1f2   : > { %v2459_v23 = vadd.f32 %v2458_v19, %v2457_v5  ;;  %v2262_v24 = vadd.f32 %v2261_v21, %v2260_v18 }
 0x1f3   : > { %2146 = vst.msk [vmem:[%s3451_s27 + $0xcc] sm:$0xf] %vm2094_vm0, %v2901_v20  ;;  %v2460_v25 = vsel %vm2159_vm1, %v2346_v22, 0.0  ;;  %v1502_v26 = vpop.f32.mrb[104].mxu1 }
 0x1f4   : > { %v2461_v27 = vadd.f32 %v2460_v25, %v2459_v23  ;;  %v1791_v28 = vpop.f32.mrb[104].mxu0  ;;  %v1504_v29 = vpop.f32.mrb[105].mxu1 }
 0x1f5   : > { %v1792_v30 = vadd.f32 %v1791_v28, %v1502_v26  ;;  %v1793_v31 = vpop.f32.mrb[105].mxu0  ;;  %v1505_v32 = vpop.f32.mrb[106].mxu1 }
 0x1f6   : > { %v1794_v33 = vpop.f32.mrb[106].mxu0  ;;  %v1507_v34 = vpop.f32.mrb[107].mxu1 }
 0x1f7   : > { %v2902_v35 = vpack.c.bf16 %v1792_v30, %v1792_v30  ;;  %v2263_v36 = vsel %vm2159_vm1, %v1792_v30, 0.0  ;;  %v2347_v37 = vmul.f32 %v1792_v30, %v1792_v30  ;;  %v1795_v38 = vadd.f32 %v1794_v33, %v1505_v32  ;;  %v1796_v39 = vpop.f32.mrb[107].mxu0 }
 0x1f8   : > { %v2264_v40 = vadd.f32 %v2263_v36, %v2262_v24 }
 0x1f9   : > { %2147 = vst.msk [vmem:[%s3451_s27 + $0xd0] sm:$0xf] %vm2094_vm0, %v2902_v35  ;;  %v2462_v41 = vsel %vm2159_vm1, %v2347_v37, 0.0  ;;  %v2903_v42 = vpack.c.bf16 %v1795_v38, %v1795_v38  ;;  %v2265_v43 = vsel %vm2159_vm1, %v1795_v38, 0.0  ;;  %v2348_v44 = vmul.f32 %v1795_v38, %v1795_v38 }
 0x1fa   : > { %v2463_v45 = vadd.f32 %v2462_v41, %v2461_v27  ;;  %v2266_v46 = vadd.f32 %v2265_v43, %v2264_v40 }
 0x1fb   : > { %2148 = vst.msk [vmem:[%s3451_s27 + $0xd4] sm:$0xf] %vm2094_vm0, %v2903_v42  ;;  %v2464_v47 = vsel %vm2159_vm1, %v2348_v44, 0.0  ;;  %v1510_v48 = vpop.f32.mrb[108].mxu1 }
 0x1fc   : > { %v2465_v49 = vadd.f32 %v2464_v47, %v2463_v45  ;;  %v1799_v50 = vpop.f32.mrb[108].mxu0  ;;  %v1512_v51 = vpop.f32.mrb[109].mxu1 }
 0x1fd   : > { %v1800_v52 = vadd.f32 %v1799_v50, %v1510_v48  ;;  %v1801_v53 = vpop.f32.mrb[109].mxu0  ;;  %v1513_v54 = vpop.f32.mrb[110].mxu1 }
 0x1fe   : > { %v1802_v55 = vpop.f32.mrb[110].mxu0  ;;  %v1515_v56 = vpop.f32.mrb[111].mxu1 }
 0x1ff   : > { %v2904_v57 = vpack.c.bf16 %v1800_v52, %v1800_v52  ;;  %v2267_v58 = vsel %vm2159_vm1, %v1800_v52, 0.0  ;;  %v2349_v59 = vmul.f32 %v1800_v52, %v1800_v52  ;;  %v1803_v60 = vadd.f32 %v1802_v55, %v1513_v54  ;;  %v1804_v61 = vpop.f32.mrb[111].mxu0 }
 0x200   : > { %v2268_v62 = vadd.f32 %v2267_v58, %v2266_v46 }
 0x201   : > { %2149 = vst.msk [vmem:[%s3451_s27 + $0xd8] sm:$0xf] %vm2094_vm0, %v2904_v57  ;;  %v2466_v63 = vsel %vm2159_vm1, %v2349_v59, 0.0  ;;  %v2905_v0 = vpack.c.bf16 %v1803_v60, %v1803_v60  ;;  %v2269_v1 = vsel %vm2159_vm1, %v1803_v60, 0.0  ;;  %v2350_v2 = vmul.f32 %v1803_v60, %v1803_v60 }
 0x202   : > { %v2467_v3 = vadd.f32 %v2466_v63, %v2465_v49  ;;  %v2270_v4 = vadd.f32 %v2269_v1, %v2268_v62 }
 0x203   : > { %2150 = vst.msk [vmem:[%s3451_s27 + $0xdc] sm:$0xf] %vm2094_vm0, %v2905_v0  ;;  %v2468_v5 = vsel %vm2159_vm1, %v2350_v2, 0.0  ;;  %v1518_v6 = vpop.f32.mrb[112].mxu1 }
 0x204   : > { %v2469_v7 = vadd.f32 %v2468_v5, %v2467_v3  ;;  %v1807_v8 = vpop.f32.mrb[112].mxu0  ;;  %v1520_v9 = vpop.f32.mrb[113].mxu1 }
 0x205   : > { %v1808_v10 = vadd.f32 %v1807_v8, %v1518_v6  ;;  %v1809_v11 = vpop.f32.mrb[113].mxu0  ;;  %v1521_v12 = vpop.f32.mrb[114].mxu1 }
 0x206   : > { %v1810_v13 = vpop.f32.mrb[114].mxu0  ;;  %v1523_v14 = vpop.f32.mrb[115].mxu1 }
 0x207   : > { %v2906_v15 = vpack.c.bf16 %v1808_v10, %v1808_v10  ;;  %v2271_v16 = vsel %vm2159_vm1, %v1808_v10, 0.0  ;;  %v2351_v17 = vmul.f32 %v1808_v10, %v1808_v10  ;;  %v1811_v18 = vadd.f32 %v1810_v13, %v1521_v12  ;;  %v1812_v19 = vpop.f32.mrb[115].mxu0 }
 0x208   : > { %v2272_v20 = vadd.f32 %v2271_v16, %v2270_v4 }
 0x209   : > { %2151 = vst.msk [vmem:[%s3451_s27 + $0xe0] sm:$0xf] %vm2094_vm0, %v2906_v15  ;;  %v2470_v21 = vsel %vm2159_vm1, %v2351_v17, 0.0  ;;  %v2907_v22 = vpack.c.bf16 %v1811_v18, %v1811_v18  ;;  %v2273_v23 = vsel %vm2159_vm1, %v1811_v18, 0.0  ;;  %v2352_v24 = vmul.f32 %v1811_v18, %v1811_v18 }
 0x20a   : > { %v2471_v25 = vadd.f32 %v2470_v21, %v2469_v7  ;;  %v2274_v26 = vadd.f32 %v2273_v23, %v2272_v20 }
 0x20b   : > { %2152 = vst.msk [vmem:[%s3451_s27 + $0xe4] sm:$0xf] %vm2094_vm0, %v2907_v22  ;;  %v2472_v27 = vsel %vm2159_vm1, %v2352_v24, 0.0  ;;  %v1526_v28 = vpop.f32.mrb[116].mxu1 }
 0x20c   : > { %v2473_v29 = vadd.f32 %v2472_v27, %v2471_v25  ;;  %v1815_v30 = vpop.f32.mrb[116].mxu0  ;;  %v1528_v31 = vpop.f32.mrb[117].mxu1 }
 0x20d   : > { %v1816_v32 = vadd.f32 %v1815_v30, %v1526_v28  ;;  %v1817_v33 = vpop.f32.mrb[117].mxu0  ;;  %v1529_v34 = vpop.f32.mrb[118].mxu1 }
 0x20e   : > { %v1818_v35 = vpop.f32.mrb[118].mxu0  ;;  %v1531_v36 = vpop.f32.mrb[119].mxu1 }
 0x20f   : > { %v2908_v37 = vpack.c.bf16 %v1816_v32, %v1816_v32  ;;  %v2275_v38 = vsel %vm2159_vm1, %v1816_v32, 0.0  ;;  %v2353_v39 = vmul.f32 %v1816_v32, %v1816_v32  ;;  %v1819_v40 = vadd.f32 %v1818_v35, %v1529_v34  ;;  %v1820_v41 = vpop.f32.mrb[119].mxu0 }
 0x210   : > { %v2276_v42 = vadd.f32 %v2275_v38, %v2274_v26 }
 0x211   : > { %2153 = vst.msk [vmem:[%s3451_s27 + $0xe8] sm:$0xf] %vm2094_vm0, %v2908_v37  ;;  %v2474_v43 = vsel %vm2159_vm1, %v2353_v39, 0.0  ;;  %v2909_v44 = vpack.c.bf16 %v1819_v40, %v1819_v40  ;;  %v2277_v45 = vsel %vm2159_vm1, %v1819_v40, 0.0  ;;  %v2354_v46 = vmul.f32 %v1819_v40, %v1819_v40 }
 0x212   : > { %v2475_v47 = vadd.f32 %v2474_v43, %v2473_v29  ;;  %v2278_v48 = vadd.f32 %v2277_v45, %v2276_v42 }
 0x213   : > { %2154 = vst.msk [vmem:[%s3451_s27 + $0xec] sm:$0xf] %vm2094_vm0, %v2909_v44  ;;  %v2476_v49 = vsel %vm2159_vm1, %v2354_v46, 0.0  ;;  %v1534_v50 = vpop.f32.mrb[120].mxu1 }
 0x214   : > { %v2477_v51 = vadd.f32 %v2476_v49, %v2475_v47  ;;  %v1823_v52 = vpop.f32.mrb[120].mxu0  ;;  %v1536_v53 = vpop.f32.mrb[121].mxu1 }
 0x215   : > { %v1824_v54 = vadd.f32 %v1823_v52, %v1534_v50  ;;  %v1825_v55 = vpop.f32.mrb[121].mxu0  ;;  %v1537_v56 = vpop.f32.mrb[122].mxu1 }
 0x216   : > { %v1826_v57 = vpop.f32.mrb[122].mxu0  ;;  %v1539_v58 = vpop.f32.mrb[123].mxu1 }
 0x217   : > { %v2910_v59 = vpack.c.bf16 %v1824_v54, %v1824_v54  ;;  %v2279_v60 = vsel %vm2159_vm1, %v1824_v54, 0.0  ;;  %v2355_v61 = vmul.f32 %v1824_v54, %v1824_v54  ;;  %v1827_v62 = vadd.f32 %v1826_v57, %v1537_v56  ;;  %v1828_v63 = vpop.f32.mrb[123].mxu0 }
 0x218   : > { %v2280_v0 = vadd.f32 %v2279_v60, %v2278_v48 }
 0x219   : > { %2155 = vst.msk [vmem:[%s3451_s27 + $0xf0] sm:$0xf] %vm2094_vm0, %v2910_v59  ;;  %v2478_v1 = vsel %vm2159_vm1, %v2355_v61, 0.0  ;;  %v2911_v2 = vpack.c.bf16 %v1827_v62, %v1827_v62  ;;  %v2281_v3 = vsel %vm2159_vm1, %v1827_v62, 0.0  ;;  %v2356_v4 = vmul.f32 %v1827_v62, %v1827_v62 }
 0x21a   : > { %v2479_v5 = vadd.f32 %v2478_v1, %v2477_v51  ;;  %v2282_v6 = vadd.f32 %v2281_v3, %v2280_v0 }
 0x21b   : > { %2156 = vst.msk [vmem:[%s3451_s27 + $0xf4] sm:$0xf] %vm2094_vm0, %v2911_v2  ;;  %v2480_v7 = vsel %vm2159_vm1, %v2356_v4, 0.0  ;;  %v1542_v8 = vpop.f32.mrb[124].mxu1 }
 0x21c   : > { %v2481_v9 = vadd.f32 %v2480_v7, %v2479_v5  ;;  %v1831_v10 = vpop.f32.mrb[124].mxu0  ;;  %v1544_v11 = vpop.f32.mrb[125].mxu1 }
 0x21d   : > { %v1832_v12 = vadd.f32 %v1831_v10, %v1542_v8  ;;  %v1833_v13 = vpop.f32.mrb[125].mxu0  ;;  %v1545_v14 = vpop.f32.mrb[126].mxu1 }
 0x21e   : > { %v1834_v15 = vpop.f32.mrb[126].mxu0  ;;  %v1547_v16 = vpop.f32.mrb[127].mxu1 }
 0x21f   : > { %v2912_v17 = vpack.c.bf16 %v1832_v12, %v1832_v12  ;;  %v2283_v18 = vsel %vm2159_vm1, %v1832_v12, 0.0  ;;  %v2357_v19 = vmul.f32 %v1832_v12, %v1832_v12  ;;  %v1835_v20 = vadd.f32 %v1834_v15, %v1545_v14  ;;  %v1836_v21 = vpop.f32.mrb[127].mxu0 }
 0x220   : > { %v2284_v22 = vadd.f32 %v2283_v18, %v2282_v6 }
 0x221   : > { %2157 = vst.msk [vmem:[%s3451_s27 + $0xf8] sm:$0xf] %vm2094_vm0, %v2912_v17  ;;  %v2482_v23 = vsel %vm2159_vm1, %v2357_v19, 0.0  ;;  %v2913_v24 = vpack.c.bf16 %v1835_v20, %v1835_v20  ;;  %v2285_v25 = vsel %vm2159_vm1, %v1835_v20, 0.0  ;;  %v2358_v26 = vmul.f32 %v1835_v20, %v1835_v20 }
 0x222   : > { %v2483_v27 = vadd.f32 %v2482_v23, %v2481_v9  ;;  %v2286_v28 = vadd.f32 %v2285_v25, %v2284_v22 }
 0x223   : > { %2158 = vst.msk [vmem:[%s3451_s27 + $0xfc] sm:$0xf] %vm2094_vm0, %v2913_v24  ;;  %v2484_v29 = vsel %vm2159_vm1, %v2358_v26, 0.0 }
 0x224   : > { %v2287_v30 = vrot.slane %v2286_v28, 4  ;;  %v2485_v31 = vadd.f32 %v2484_v29, %v2483_v27 }
 0x226   : > { %v2288_v32 = vadd.f32 %v2287_v30, %v2286_v28  ;;  %v2486_v33 = vrot.slane %v2485_v31, 4 }
 0x228   : > { %v2289_v34 = vrot.slane %v2288_v32, 2  ;;  %v2487_v35 = vadd.f32 %v2486_v33, %v2485_v31 }
 0x22a   : > { %v2290_v36 = vadd.f32 %v2289_v34, %v2288_v32  ;;  %v2488_v37 = vrot.slane %v2487_v35, 2 }
 0x22c   : > { %v2291_v38 = vrot.slane %v2290_v36, 1  ;;  %v2489_v39 = vadd.f32 %v2488_v37, %v2487_v35 }
 0x22e   : > { %v2292_v40 = vadd.f32 %v2291_v38, %v2290_v36  ;;  %v2490_v41 = vrot.slane %v2489_v39, 1 }
 0x230   : > { %2294 = vst.msk [vmem:[%s231_s30] sm:$0x1] %vm2293_vm2, %v2292_v40  ;;  %v2491_v42 = vadd.f32 %v2490_v41, %v2489_v39 }
 0x232   : > { %2492 = vst.msk [vmem:[%s234_s7] sm:$0x1] %vm2293_vm2, %v2491_v42 }
 0x233 PF: > { %s15_s15 = sadd.s32 1, %s3217_s15  }
 0x234   : > { %p12_p4 = scmp.ge.s32.totalorder %s15_s15, 6  }
 0x236   :  { %14 = sbr.rel (!%p12_p4) target bundleno = 1 (0x1), region = 85 }

// kernel: generator_forward.9
= control target key start
LH: loop header
LB: loop body
LE: loop exit
PB: predicated region body
PF: predicated region fallthrough
CT: control target
= control target key end

     0   :  { %s4731_s9 = smov 0   ;;  %s5581_s0 = inlined_call_operand.vmem [shape: bf16[4,2048,256], index: 0, kind: input, shape index: {}]   ;;  %s5582_s1 = inlined_call_operand.vmem [shape: bf16[4,256,128], index: 1, kind: input, shape index: {}]   ;;  %s5583_s2 = inlined_call_operand.vmem [shape: f32[4,2048,1], index: 2, kind: output, shape index: {}]  }
   0x1 LB: > { %s3466_s10 = sadd.s32 4294967295, %s4713_s9   ;;  %p3470_p0 = scmp.ge.s32.totalorder %s4713_s9, 1  ;;  %s4713_s9 = sphi %s4731_s9, %s12_s9  }
   0x2   : > { %p122_p1 = scmp.lt.s32.totalorder %s4713_s9, 5 }
   0x4   : > { %p123_p2 = pnand %p3470_p0, %p122_p1 }
   0x5   : > { %p149_p3 = scmp.lt.s32.totalorder (!%p123_p2), %s3466_s10, 3  ;;  %v4715_v0 = vmov (!%p123_p2), 0   ;;  %vm3142_vm0 = vcmask (!%p123_p2), 7168  }
   0x6   : > { %126 = sbr.rel (%p123_p2) target bundleno = 811 (0x32b), region = 28  ;;  %1829 = vmatprep.subr.bf16.mxu0 (!%p123_p2), %v4715_v0  ;;  %3754 = vmatprep.subr.bf16.mxu1 (!%p123_p2), %v4715_v0 }
   0xd   : > { %s5585_s10 = smov (!%p149_p3, %s3466_s10), 3 }
   0xe   : > { %s3752_s11 = sshll.u32 %s5585_s10, 7  ;;  %s3751_s15 = sshll.u32 %s5585_s10, 11 }
   0xf   : > { %s4747_s14 = scalar_lea.vmem %s5582_s1, %s3752_s11  ;;  %s4766_s18 = scalar_lea.vmem %s5581_s0, %s3751_s15 }
  0x10   : > { %v3795_v1 = vld [vmem:[%s4747_s14] sm:$0xff]   ;;  %v3796_v2 = vld [vmem:[%s4747_s14 + $0x8] sm:$0xff]   ;;  %v3797_v3 = vld [vmem:[%s4747_s14 + $0x10] sm:$0xff]   ;;  %s4922_s21 = scalar_lea.vmem %s5583_s2, %s3751_s15 }
  0x11   : > { %1830 = vmatpush1.bf16.msra.mxu0 %v3795_v1  ;;  %3770 = vmatpush1.bf16.msra.mxu1 %v3795_v1  ;;  %v3798_v4 = vld [vmem:[%s4747_s14 + $0x18] sm:$0xff]   ;;  %v3799_v5 = vld [vmem:[%s4747_s14 + $0x20] sm:$0xff]   ;;  %v3800_v7 = vld [vmem:[%s4747_s14 + $0x28] sm:$0xff]  }
  0x12   : > { %1831 = vmatprep.subr.bf16.mxu0 %v4715_v0  ;;  %3755 = vmatprep.subr.bf16.mxu1 %v4715_v0  ;;  %v3813_v6 = vld [vmem:[%s4766_s18 + $0x4] ss:$8 sps:$4 sm:$0xff]   ;;  %v3801_v9 = vld [vmem:[%s4747_s14 + $0x30] sm:$0xff]   ;;  %v3802_v10 = vld [vmem:[%s4747_s14 + $0x38] sm:$0xff]  }
  0x13   : > { %v3816_v8 = vld [vmem:[%s4766_s18 + $0x404] ss:$8 sps:$4 sm:$0xff]   ;;  %1861 = vmatprep.mubr.bf16.mxu0 %v3813_v6  ;;  %v3805_v13 = vld [vmem:[%s4747_s14 + $0x50] sm:$0xff]   ;;  %v3806_v14 = vld [vmem:[%s4747_s14 + $0x58] sm:$0xff]  }
  0x14   : > { %2373 = vmatprep.mubr.bf16.mxu1 %v3816_v8  ;;  %v3803_v11 = vld [vmem:[%s4747_s14 + $0x40] sm:$0xff]   ;;  %v3804_v12 = vld [vmem:[%s4747_s14 + $0x48] sm:$0xff]   ;;  %v3809_v17 = vld [vmem:[%s4747_s14 + $0x70] sm:$0xff]  }
  0x15   : > { %1832 = vmatpush1.bf16.msra.mxu0 %v3796_v2  ;;  %3771 = vmatpush1.bf16.msra.mxu1 %v3796_v2  ;;  %v3807_v15 = vld [vmem:[%s4747_s14 + $0x60] sm:$0xff]   ;;  %v3808_v16 = vld [vmem:[%s4747_s14 + $0x68] sm:$0xff]   ;;  %v3810_v18 = vld [vmem:[%s4747_s14 + $0x78] sm:$0xff]  }
  0x16   : > { %1833 = vmatprep.subr.bf16.mxu0 %v4715_v0  ;;  %3756 = vmatprep.subr.bf16.mxu1 %v4715_v0  ;;  %v3811_v19 = vld [vmem:[%s4766_s18] ss:$8 sps:$4 sm:$0xff]   ;;  %v3817_v21 = vld [vmem:[%s4766_s18 + $0x14] ss:$8 sps:$4 sm:$0xff]   ;;  %v3821_v23 = vld [vmem:[%s4766_s18 + $0x10] ss:$8 sps:$4 sm:$0xff]  }
  0x17   : > { %v3814_v20 = vld [vmem:[%s4766_s18 + $0x400] ss:$8 sps:$4 sm:$0xff]   ;;  %v3819_v22 = vld [vmem:[%s4766_s18 + $0x414] ss:$8 sps:$4 sm:$0xff]   ;;  %v3822_v24 = vld [vmem:[%s4766_s18 + $0x410] ss:$8 sps:$4 sm:$0xff]  }
  0x18   : > { %v3823_v25 = vld [vmem:[%s4766_s18 + $0x24] ss:$8 sps:$4 sm:$0xff]   ;;  %v3827_v27 = vld [vmem:[%s4766_s18 + $0x20] ss:$8 sps:$4 sm:$0xff]   ;;  %v3829_v29 = vld [vmem:[%s4766_s18 + $0x34] ss:$8 sps:$4 sm:$0xff]  }
  0x19   : > { %1834 = vmatpush1.bf16.msra.mxu0 %v3797_v3  ;;  %3772 = vmatpush1.bf16.msra.mxu1 %v3797_v3  ;;  %v3825_v26 = vld [vmem:[%s4766_s18 + $0x424] ss:$8 sps:$4 sm:$0xff]   ;;  %v3828_v28 = vld [vmem:[%s4766_s18 + $0x420] ss:$8 sps:$4 sm:$0xff]   ;;  %v3831_v30 = vld [vmem:[%s4766_s18 + $0x434] ss:$8 sps:$4 sm:$0xff]  }
  0x1a   : > { %1835 = vmatprep.subr.bf16.mxu0 %v4715_v0  ;;  %3757 = vmatprep.subr.bf16.mxu1 %v4715_v0  ;;  %v3833_v31 = vld [vmem:[%s4766_s18 + $0x30] ss:$8 sps:$4 sm:$0xff]   ;;  %v3835_v33 = vld [vmem:[%s4766_s18 + $0x44] ss:$8 sps:$4 sm:$0xff]   ;;  %v3839_v35 = vld [vmem:[%s4766_s18 + $0x40] ss:$8 sps:$4 sm:$0xff]  }
  0x1b   : > { %v3834_v32 = vld [vmem:[%s4766_s18 + $0x430] ss:$8 sps:$4 sm:$0xff]   ;;  %v3837_v34 = vld [vmem:[%s4766_s18 + $0x444] ss:$8 sps:$4 sm:$0xff]   ;;  %v3840_v36 = vld [vmem:[%s4766_s18 + $0x440] ss:$8 sps:$4 sm:$0xff]  }
  0x1c   : > { %v3841_v37 = vld [vmem:[%s4766_s18 + $0x54] ss:$8 sps:$4 sm:$0xff]   ;;  %v3845_v39 = vld [vmem:[%s4766_s18 + $0x50] ss:$8 sps:$4 sm:$0xff]   ;;  %v3847_v41 = vld [vmem:[%s4766_s18 + $0x64] ss:$8 sps:$4 sm:$0xff]  }
  0x1d   : > { %1836 = vmatpush1.bf16.msra.mxu0 %v3798_v4  ;;  %3773 = vmatpush1.bf16.msra.mxu1 %v3798_v4  ;;  %v3843_v38 = vld [vmem:[%s4766_s18 + $0x454] ss:$8 sps:$4 sm:$0xff]   ;;  %v3846_v40 = vld [vmem:[%s4766_s18 + $0x450] ss:$8 sps:$4 sm:$0xff]   ;;  %v3849_v42 = vld [vmem:[%s4766_s18 + $0x464] ss:$8 sps:$4 sm:$0xff]  }
  0x1e   : > { %1837 = vmatprep.subr.bf16.mxu0 %v4715_v0  ;;  %3758 = vmatprep.subr.bf16.mxu1 %v4715_v0  ;;  %v3851_v43 = vld [vmem:[%s4766_s18 + $0x60] ss:$8 sps:$4 sm:$0xff]   ;;  %v3853_v45 = vld [vmem:[%s4766_s18 + $0x74] ss:$8 sps:$4 sm:$0xff]   ;;  %v3857_v47 = vld [vmem:[%s4766_s18 + $0x70] ss:$8 sps:$4 sm:$0xff]  }
  0x1f   : > { %v3852_v44 = vld [vmem:[%s4766_s18 + $0x460] ss:$8 sps:$4 sm:$0xff]   ;;  %v3855_v46 = vld [vmem:[%s4766_s18 + $0x474] ss:$8 sps:$4 sm:$0xff]   ;;  %v3858_v48 = vld [vmem:[%s4766_s18 + $0x470] ss:$8 sps:$4 sm:$0xff]  }
  0x20   : > { %v3859_v49 = vld [vmem:[%s4766_s18 + $0x84] ss:$8 sps:$4 sm:$0xff]   ;;  %v3863_v51 = vld [vmem:[%s4766_s18 + $0x80] ss:$8 sps:$4 sm:$0xff]   ;;  %v3865_v53 = vld [vmem:[%s4766_s18 + $0x94] ss:$8 sps:$4 sm:$0xff]  }
  0x21   : > { %1838 = vmatpush1.bf16.msra.mxu0 %v3799_v5  ;;  %3774 = vmatpush1.bf16.msra.mxu1 %v3799_v5  ;;  %v3861_v50 = vld [vmem:[%s4766_s18 + $0x484] ss:$8 sps:$4 sm:$0xff]   ;;  %v3864_v52 = vld [vmem:[%s4766_s18 + $0x480] ss:$8 sps:$4 sm:$0xff]   ;;  %v3867_v54 = vld [vmem:[%s4766_s18 + $0x494] ss:$8 sps:$4 sm:$0xff]  }
  0x22   : > { %1839 = vmatprep.subr.bf16.mxu0 %v4715_v0  ;;  %3759 = vmatprep.subr.bf16.mxu1 %v4715_v0  ;;  %v3869_v55 = vld [vmem:[%s4766_s18 + $0x90] ss:$8 sps:$4 sm:$0xff]   ;;  %v3871_v57 = vld [vmem:[%s4766_s18 + $0xa4] ss:$8 sps:$4 sm:$0xff]   ;;  %v3875_v59 = vld [vmem:[%s4766_s18 + $0xa0] ss:$8 sps:$4 sm:$0xff]  }
  0x23   : > { %v3870_v56 = vld [vmem:[%s4766_s18 + $0x490] ss:$8 sps:$4 sm:$0xff]   ;;  %v3873_v58 = vld [vmem:[%s4766_s18 + $0x4a4] ss:$8 sps:$4 sm:$0xff]   ;;  %v3876_v60 = vld [vmem:[%s4766_s18 + $0x4a0] ss:$8 sps:$4 sm:$0xff]  }
  0x24   : > { %v3877_v61 = vld [vmem:[%s4766_s18 + $0xb4] ss:$8 sps:$4 sm:$0xff]   ;;  %v3881_v63 = vld [vmem:[%s4766_s18 + $0xb0] ss:$8 sps:$4 sm:$0xff]   ;;  %v3883_v1 = vld [vmem:[%s4766_s18 + $0xc4] ss:$8 sps:$4 sm:$0xff]  }
  0x25   : > { %1840 = vmatpush1.bf16.msra.mxu0 %v3800_v7  ;;  %3775 = vmatpush1.bf16.msra.mxu1 %v3800_v7  ;;  %v3879_v62 = vld [vmem:[%s4766_s18 + $0x4b4] ss:$8 sps:$4 sm:$0xff]   ;;  %v3885_v2 = vld [vmem:[%s4766_s18 + $0x4c4] ss:$8 sps:$4 sm:$0xff]   ;;  %v3887_v3 = vld [vmem:[%s4766_s18 + $0xc0] ss:$8 sps:$4 sm:$0xff]  }
  0x26   : > { %1841 = vmatprep.subr.bf16.mxu0 %v4715_v0  ;;  %3760 = vmatprep.subr.bf16.mxu1 %v4715_v0  ;;  %v3888_v4 = vld [vmem:[%s4766_s18 + $0x4c0] ss:$8 sps:$4 sm:$0xff]   ;;  %v3889_v5 = vld [vmem:[%s4766_s18 + $0xd4] ss:$8 sps:$4 sm:$0xff]   ;;  %v3893_v7 = vld [vmem:[%s4766_s18 + $0xd0] ss:$8 sps:$4 sm:$0xff]  }
  0x27   : > { %v3891_v6 = vld [vmem:[%s4766_s18 + $0x4d4] ss:$8 sps:$4 sm:$0xff]   ;;  %v3894_v8 = vld [vmem:[%s4766_s18 + $0x4d0] ss:$8 sps:$4 sm:$0xff]  }
  0x29   : > { %1842 = vmatpush1.bf16.msra.mxu0 %v3801_v9  ;;  %3776 = vmatpush1.bf16.msra.mxu1 %v3801_v9  ;;  %v3895_v9 = vld [vmem:[%s4766_s18 + $0xe4] ss:$8 sps:$4 sm:$0xff]  }
  0x2a   : > { %1843 = vmatprep.subr.bf16.mxu0 %v4715_v0  ;;  %3761 = vmatprep.subr.bf16.mxu1 %v4715_v0 }
  0x2d   : > { %1844 = vmatpush1.bf16.msra.mxu0 %v3802_v10  ;;  %3777 = vmatpush1.bf16.msra.mxu1 %v3802_v10  ;;  %v3897_v10 = vld [vmem:[%s4766_s18 + $0x4e4] ss:$8 sps:$4 sm:$0xff]  }
  0x2e   : > { %1845 = vmatprep.subr.bf16.mxu0 %v4715_v0  ;;  %3762 = vmatprep.subr.bf16.mxu1 %v4715_v0 }
  0x31   : > { %1846 = vmatpush1.bf16.msra.mxu0 %v3803_v11  ;;  %3778 = vmatpush1.bf16.msra.mxu1 %v3803_v11  ;;  %v3899_v11 = vld [vmem:[%s4766_s18 + $0xe0] ss:$8 sps:$4 sm:$0xff]  }
  0x32   : > { %1847 = vmatprep.subr.bf16.mxu0 %v4715_v0  ;;  %3763 = vmatprep.subr.bf16.mxu1 %v4715_v0 }
  0x35   : > { %1848 = vmatpush1.bf16.msra.mxu0 %v3804_v12  ;;  %3779 = vmatpush1.bf16.msra.mxu1 %v3804_v12  ;;  %v3900_v12 = vld [vmem:[%s4766_s18 + $0x4e0] ss:$8 sps:$4 sm:$0xff]  }
  0x36   : > { %1849 = vmatprep.subr.bf16.mxu0 %v4715_v0  ;;  %3764 = vmatprep.subr.bf16.mxu1 %v4715_v0 }
  0x39   : > { %1850 = vmatpush1.bf16.msra.mxu0 %v3805_v13  ;;  %3780 = vmatpush1.bf16.msra.mxu1 %v3805_v13  ;;  %v3901_v13 = vld [vmem:[%s4766_s18 + $0xf4] ss:$8 sps:$4 sm:$0xff]  }
  0x3a   : > { %1851 = vmatprep.subr.bf16.mxu0 %v4715_v0  ;;  %3765 = vmatprep.subr.bf16.mxu1 %v4715_v0 }
  0x3d   : > { %1852 = vmatpush1.bf16.msra.mxu0 %v3806_v14  ;;  %3781 = vmatpush1.bf16.msra.mxu1 %v3806_v14  ;;  %v3903_v14 = vld [vmem:[%s4766_s18 + $0x4f4] ss:$8 sps:$4 sm:$0xff]  }
  0x3e   : > { %1853 = vmatprep.subr.bf16.mxu0 %v4715_v0  ;;  %3766 = vmatprep.subr.bf16.mxu1 %v4715_v0 }
  0x41   : > { %1854 = vmatpush1.bf16.msra.mxu0 %v3807_v15  ;;  %3782 = vmatpush1.bf16.msra.mxu1 %v3807_v15  ;;  %v3905_v15 = vld [vmem:[%s4766_s18 + $0xf0] ss:$8 sps:$4 sm:$0xff]  }
  0x42   : > { %1855 = vmatprep.subr.bf16.mxu0 %v4715_v0  ;;  %3767 = vmatprep.subr.bf16.mxu1 %v4715_v0 }
  0x45   : > { %1856 = vmatpush1.bf16.msra.mxu0 %v3808_v16  ;;  %3783 = vmatpush1.bf16.msra.mxu1 %v3808_v16  ;;  %v3906_v16 = vld [vmem:[%s4766_s18 + $0x4f0] ss:$8 sps:$4 sm:$0xff]  }
  0x46   : > { %1857 = vmatprep.subr.bf16.mxu0 %v4715_v0  ;;  %3768 = vmatprep.subr.bf16.mxu1 %v4715_v0 }
  0x49   : > { %1858 = vmatpush1.bf16.msra.mxu0 %v3809_v17  ;;  %3784 = vmatpush1.bf16.msra.mxu1 %v3809_v17  ;;  %v3907_v17 = vld [vmem:[%s4766_s18 + $0x104] ss:$8 sps:$4 sm:$0xff]  }
  0x4a   : > { %1859 = vmatprep.subr.bf16.mxu0 %v4715_v0  ;;  %3769 = vmatprep.subr.bf16.mxu1 %v4715_v0  ;;  %v3882_v0 = vld [vmem:[%s4766_s18 + $0x4b0] ss:$8 sps:$4 sm:$0xff]  }
  0x4d   : > { %1860 = vmatpush1.bf16.msra.mxu0 %v3810_v18  ;;  %3785 = vmatpush1.bf16.msra.mxu1 %v3810_v18  ;;  %v3909_v18 = vld [vmem:[%s4766_s18 + $0x504] ss:$8 sps:$4 sm:$0xff]  }
  0x50   : > { %1862 = vmatmul.mubr.bf16.vlgmr.msra.gmra.mrb[0].mxu0 %v3811_v19  ;;  %2374 = vmatmul.mubr.bf16.vlgmr.msra.gmra.mrb[0].mxu1 %v3814_v20  ;;  %v3911_v19 = vld [vmem:[%s4766_s18 + $0x100] ss:$8 sps:$4 sm:$0xff]  }
  0x51   : > { %1869 = vmatprep.mubr.bf16.mxu0 %v3817_v21  ;;  %2381 = vmatprep.mubr.bf16.mxu1 %v3819_v22  ;;  %v3912_v20 = vld [vmem:[%s4766_s18 + $0x500] ss:$8 sps:$4 sm:$0xff]   ;;  %v3913_v21 = vld [vmem:[%s4766_s18 + $0x114] ss:$8 sps:$4 sm:$0xff]  }
  0x52   : > { %v3915_v22 = vld [vmem:[%s4766_s18 + $0x514] ss:$8 sps:$4 sm:$0xff]  }
  0x58   : > { %1870 = vmatmul.mubr.bf16.gmra.mrb[4].mxu0 %v3821_v23  ;;  %2382 = vmatmul.mubr.bf16.gmra.mrb[4].mxu1 %v3822_v24  ;;  %v3917_v23 = vld [vmem:[%s4766_s18 + $0x110] ss:$8 sps:$4 sm:$0xff]  }
  0x59   : > { %1877 = vmatprep.mubr.bf16.mxu0 %v3823_v25  ;;  %2389 = vmatprep.mubr.bf16.mxu1 %v3825_v26  ;;  %v3918_v24 = vld [vmem:[%s4766_s18 + $0x510] ss:$8 sps:$4 sm:$0xff]   ;;  %v3919_v25 = vld [vmem:[%s4766_s18 + $0x124] ss:$8 sps:$4 sm:$0xff]  }
  0x5a   : > { %v3921_v26 = vld [vmem:[%s4766_s18 + $0x524] ss:$8 sps:$4 sm:$0xff]  }
  0x60   : > { %1878 = vmatmul.mubr.bf16.gmra.mrb[8].mxu0 %v3827_v27  ;;  %2390 = vmatmul.mubr.bf16.gmra.mrb[8].mxu1 %v3828_v28  ;;  %v3923_v27 = vld [vmem:[%s4766_s18 + $0x120] ss:$8 sps:$4 sm:$0xff]  }
  0x61   : > { %1885 = vmatprep.mubr.bf16.mxu0 %v3829_v29  ;;  %2397 = vmatprep.mubr.bf16.mxu1 %v3831_v30  ;;  %v3924_v28 = vld [vmem:[%s4766_s18 + $0x520] ss:$8 sps:$4 sm:$0xff]   ;;  %v3925_v29 = vld [vmem:[%s4766_s18 + $0x134] ss:$8 sps:$4 sm:$0xff]  }
  0x62   : > { %v3927_v30 = vld [vmem:[%s4766_s18 + $0x534] ss:$8 sps:$4 sm:$0xff]  }
  0x68   : > { %1886 = vmatmul.mubr.bf16.gmra.mrb[12].mxu0 %v3833_v31  ;;  %2398 = vmatmul.mubr.bf16.gmra.mrb[12].mxu1 %v3834_v32  ;;  %v3929_v31 = vld [vmem:[%s4766_s18 + $0x130] ss:$8 sps:$4 sm:$0xff]  }
  0x69   : > { %1893 = vmatprep.mubr.bf16.mxu0 %v3835_v33  ;;  %2405 = vmatprep.mubr.bf16.mxu1 %v3837_v34  ;;  %v3930_v32 = vld [vmem:[%s4766_s18 + $0x530] ss:$8 sps:$4 sm:$0xff]   ;;  %v3931_v33 = vld [vmem:[%s4766_s18 + $0x144] ss:$8 sps:$4 sm:$0xff]  }
  0x6a   : > { %v3933_v34 = vld [vmem:[%s4766_s18 + $0x544] ss:$8 sps:$4 sm:$0xff]  }
  0x70   : > { %1894 = vmatmul.mubr.bf16.gmra.mrb[16].mxu0 %v3839_v35  ;;  %2406 = vmatmul.mubr.bf16.gmra.mrb[16].mxu1 %v3840_v36  ;;  %v3935_v35 = vld [vmem:[%s4766_s18 + $0x140] ss:$8 sps:$4 sm:$0xff]  }
  0x71   : > { %1901 = vmatprep.mubr.bf16.mxu0 %v3841_v37  ;;  %2413 = vmatprep.mubr.bf16.mxu1 %v3843_v38  ;;  %v3936_v36 = vld [vmem:[%s4766_s18 + $0x540] ss:$8 sps:$4 sm:$0xff]   ;;  %v3937_v37 = vld [vmem:[%s4766_s18 + $0x154] ss:$8 sps:$4 sm:$0xff]  }
  0x72   : > { %v3939_v38 = vld [vmem:[%s4766_s18 + $0x554] ss:$8 sps:$4 sm:$0xff]  }
  0x78   : > { %1902 = vmatmul.mubr.bf16.gmra.mrb[20].mxu0 %v3845_v39  ;;  %2414 = vmatmul.mubr.bf16.gmra.mrb[20].mxu1 %v3846_v40  ;;  %v3941_v39 = vld [vmem:[%s4766_s18 + $0x150] ss:$8 sps:$4 sm:$0xff]  }
  0x79   : > { %1909 = vmatprep.mubr.bf16.mxu0 %v3847_v41  ;;  %2421 = vmatprep.mubr.bf16.mxu1 %v3849_v42  ;;  %v3942_v40 = vld [vmem:[%s4766_s18 + $0x550] ss:$8 sps:$4 sm:$0xff]   ;;  %v3943_v41 = vld [vmem:[%s4766_s18 + $0x164] ss:$8 sps:$4 sm:$0xff]  }
  0x7a   : > { %v3945_v42 = vld [vmem:[%s4766_s18 + $0x564] ss:$8 sps:$4 sm:$0xff]  }
  0x80   : > { %1910 = vmatmul.mubr.bf16.gmra.mrb[24].mxu0 %v3851_v43  ;;  %2422 = vmatmul.mubr.bf16.gmra.mrb[24].mxu1 %v3852_v44  ;;  %v3947_v43 = vld [vmem:[%s4766_s18 + $0x160] ss:$8 sps:$4 sm:$0xff]  }
  0x81   : > { %1917 = vmatprep.mubr.bf16.mxu0 %v3853_v45  ;;  %2429 = vmatprep.mubr.bf16.mxu1 %v3855_v46  ;;  %v3948_v44 = vld [vmem:[%s4766_s18 + $0x560] ss:$8 sps:$4 sm:$0xff]   ;;  %v3949_v45 = vld [vmem:[%s4766_s18 + $0x174] ss:$8 sps:$4 sm:$0xff]  }
  0x82   : > { %v3951_v46 = vld [vmem:[%s4766_s18 + $0x574] ss:$8 sps:$4 sm:$0xff]  }
  0x88   : > { %1918 = vmatmul.mubr.bf16.gmra.mrb[28].mxu0 %v3857_v47  ;;  %2430 = vmatmul.mubr.bf16.gmra.mrb[28].mxu1 %v3858_v48  ;;  %v3953_v47 = vld [vmem:[%s4766_s18 + $0x170] ss:$8 sps:$4 sm:$0xff]  }
  0x89   : > { %1925 = vmatprep.mubr.bf16.mxu0 %v3859_v49  ;;  %2437 = vmatprep.mubr.bf16.mxu1 %v3861_v50  ;;  %v3954_v48 = vld [vmem:[%s4766_s18 + $0x570] ss:$8 sps:$4 sm:$0xff]   ;;  %v3955_v49 = vld [vmem:[%s4766_s18 + $0x184] ss:$8 sps:$4 sm:$0xff]  }
  0x8a   : > { %v3957_v50 = vld [vmem:[%s4766_s18 + $0x584] ss:$8 sps:$4 sm:$0xff]  }
  0x90   : > { %1926 = vmatmul.mubr.bf16.gmra.mrb[32].mxu0 %v3863_v51  ;;  %2438 = vmatmul.mubr.bf16.gmra.mrb[32].mxu1 %v3864_v52  ;;  %v3959_v51 = vld [vmem:[%s4766_s18 + $0x180] ss:$8 sps:$4 sm:$0xff]  }
  0x91   : > { %1933 = vmatprep.mubr.bf16.mxu0 %v3865_v53  ;;  %2445 = vmatprep.mubr.bf16.mxu1 %v3867_v54  ;;  %v3960_v52 = vld [vmem:[%s4766_s18 + $0x580] ss:$8 sps:$4 sm:$0xff]   ;;  %v3961_v53 = vld [vmem:[%s4766_s18 + $0x194] ss:$8 sps:$4 sm:$0xff]  }
  0x92   : > { %v3963_v54 = vld [vmem:[%s4766_s18 + $0x594] ss:$8 sps:$4 sm:$0xff]  }
  0x98   : > { %1934 = vmatmul.mubr.bf16.gmra.mrb[36].mxu0 %v3869_v55  ;;  %2446 = vmatmul.mubr.bf16.gmra.mrb[36].mxu1 %v3870_v56  ;;  %v3965_v55 = vld [vmem:[%s4766_s18 + $0x190] ss:$8 sps:$4 sm:$0xff]  }
  0x99   : > { %1941 = vmatprep.mubr.bf16.mxu0 %v3871_v57  ;;  %2453 = vmatprep.mubr.bf16.mxu1 %v3873_v58  ;;  %v3966_v56 = vld [vmem:[%s4766_s18 + $0x590] ss:$8 sps:$4 sm:$0xff]   ;;  %v3967_v57 = vld [vmem:[%s4766_s18 + $0x1a4] ss:$8 sps:$4 sm:$0xff]  }
  0x9a   : > { %v3969_v58 = vld [vmem:[%s4766_s18 + $0x5a4] ss:$8 sps:$4 sm:$0xff]  }
  0xa0   : > { %1942 = vmatmul.mubr.bf16.gmra.mrb[40].mxu0 %v3875_v59  ;;  %2454 = vmatmul.mubr.bf16.gmra.mrb[40].mxu1 %v3876_v60  ;;  %v3971_v59 = vld [vmem:[%s4766_s18 + $0x1a0] ss:$8 sps:$4 sm:$0xff]  }
  0xa1   : > { %1949 = vmatprep.mubr.bf16.mxu0 %v3877_v61  ;;  %2461 = vmatprep.mubr.bf16.mxu1 %v3879_v62  ;;  %v3972_v60 = vld [vmem:[%s4766_s18 + $0x5a0] ss:$8 sps:$4 sm:$0xff]   ;;  %v3973_v61 = vld [vmem:[%s4766_s18 + $0x1b4] ss:$8 sps:$4 sm:$0xff]  }
  0xa2   : > { %v3975_v62 = vld [vmem:[%s4766_s18 + $0x5b4] ss:$8 sps:$4 sm:$0xff]  }
  0xa8   : > { %1950 = vmatmul.mubr.bf16.gmra.mrb[44].mxu0 %v3881_v63  ;;  %2462 = vmatmul.mubr.bf16.gmra.mrb[44].mxu1 %v3882_v0 }
  0xa9   : > { %1957 = vmatprep.mubr.bf16.mxu0 %v3883_v1  ;;  %2469 = vmatprep.mubr.bf16.mxu1 %v3885_v2 }
  0xb0   : > { %1958 = vmatmul.mubr.bf16.gmra.mrb[48].mxu0 %v3887_v3  ;;  %2470 = vmatmul.mubr.bf16.gmra.mrb[48].mxu1 %v3888_v4  ;;  %v3977_v3 = vld [vmem:[%s4766_s18 + $0x1b0] ss:$8 sps:$4 sm:$0xff]  }
  0xb1   : > { %1965 = vmatprep.mubr.bf16.mxu0 %v3889_v5  ;;  %2477 = vmatprep.mubr.bf16.mxu1 %v3891_v6  ;;  %v3978_v4 = vld [vmem:[%s4766_s18 + $0x5b0] ss:$8 sps:$4 sm:$0xff]  }
  0xb8   : > { %1966 = vmatmul.mubr.bf16.gmra.mrb[52].mxu0 %v3893_v7  ;;  %2478 = vmatmul.mubr.bf16.gmra.mrb[52].mxu1 %v3894_v8  ;;  %v3979_v7 = vld [vmem:[%s4766_s18 + $0x1c4] ss:$8 sps:$4 sm:$0xff]  }
  0xb9   : > { %1973 = vmatprep.mubr.bf16.mxu0 %v3895_v9  ;;  %2485 = vmatprep.mubr.bf16.mxu1 %v3897_v10  ;;  %v3981_v8 = vld [vmem:[%s4766_s18 + $0x5c4] ss:$8 sps:$4 sm:$0xff]  }
  0xc0   : > { %1974 = vmatmul.mubr.bf16.gmra.mrb[56].mxu0 %v3899_v11  ;;  %2486 = vmatmul.mubr.bf16.gmra.mrb[56].mxu1 %v3900_v12 }
  0xc1   : > { %1981 = vmatprep.mubr.bf16.mxu0 %v3901_v13  ;;  %2493 = vmatprep.mubr.bf16.mxu1 %v3903_v14 }
  0xc8   : > { %1982 = vmatmul.mubr.bf16.gmra.mrb[60].mxu0 %v3905_v15  ;;  %2494 = vmatmul.mubr.bf16.gmra.mrb[60].mxu1 %v3906_v16  ;;  %v3983_v15 = vld [vmem:[%s4766_s18 + $0x1c0] ss:$8 sps:$4 sm:$0xff]  }
  0xc9   : > { %1989 = vmatprep.mubr.bf16.mxu0 %v3907_v17  ;;  %2501 = vmatprep.mubr.bf16.mxu1 %v3909_v18  ;;  %v3984_v16 = vld [vmem:[%s4766_s18 + $0x5c0] ss:$8 sps:$4 sm:$0xff]  }
  0xd0   : > { %1990 = vmatmul.mubr.bf16.gmra.mrb[64].mxu0 %v3911_v19  ;;  %2502 = vmatmul.mubr.bf16.gmra.mrb[64].mxu1 %v3912_v20  ;;  %v3985_v19 = vld [vmem:[%s4766_s18 + $0x1d4] ss:$8 sps:$4 sm:$0xff]  }
  0xd1   : > { %1997 = vmatprep.mubr.bf16.mxu0 %v3913_v21  ;;  %2509 = vmatprep.mubr.bf16.mxu1 %v3915_v22  ;;  %v3987_v20 = vld [vmem:[%s4766_s18 + $0x5d4] ss:$8 sps:$4 sm:$0xff]  }
  0xd8   : > { %1998 = vmatmul.mubr.bf16.gmra.mrb[68].mxu0 %v3917_v23  ;;  %2510 = vmatmul.mubr.bf16.gmra.mrb[68].mxu1 %v3918_v24 }
  0xd9   : > { %2005 = vmatprep.mubr.bf16.mxu0 %v3919_v25  ;;  %2517 = vmatprep.mubr.bf16.mxu1 %v3921_v26 }
  0xe0   : > { %2006 = vmatmul.mubr.bf16.gmra.mrb[72].mxu0 %v3923_v27  ;;  %2518 = vmatmul.mubr.bf16.gmra.mrb[72].mxu1 %v3924_v28 }
  0xe1   : > { %2013 = vmatprep.mubr.bf16.mxu0 %v3925_v29  ;;  %2525 = vmatprep.mubr.bf16.mxu1 %v3927_v30 }
  0xe8   : > { %2014 = vmatmul.mubr.bf16.gmra.mrb[76].mxu0 %v3929_v31  ;;  %2526 = vmatmul.mubr.bf16.gmra.mrb[76].mxu1 %v3930_v32  ;;  %v3989_v31 = vld [vmem:[%s4766_s18 + $0x1d0] ss:$8 sps:$4 sm:$0xff]  }
  0xe9   : > { %2021 = vmatprep.mubr.bf16.mxu0 %v3931_v33  ;;  %2533 = vmatprep.mubr.bf16.mxu1 %v3933_v34  ;;  %v3990_v32 = vld [vmem:[%s4766_s18 + $0x5d0] ss:$8 sps:$4 sm:$0xff]  }
  0xf0   : > { %2022 = vmatmul.mubr.bf16.gmra.mrb[80].mxu0 %v3935_v35  ;;  %2534 = vmatmul.mubr.bf16.gmra.mrb[80].mxu1 %v3936_v36  ;;  %v3991_v35 = vld [vmem:[%s4766_s18 + $0x1e4] ss:$8 sps:$4 sm:$0xff]  }
  0xf1   : > { %2029 = vmatprep.mubr.bf16.mxu0 %v3937_v37  ;;  %2541 = vmatprep.mubr.bf16.mxu1 %v3939_v38  ;;  %v3993_v36 = vld [vmem:[%s4766_s18 + $0x5e4] ss:$8 sps:$4 sm:$0xff]  }
  0xf8   : > { %2030 = vmatmul.mubr.bf16.gmra.mrb[84].mxu0 %v3941_v39  ;;  %2542 = vmatmul.mubr.bf16.gmra.mrb[84].mxu1 %v3942_v40 }
  0xf9   : > { %2037 = vmatprep.mubr.bf16.mxu0 %v3943_v41  ;;  %2549 = vmatprep.mubr.bf16.mxu1 %v3945_v42 }
 0x100   : > { %2038 = vmatmul.mubr.bf16.gmra.mrb[88].mxu0 %v3947_v43  ;;  %2550 = vmatmul.mubr.bf16.gmra.mrb[88].mxu1 %v3948_v44 }
 0x101   : > { %2045 = vmatprep.mubr.bf16.mxu0 %v3949_v45  ;;  %2557 = vmatprep.mubr.bf16.mxu1 %v3951_v46 }
 0x108   : > { %2046 = vmatmul.mubr.bf16.gmra.mrb[92].mxu0 %v3953_v47  ;;  %2558 = vmatmul.mubr.bf16.gmra.mrb[92].mxu1 %v3954_v48  ;;  %v3995_v47 = vld [vmem:[%s4766_s18 + $0x1e0] ss:$8 sps:$4 sm:$0xff]  }
 0x109   : > { %2053 = vmatprep.mubr.bf16.mxu0 %v3955_v49  ;;  %2565 = vmatprep.mubr.bf16.mxu1 %v3957_v50  ;;  %v3996_v48 = vld [vmem:[%s4766_s18 + $0x5e0] ss:$8 sps:$4 sm:$0xff]  }
 0x110   : > { %2054 = vmatmul.mubr.bf16.gmra.mrb[96].mxu0 %v3959_v51  ;;  %2566 = vmatmul.mubr.bf16.gmra.mrb[96].mxu1 %v3960_v52  ;;  %v3997_v51 = vld [vmem:[%s4766_s18 + $0x1f4] ss:$8 sps:$4 sm:$0xff]  }
 0x111   : > { %2061 = vmatprep.mubr.bf16.mxu0 %v3961_v53  ;;  %2573 = vmatprep.mubr.bf16.mxu1 %v3963_v54  ;;  %v3999_v52 = vld [vmem:[%s4766_s18 + $0x5f4] ss:$8 sps:$4 sm:$0xff]  }
 0x118   : > { %2062 = vmatmul.mubr.bf16.gmra.mrb[100].mxu0 %v3965_v55  ;;  %2574 = vmatmul.mubr.bf16.gmra.mrb[100].mxu1 %v3966_v56 }
 0x119   : > { %2069 = vmatprep.mubr.bf16.mxu0 %v3967_v57  ;;  %2581 = vmatprep.mubr.bf16.mxu1 %v3969_v58 }
 0x120   : > { %2070 = vmatmul.mubr.bf16.gmra.mrb[104].mxu0 %v3971_v59  ;;  %2582 = vmatmul.mubr.bf16.gmra.mrb[104].mxu1 %v3972_v60 }
 0x121   : > { %2077 = vmatprep.mubr.bf16.mxu0 %v3973_v61  ;;  %2589 = vmatprep.mubr.bf16.mxu1 %v3975_v62 }
 0x123   : > { %v1863_v63 = vpop.f32.mrb[0].mxu0  ;;  %v2375_v0 = vpop.f32.mrb[0].mxu1 }
 0x124   : > { %4195 = vtanh.f32 %v1863_v63  ;;  %v1865_v1 = vpop.f32.mrb[1].mxu0  ;;  %v2377_v2 = vpop.f32.mrb[1].mxu1  ;;  %v4001_v63 = vld [vmem:[%s4766_s18 + $0x1f0] ss:$8 sps:$4 sm:$0xff]  }
 0x125   : > { %4197 = vtanh.f32 %v2375_v0  ;;  %v1866_v5 = vpop.f32.mrb[2].mxu0  ;;  %v2378_v6 = vpop.f32.mrb[2].mxu1  ;;  %v4002_v0 = vld [vmem:[%s4766_s18 + $0x5f0] ss:$8 sps:$4 sm:$0xff]  }
 0x126   : > { %4199 = vtanh.f32 %v1866_v5  ;;  %v1868_v9 = vpop.f32.mrb[3].mxu0  ;;  %v2380_v10 = vpop.f32.mrb[3].mxu1 }
 0x127   : > { %4201 = vtanh.f32 %v2378_v6 }
 0x128   : > { %2078 = vmatmul.mubr.bf16.gmra.mrb[108].mxu0 %v3977_v3  ;;  %2590 = vmatmul.mubr.bf16.gmra.mrb[108].mxu1 %v3978_v4  ;;  %v4003_v3 = vld [vmem:[%s4766_s18 + $0x204] ss:$8 sps:$4 sm:$0xff]  }
 0x129   : > { %2085 = vmatprep.mubr.bf16.mxu0 %v3979_v7  ;;  %2597 = vmatprep.mubr.bf16.mxu1 %v3981_v8  ;;  %v4005_v4 = vld [vmem:[%s4766_s18 + $0x604] ss:$8 sps:$4 sm:$0xff]  }
 0x12b   : > { %v1871_v11 = vpop.f32.mrb[4].mxu0  ;;  %v2383_v12 = vpop.f32.mrb[4].mxu1 }
 0x12c   : > { %4203 = vtanh.f32 %v1871_v11  ;;  %v1873_v13 = vpop.f32.mrb[5].mxu0  ;;  %v2385_v14 = vpop.f32.mrb[5].mxu1 }
 0x12d   : > { %4205 = vtanh.f32 %v2383_v12  ;;  %v1874_v17 = vpop.f32.mrb[6].mxu0  ;;  %v2386_v18 = vpop.f32.mrb[6].mxu1 }
 0x12e   : > { %v4196_v21 = vpop.eup %4195  ;;  %4207 = vtanh.f32 %v1874_v17  ;;  %v1876_v22 = vpop.f32.mrb[7].mxu0 }
 0x12f   : > { %v2388_v23 = vpop.f32.mrb[7].mxu1  ;;  %v4198_v24 = vpop.eup %4197  ;;  %3143 = vst.msk [vmem:[%s4922_s21] sm:$0xff] %vm3142_vm0, %v4196_v21  ;;  %4209 = vtanh.f32 %v2386_v18 }
 0x130   : > { %v4200_v25 = vpop.eup %4199  ;;  %3271 = vst.msk [vmem:[%s4922_s21 + $0x400] sm:$0xff] %vm3142_vm0, %v4198_v24  ;;  %2086 = vmatmul.mubr.bf16.gmra.mrb[112].mxu0 %v3983_v15  ;;  %2598 = vmatmul.mubr.bf16.gmra.mrb[112].mxu1 %v3984_v16  ;;  %v4007_v15 = vld [vmem:[%s4766_s18 + $0x200] ss:$8 sps:$4 sm:$0xff]  }
 0x131   : > { %v4202_v26 = vpop.eup %4201  ;;  %3144 = vst.msk [vmem:[%s4922_s21 + $0x8] sm:$0xff] %vm3142_vm0, %v4200_v25  ;;  %2093 = vmatprep.mubr.bf16.mxu0 %v3985_v19  ;;  %2605 = vmatprep.mubr.bf16.mxu1 %v3987_v20  ;;  %v4008_v16 = vld [vmem:[%s4766_s18 + $0x600] ss:$8 sps:$4 sm:$0xff]   ;;  %v4009_v19 = vld [vmem:[%s4766_s18 + $0x214] ss:$8 sps:$4 sm:$0xff]  }
 0x132   : > { %3272 = vst.msk [vmem:[%s4922_s21 + $0x408] sm:$0xff] %vm3142_vm0, %v4202_v26  ;;  %v4011_v20 = vld [vmem:[%s4766_s18 + $0x614] ss:$8 sps:$4 sm:$0xff]  }
 0x133   : > { %v1879_v27 = vpop.f32.mrb[8].mxu0  ;;  %v2391_v28 = vpop.f32.mrb[8].mxu1 }
 0x134   : > { %4211 = vtanh.f32 %v1879_v27  ;;  %v1881_v29 = vpop.f32.mrb[9].mxu0  ;;  %v2393_v30 = vpop.f32.mrb[9].mxu1 }
 0x135   : > { %4213 = vtanh.f32 %v2391_v28  ;;  %v1882_v33 = vpop.f32.mrb[10].mxu0  ;;  %v2394_v34 = vpop.f32.mrb[10].mxu1 }
 0x136   : > { %v4204_v37 = vpop.eup %4203  ;;  %4215 = vtanh.f32 %v1882_v33  ;;  %v1884_v38 = vpop.f32.mrb[11].mxu0 }
 0x137   : > { %v2396_v39 = vpop.f32.mrb[11].mxu1  ;;  %v4206_v40 = vpop.eup %4205  ;;  %3145 = vst.msk [vmem:[%s4922_s21 + $0x10] sm:$0xff] %vm3142_vm0, %v4204_v37  ;;  %4217 = vtanh.f32 %v2394_v34 }
 0x138   : > { %v4208_v41 = vpop.eup %4207  ;;  %3273 = vst.msk [vmem:[%s4922_s21 + $0x410] sm:$0xff] %vm3142_vm0, %v4206_v40  ;;  %2094 = vmatmul.mubr.bf16.gmra.mrb[116].mxu0 %v3989_v31  ;;  %2606 = vmatmul.mubr.bf16.gmra.mrb[116].mxu1 %v3990_v32  ;;  %v4013_v31 = vld [vmem:[%s4766_s18 + $0x210] ss:$8 sps:$4 sm:$0xff]  }
 0x139   : > { %v4210_v42 = vpop.eup %4209  ;;  %3146 = vst.msk [vmem:[%s4922_s21 + $0x18] sm:$0xff] %vm3142_vm0, %v4208_v41  ;;  %2101 = vmatprep.mubr.bf16.mxu0 %v3991_v35  ;;  %2613 = vmatprep.mubr.bf16.mxu1 %v3993_v36  ;;  %v4014_v32 = vld [vmem:[%s4766_s18 + $0x610] ss:$8 sps:$4 sm:$0xff]   ;;  %v4015_v35 = vld [vmem:[%s4766_s18 + $0x224] ss:$8 sps:$4 sm:$0xff]  }
 0x13a   : > { %3274 = vst.msk [vmem:[%s4922_s21 + $0x418] sm:$0xff] %vm3142_vm0, %v4210_v42  ;;  %v4017_v36 = vld [vmem:[%s4766_s18 + $0x624] ss:$8 sps:$4 sm:$0xff]  }
 0x13b   : > { %v1887_v43 = vpop.f32.mrb[12].mxu0  ;;  %v2399_v44 = vpop.f32.mrb[12].mxu1 }
 0x13c   : > { %4219 = vtanh.f32 %v1887_v43  ;;  %v1889_v45 = vpop.f32.mrb[13].mxu0  ;;  %v2401_v46 = vpop.f32.mrb[13].mxu1 }
 0x13d   : > { %4221 = vtanh.f32 %v2399_v44  ;;  %v1890_v49 = vpop.f32.mrb[14].mxu0  ;;  %v2402_v50 = vpop.f32.mrb[14].mxu1 }
 0x13e   : > { %v4212_v53 = vpop.eup %4211  ;;  %4223 = vtanh.f32 %v1890_v49  ;;  %v1892_v54 = vpop.f32.mrb[15].mxu0 }
 0x13f   : > { %v2404_v55 = vpop.f32.mrb[15].mxu1  ;;  %v4214_v56 = vpop.eup %4213  ;;  %3147 = vst.msk [vmem:[%s4922_s21 + $0x20] sm:$0xff] %vm3142_vm0, %v4212_v53  ;;  %4225 = vtanh.f32 %v2402_v50 }
 0x140   : > { %v4216_v57 = vpop.eup %4215  ;;  %3275 = vst.msk [vmem:[%s4922_s21 + $0x420] sm:$0xff] %vm3142_vm0, %v4214_v56  ;;  %2102 = vmatmul.mubr.bf16.gmra.mrb[120].mxu0 %v3995_v47  ;;  %2614 = vmatmul.mubr.bf16.gmra.mrb[120].mxu1 %v3996_v48  ;;  %v4019_v47 = vld [vmem:[%s4766_s18 + $0x220] ss:$8 sps:$4 sm:$0xff]  }
 0x141   : > { %v4218_v58 = vpop.eup %4217  ;;  %3148 = vst.msk [vmem:[%s4922_s21 + $0x28] sm:$0xff] %vm3142_vm0, %v4216_v57  ;;  %2109 = vmatprep.mubr.bf16.mxu0 %v3997_v51  ;;  %2621 = vmatprep.mubr.bf16.mxu1 %v3999_v52  ;;  %v4020_v48 = vld [vmem:[%s4766_s18 + $0x620] ss:$8 sps:$4 sm:$0xff]   ;;  %v4021_v51 = vld [vmem:[%s4766_s18 + $0x234] ss:$8 sps:$4 sm:$0xff]  }
 0x142   : > { %3276 = vst.msk [vmem:[%s4922_s21 + $0x428] sm:$0xff] %vm3142_vm0, %v4218_v58  ;;  %v4023_v52 = vld [vmem:[%s4766_s18 + $0x634] ss:$8 sps:$4 sm:$0xff]  }
 0x143   : > { %v1895_v59 = vpop.f32.mrb[16].mxu0  ;;  %v2407_v60 = vpop.f32.mrb[16].mxu1 }
 0x144   : > { %4227 = vtanh.f32 %v1895_v59  ;;  %v1897_v61 = vpop.f32.mrb[17].mxu0  ;;  %v2409_v62 = vpop.f32.mrb[17].mxu1 }
 0x145   : > { %4229 = vtanh.f32 %v2407_v60  ;;  %v1898_v1 = vpop.f32.mrb[18].mxu0  ;;  %v2410_v2 = vpop.f32.mrb[18].mxu1 }
 0x146   : > { %v4220_v5 = vpop.eup %4219  ;;  %4231 = vtanh.f32 %v1898_v1  ;;  %v1900_v6 = vpop.f32.mrb[19].mxu0 }
 0x147   : > { %v2412_v7 = vpop.f32.mrb[19].mxu1  ;;  %v4222_v8 = vpop.eup %4221  ;;  %3149 = vst.msk [vmem:[%s4922_s21 + $0x30] sm:$0xff] %vm3142_vm0, %v4220_v5  ;;  %4233 = vtanh.f32 %v2410_v2 }
 0x148   : > { %v4224_v9 = vpop.eup %4223  ;;  %3277 = vst.msk [vmem:[%s4922_s21 + $0x430] sm:$0xff] %vm3142_vm0, %v4222_v8  ;;  %2110 = vmatmul.mubr.bf16.gmra.mrb[124].mxu0 %v4001_v63  ;;  %2622 = vmatmul.mubr.bf16.gmra.mrb[124].mxu1 %v4002_v0  ;;  %v4025_v63 = vld [vmem:[%s4766_s18 + $0x230] ss:$8 sps:$4 sm:$0xff]  }
 0x149   : > { %v4226_v10 = vpop.eup %4225  ;;  %3150 = vst.msk [vmem:[%s4922_s21 + $0x38] sm:$0xff] %vm3142_vm0, %v4224_v9  ;;  %2117 = vmatprep.mubr.bf16.mxu0 %v4003_v3  ;;  %2629 = vmatprep.mubr.bf16.mxu1 %v4005_v4  ;;  %v4026_v0 = vld [vmem:[%s4766_s18 + $0x630] ss:$8 sps:$4 sm:$0xff]   ;;  %v4027_v3 = vld [vmem:[%s4766_s18 + $0x244] ss:$8 sps:$4 sm:$0xff]  }
 0x14a   : > { %3278 = vst.msk [vmem:[%s4922_s21 + $0x438] sm:$0xff] %vm3142_vm0, %v4226_v10  ;;  %v4029_v4 = vld [vmem:[%s4766_s18 + $0x644] ss:$8 sps:$4 sm:$0xff]  }
 0x14b   : > { %v1903_v11 = vpop.f32.mrb[20].mxu0  ;;  %v2415_v12 = vpop.f32.mrb[20].mxu1 }
 0x14c   : > { %4235 = vtanh.f32 %v1903_v11  ;;  %v1905_v13 = vpop.f32.mrb[21].mxu0  ;;  %v2417_v14 = vpop.f32.mrb[21].mxu1 }
 0x14d   : > { %4237 = vtanh.f32 %v2415_v12  ;;  %v1906_v17 = vpop.f32.mrb[22].mxu0  ;;  %v2418_v18 = vpop.f32.mrb[22].mxu1 }
 0x14e   : > { %v4228_v21 = vpop.eup %4227  ;;  %4239 = vtanh.f32 %v1906_v17  ;;  %v1908_v22 = vpop.f32.mrb[23].mxu0 }
 0x14f   : > { %v2420_v23 = vpop.f32.mrb[23].mxu1  ;;  %v4230_v24 = vpop.eup %4229  ;;  %3151 = vst.msk [vmem:[%s4922_s21 + $0x40] sm:$0xff] %vm3142_vm0, %v4228_v21  ;;  %4241 = vtanh.f32 %v2418_v18 }
 0x150   : > { %v4232_v25 = vpop.eup %4231  ;;  %3279 = vst.msk [vmem:[%s4922_s21 + $0x440] sm:$0xff] %vm3142_vm0, %v4230_v24  ;;  %2118 = vmatmul.mubr.bf16.gmra.mrb[128].mxu0 %v4007_v15  ;;  %2630 = vmatmul.mubr.bf16.gmra.mrb[128].mxu1 %v4008_v16  ;;  %v4031_v15 = vld [vmem:[%s4766_s18 + $0x240] ss:$8 sps:$4 sm:$0xff]  }
 0x151   : > { %v4234_v26 = vpop.eup %4233  ;;  %3152 = vst.msk [vmem:[%s4922_s21 + $0x48] sm:$0xff] %vm3142_vm0, %v4232_v25  ;;  %2125 = vmatprep.mubr.bf16.mxu0 %v4009_v19  ;;  %2637 = vmatprep.mubr.bf16.mxu1 %v4011_v20  ;;  %v4032_v16 = vld [vmem:[%s4766_s18 + $0x640] ss:$8 sps:$4 sm:$0xff]   ;;  %v4033_v19 = vld [vmem:[%s4766_s18 + $0x254] ss:$8 sps:$4 sm:$0xff]  }
 0x152   : > { %3280 = vst.msk [vmem:[%s4922_s21 + $0x448] sm:$0xff] %vm3142_vm0, %v4234_v26  ;;  %v4035_v20 = vld [vmem:[%s4766_s18 + $0x654] ss:$8 sps:$4 sm:$0xff]  }
 0x153   : > { %v1911_v27 = vpop.f32.mrb[24].mxu0  ;;  %v2423_v28 = vpop.f32.mrb[24].mxu1 }
 0x154   : > { %4243 = vtanh.f32 %v1911_v27  ;;  %v1913_v29 = vpop.f32.mrb[25].mxu0  ;;  %v2425_v30 = vpop.f32.mrb[25].mxu1 }
 0x155   : > { %4245 = vtanh.f32 %v2423_v28  ;;  %v1914_v33 = vpop.f32.mrb[26].mxu0  ;;  %v2426_v34 = vpop.f32.mrb[26].mxu1 }
 0x156   : > { %v4236_v37 = vpop.eup %4235  ;;  %4247 = vtanh.f32 %v1914_v33  ;;  %v1916_v38 = vpop.f32.mrb[27].mxu0 }
 0x157   : > { %v2428_v39 = vpop.f32.mrb[27].mxu1  ;;  %v4238_v40 = vpop.eup %4237  ;;  %3153 = vst.msk [vmem:[%s4922_s21 + $0x50] sm:$0xff] %vm3142_vm0, %v4236_v37  ;;  %4249 = vtanh.f32 %v2426_v34 }
 0x158   : > { %v4240_v41 = vpop.eup %4239  ;;  %3281 = vst.msk [vmem:[%s4922_s21 + $0x450] sm:$0xff] %vm3142_vm0, %v4238_v40  ;;  %2126 = vmatmul.mubr.bf16.gmra.mrb[132].mxu0 %v4013_v31  ;;  %2638 = vmatmul.mubr.bf16.gmra.mrb[132].mxu1 %v4014_v32  ;;  %v4037_v31 = vld [vmem:[%s4766_s18 + $0x250] ss:$8 sps:$4 sm:$0xff]  }
 0x159   : > { %v4242_v42 = vpop.eup %4241  ;;  %3154 = vst.msk [vmem:[%s4922_s21 + $0x58] sm:$0xff] %vm3142_vm0, %v4240_v41  ;;  %2133 = vmatprep.mubr.bf16.mxu0 %v4015_v35  ;;  %2645 = vmatprep.mubr.bf16.mxu1 %v4017_v36  ;;  %v4038_v32 = vld [vmem:[%s4766_s18 + $0x650] ss:$8 sps:$4 sm:$0xff]   ;;  %v4039_v35 = vld [vmem:[%s4766_s18 + $0x264] ss:$8 sps:$4 sm:$0xff]  }
 0x15a   : > { %3282 = vst.msk [vmem:[%s4922_s21 + $0x458] sm:$0xff] %vm3142_vm0, %v4242_v42  ;;  %v4041_v36 = vld [vmem:[%s4766_s18 + $0x664] ss:$8 sps:$4 sm:$0xff]  }
 0x15b   : > { %v1919_v43 = vpop.f32.mrb[28].mxu0  ;;  %v2431_v44 = vpop.f32.mrb[28].mxu1 }
 0x15c   : > { %4251 = vtanh.f32 %v1919_v43  ;;  %v1921_v45 = vpop.f32.mrb[29].mxu0  ;;  %v2433_v46 = vpop.f32.mrb[29].mxu1 }
 0x15d   : > { %4253 = vtanh.f32 %v2431_v44  ;;  %v1922_v49 = vpop.f32.mrb[30].mxu0  ;;  %v2434_v50 = vpop.f32.mrb[30].mxu1 }
 0x15e   : > { %v4244_v53 = vpop.eup %4243  ;;  %4255 = vtanh.f32 %v1922_v49  ;;  %v1924_v54 = vpop.f32.mrb[31].mxu0 }
 0x15f   : > { %v2436_v55 = vpop.f32.mrb[31].mxu1  ;;  %v4246_v56 = vpop.eup %4245  ;;  %3155 = vst.msk [vmem:[%s4922_s21 + $0x60] sm:$0xff] %vm3142_vm0, %v4244_v53  ;;  %4257 = vtanh.f32 %v2434_v50 }
 0x160   : > { %v4248_v57 = vpop.eup %4247  ;;  %3283 = vst.msk [vmem:[%s4922_s21 + $0x460] sm:$0xff] %vm3142_vm0, %v4246_v56  ;;  %2134 = vmatmul.mubr.bf16.gmra.mrb[136].mxu0 %v4019_v47  ;;  %2646 = vmatmul.mubr.bf16.gmra.mrb[136].mxu1 %v4020_v48  ;;  %v4043_v47 = vld [vmem:[%s4766_s18 + $0x260] ss:$8 sps:$4 sm:$0xff]  }
 0x161   : > { %v4250_v58 = vpop.eup %4249  ;;  %3156 = vst.msk [vmem:[%s4922_s21 + $0x68] sm:$0xff] %vm3142_vm0, %v4248_v57  ;;  %2141 = vmatprep.mubr.bf16.mxu0 %v4021_v51  ;;  %2653 = vmatprep.mubr.bf16.mxu1 %v4023_v52  ;;  %v4044_v48 = vld [vmem:[%s4766_s18 + $0x660] ss:$8 sps:$4 sm:$0xff]   ;;  %v4045_v51 = vld [vmem:[%s4766_s18 + $0x274] ss:$8 sps:$4 sm:$0xff]  }
 0x162   : > { %3284 = vst.msk [vmem:[%s4922_s21 + $0x468] sm:$0xff] %vm3142_vm0, %v4250_v58  ;;  %v4047_v52 = vld [vmem:[%s4766_s18 + $0x674] ss:$8 sps:$4 sm:$0xff]  }
 0x163   : > { %v1927_v59 = vpop.f32.mrb[32].mxu0  ;;  %v2439_v60 = vpop.f32.mrb[32].mxu1 }
 0x164   : > { %4259 = vtanh.f32 %v1927_v59  ;;  %v1929_v61 = vpop.f32.mrb[33].mxu0  ;;  %v2441_v62 = vpop.f32.mrb[33].mxu1 }
 0x165   : > { %4261 = vtanh.f32 %v2439_v60  ;;  %v1930_v1 = vpop.f32.mrb[34].mxu0  ;;  %v2442_v2 = vpop.f32.mrb[34].mxu1 }
 0x166   : > { %v4252_v5 = vpop.eup %4251  ;;  %4263 = vtanh.f32 %v1930_v1  ;;  %v1932_v6 = vpop.f32.mrb[35].mxu0 }
 0x167   : > { %v2444_v7 = vpop.f32.mrb[35].mxu1  ;;  %v4254_v8 = vpop.eup %4253  ;;  %3157 = vst.msk [vmem:[%s4922_s21 + $0x70] sm:$0xff] %vm3142_vm0, %v4252_v5  ;;  %4265 = vtanh.f32 %v2442_v2 }
 0x168   : > { %v4256_v9 = vpop.eup %4255  ;;  %3285 = vst.msk [vmem:[%s4922_s21 + $0x470] sm:$0xff] %vm3142_vm0, %v4254_v8  ;;  %2142 = vmatmul.mubr.bf16.gmra.mrb[140].mxu0 %v4025_v63  ;;  %2654 = vmatmul.mubr.bf16.gmra.mrb[140].mxu1 %v4026_v0  ;;  %v4049_v63 = vld [vmem:[%s4766_s18 + $0x270] ss:$8 sps:$4 sm:$0xff]  }
 0x169   : > { %v4258_v10 = vpop.eup %4257  ;;  %3158 = vst.msk [vmem:[%s4922_s21 + $0x78] sm:$0xff] %vm3142_vm0, %v4256_v9  ;;  %2149 = vmatprep.mubr.bf16.mxu0 %v4027_v3  ;;  %2661 = vmatprep.mubr.bf16.mxu1 %v4029_v4  ;;  %v4050_v0 = vld [vmem:[%s4766_s18 + $0x670] ss:$8 sps:$4 sm:$0xff]   ;;  %v4051_v3 = vld [vmem:[%s4766_s18 + $0x284] ss:$8 sps:$4 sm:$0xff]  }
 0x16a   : > { %3286 = vst.msk [vmem:[%s4922_s21 + $0x478] sm:$0xff] %vm3142_vm0, %v4258_v10  ;;  %v4053_v4 = vld [vmem:[%s4766_s18 + $0x684] ss:$8 sps:$4 sm:$0xff]  }
 0x16b   : > { %v1935_v11 = vpop.f32.mrb[36].mxu0  ;;  %v2447_v12 = vpop.f32.mrb[36].mxu1 }
 0x16c   : > { %4267 = vtanh.f32 %v1935_v11  ;;  %v1937_v13 = vpop.f32.mrb[37].mxu0  ;;  %v2449_v14 = vpop.f32.mrb[37].mxu1 }
 0x16d   : > { %4269 = vtanh.f32 %v2447_v12  ;;  %v1938_v17 = vpop.f32.mrb[38].mxu0  ;;  %v2450_v18 = vpop.f32.mrb[38].mxu1 }
 0x16e   : > { %v4260_v21 = vpop.eup %4259  ;;  %4271 = vtanh.f32 %v1938_v17  ;;  %v1940_v22 = vpop.f32.mrb[39].mxu0 }
 0x16f   : > { %v2452_v23 = vpop.f32.mrb[39].mxu1  ;;  %v4262_v24 = vpop.eup %4261  ;;  %3159 = vst.msk [vmem:[%s4922_s21 + $0x80] sm:$0xff] %vm3142_vm0, %v4260_v21  ;;  %4273 = vtanh.f32 %v2450_v18 }
 0x170   : > { %v4264_v25 = vpop.eup %4263  ;;  %3287 = vst.msk [vmem:[%s4922_s21 + $0x480] sm:$0xff] %vm3142_vm0, %v4262_v24  ;;  %2150 = vmatmul.mubr.bf16.gmra.mrb[144].mxu0 %v4031_v15  ;;  %2662 = vmatmul.mubr.bf16.gmra.mrb[144].mxu1 %v4032_v16  ;;  %v4055_v15 = vld [vmem:[%s4766_s18 + $0x280] ss:$8 sps:$4 sm:$0xff]  }
 0x171   : > { %v4266_v26 = vpop.eup %4265  ;;  %3160 = vst.msk [vmem:[%s4922_s21 + $0x88] sm:$0xff] %vm3142_vm0, %v4264_v25  ;;  %2157 = vmatprep.mubr.bf16.mxu0 %v4033_v19  ;;  %2669 = vmatprep.mubr.bf16.mxu1 %v4035_v20  ;;  %v4056_v16 = vld [vmem:[%s4766_s18 + $0x680] ss:$8 sps:$4 sm:$0xff]   ;;  %v4057_v19 = vld [vmem:[%s4766_s18 + $0x294] ss:$8 sps:$4 sm:$0xff]  }
 0x172   : > { %3288 = vst.msk [vmem:[%s4922_s21 + $0x488] sm:$0xff] %vm3142_vm0, %v4266_v26  ;;  %v4059_v20 = vld [vmem:[%s4766_s18 + $0x694] ss:$8 sps:$4 sm:$0xff]  }
 0x173   : > { %v1943_v27 = vpop.f32.mrb[40].mxu0  ;;  %v2455_v28 = vpop.f32.mrb[40].mxu1 }
 0x174   : > { %4275 = vtanh.f32 %v1943_v27  ;;  %v1945_v29 = vpop.f32.mrb[41].mxu0  ;;  %v2457_v30 = vpop.f32.mrb[41].mxu1 }
 0x175   : > { %4277 = vtanh.f32 %v2455_v28  ;;  %v1946_v33 = vpop.f32.mrb[42].mxu0  ;;  %v2458_v34 = vpop.f32.mrb[42].mxu1 }
 0x176   : > { %v4268_v37 = vpop.eup %4267  ;;  %4279 = vtanh.f32 %v1946_v33  ;;  %v1948_v38 = vpop.f32.mrb[43].mxu0 }
 0x177   : > { %v2460_v39 = vpop.f32.mrb[43].mxu1  ;;  %v4270_v40 = vpop.eup %4269  ;;  %3161 = vst.msk [vmem:[%s4922_s21 + $0x90] sm:$0xff] %vm3142_vm0, %v4268_v37  ;;  %4281 = vtanh.f32 %v2458_v34 }
 0x178   : > { %v4272_v41 = vpop.eup %4271  ;;  %3289 = vst.msk [vmem:[%s4922_s21 + $0x490] sm:$0xff] %vm3142_vm0, %v4270_v40  ;;  %2158 = vmatmul.mubr.bf16.gmra.mrb[148].mxu0 %v4037_v31  ;;  %2670 = vmatmul.mubr.bf16.gmra.mrb[148].mxu1 %v4038_v32  ;;  %v4061_v31 = vld [vmem:[%s4766_s18 + $0x290] ss:$8 sps:$4 sm:$0xff]  }
 0x179   : > { %v4274_v42 = vpop.eup %4273  ;;  %3162 = vst.msk [vmem:[%s4922_s21 + $0x98] sm:$0xff] %vm3142_vm0, %v4272_v41  ;;  %2165 = vmatprep.mubr.bf16.mxu0 %v4039_v35  ;;  %2677 = vmatprep.mubr.bf16.mxu1 %v4041_v36  ;;  %v4062_v32 = vld [vmem:[%s4766_s18 + $0x690] ss:$8 sps:$4 sm:$0xff]   ;;  %v4063_v35 = vld [vmem:[%s4766_s18 + $0x2a4] ss:$8 sps:$4 sm:$0xff]  }
 0x17a   : > { %3290 = vst.msk [vmem:[%s4922_s21 + $0x498] sm:$0xff] %vm3142_vm0, %v4274_v42  ;;  %v4065_v36 = vld [vmem:[%s4766_s18 + $0x6a4] ss:$8 sps:$4 sm:$0xff]  }
 0x17b   : > { %v1951_v43 = vpop.f32.mrb[44].mxu0  ;;  %v2463_v44 = vpop.f32.mrb[44].mxu1 }
 0x17c   : > { %4283 = vtanh.f32 %v1951_v43  ;;  %v1953_v45 = vpop.f32.mrb[45].mxu0  ;;  %v2465_v46 = vpop.f32.mrb[45].mxu1 }
 0x17d   : > { %4285 = vtanh.f32 %v2463_v44  ;;  %v1954_v49 = vpop.f32.mrb[46].mxu0  ;;  %v2466_v50 = vpop.f32.mrb[46].mxu1 }
 0x17e   : > { %v4276_v53 = vpop.eup %4275  ;;  %4287 = vtanh.f32 %v1954_v49  ;;  %v1956_v54 = vpop.f32.mrb[47].mxu0 }
 0x17f   : > { %v2468_v55 = vpop.f32.mrb[47].mxu1  ;;  %v4278_v56 = vpop.eup %4277  ;;  %3163 = vst.msk [vmem:[%s4922_s21 + $0xa0] sm:$0xff] %vm3142_vm0, %v4276_v53  ;;  %4289 = vtanh.f32 %v2466_v50 }
 0x180   : > { %v4280_v57 = vpop.eup %4279  ;;  %3291 = vst.msk [vmem:[%s4922_s21 + $0x4a0] sm:$0xff] %vm3142_vm0, %v4278_v56  ;;  %2166 = vmatmul.mubr.bf16.gmra.mrb[152].mxu0 %v4043_v47  ;;  %2678 = vmatmul.mubr.bf16.gmra.mrb[152].mxu1 %v4044_v48  ;;  %v4067_v47 = vld [vmem:[%s4766_s18 + $0x2a0] ss:$8 sps:$4 sm:$0xff]  }
 0x181   : > { %v4282_v58 = vpop.eup %4281  ;;  %3164 = vst.msk [vmem:[%s4922_s21 + $0xa8] sm:$0xff] %vm3142_vm0, %v4280_v57  ;;  %2173 = vmatprep.mubr.bf16.mxu0 %v4045_v51  ;;  %2685 = vmatprep.mubr.bf16.mxu1 %v4047_v52  ;;  %v4068_v48 = vld [vmem:[%s4766_s18 + $0x6a0] ss:$8 sps:$4 sm:$0xff]   ;;  %v4069_v51 = vld [vmem:[%s4766_s18 + $0x2b4] ss:$8 sps:$4 sm:$0xff]  }
 0x182   : > { %3292 = vst.msk [vmem:[%s4922_s21 + $0x4a8] sm:$0xff] %vm3142_vm0, %v4282_v58  ;;  %v4071_v52 = vld [vmem:[%s4766_s18 + $0x6b4] ss:$8 sps:$4 sm:$0xff]  }
 0x183   : > { %v1959_v59 = vpop.f32.mrb[48].mxu0  ;;  %v2471_v60 = vpop.f32.mrb[48].mxu1 }
 0x184   : > { %4291 = vtanh.f32 %v1959_v59  ;;  %v1961_v61 = vpop.f32.mrb[49].mxu0  ;;  %v2473_v62 = vpop.f32.mrb[49].mxu1 }
 0x185   : > { %4293 = vtanh.f32 %v2471_v60  ;;  %v1962_v1 = vpop.f32.mrb[50].mxu0  ;;  %v2474_v2 = vpop.f32.mrb[50].mxu1 }
 0x186   : > { %v4284_v5 = vpop.eup %4283  ;;  %4295 = vtanh.f32 %v1962_v1  ;;  %v1964_v6 = vpop.f32.mrb[51].mxu0 }
 0x187   : > { %v2476_v7 = vpop.f32.mrb[51].mxu1  ;;  %v4286_v8 = vpop.eup %4285  ;;  %3165 = vst.msk [vmem:[%s4922_s21 + $0xb0] sm:$0xff] %vm3142_vm0, %v4284_v5  ;;  %4297 = vtanh.f32 %v2474_v2 }
 0x188   : > { %v4288_v9 = vpop.eup %4287  ;;  %3293 = vst.msk [vmem:[%s4922_s21 + $0x4b0] sm:$0xff] %vm3142_vm0, %v4286_v8  ;;  %2174 = vmatmul.mubr.bf16.gmra.mrb[156].mxu0 %v4049_v63  ;;  %2686 = vmatmul.mubr.bf16.gmra.mrb[156].mxu1 %v4050_v0  ;;  %v4073_v63 = vld [vmem:[%s4766_s18 + $0x2b0] ss:$8 sps:$4 sm:$0xff]  }
 0x189   : > { %v4290_v10 = vpop.eup %4289  ;;  %3166 = vst.msk [vmem:[%s4922_s21 + $0xb8] sm:$0xff] %vm3142_vm0, %v4288_v9  ;;  %2181 = vmatprep.mubr.bf16.mxu0 %v4051_v3  ;;  %2693 = vmatprep.mubr.bf16.mxu1 %v4053_v4  ;;  %v4074_v0 = vld [vmem:[%s4766_s18 + $0x6b0] ss:$8 sps:$4 sm:$0xff]   ;;  %v4075_v3 = vld [vmem:[%s4766_s18 + $0x2c4] ss:$8 sps:$4 sm:$0xff]  }
 0x18a   : > { %3294 = vst.msk [vmem:[%s4922_s21 + $0x4b8] sm:$0xff] %vm3142_vm0, %v4290_v10  ;;  %v4077_v4 = vld [vmem:[%s4766_s18 + $0x6c4] ss:$8 sps:$4 sm:$0xff]  }
 0x18b   : > { %v1967_v11 = vpop.f32.mrb[52].mxu0  ;;  %v2479_v12 = vpop.f32.mrb[52].mxu1 }
 0x18c   : > { %4299 = vtanh.f32 %v1967_v11  ;;  %v1969_v13 = vpop.f32.mrb[53].mxu0  ;;  %v2481_v14 = vpop.f32.mrb[53].mxu1 }
 0x18d   : > { %4301 = vtanh.f32 %v2479_v12  ;;  %v1970_v17 = vpop.f32.mrb[54].mxu0  ;;  %v2482_v18 = vpop.f32.mrb[54].mxu1 }
 0x18e   : > { %v4292_v21 = vpop.eup %4291  ;;  %4303 = vtanh.f32 %v1970_v17  ;;  %v1972_v22 = vpop.f32.mrb[55].mxu0 }
 0x18f   : > { %v2484_v23 = vpop.f32.mrb[55].mxu1  ;;  %v4294_v24 = vpop.eup %4293  ;;  %3167 = vst.msk [vmem:[%s4922_s21 + $0xc0] sm:$0xff] %vm3142_vm0, %v4292_v21  ;;  %4305 = vtanh.f32 %v2482_v18 }
 0x190   : > { %v4296_v25 = vpop.eup %4295  ;;  %3295 = vst.msk [vmem:[%s4922_s21 + $0x4c0] sm:$0xff] %vm3142_vm0, %v4294_v24  ;;  %2182 = vmatmul.mubr.bf16.gmra.mrb[160].mxu0 %v4055_v15  ;;  %2694 = vmatmul.mubr.bf16.gmra.mrb[160].mxu1 %v4056_v16  ;;  %v4079_v15 = vld [vmem:[%s4766_s18 + $0x2c0] ss:$8 sps:$4 sm:$0xff]  }
 0x191   : > { %v4298_v26 = vpop.eup %4297  ;;  %3168 = vst.msk [vmem:[%s4922_s21 + $0xc8] sm:$0xff] %vm3142_vm0, %v4296_v25  ;;  %2189 = vmatprep.mubr.bf16.mxu0 %v4057_v19  ;;  %2701 = vmatprep.mubr.bf16.mxu1 %v4059_v20  ;;  %v4080_v16 = vld [vmem:[%s4766_s18 + $0x6c0] ss:$8 sps:$4 sm:$0xff]   ;;  %v4081_v19 = vld [vmem:[%s4766_s18 + $0x2d4] ss:$8 sps:$4 sm:$0xff]  }
 0x192   : > { %3296 = vst.msk [vmem:[%s4922_s21 + $0x4c8] sm:$0xff] %vm3142_vm0, %v4298_v26  ;;  %v4083_v20 = vld [vmem:[%s4766_s18 + $0x6d4] ss:$8 sps:$4 sm:$0xff]  }
 0x193   : > { %v1975_v27 = vpop.f32.mrb[56].mxu0  ;;  %v2487_v28 = vpop.f32.mrb[56].mxu1 }
 0x194   : > { %4307 = vtanh.f32 %v1975_v27  ;;  %v1977_v29 = vpop.f32.mrb[57].mxu0  ;;  %v2489_v30 = vpop.f32.mrb[57].mxu1 }
 0x195   : > { %4309 = vtanh.f32 %v2487_v28  ;;  %v1978_v33 = vpop.f32.mrb[58].mxu0  ;;  %v2490_v34 = vpop.f32.mrb[58].mxu1 }
 0x196   : > { %v4300_v37 = vpop.eup %4299  ;;  %4311 = vtanh.f32 %v1978_v33  ;;  %v1980_v38 = vpop.f32.mrb[59].mxu0 }
 0x197   : > { %v2492_v39 = vpop.f32.mrb[59].mxu1  ;;  %v4302_v40 = vpop.eup %4301  ;;  %3169 = vst.msk [vmem:[%s4922_s21 + $0xd0] sm:$0xff] %vm3142_vm0, %v4300_v37  ;;  %4313 = vtanh.f32 %v2490_v34 }
 0x198   : > { %v4304_v41 = vpop.eup %4303  ;;  %3297 = vst.msk [vmem:[%s4922_s21 + $0x4d0] sm:$0xff] %vm3142_vm0, %v4302_v40  ;;  %2190 = vmatmul.mubr.bf16.gmra.mrb[164].mxu0 %v4061_v31  ;;  %2702 = vmatmul.mubr.bf16.gmra.mrb[164].mxu1 %v4062_v32  ;;  %v4085_v31 = vld [vmem:[%s4766_s18 + $0x2d0] ss:$8 sps:$4 sm:$0xff]  }
 0x199   : > { %v4306_v42 = vpop.eup %4305  ;;  %3170 = vst.msk [vmem:[%s4922_s21 + $0xd8] sm:$0xff] %vm3142_vm0, %v4304_v41  ;;  %2197 = vmatprep.mubr.bf16.mxu0 %v4063_v35  ;;  %2709 = vmatprep.mubr.bf16.mxu1 %v4065_v36  ;;  %v4086_v32 = vld [vmem:[%s4766_s18 + $0x6d0] ss:$8 sps:$4 sm:$0xff]   ;;  %v4087_v35 = vld [vmem:[%s4766_s18 + $0x2e4] ss:$8 sps:$4 sm:$0xff]  }
 0x19a   : > { %3298 = vst.msk [vmem:[%s4922_s21 + $0x4d8] sm:$0xff] %vm3142_vm0, %v4306_v42  ;;  %v4089_v36 = vld [vmem:[%s4766_s18 + $0x6e4] ss:$8 sps:$4 sm:$0xff]  }
 0x19b   : > { %v1983_v43 = vpop.f32.mrb[60].mxu0  ;;  %v2495_v44 = vpop.f32.mrb[60].mxu1 }
 0x19c   : > { %4315 = vtanh.f32 %v1983_v43  ;;  %v1985_v45 = vpop.f32.mrb[61].mxu0  ;;  %v2497_v46 = vpop.f32.mrb[61].mxu1 }
 0x19d   : > { %4317 = vtanh.f32 %v2495_v44  ;;  %v1986_v49 = vpop.f32.mrb[62].mxu0  ;;  %v2498_v50 = vpop.f32.mrb[62].mxu1 }
 0x19e   : > { %v4308_v53 = vpop.eup %4307  ;;  %4319 = vtanh.f32 %v1986_v49  ;;  %v1988_v54 = vpop.f32.mrb[63].mxu0 }
 0x19f   : > { %v2500_v55 = vpop.f32.mrb[63].mxu1  ;;  %v4310_v56 = vpop.eup %4309  ;;  %3171 = vst.msk [vmem:[%s4922_s21 + $0xe0] sm:$0xff] %vm3142_vm0, %v4308_v53  ;;  %4321 = vtanh.f32 %v2498_v50 }
 0x1a0   : > { %v4312_v57 = vpop.eup %4311  ;;  %3299 = vst.msk [vmem:[%s4922_s21 + $0x4e0] sm:$0xff] %vm3142_vm0, %v4310_v56  ;;  %2198 = vmatmul.mubr.bf16.gmra.mrb[168].mxu0 %v4067_v47  ;;  %2710 = vmatmul.mubr.bf16.gmra.mrb[168].mxu1 %v4068_v48  ;;  %v4091_v47 = vld [vmem:[%s4766_s18 + $0x2e0] ss:$8 sps:$4 sm:$0xff]  }
 0x1a1   : > { %v4314_v58 = vpop.eup %4313  ;;  %3172 = vst.msk [vmem:[%s4922_s21 + $0xe8] sm:$0xff] %vm3142_vm0, %v4312_v57  ;;  %2205 = vmatprep.mubr.bf16.mxu0 %v4069_v51  ;;  %2717 = vmatprep.mubr.bf16.mxu1 %v4071_v52  ;;  %v4092_v48 = vld [vmem:[%s4766_s18 + $0x6e0] ss:$8 sps:$4 sm:$0xff]   ;;  %v4093_v51 = vld [vmem:[%s4766_s18 + $0x2f4] ss:$8 sps:$4 sm:$0xff]  }
 0x1a2   : > { %3300 = vst.msk [vmem:[%s4922_s21 + $0x4e8] sm:$0xff] %vm3142_vm0, %v4314_v58  ;;  %v4095_v52 = vld [vmem:[%s4766_s18 + $0x6f4] ss:$8 sps:$4 sm:$0xff]  }
 0x1a3   : > { %v1991_v59 = vpop.f32.mrb[64].mxu0  ;;  %v2503_v60 = vpop.f32.mrb[64].mxu1 }
 0x1a4   : > { %4323 = vtanh.f32 %v1991_v59  ;;  %v1993_v61 = vpop.f32.mrb[65].mxu0  ;;  %v2505_v62 = vpop.f32.mrb[65].mxu1 }
 0x1a5   : > { %4325 = vtanh.f32 %v2503_v60  ;;  %v1994_v1 = vpop.f32.mrb[66].mxu0  ;;  %v2506_v2 = vpop.f32.mrb[66].mxu1 }
 0x1a6   : > { %v4316_v5 = vpop.eup %4315  ;;  %4327 = vtanh.f32 %v1994_v1  ;;  %v1996_v6 = vpop.f32.mrb[67].mxu0 }
 0x1a7   : > { %v2508_v7 = vpop.f32.mrb[67].mxu1  ;;  %v4318_v8 = vpop.eup %4317  ;;  %3173 = vst.msk [vmem:[%s4922_s21 + $0xf0] sm:$0xff] %vm3142_vm0, %v4316_v5  ;;  %4329 = vtanh.f32 %v2506_v2 }
 0x1a8   : > { %v4320_v9 = vpop.eup %4319  ;;  %3301 = vst.msk [vmem:[%s4922_s21 + $0x4f0] sm:$0xff] %vm3142_vm0, %v4318_v8  ;;  %2206 = vmatmul.mubr.bf16.gmra.mrb[172].mxu0 %v4073_v63  ;;  %2718 = vmatmul.mubr.bf16.gmra.mrb[172].mxu1 %v4074_v0  ;;  %v4097_v63 = vld [vmem:[%s4766_s18 + $0x2f0] ss:$8 sps:$4 sm:$0xff]  }
 0x1a9   : > { %v4322_v10 = vpop.eup %4321  ;;  %3174 = vst.msk [vmem:[%s4922_s21 + $0xf8] sm:$0xff] %vm3142_vm0, %v4320_v9  ;;  %2213 = vmatprep.mubr.bf16.mxu0 %v4075_v3  ;;  %2725 = vmatprep.mubr.bf16.mxu1 %v4077_v4  ;;  %v4098_v0 = vld [vmem:[%s4766_s18 + $0x6f0] ss:$8 sps:$4 sm:$0xff]   ;;  %v4099_v3 = vld [vmem:[%s4766_s18 + $0x304] ss:$8 sps:$4 sm:$0xff]  }
 0x1aa   : > { %3302 = vst.msk [vmem:[%s4922_s21 + $0x4f8] sm:$0xff] %vm3142_vm0, %v4322_v10  ;;  %v4101_v4 = vld [vmem:[%s4766_s18 + $0x704] ss:$8 sps:$4 sm:$0xff]  }
 0x1ab   : > { %v1999_v11 = vpop.f32.mrb[68].mxu0  ;;  %v2511_v12 = vpop.f32.mrb[68].mxu1 }
 0x1ac   : > { %4331 = vtanh.f32 %v1999_v11  ;;  %v2001_v13 = vpop.f32.mrb[69].mxu0  ;;  %v2513_v14 = vpop.f32.mrb[69].mxu1 }
 0x1ad   : > { %4333 = vtanh.f32 %v2511_v12  ;;  %v2002_v17 = vpop.f32.mrb[70].mxu0  ;;  %v2514_v18 = vpop.f32.mrb[70].mxu1 }
 0x1ae   : > { %v4324_v21 = vpop.eup %4323  ;;  %4335 = vtanh.f32 %v2002_v17  ;;  %v2004_v22 = vpop.f32.mrb[71].mxu0 }
 0x1af   : > { %v2516_v23 = vpop.f32.mrb[71].mxu1  ;;  %v4326_v24 = vpop.eup %4325  ;;  %3175 = vst.msk [vmem:[%s4922_s21 + $0x100] sm:$0xff] %vm3142_vm0, %v4324_v21  ;;  %4337 = vtanh.f32 %v2514_v18 }
 0x1b0   : > { %v4328_v25 = vpop.eup %4327  ;;  %3303 = vst.msk [vmem:[%s4922_s21 + $0x500] sm:$0xff] %vm3142_vm0, %v4326_v24  ;;  %2214 = vmatmul.mubr.bf16.gmra.mrb[176].mxu0 %v4079_v15  ;;  %2726 = vmatmul.mubr.bf16.gmra.mrb[176].mxu1 %v4080_v16  ;;  %v4103_v15 = vld [vmem:[%s4766_s18 + $0x300] ss:$8 sps:$4 sm:$0xff]  }
 0x1b1   : > { %v4330_v26 = vpop.eup %4329  ;;  %3176 = vst.msk [vmem:[%s4922_s21 + $0x108] sm:$0xff] %vm3142_vm0, %v4328_v25  ;;  %2221 = vmatprep.mubr.bf16.mxu0 %v4081_v19  ;;  %2733 = vmatprep.mubr.bf16.mxu1 %v4083_v20  ;;  %v4104_v16 = vld [vmem:[%s4766_s18 + $0x700] ss:$8 sps:$4 sm:$0xff]   ;;  %v4105_v19 = vld [vmem:[%s4766_s18 + $0x314] ss:$8 sps:$4 sm:$0xff]  }
 0x1b2   : > { %3304 = vst.msk [vmem:[%s4922_s21 + $0x508] sm:$0xff] %vm3142_vm0, %v4330_v26  ;;  %v4107_v20 = vld [vmem:[%s4766_s18 + $0x714] ss:$8 sps:$4 sm:$0xff]  }
 0x1b3   : > { %v2007_v27 = vpop.f32.mrb[72].mxu0  ;;  %v2519_v28 = vpop.f32.mrb[72].mxu1 }
 0x1b4   : > { %4339 = vtanh.f32 %v2007_v27  ;;  %v2009_v29 = vpop.f32.mrb[73].mxu0  ;;  %v2521_v30 = vpop.f32.mrb[73].mxu1 }
 0x1b5   : > { %4341 = vtanh.f32 %v2519_v28  ;;  %v2010_v33 = vpop.f32.mrb[74].mxu0  ;;  %v2522_v34 = vpop.f32.mrb[74].mxu1 }
 0x1b6   : > { %v4332_v37 = vpop.eup %4331  ;;  %4343 = vtanh.f32 %v2010_v33  ;;  %v2012_v38 = vpop.f32.mrb[75].mxu0 }
 0x1b7   : > { %v2524_v39 = vpop.f32.mrb[75].mxu1  ;;  %v4334_v40 = vpop.eup %4333  ;;  %3177 = vst.msk [vmem:[%s4922_s21 + $0x110] sm:$0xff] %vm3142_vm0, %v4332_v37  ;;  %4345 = vtanh.f32 %v2522_v34 }
 0x1b8   : > { %v4336_v41 = vpop.eup %4335  ;;  %3305 = vst.msk [vmem:[%s4922_s21 + $0x510] sm:$0xff] %vm3142_vm0, %v4334_v40  ;;  %2222 = vmatmul.mubr.bf16.gmra.mrb[180].mxu0 %v4085_v31  ;;  %2734 = vmatmul.mubr.bf16.gmra.mrb[180].mxu1 %v4086_v32  ;;  %v4109_v31 = vld [vmem:[%s4766_s18 + $0x310] ss:$8 sps:$4 sm:$0xff]  }
 0x1b9   : > { %v4338_v42 = vpop.eup %4337  ;;  %3178 = vst.msk [vmem:[%s4922_s21 + $0x118] sm:$0xff] %vm3142_vm0, %v4336_v41  ;;  %2229 = vmatprep.mubr.bf16.mxu0 %v4087_v35  ;;  %2741 = vmatprep.mubr.bf16.mxu1 %v4089_v36  ;;  %v4110_v32 = vld [vmem:[%s4766_s18 + $0x710] ss:$8 sps:$4 sm:$0xff]   ;;  %v4111_v35 = vld [vmem:[%s4766_s18 + $0x324] ss:$8 sps:$4 sm:$0xff]  }
 0x1ba   : > { %3306 = vst.msk [vmem:[%s4922_s21 + $0x518] sm:$0xff] %vm3142_vm0, %v4338_v42  ;;  %v4113_v36 = vld [vmem:[%s4766_s18 + $0x724] ss:$8 sps:$4 sm:$0xff]  }
 0x1bb   : > { %v2015_v43 = vpop.f32.mrb[76].mxu0  ;;  %v2527_v44 = vpop.f32.mrb[76].mxu1 }
 0x1bc   : > { %4347 = vtanh.f32 %v2015_v43  ;;  %v2017_v45 = vpop.f32.mrb[77].mxu0  ;;  %v2529_v46 = vpop.f32.mrb[77].mxu1 }
 0x1bd   : > { %4349 = vtanh.f32 %v2527_v44  ;;  %v2018_v49 = vpop.f32.mrb[78].mxu0  ;;  %v2530_v50 = vpop.f32.mrb[78].mxu1 }
 0x1be   : > { %v4340_v53 = vpop.eup %4339  ;;  %4351 = vtanh.f32 %v2018_v49  ;;  %v2020_v54 = vpop.f32.mrb[79].mxu0 }
 0x1bf   : > { %v2532_v55 = vpop.f32.mrb[79].mxu1  ;;  %v4342_v56 = vpop.eup %4341  ;;  %3179 = vst.msk [vmem:[%s4922_s21 + $0x120] sm:$0xff] %vm3142_vm0, %v4340_v53  ;;  %4353 = vtanh.f32 %v2530_v50 }
 0x1c0   : > { %v4344_v57 = vpop.eup %4343  ;;  %3307 = vst.msk [vmem:[%s4922_s21 + $0x520] sm:$0xff] %vm3142_vm0, %v4342_v56  ;;  %2230 = vmatmul.mubr.bf16.gmra.mrb[184].mxu0 %v4091_v47  ;;  %2742 = vmatmul.mubr.bf16.gmra.mrb[184].mxu1 %v4092_v48  ;;  %v4115_v47 = vld [vmem:[%s4766_s18 + $0x320] ss:$8 sps:$4 sm:$0xff]  }
 0x1c1   : > { %v4346_v58 = vpop.eup %4345  ;;  %3180 = vst.msk [vmem:[%s4922_s21 + $0x128] sm:$0xff] %vm3142_vm0, %v4344_v57  ;;  %2237 = vmatprep.mubr.bf16.mxu0 %v4093_v51  ;;  %2749 = vmatprep.mubr.bf16.mxu1 %v4095_v52  ;;  %v4116_v48 = vld [vmem:[%s4766_s18 + $0x720] ss:$8 sps:$4 sm:$0xff]   ;;  %v4117_v51 = vld [vmem:[%s4766_s18 + $0x334] ss:$8 sps:$4 sm:$0xff]  }
 0x1c2   : > { %3308 = vst.msk [vmem:[%s4922_s21 + $0x528] sm:$0xff] %vm3142_vm0, %v4346_v58  ;;  %v4119_v52 = vld [vmem:[%s4766_s18 + $0x734] ss:$8 sps:$4 sm:$0xff]  }
 0x1c3   : > { %v2023_v59 = vpop.f32.mrb[80].mxu0  ;;  %v2535_v60 = vpop.f32.mrb[80].mxu1 }
 0x1c4   : > { %4355 = vtanh.f32 %v2023_v59  ;;  %v2025_v61 = vpop.f32.mrb[81].mxu0  ;;  %v2537_v62 = vpop.f32.mrb[81].mxu1 }
 0x1c5   : > { %4357 = vtanh.f32 %v2535_v60  ;;  %v2026_v1 = vpop.f32.mrb[82].mxu0  ;;  %v2538_v2 = vpop.f32.mrb[82].mxu1 }
 0x1c6   : > { %v4348_v5 = vpop.eup %4347  ;;  %4359 = vtanh.f32 %v2026_v1  ;;  %v2028_v6 = vpop.f32.mrb[83].mxu0 }
 0x1c7   : > { %v2540_v7 = vpop.f32.mrb[83].mxu1  ;;  %v4350_v8 = vpop.eup %4349  ;;  %3181 = vst.msk [vmem:[%s4922_s21 + $0x130] sm:$0xff] %vm3142_vm0, %v4348_v5  ;;  %4361 = vtanh.f32 %v2538_v2 }
 0x1c8   : > { %v4352_v9 = vpop.eup %4351  ;;  %3309 = vst.msk [vmem:[%s4922_s21 + $0x530] sm:$0xff] %vm3142_vm0, %v4350_v8  ;;  %2238 = vmatmul.mubr.bf16.gmra.mrb[188].mxu0 %v4097_v63  ;;  %2750 = vmatmul.mubr.bf16.gmra.mrb[188].mxu1 %v4098_v0  ;;  %v4121_v63 = vld [vmem:[%s4766_s18 + $0x330] ss:$8 sps:$4 sm:$0xff]  }
 0x1c9   : > { %v4354_v10 = vpop.eup %4353  ;;  %3182 = vst.msk [vmem:[%s4922_s21 + $0x138] sm:$0xff] %vm3142_vm0, %v4352_v9  ;;  %2245 = vmatprep.mubr.bf16.mxu0 %v4099_v3  ;;  %2757 = vmatprep.mubr.bf16.mxu1 %v4101_v4  ;;  %v4122_v0 = vld [vmem:[%s4766_s18 + $0x730] ss:$8 sps:$4 sm:$0xff]   ;;  %v4123_v3 = vld [vmem:[%s4766_s18 + $0x344] ss:$8 sps:$4 sm:$0xff]  }
 0x1ca   : > { %3310 = vst.msk [vmem:[%s4922_s21 + $0x538] sm:$0xff] %vm3142_vm0, %v4354_v10  ;;  %v4125_v4 = vld [vmem:[%s4766_s18 + $0x744] ss:$8 sps:$4 sm:$0xff]  }
 0x1cb   : > { %v2031_v11 = vpop.f32.mrb[84].mxu0  ;;  %v2543_v12 = vpop.f32.mrb[84].mxu1 }
 0x1cc   : > { %4363 = vtanh.f32 %v2031_v11  ;;  %v2033_v13 = vpop.f32.mrb[85].mxu0  ;;  %v2545_v14 = vpop.f32.mrb[85].mxu1 }
 0x1cd   : > { %4365 = vtanh.f32 %v2543_v12  ;;  %v2034_v17 = vpop.f32.mrb[86].mxu0  ;;  %v2546_v18 = vpop.f32.mrb[86].mxu1 }
 0x1ce   : > { %v4356_v21 = vpop.eup %4355  ;;  %4367 = vtanh.f32 %v2034_v17  ;;  %v2036_v22 = vpop.f32.mrb[87].mxu0 }
 0x1cf   : > { %v2548_v23 = vpop.f32.mrb[87].mxu1  ;;  %v4358_v24 = vpop.eup %4357  ;;  %3183 = vst.msk [vmem:[%s4922_s21 + $0x140] sm:$0xff] %vm3142_vm0, %v4356_v21  ;;  %4369 = vtanh.f32 %v2546_v18 }
 0x1d0   : > { %v4360_v25 = vpop.eup %4359  ;;  %3311 = vst.msk [vmem:[%s4922_s21 + $0x540] sm:$0xff] %vm3142_vm0, %v4358_v24  ;;  %2246 = vmatmul.mubr.bf16.gmra.mrb[192].mxu0 %v4103_v15  ;;  %2758 = vmatmul.mubr.bf16.gmra.mrb[192].mxu1 %v4104_v16  ;;  %v4127_v15 = vld [vmem:[%s4766_s18 + $0x340] ss:$8 sps:$4 sm:$0xff]  }
 0x1d1   : > { %v4362_v26 = vpop.eup %4361  ;;  %3184 = vst.msk [vmem:[%s4922_s21 + $0x148] sm:$0xff] %vm3142_vm0, %v4360_v25  ;;  %2253 = vmatprep.mubr.bf16.mxu0 %v4105_v19  ;;  %2765 = vmatprep.mubr.bf16.mxu1 %v4107_v20  ;;  %v4128_v16 = vld [vmem:[%s4766_s18 + $0x740] ss:$8 sps:$4 sm:$0xff]   ;;  %v4129_v19 = vld [vmem:[%s4766_s18 + $0x354] ss:$8 sps:$4 sm:$0xff]  }
 0x1d2   : > { %3312 = vst.msk [vmem:[%s4922_s21 + $0x548] sm:$0xff] %vm3142_vm0, %v4362_v26  ;;  %v4131_v20 = vld [vmem:[%s4766_s18 + $0x754] ss:$8 sps:$4 sm:$0xff]  }
 0x1d3   : > { %v2039_v27 = vpop.f32.mrb[88].mxu0  ;;  %v2551_v28 = vpop.f32.mrb[88].mxu1 }
 0x1d4   : > { %4371 = vtanh.f32 %v2039_v27  ;;  %v2041_v29 = vpop.f32.mrb[89].mxu0  ;;  %v2553_v30 = vpop.f32.mrb[89].mxu1 }
 0x1d5   : > { %4373 = vtanh.f32 %v2551_v28  ;;  %v2042_v33 = vpop.f32.mrb[90].mxu0  ;;  %v2554_v34 = vpop.f32.mrb[90].mxu1 }
 0x1d6   : > { %v4364_v37 = vpop.eup %4363  ;;  %4375 = vtanh.f32 %v2042_v33  ;;  %v2044_v38 = vpop.f32.mrb[91].mxu0 }
 0x1d7   : > { %v2556_v39 = vpop.f32.mrb[91].mxu1  ;;  %v4366_v40 = vpop.eup %4365  ;;  %3185 = vst.msk [vmem:[%s4922_s21 + $0x150] sm:$0xff] %vm3142_vm0, %v4364_v37  ;;  %4377 = vtanh.f32 %v2554_v34 }
 0x1d8   : > { %v4368_v41 = vpop.eup %4367  ;;  %3313 = vst.msk [vmem:[%s4922_s21 + $0x550] sm:$0xff] %vm3142_vm0, %v4366_v40  ;;  %2254 = vmatmul.mubr.bf16.gmra.mrb[196].mxu0 %v4109_v31  ;;  %2766 = vmatmul.mubr.bf16.gmra.mrb[196].mxu1 %v4110_v32  ;;  %v4133_v31 = vld [vmem:[%s4766_s18 + $0x350] ss:$8 sps:$4 sm:$0xff]  }
 0x1d9   : > { %v4370_v42 = vpop.eup %4369  ;;  %3186 = vst.msk [vmem:[%s4922_s21 + $0x158] sm:$0xff] %vm3142_vm0, %v4368_v41  ;;  %2261 = vmatprep.mubr.bf16.mxu0 %v4111_v35  ;;  %2773 = vmatprep.mubr.bf16.mxu1 %v4113_v36  ;;  %v4134_v32 = vld [vmem:[%s4766_s18 + $0x750] ss:$8 sps:$4 sm:$0xff]   ;;  %v4135_v35 = vld [vmem:[%s4766_s18 + $0x364] ss:$8 sps:$4 sm:$0xff]  }
 0x1da   : > { %3314 = vst.msk [vmem:[%s4922_s21 + $0x558] sm:$0xff] %vm3142_vm0, %v4370_v42  ;;  %v4137_v36 = vld [vmem:[%s4766_s18 + $0x764] ss:$8 sps:$4 sm:$0xff]  }
 0x1db   : > { %v2047_v43 = vpop.f32.mrb[92].mxu0  ;;  %v2559_v44 = vpop.f32.mrb[92].mxu1 }
 0x1dc   : > { %4379 = vtanh.f32 %v2047_v43  ;;  %v2049_v45 = vpop.f32.mrb[93].mxu0  ;;  %v2561_v46 = vpop.f32.mrb[93].mxu1 }
 0x1dd   : > { %4381 = vtanh.f32 %v2559_v44  ;;  %v2050_v49 = vpop.f32.mrb[94].mxu0  ;;  %v2562_v50 = vpop.f32.mrb[94].mxu1 }
 0x1de   : > { %v4372_v53 = vpop.eup %4371  ;;  %4383 = vtanh.f32 %v2050_v49  ;;  %v2052_v54 = vpop.f32.mrb[95].mxu0 }
 0x1df   : > { %v2564_v55 = vpop.f32.mrb[95].mxu1  ;;  %v4374_v56 = vpop.eup %4373  ;;  %3187 = vst.msk [vmem:[%s4922_s21 + $0x160] sm:$0xff] %vm3142_vm0, %v4372_v53  ;;  %4385 = vtanh.f32 %v2562_v50 }
 0x1e0   : > { %v4376_v57 = vpop.eup %4375  ;;  %3315 = vst.msk [vmem:[%s4922_s21 + $0x560] sm:$0xff] %vm3142_vm0, %v4374_v56  ;;  %2262 = vmatmul.mubr.bf16.gmra.mrb[200].mxu0 %v4115_v47  ;;  %2774 = vmatmul.mubr.bf16.gmra.mrb[200].mxu1 %v4116_v48  ;;  %v4139_v47 = vld [vmem:[%s4766_s18 + $0x360] ss:$8 sps:$4 sm:$0xff]  }
 0x1e1   : > { %v4378_v58 = vpop.eup %4377  ;;  %3188 = vst.msk [vmem:[%s4922_s21 + $0x168] sm:$0xff] %vm3142_vm0, %v4376_v57  ;;  %2269 = vmatprep.mubr.bf16.mxu0 %v4117_v51  ;;  %2781 = vmatprep.mubr.bf16.mxu1 %v4119_v52  ;;  %v4140_v48 = vld [vmem:[%s4766_s18 + $0x760] ss:$8 sps:$4 sm:$0xff]   ;;  %v4141_v51 = vld [vmem:[%s4766_s18 + $0x374] ss:$8 sps:$4 sm:$0xff]  }
 0x1e2   : > { %3316 = vst.msk [vmem:[%s4922_s21 + $0x568] sm:$0xff] %vm3142_vm0, %v4378_v58  ;;  %v4143_v52 = vld [vmem:[%s4766_s18 + $0x774] ss:$8 sps:$4 sm:$0xff]  }
 0x1e3   : > { %v2055_v59 = vpop.f32.mrb[96].mxu0  ;;  %v2567_v60 = vpop.f32.mrb[96].mxu1 }
 0x1e4   : > { %4387 = vtanh.f32 %v2055_v59  ;;  %v2057_v61 = vpop.f32.mrb[97].mxu0  ;;  %v2569_v62 = vpop.f32.mrb[97].mxu1 }
 0x1e5   : > { %4389 = vtanh.f32 %v2567_v60  ;;  %v2058_v1 = vpop.f32.mrb[98].mxu0  ;;  %v2570_v2 = vpop.f32.mrb[98].mxu1 }
 0x1e6   : > { %v4380_v5 = vpop.eup %4379  ;;  %4391 = vtanh.f32 %v2058_v1  ;;  %v2060_v6 = vpop.f32.mrb[99].mxu0 }
 0x1e7   : > { %v2572_v7 = vpop.f32.mrb[99].mxu1  ;;  %v4382_v8 = vpop.eup %4381  ;;  %3189 = vst.msk [vmem:[%s4922_s21 + $0x170] sm:$0xff] %vm3142_vm0, %v4380_v5  ;;  %4393 = vtanh.f32 %v2570_v2 }
 0x1e8   : > { %v4384_v9 = vpop.eup %4383  ;;  %3317 = vst.msk [vmem:[%s4922_s21 + $0x570] sm:$0xff] %vm3142_vm0, %v4382_v8  ;;  %2270 = vmatmul.mubr.bf16.gmra.mrb[204].mxu0 %v4121_v63  ;;  %2782 = vmatmul.mubr.bf16.gmra.mrb[204].mxu1 %v4122_v0  ;;  %v4145_v63 = vld [vmem:[%s4766_s18 + $0x370] ss:$8 sps:$4 sm:$0xff]  }
 0x1e9   : > { %v4386_v10 = vpop.eup %4385  ;;  %3190 = vst.msk [vmem:[%s4922_s21 + $0x178] sm:$0xff] %vm3142_vm0, %v4384_v9  ;;  %2277 = vmatprep.mubr.bf16.mxu0 %v4123_v3  ;;  %2789 = vmatprep.mubr.bf16.mxu1 %v4125_v4  ;;  %v4146_v0 = vld [vmem:[%s4766_s18 + $0x770] ss:$8 sps:$4 sm:$0xff]   ;;  %v4147_v3 = vld [vmem:[%s4766_s18 + $0x384] ss:$8 sps:$4 sm:$0xff]  }
 0x1ea   : > { %3318 = vst.msk [vmem:[%s4922_s21 + $0x578] sm:$0xff] %vm3142_vm0, %v4386_v10  ;;  %v4149_v4 = vld [vmem:[%s4766_s18 + $0x784] ss:$8 sps:$4 sm:$0xff]  }
 0x1eb   : > { %v2063_v11 = vpop.f32.mrb[100].mxu0  ;;  %v2575_v12 = vpop.f32.mrb[100].mxu1 }
 0x1ec   : > { %4395 = vtanh.f32 %v2063_v11  ;;  %v2065_v13 = vpop.f32.mrb[101].mxu0  ;;  %v2577_v14 = vpop.f32.mrb[101].mxu1 }
 0x1ed   : > { %4397 = vtanh.f32 %v2575_v12  ;;  %v2066_v17 = vpop.f32.mrb[102].mxu0  ;;  %v2578_v18 = vpop.f32.mrb[102].mxu1 }
 0x1ee   : > { %v4388_v21 = vpop.eup %4387  ;;  %4399 = vtanh.f32 %v2066_v17  ;;  %v2068_v22 = vpop.f32.mrb[103].mxu0 }
 0x1ef   : > { %v2580_v23 = vpop.f32.mrb[103].mxu1  ;;  %v4390_v24 = vpop.eup %4389  ;;  %3191 = vst.msk [vmem:[%s4922_s21 + $0x180] sm:$0xff] %vm3142_vm0, %v4388_v21  ;;  %4401 = vtanh.f32 %v2578_v18 }
 0x1f0   : > { %v4392_v25 = vpop.eup %4391  ;;  %3319 = vst.msk [vmem:[%s4922_s21 + $0x580] sm:$0xff] %vm3142_vm0, %v4390_v24  ;;  %2278 = vmatmul.mubr.bf16.gmra.mrb[208].mxu0 %v4127_v15  ;;  %2790 = vmatmul.mubr.bf16.gmra.mrb[208].mxu1 %v4128_v16  ;;  %v4151_v15 = vld [vmem:[%s4766_s18 + $0x380] ss:$8 sps:$4 sm:$0xff]  }
 0x1f1   : > { %v4394_v26 = vpop.eup %4393  ;;  %3192 = vst.msk [vmem:[%s4922_s21 + $0x188] sm:$0xff] %vm3142_vm0, %v4392_v25  ;;  %2285 = vmatprep.mubr.bf16.mxu0 %v4129_v19  ;;  %2797 = vmatprep.mubr.bf16.mxu1 %v4131_v20  ;;  %v4152_v16 = vld [vmem:[%s4766_s18 + $0x780] ss:$8 sps:$4 sm:$0xff]   ;;  %v4153_v19 = vld [vmem:[%s4766_s18 + $0x394] ss:$8 sps:$4 sm:$0xff]  }
 0x1f2   : > { %3320 = vst.msk [vmem:[%s4922_s21 + $0x588] sm:$0xff] %vm3142_vm0, %v4394_v26  ;;  %v4155_v20 = vld [vmem:[%s4766_s18 + $0x794] ss:$8 sps:$4 sm:$0xff]  }
 0x1f3   : > { %v2071_v27 = vpop.f32.mrb[104].mxu0  ;;  %v2583_v28 = vpop.f32.mrb[104].mxu1 }
 0x1f4   : > { %4403 = vtanh.f32 %v2071_v27  ;;  %v2073_v29 = vpop.f32.mrb[105].mxu0  ;;  %v2585_v30 = vpop.f32.mrb[105].mxu1 }
 0x1f5   : > { %4405 = vtanh.f32 %v2583_v28  ;;  %v2074_v33 = vpop.f32.mrb[106].mxu0  ;;  %v2586_v34 = vpop.f32.mrb[106].mxu1 }
 0x1f6   : > { %v4396_v37 = vpop.eup %4395  ;;  %4407 = vtanh.f32 %v2074_v33  ;;  %v2076_v38 = vpop.f32.mrb[107].mxu0 }
 0x1f7   : > { %v2588_v39 = vpop.f32.mrb[107].mxu1  ;;  %v4398_v40 = vpop.eup %4397  ;;  %3193 = vst.msk [vmem:[%s4922_s21 + $0x190] sm:$0xff] %vm3142_vm0, %v4396_v37  ;;  %4409 = vtanh.f32 %v2586_v34 }
 0x1f8   : > { %v4400_v41 = vpop.eup %4399  ;;  %3321 = vst.msk [vmem:[%s4922_s21 + $0x590] sm:$0xff] %vm3142_vm0, %v4398_v40  ;;  %2286 = vmatmul.mubr.bf16.gmra.mrb[212].mxu0 %v4133_v31  ;;  %2798 = vmatmul.mubr.bf16.gmra.mrb[212].mxu1 %v4134_v32  ;;  %v4157_v31 = vld [vmem:[%s4766_s18 + $0x390] ss:$8 sps:$4 sm:$0xff]  }
 0x1f9   : > { %v4402_v42 = vpop.eup %4401  ;;  %3194 = vst.msk [vmem:[%s4922_s21 + $0x198] sm:$0xff] %vm3142_vm0, %v4400_v41  ;;  %2293 = vmatprep.mubr.bf16.mxu0 %v4135_v35  ;;  %2805 = vmatprep.mubr.bf16.mxu1 %v4137_v36  ;;  %v4158_v32 = vld [vmem:[%s4766_s18 + $0x790] ss:$8 sps:$4 sm:$0xff]   ;;  %v4159_v35 = vld [vmem:[%s4766_s18 + $0x3a4] ss:$8 sps:$4 sm:$0xff]  }
 0x1fa   : > { %3322 = vst.msk [vmem:[%s4922_s21 + $0x598] sm:$0xff] %vm3142_vm0, %v4402_v42  ;;  %v4161_v36 = vld [vmem:[%s4766_s18 + $0x7a4] ss:$8 sps:$4 sm:$0xff]  }
 0x1fb   : > { %v2079_v43 = vpop.f32.mrb[108].mxu0  ;;  %v2591_v44 = vpop.f32.mrb[108].mxu1 }
 0x1fc   : > { %4411 = vtanh.f32 %v2079_v43  ;;  %v2081_v45 = vpop.f32.mrb[109].mxu0  ;;  %v2593_v46 = vpop.f32.mrb[109].mxu1 }
 0x1fd   : > { %4413 = vtanh.f32 %v2591_v44  ;;  %v2082_v49 = vpop.f32.mrb[110].mxu0  ;;  %v2594_v50 = vpop.f32.mrb[110].mxu1 }
 0x1fe   : > { %v4404_v53 = vpop.eup %4403  ;;  %4415 = vtanh.f32 %v2082_v49  ;;  %v2084_v54 = vpop.f32.mrb[111].mxu0 }
 0x1ff   : > { %v2596_v55 = vpop.f32.mrb[111].mxu1  ;;  %v4406_v56 = vpop.eup %4405  ;;  %3195 = vst.msk [vmem:[%s4922_s21 + $0x1a0] sm:$0xff] %vm3142_vm0, %v4404_v53  ;;  %4417 = vtanh.f32 %v2594_v50 }
 0x200   : > { %v4408_v57 = vpop.eup %4407  ;;  %3323 = vst.msk [vmem:[%s4922_s21 + $0x5a0] sm:$0xff] %vm3142_vm0, %v4406_v56  ;;  %2294 = vmatmul.mubr.bf16.gmra.mrb[216].mxu0 %v4139_v47  ;;  %2806 = vmatmul.mubr.bf16.gmra.mrb[216].mxu1 %v4140_v48  ;;  %v4163_v47 = vld [vmem:[%s4766_s18 + $0x3a0] ss:$8 sps:$4 sm:$0xff]  }
 0x201   : > { %v4410_v58 = vpop.eup %4409  ;;  %3196 = vst.msk [vmem:[%s4922_s21 + $0x1a8] sm:$0xff] %vm3142_vm0, %v4408_v57  ;;  %2301 = vmatprep.mubr.bf16.mxu0 %v4141_v51  ;;  %2813 = vmatprep.mubr.bf16.mxu1 %v4143_v52  ;;  %v4164_v48 = vld [vmem:[%s4766_s18 + $0x7a0] ss:$8 sps:$4 sm:$0xff]   ;;  %v4165_v51 = vld [vmem:[%s4766_s18 + $0x3b4] ss:$8 sps:$4 sm:$0xff]  }
 0x202   : > { %3324 = vst.msk [vmem:[%s4922_s21 + $0x5a8] sm:$0xff] %vm3142_vm0, %v4410_v58  ;;  %v4167_v52 = vld [vmem:[%s4766_s18 + $0x7b4] ss:$8 sps:$4 sm:$0xff]  }
 0x203   : > { %v2087_v59 = vpop.f32.mrb[112].mxu0  ;;  %v2599_v60 = vpop.f32.mrb[112].mxu1 }
 0x204   : > { %4419 = vtanh.f32 %v2087_v59  ;;  %v2089_v61 = vpop.f32.mrb[113].mxu0  ;;  %v2601_v62 = vpop.f32.mrb[113].mxu1 }
 0x205   : > { %4421 = vtanh.f32 %v2599_v60  ;;  %v2090_v1 = vpop.f32.mrb[114].mxu0  ;;  %v2602_v2 = vpop.f32.mrb[114].mxu1 }
 0x206   : > { %v4412_v5 = vpop.eup %4411  ;;  %4423 = vtanh.f32 %v2090_v1  ;;  %v2092_v6 = vpop.f32.mrb[115].mxu0 }
 0x207   : > { %v2604_v7 = vpop.f32.mrb[115].mxu1  ;;  %v4414_v8 = vpop.eup %4413  ;;  %3197 = vst.msk [vmem:[%s4922_s21 + $0x1b0] sm:$0xff] %vm3142_vm0, %v4412_v5  ;;  %4425 = vtanh.f32 %v2602_v2 }
 0x208   : > { %v4416_v9 = vpop.eup %4415  ;;  %3325 = vst.msk [vmem:[%s4922_s21 + $0x5b0] sm:$0xff] %vm3142_vm0, %v4414_v8  ;;  %2302 = vmatmul.mubr.bf16.gmra.mrb[220].mxu0 %v4145_v63  ;;  %2814 = vmatmul.mubr.bf16.gmra.mrb[220].mxu1 %v4146_v0  ;;  %v4169_v63 = vld [vmem:[%s4766_s18 + $0x3b0] ss:$8 sps:$4 sm:$0xff]  }
 0x209   : > { %v4418_v10 = vpop.eup %4417  ;;  %3198 = vst.msk [vmem:[%s4922_s21 + $0x1b8] sm:$0xff] %vm3142_vm0, %v4416_v9  ;;  %2309 = vmatprep.mubr.bf16.mxu0 %v4147_v3  ;;  %2821 = vmatprep.mubr.bf16.mxu1 %v4149_v4  ;;  %v4170_v0 = vld [vmem:[%s4766_s18 + $0x7b0] ss:$8 sps:$4 sm:$0xff]   ;;  %v4171_v3 = vld [vmem:[%s4766_s18 + $0x3c4] ss:$8 sps:$4 sm:$0xff]  }
 0x20a   : > { %3326 = vst.msk [vmem:[%s4922_s21 + $0x5b8] sm:$0xff] %vm3142_vm0, %v4418_v10  ;;  %v4173_v4 = vld [vmem:[%s4766_s18 + $0x7c4] ss:$8 sps:$4 sm:$0xff]  }
 0x20b   : > { %v2095_v11 = vpop.f32.mrb[116].mxu0  ;;  %v2607_v12 = vpop.f32.mrb[116].mxu1 }
 0x20c   : > { %4427 = vtanh.f32 %v2095_v11  ;;  %v2097_v13 = vpop.f32.mrb[117].mxu0  ;;  %v2609_v14 = vpop.f32.mrb[117].mxu1 }
 0x20d   : > { %4429 = vtanh.f32 %v2607_v12  ;;  %v2098_v17 = vpop.f32.mrb[118].mxu0  ;;  %v2610_v18 = vpop.f32.mrb[118].mxu1 }
 0x20e   : > { %v4420_v21 = vpop.eup %4419  ;;  %4431 = vtanh.f32 %v2098_v17  ;;  %v2100_v22 = vpop.f32.mrb[119].mxu0 }
 0x20f   : > { %v2612_v23 = vpop.f32.mrb[119].mxu1  ;;  %v4422_v24 = vpop.eup %4421  ;;  %3199 = vst.msk [vmem:[%s4922_s21 + $0x1c0] sm:$0xff] %vm3142_vm0, %v4420_v21  ;;  %4433 = vtanh.f32 %v2610_v18 }
 0x210   : > { %v4424_v25 = vpop.eup %4423  ;;  %3327 = vst.msk [vmem:[%s4922_s21 + $0x5c0] sm:$0xff] %vm3142_vm0, %v4422_v24  ;;  %2310 = vmatmul.mubr.bf16.gmra.mrb[224].mxu0 %v4151_v15  ;;  %2822 = vmatmul.mubr.bf16.gmra.mrb[224].mxu1 %v4152_v16  ;;  %v4175_v15 = vld [vmem:[%s4766_s18 + $0x3c0] ss:$8 sps:$4 sm:$0xff]  }
 0x211   : > { %v4426_v26 = vpop.eup %4425  ;;  %3200 = vst.msk [vmem:[%s4922_s21 + $0x1c8] sm:$0xff] %vm3142_vm0, %v4424_v25  ;;  %2317 = vmatprep.mubr.bf16.mxu0 %v4153_v19  ;;  %2829 = vmatprep.mubr.bf16.mxu1 %v4155_v20  ;;  %v4176_v16 = vld [vmem:[%s4766_s18 + $0x7c0] ss:$8 sps:$4 sm:$0xff]   ;;  %v4177_v19 = vld [vmem:[%s4766_s18 + $0x3d4] ss:$8 sps:$4 sm:$0xff]  }
 0x212   : > { %3328 = vst.msk [vmem:[%s4922_s21 + $0x5c8] sm:$0xff] %vm3142_vm0, %v4426_v26  ;;  %v4179_v20 = vld [vmem:[%s4766_s18 + $0x7d4] ss:$8 sps:$4 sm:$0xff]  }
 0x213   : > { %v2103_v27 = vpop.f32.mrb[120].mxu0  ;;  %v2615_v28 = vpop.f32.mrb[120].mxu1 }
 0x214   : > { %4435 = vtanh.f32 %v2103_v27  ;;  %v2105_v29 = vpop.f32.mrb[121].mxu0  ;;  %v2617_v30 = vpop.f32.mrb[121].mxu1 }
 0x215   : > { %4437 = vtanh.f32 %v2615_v28  ;;  %v2106_v33 = vpop.f32.mrb[122].mxu0  ;;  %v2618_v34 = vpop.f32.mrb[122].mxu1 }
 0x216   : > { %v4428_v37 = vpop.eup %4427  ;;  %4439 = vtanh.f32 %v2106_v33  ;;  %v2108_v38 = vpop.f32.mrb[123].mxu0 }
 0x217   : > { %v2620_v39 = vpop.f32.mrb[123].mxu1  ;;  %v4430_v40 = vpop.eup %4429  ;;  %3201 = vst.msk [vmem:[%s4922_s21 + $0x1d0] sm:$0xff] %vm3142_vm0, %v4428_v37  ;;  %4441 = vtanh.f32 %v2618_v34 }
 0x218   : > { %v4432_v41 = vpop.eup %4431  ;;  %3329 = vst.msk [vmem:[%s4922_s21 + $0x5d0] sm:$0xff] %vm3142_vm0, %v4430_v40  ;;  %2318 = vmatmul.mubr.bf16.gmra.mrb[228].mxu0 %v4157_v31  ;;  %2830 = vmatmul.mubr.bf16.gmra.mrb[228].mxu1 %v4158_v32  ;;  %v4181_v31 = vld [vmem:[%s4766_s18 + $0x3d0] ss:$8 sps:$4 sm:$0xff]  }
 0x219   : > { %v4434_v42 = vpop.eup %4433  ;;  %3202 = vst.msk [vmem:[%s4922_s21 + $0x1d8] sm:$0xff] %vm3142_vm0, %v4432_v41  ;;  %2325 = vmatprep.mubr.bf16.mxu0 %v4159_v35  ;;  %2837 = vmatprep.mubr.bf16.mxu1 %v4161_v36  ;;  %v4182_v32 = vld [vmem:[%s4766_s18 + $0x7d0] ss:$8 sps:$4 sm:$0xff]   ;;  %v4183_v35 = vld [vmem:[%s4766_s18 + $0x3e4] ss:$8 sps:$4 sm:$0xff]  }
 0x21a   : > { %3330 = vst.msk [vmem:[%s4922_s21 + $0x5d8] sm:$0xff] %vm3142_vm0, %v4434_v42  ;;  %v4185_v36 = vld [vmem:[%s4766_s18 + $0x7e4] ss:$8 sps:$4 sm:$0xff]  }
 0x21b   : > { %v2111_v43 = vpop.f32.mrb[124].mxu0  ;;  %v2623_v44 = vpop.f32.mrb[124].mxu1 }
 0x21c   : > { %4443 = vtanh.f32 %v2111_v43  ;;  %v2113_v45 = vpop.f32.mrb[125].mxu0  ;;  %v2625_v46 = vpop.f32.mrb[125].mxu1 }
 0x21d   : > { %4445 = vtanh.f32 %v2623_v44  ;;  %v2114_v49 = vpop.f32.mrb[126].mxu0  ;;  %v2626_v50 = vpop.f32.mrb[126].mxu1 }
 0x21e   : > { %v4436_v53 = vpop.eup %4435  ;;  %4447 = vtanh.f32 %v2114_v49  ;;  %v2116_v54 = vpop.f32.mrb[127].mxu0 }
 0x21f   : > { %v2628_v55 = vpop.f32.mrb[127].mxu1  ;;  %v4438_v56 = vpop.eup %4437  ;;  %3203 = vst.msk [vmem:[%s4922_s21 + $0x1e0] sm:$0xff] %vm3142_vm0, %v4436_v53  ;;  %4449 = vtanh.f32 %v2626_v50 }
 0x220   : > { %v4440_v57 = vpop.eup %4439  ;;  %3331 = vst.msk [vmem:[%s4922_s21 + $0x5e0] sm:$0xff] %vm3142_vm0, %v4438_v56  ;;  %2326 = vmatmul.mubr.bf16.gmra.mrb[232].mxu0 %v4163_v47  ;;  %2838 = vmatmul.mubr.bf16.gmra.mrb[232].mxu1 %v4164_v48  ;;  %v4187_v47 = vld [vmem:[%s4766_s18 + $0x3e0] ss:$8 sps:$4 sm:$0xff]  }
 0x221   : > { %v4442_v58 = vpop.eup %4441  ;;  %3204 = vst.msk [vmem:[%s4922_s21 + $0x1e8] sm:$0xff] %vm3142_vm0, %v4440_v57  ;;  %2333 = vmatprep.mubr.bf16.mxu0 %v4165_v51  ;;  %2845 = vmatprep.mubr.bf16.mxu1 %v4167_v52  ;;  %v4188_v48 = vld [vmem:[%s4766_s18 + $0x7e0] ss:$8 sps:$4 sm:$0xff]   ;;  %v4189_v51 = vld [vmem:[%s4766_s18 + $0x3f4] ss:$8 sps:$4 sm:$0xff]  }
 0x222   : > { %3332 = vst.msk [vmem:[%s4922_s21 + $0x5e8] sm:$0xff] %vm3142_vm0, %v4442_v58  ;;  %v4191_v52 = vld [vmem:[%s4766_s18 + $0x7f4] ss:$8 sps:$4 sm:$0xff]  }
 0x223   : > { %v2119_v59 = vpop.f32.mrb[128].mxu0  ;;  %v2631_v60 = vpop.f32.mrb[128].mxu1 }
 0x224   : > { %4451 = vtanh.f32 %v2119_v59  ;;  %v2121_v61 = vpop.f32.mrb[129].mxu0  ;;  %v2633_v62 = vpop.f32.mrb[129].mxu1 }
 0x225   : > { %4453 = vtanh.f32 %v2631_v60  ;;  %v2122_v1 = vpop.f32.mrb[130].mxu0  ;;  %v2634_v2 = vpop.f32.mrb[130].mxu1 }
 0x226   : > { %v4444_v5 = vpop.eup %4443  ;;  %4455 = vtanh.f32 %v2122_v1  ;;  %v2124_v6 = vpop.f32.mrb[131].mxu0 }
 0x227   : > { %v2636_v7 = vpop.f32.mrb[131].mxu1  ;;  %v4446_v8 = vpop.eup %4445  ;;  %3205 = vst.msk [vmem:[%s4922_s21 + $0x1f0] sm:$0xff] %vm3142_vm0, %v4444_v5  ;;  %4457 = vtanh.f32 %v2634_v2 }
 0x228   : > { %v4448_v9 = vpop.eup %4447  ;;  %3333 = vst.msk [vmem:[%s4922_s21 + $0x5f0] sm:$0xff] %vm3142_vm0, %v4446_v8  ;;  %2334 = vmatmul.mubr.bf16.gmra.mrb[236].mxu0 %v4169_v63  ;;  %2846 = vmatmul.mubr.bf16.gmra.mrb[236].mxu1 %v4170_v0  ;;  %v4193_v63 = vld [vmem:[%s4766_s18 + $0x3f0] ss:$8 sps:$4 sm:$0xff]  }
 0x229   : > { %v4450_v10 = vpop.eup %4449  ;;  %3206 = vst.msk [vmem:[%s4922_s21 + $0x1f8] sm:$0xff] %vm3142_vm0, %v4448_v9  ;;  %2341 = vmatprep.mubr.bf16.mxu0 %v4171_v3  ;;  %2853 = vmatprep.mubr.bf16.mxu1 %v4173_v4  ;;  %v4194_v0 = vld [vmem:[%s4766_s18 + $0x7f0] ss:$8 sps:$4 sm:$0xff]  }
 0x22a   : > { %3334 = vst.msk [vmem:[%s4922_s21 + $0x5f8] sm:$0xff] %vm3142_vm0, %v4450_v10 }
 0x22b   : > { %v2127_v11 = vpop.f32.mrb[132].mxu0  ;;  %v2639_v12 = vpop.f32.mrb[132].mxu1 }
 0x22c   : > { %4459 = vtanh.f32 %v2127_v11  ;;  %v2129_v13 = vpop.f32.mrb[133].mxu0  ;;  %v2641_v14 = vpop.f32.mrb[133].mxu1 }
 0x22d   : > { %4461 = vtanh.f32 %v2639_v12  ;;  %v2130_v17 = vpop.f32.mrb[134].mxu0  ;;  %v2642_v18 = vpop.f32.mrb[134].mxu1 }
 0x22e   : > { %v4452_v21 = vpop.eup %4451  ;;  %4463 = vtanh.f32 %v2130_v17  ;;  %v2132_v22 = vpop.f32.mrb[135].mxu0 }
 0x22f   : > { %v2644_v23 = vpop.f32.mrb[135].mxu1  ;;  %v4454_v24 = vpop.eup %4453  ;;  %3207 = vst.msk [vmem:[%s4922_s21 + $0x200] sm:$0xff] %vm3142_vm0, %v4452_v21  ;;  %4465 = vtanh.f32 %v2642_v18 }
 0x230   : > { %v4456_v25 = vpop.eup %4455  ;;  %3335 = vst.msk [vmem:[%s4922_s21 + $0x600] sm:$0xff] %vm3142_vm0, %v4454_v24  ;;  %2342 = vmatmul.mubr.bf16.gmra.mrb[240].mxu0 %v4175_v15  ;;  %2854 = vmatmul.mubr.bf16.gmra.mrb[240].mxu1 %v4176_v16 }
 0x231   : > { %v4458_v26 = vpop.eup %4457  ;;  %3208 = vst.msk [vmem:[%s4922_s21 + $0x208] sm:$0xff] %vm3142_vm0, %v4456_v25  ;;  %2349 = vmatprep.mubr.bf16.mxu0 %v4177_v19  ;;  %2861 = vmatprep.mubr.bf16.mxu1 %v4179_v20 }
 0x232   : > { %3336 = vst.msk [vmem:[%s4922_s21 + $0x608] sm:$0xff] %vm3142_vm0, %v4458_v26 }
 0x233   : > { %v2135_v27 = vpop.f32.mrb[136].mxu0  ;;  %v2647_v28 = vpop.f32.mrb[136].mxu1 }
 0x234   : > { %4467 = vtanh.f32 %v2135_v27  ;;  %v2137_v29 = vpop.f32.mrb[137].mxu0  ;;  %v2649_v30 = vpop.f32.mrb[137].mxu1 }
 0x235   : > { %4469 = vtanh.f32 %v2647_v28  ;;  %v2138_v33 = vpop.f32.mrb[138].mxu0  ;;  %v2650_v34 = vpop.f32.mrb[138].mxu1 }
 0x236   : > { %v4460_v37 = vpop.eup %4459  ;;  %4471 = vtanh.f32 %v2138_v33  ;;  %v2140_v38 = vpop.f32.mrb[139].mxu0 }
 0x237   : > { %v2652_v39 = vpop.f32.mrb[139].mxu1  ;;  %v4462_v40 = vpop.eup %4461  ;;  %3209 = vst.msk [vmem:[%s4922_s21 + $0x210] sm:$0xff] %vm3142_vm0, %v4460_v37  ;;  %4473 = vtanh.f32 %v2650_v34 }
 0x238   : > { %v4464_v41 = vpop.eup %4463  ;;  %3337 = vst.msk [vmem:[%s4922_s21 + $0x610] sm:$0xff] %vm3142_vm0, %v4462_v40  ;;  %2350 = vmatmul.mubr.bf16.gmra.mrb[244].mxu0 %v4181_v31  ;;  %2862 = vmatmul.mubr.bf16.gmra.mrb[244].mxu1 %v4182_v32 }
 0x239   : > { %v4466_v42 = vpop.eup %4465  ;;  %3210 = vst.msk [vmem:[%s4922_s21 + $0x218] sm:$0xff] %vm3142_vm0, %v4464_v41  ;;  %2357 = vmatprep.mubr.bf16.mxu0 %v4183_v35  ;;  %2869 = vmatprep.mubr.bf16.mxu1 %v4185_v36 }
 0x23a   : > { %3338 = vst.msk [vmem:[%s4922_s21 + $0x618] sm:$0xff] %vm3142_vm0, %v4466_v42 }
 0x23b   : > { %v2143_v43 = vpop.f32.mrb[140].mxu0  ;;  %v2655_v44 = vpop.f32.mrb[140].mxu1 }
 0x23c   : > { %4475 = vtanh.f32 %v2143_v43  ;;  %v2145_v45 = vpop.f32.mrb[141].mxu0  ;;  %v2657_v46 = vpop.f32.mrb[141].mxu1 }
 0x23d   : > { %4477 = vtanh.f32 %v2655_v44  ;;  %v2146_v49 = vpop.f32.mrb[142].mxu0  ;;  %v2658_v50 = vpop.f32.mrb[142].mxu1 }
 0x23e   : > { %v4468_v53 = vpop.eup %4467  ;;  %4479 = vtanh.f32 %v2146_v49  ;;  %v2148_v54 = vpop.f32.mrb[143].mxu0 }
 0x23f   : > { %v2660_v55 = vpop.f32.mrb[143].mxu1  ;;  %v4470_v56 = vpop.eup %4469  ;;  %3211 = vst.msk [vmem:[%s4922_s21 + $0x220] sm:$0xff] %vm3142_vm0, %v4468_v53  ;;  %4481 = vtanh.f32 %v2658_v50 }
 0x240   : > { %v4472_v57 = vpop.eup %4471  ;;  %3339 = vst.msk [vmem:[%s4922_s21 + $0x620] sm:$0xff] %vm3142_vm0, %v4470_v56  ;;  %2358 = vmatmul.mubr.bf16.gmra.mrb[248].mxu0 %v4187_v47  ;;  %2870 = vmatmul.mubr.bf16.gmra.mrb[248].mxu1 %v4188_v48 }
 0x241   : > { %v4474_v58 = vpop.eup %4473  ;;  %3212 = vst.msk [vmem:[%s4922_s21 + $0x228] sm:$0xff] %vm3142_vm0, %v4472_v57  ;;  %2365 = vmatprep.mubr.bf16.mxu0 %v4189_v51  ;;  %2877 = vmatprep.mubr.bf16.mxu1 %v4191_v52 }
 0x242   : > { %3340 = vst.msk [vmem:[%s4922_s21 + $0x628] sm:$0xff] %vm3142_vm0, %v4474_v58 }
 0x243   : > { %v2151_v59 = vpop.f32.mrb[144].mxu0  ;;  %v2663_v60 = vpop.f32.mrb[144].mxu1 }
 0x244   : > { %4483 = vtanh.f32 %v2151_v59  ;;  %v2153_v61 = vpop.f32.mrb[145].mxu0  ;;  %v2665_v62 = vpop.f32.mrb[145].mxu1 }
 0x245   : > { %4485 = vtanh.f32 %v2663_v60  ;;  %v2154_v1 = vpop.f32.mrb[146].mxu0  ;;  %v2666_v2 = vpop.f32.mrb[146].mxu1 }
 0x246   : > { %v4476_v3 = vpop.eup %4475  ;;  %4487 = vtanh.f32 %v2154_v1  ;;  %v2156_v4 = vpop.f32.mrb[147].mxu0 }
 0x247   : > { %v2668_v5 = vpop.f32.mrb[147].mxu1  ;;  %v4478_v6 = vpop.eup %4477  ;;  %3213 = vst.msk [vmem:[%s4922_s21 + $0x230] sm:$0xff] %vm3142_vm0, %v4476_v3  ;;  %4489 = vtanh.f32 %v2666_v2 }
 0x248   : > { %v4480_v7 = vpop.eup %4479  ;;  %3341 = vst.msk [vmem:[%s4922_s21 + $0x630] sm:$0xff] %vm3142_vm0, %v4478_v6  ;;  %2366 = vmatmul.mubr.bf16.gmra.mrb[252].mxu0 %v4193_v63  ;;  %2878 = vmatmul.mubr.bf16.gmra.mrb[252].mxu1 %v4194_v0 }
 0x249   : > { %v4482_v8 = vpop.eup %4481  ;;  %3214 = vst.msk [vmem:[%s4922_s21 + $0x238] sm:$0xff] %vm3142_vm0, %v4480_v7 }
 0x24a   : > { %3342 = vst.msk [vmem:[%s4922_s21 + $0x638] sm:$0xff] %vm3142_vm0, %v4482_v8 }
 0x24b   : > { %v2159_v9 = vpop.f32.mrb[148].mxu0  ;;  %v2671_v10 = vpop.f32.mrb[148].mxu1 }
 0x24c   : > { %4491 = vtanh.f32 %v2159_v9  ;;  %v2161_v11 = vpop.f32.mrb[149].mxu0  ;;  %v2673_v12 = vpop.f32.mrb[149].mxu1 }
 0x24d   : > { %4493 = vtanh.f32 %v2671_v10  ;;  %v2162_v13 = vpop.f32.mrb[150].mxu0  ;;  %v2674_v14 = vpop.f32.mrb[150].mxu1 }
 0x24e   : > { %v4484_v15 = vpop.eup %4483  ;;  %4495 = vtanh.f32 %v2162_v13  ;;  %v2164_v16 = vpop.f32.mrb[151].mxu0 }
 0x24f   : > { %v2676_v17 = vpop.f32.mrb[151].mxu1  ;;  %v4486_v18 = vpop.eup %4485  ;;  %3215 = vst.msk [vmem:[%s4922_s21 + $0x240] sm:$0xff] %vm3142_vm0, %v4484_v15  ;;  %4497 = vtanh.f32 %v2674_v14 }
 0x250   : > { %v4488_v19 = vpop.eup %4487  ;;  %3343 = vst.msk [vmem:[%s4922_s21 + $0x640] sm:$0xff] %vm3142_vm0, %v4486_v18 }
 0x251   : > { %v4490_v20 = vpop.eup %4489  ;;  %3216 = vst.msk [vmem:[%s4922_s21 + $0x248] sm:$0xff] %vm3142_vm0, %v4488_v19 }
 0x252   : > { %3344 = vst.msk [vmem:[%s4922_s21 + $0x648] sm:$0xff] %vm3142_vm0, %v4490_v20 }
 0x253   : > { %v2167_v21 = vpop.f32.mrb[152].mxu0  ;;  %v2679_v22 = vpop.f32.mrb[152].mxu1 }
 0x254   : > { %4499 = vtanh.f32 %v2167_v21  ;;  %v2169_v23 = vpop.f32.mrb[153].mxu0  ;;  %v2681_v24 = vpop.f32.mrb[153].mxu1 }
 0x255   : > { %4501 = vtanh.f32 %v2679_v22  ;;  %v2170_v25 = vpop.f32.mrb[154].mxu0  ;;  %v2682_v26 = vpop.f32.mrb[154].mxu1 }
 0x256   : > { %v4492_v27 = vpop.eup %4491  ;;  %4503 = vtanh.f32 %v2170_v25  ;;  %v2172_v28 = vpop.f32.mrb[155].mxu0 }
 0x257   : > { %v2684_v29 = vpop.f32.mrb[155].mxu1  ;;  %v4494_v30 = vpop.eup %4493  ;;  %3217 = vst.msk [vmem:[%s4922_s21 + $0x250] sm:$0xff] %vm3142_vm0, %v4492_v27  ;;  %4505 = vtanh.f32 %v2682_v26 }
 0x258   : > { %v4496_v31 = vpop.eup %4495  ;;  %3345 = vst.msk [vmem:[%s4922_s21 + $0x650] sm:$0xff] %vm3142_vm0, %v4494_v30 }
 0x259   : > { %v4498_v32 = vpop.eup %4497  ;;  %3218 = vst.msk [vmem:[%s4922_s21 + $0x258] sm:$0xff] %vm3142_vm0, %v4496_v31 }
 0x25a   : > { %3346 = vst.msk [vmem:[%s4922_s21 + $0x658] sm:$0xff] %vm3142_vm0, %v4498_v32 }
 0x25b   : > { %v2175_v33 = vpop.f32.mrb[156].mxu0  ;;  %v2687_v34 = vpop.f32.mrb[156].mxu1 }
 0x25c   : > { %4507 = vtanh.f32 %v2175_v33  ;;  %v2177_v35 = vpop.f32.mrb[157].mxu0  ;;  %v2689_v36 = vpop.f32.mrb[157].mxu1 }
 0x25d   : > { %4509 = vtanh.f32 %v2687_v34  ;;  %v2178_v37 = vpop.f32.mrb[158].mxu0  ;;  %v2690_v38 = vpop.f32.mrb[158].mxu1 }
 0x25e   : > { %v4500_v39 = vpop.eup %4499  ;;  %4511 = vtanh.f32 %v2178_v37  ;;  %v2180_v40 = vpop.f32.mrb[159].mxu0 }
 0x25f   : > { %v2692_v41 = vpop.f32.mrb[159].mxu1  ;;  %v4502_v42 = vpop.eup %4501  ;;  %3219 = vst.msk [vmem:[%s4922_s21 + $0x260] sm:$0xff] %vm3142_vm0, %v4500_v39  ;;  %4513 = vtanh.f32 %v2690_v38 }
 0x260   : > { %v4504_v43 = vpop.eup %4503  ;;  %3347 = vst.msk [vmem:[%s4922_s21 + $0x660] sm:$0xff] %vm3142_vm0, %v4502_v42 }
 0x261   : > { %v4506_v44 = vpop.eup %4505  ;;  %3220 = vst.msk [vmem:[%s4922_s21 + $0x268] sm:$0xff] %vm3142_vm0, %v4504_v43 }
 0x262   : > { %3348 = vst.msk [vmem:[%s4922_s21 + $0x668] sm:$0xff] %vm3142_vm0, %v4506_v44 }
 0x263   : > { %v2183_v45 = vpop.f32.mrb[160].mxu0  ;;  %v2695_v46 = vpop.f32.mrb[160].mxu1 }
 0x264   : > { %4515 = vtanh.f32 %v2183_v45  ;;  %v2185_v47 = vpop.f32.mrb[161].mxu0  ;;  %v2697_v48 = vpop.f32.mrb[161].mxu1 }
 0x265   : > { %4517 = vtanh.f32 %v2695_v46  ;;  %v2186_v49 = vpop.f32.mrb[162].mxu0  ;;  %v2698_v50 = vpop.f32.mrb[162].mxu1 }
 0x266   : > { %v4508_v51 = vpop.eup %4507  ;;  %4519 = vtanh.f32 %v2186_v49  ;;  %v2188_v52 = vpop.f32.mrb[163].mxu0 }
 0x267   : > { %v2700_v53 = vpop.f32.mrb[163].mxu1  ;;  %v4510_v54 = vpop.eup %4509  ;;  %3221 = vst.msk [vmem:[%s4922_s21 + $0x270] sm:$0xff] %vm3142_vm0, %v4508_v51  ;;  %4521 = vtanh.f32 %v2698_v50 }
 0x268   : > { %v4512_v55 = vpop.eup %4511  ;;  %3349 = vst.msk [vmem:[%s4922_s21 + $0x670] sm:$0xff] %vm3142_vm0, %v4510_v54 }
 0x269   : > { %v4514_v56 = vpop.eup %4513  ;;  %3222 = vst.msk [vmem:[%s4922_s21 + $0x278] sm:$0xff] %vm3142_vm0, %v4512_v55 }
 0x26a   : > { %3350 = vst.msk [vmem:[%s4922_s21 + $0x678] sm:$0xff] %vm3142_vm0, %v4514_v56 }
 0x26b   : > { %v2191_v57 = vpop.f32.mrb[164].mxu0  ;;  %v2703_v58 = vpop.f32.mrb[164].mxu1 }
 0x26c   : > { %4523 = vtanh.f32 %v2191_v57  ;;  %v2193_v59 = vpop.f32.mrb[165].mxu0  ;;  %v2705_v60 = vpop.f32.mrb[165].mxu1 }
 0x26d   : > { %4525 = vtanh.f32 %v2703_v58  ;;  %v2194_v61 = vpop.f32.mrb[166].mxu0  ;;  %v2706_v62 = vpop.f32.mrb[166].mxu1 }
 0x26e   : > { %v4516_v63 = vpop.eup %4515  ;;  %4527 = vtanh.f32 %v2194_v61  ;;  %v2196_v0 = vpop.f32.mrb[167].mxu0 }
 0x26f   : > { %v2708_v1 = vpop.f32.mrb[167].mxu1  ;;  %v4518_v2 = vpop.eup %4517  ;;  %3223 = vst.msk [vmem:[%s4922_s21 + $0x280] sm:$0xff] %vm3142_vm0, %v4516_v63  ;;  %4529 = vtanh.f32 %v2706_v62 }
 0x270   : > { %v4520_v3 = vpop.eup %4519  ;;  %3351 = vst.msk [vmem:[%s4922_s21 + $0x680] sm:$0xff] %vm3142_vm0, %v4518_v2 }
 0x271   : > { %v4522_v4 = vpop.eup %4521  ;;  %3224 = vst.msk [vmem:[%s4922_s21 + $0x288] sm:$0xff] %vm3142_vm0, %v4520_v3 }
 0x272   : > { %3352 = vst.msk [vmem:[%s4922_s21 + $0x688] sm:$0xff] %vm3142_vm0, %v4522_v4 }
 0x273   : > { %v2199_v5 = vpop.f32.mrb[168].mxu0  ;;  %v2711_v6 = vpop.f32.mrb[168].mxu1 }
 0x274   : > { %4531 = vtanh.f32 %v2199_v5  ;;  %v2201_v7 = vpop.f32.mrb[169].mxu0  ;;  %v2713_v8 = vpop.f32.mrb[169].mxu1 }
 0x275   : > { %4533 = vtanh.f32 %v2711_v6  ;;  %v2202_v9 = vpop.f32.mrb[170].mxu0  ;;  %v2714_v10 = vpop.f32.mrb[170].mxu1 }
 0x276   : > { %v4524_v11 = vpop.eup %4523  ;;  %4535 = vtanh.f32 %v2202_v9  ;;  %v2204_v12 = vpop.f32.mrb[171].mxu0 }
 0x277   : > { %v2716_v13 = vpop.f32.mrb[171].mxu1  ;;  %v4526_v14 = vpop.eup %4525  ;;  %3225 = vst.msk [vmem:[%s4922_s21 + $0x290] sm:$0xff] %vm3142_vm0, %v4524_v11  ;;  %4537 = vtanh.f32 %v2714_v10 }
 0x278   : > { %v4528_v15 = vpop.eup %4527  ;;  %3353 = vst.msk [vmem:[%s4922_s21 + $0x690] sm:$0xff] %vm3142_vm0, %v4526_v14 }
 0x279   : > { %v4530_v16 = vpop.eup %4529  ;;  %3226 = vst.msk [vmem:[%s4922_s21 + $0x298] sm:$0xff] %vm3142_vm0, %v4528_v15 }
 0x27a   : > { %3354 = vst.msk [vmem:[%s4922_s21 + $0x698] sm:$0xff] %vm3142_vm0, %v4530_v16 }
 0x27b   : > { %v2207_v17 = vpop.f32.mrb[172].mxu0  ;;  %v2719_v18 = vpop.f32.mrb[172].mxu1 }
 0x27c   : > { %4539 = vtanh.f32 %v2207_v17  ;;  %v2209_v19 = vpop.f32.mrb[173].mxu0  ;;  %v2721_v20 = vpop.f32.mrb[173].mxu1 }
 0x27d   : > { %4541 = vtanh.f32 %v2719_v18  ;;  %v2210_v21 = vpop.f32.mrb[174].mxu0  ;;  %v2722_v22 = vpop.f32.mrb[174].mxu1 }
 0x27e   : > { %v4532_v23 = vpop.eup %4531  ;;  %4543 = vtanh.f32 %v2210_v21  ;;  %v2212_v24 = vpop.f32.mrb[175].mxu0 }
 0x27f   : > { %v2724_v25 = vpop.f32.mrb[175].mxu1  ;;  %v4534_v26 = vpop.eup %4533  ;;  %3227 = vst.msk [vmem:[%s4922_s21 + $0x2a0] sm:$0xff] %vm3142_vm0, %v4532_v23  ;;  %4545 = vtanh.f32 %v2722_v22 }
 0x280   : > { %v4536_v27 = vpop.eup %4535  ;;  %3355 = vst.msk [vmem:[%s4922_s21 + $0x6a0] sm:$0xff] %vm3142_vm0, %v4534_v26 }
 0x281   : > { %v4538_v28 = vpop.eup %4537  ;;  %3228 = vst.msk [vmem:[%s4922_s21 + $0x2a8] sm:$0xff] %vm3142_vm0, %v4536_v27 }
 0x282   : > { %3356 = vst.msk [vmem:[%s4922_s21 + $0x6a8] sm:$0xff] %vm3142_vm0, %v4538_v28 }
 0x283   : > { %v2215_v29 = vpop.f32.mrb[176].mxu0  ;;  %v2727_v30 = vpop.f32.mrb[176].mxu1 }
 0x284   : > { %4547 = vtanh.f32 %v2215_v29  ;;  %v2217_v31 = vpop.f32.mrb[177].mxu0  ;;  %v2729_v32 = vpop.f32.mrb[177].mxu1 }
 0x285   : > { %4549 = vtanh.f32 %v2727_v30  ;;  %v2218_v33 = vpop.f32.mrb[178].mxu0  ;;  %v2730_v34 = vpop.f32.mrb[178].mxu1 }
 0x286   : > { %v4540_v35 = vpop.eup %4539  ;;  %4551 = vtanh.f32 %v2218_v33  ;;  %v2220_v36 = vpop.f32.mrb[179].mxu0 }
 0x287   : > { %v2732_v37 = vpop.f32.mrb[179].mxu1  ;;  %v4542_v38 = vpop.eup %4541  ;;  %3229 = vst.msk [vmem:[%s4922_s21 + $0x2b0] sm:$0xff] %vm3142_vm0, %v4540_v35  ;;  %4553 = vtanh.f32 %v2730_v34 }
 0x288   : > { %v4544_v39 = vpop.eup %4543  ;;  %3357 = vst.msk [vmem:[%s4922_s21 + $0x6b0] sm:$0xff] %vm3142_vm0, %v4542_v38 }
 0x289   : > { %v4546_v40 = vpop.eup %4545  ;;  %3230 = vst.msk [vmem:[%s4922_s21 + $0x2b8] sm:$0xff] %vm3142_vm0, %v4544_v39 }
 0x28a   : > { %3358 = vst.msk [vmem:[%s4922_s21 + $0x6b8] sm:$0xff] %vm3142_vm0, %v4546_v40 }
 0x28b   : > { %v2223_v41 = vpop.f32.mrb[180].mxu0  ;;  %v2735_v42 = vpop.f32.mrb[180].mxu1 }
 0x28c   : > { %4555 = vtanh.f32 %v2223_v41  ;;  %v2225_v43 = vpop.f32.mrb[181].mxu0  ;;  %v2737_v44 = vpop.f32.mrb[181].mxu1 }
 0x28d   : > { %4557 = vtanh.f32 %v2735_v42  ;;  %v2226_v45 = vpop.f32.mrb[182].mxu0  ;;  %v2738_v46 = vpop.f32.mrb[182].mxu1 }
 0x28e   : > { %v4548_v47 = vpop.eup %4547  ;;  %4559 = vtanh.f32 %v2226_v45  ;;  %v2228_v48 = vpop.f32.mrb[183].mxu0 }
 0x28f   : > { %v2740_v49 = vpop.f32.mrb[183].mxu1  ;;  %v4550_v50 = vpop.eup %4549  ;;  %3231 = vst.msk [vmem:[%s4922_s21 + $0x2c0] sm:$0xff] %vm3142_vm0, %v4548_v47  ;;  %4561 = vtanh.f32 %v2738_v46 }
 0x290   : > { %v4552_v51 = vpop.eup %4551  ;;  %3359 = vst.msk [vmem:[%s4922_s21 + $0x6c0] sm:$0xff] %vm3142_vm0, %v4550_v50 }
 0x291   : > { %v4554_v52 = vpop.eup %4553  ;;  %3232 = vst.msk [vmem:[%s4922_s21 + $0x2c8] sm:$0xff] %vm3142_vm0, %v4552_v51 }
 0x292   : > { %3360 = vst.msk [vmem:[%s4922_s21 + $0x6c8] sm:$0xff] %vm3142_vm0, %v4554_v52 }
 0x293   : > { %v2231_v53 = vpop.f32.mrb[184].mxu0  ;;  %v2743_v54 = vpop.f32.mrb[184].mxu1 }
 0x294   : > { %4563 = vtanh.f32 %v2231_v53  ;;  %v2233_v55 = vpop.f32.mrb[185].mxu0  ;;  %v2745_v56 = vpop.f32.mrb[185].mxu1 }
 0x295   : > { %4565 = vtanh.f32 %v2743_v54  ;;  %v2234_v57 = vpop.f32.mrb[186].mxu0  ;;  %v2746_v58 = vpop.f32.mrb[186].mxu1 }
 0x296   : > { %v4556_v59 = vpop.eup %4555  ;;  %4567 = vtanh.f32 %v2234_v57  ;;  %v2236_v60 = vpop.f32.mrb[187].mxu0 }
 0x297   : > { %v2748_v61 = vpop.f32.mrb[187].mxu1  ;;  %v4558_v62 = vpop.eup %4557  ;;  %3233 = vst.msk [vmem:[%s4922_s21 + $0x2d0] sm:$0xff] %vm3142_vm0, %v4556_v59  ;;  %4569 = vtanh.f32 %v2746_v58 }
 0x298   : > { %v4560_v63 = vpop.eup %4559  ;;  %3361 = vst.msk [vmem:[%s4922_s21 + $0x6d0] sm:$0xff] %vm3142_vm0, %v4558_v62 }
 0x299   : > { %v4562_v0 = vpop.eup %4561  ;;  %3234 = vst.msk [vmem:[%s4922_s21 + $0x2d8] sm:$0xff] %vm3142_vm0, %v4560_v63 }
 0x29a   : > { %3362 = vst.msk [vmem:[%s4922_s21 + $0x6d8] sm:$0xff] %vm3142_vm0, %v4562_v0 }
 0x29b   : > { %v2239_v1 = vpop.f32.mrb[188].mxu0  ;;  %v2751_v2 = vpop.f32.mrb[188].mxu1 }
 0x29c   : > { %4571 = vtanh.f32 %v2239_v1  ;;  %v2241_v3 = vpop.f32.mrb[189].mxu0  ;;  %v2753_v4 = vpop.f32.mrb[189].mxu1 }
 0x29d   : > { %4573 = vtanh.f32 %v2751_v2  ;;  %v2242_v5 = vpop.f32.mrb[190].mxu0  ;;  %v2754_v6 = vpop.f32.mrb[190].mxu1 }
 0x29e   : > { %v4564_v7 = vpop.eup %4563  ;;  %4575 = vtanh.f32 %v2242_v5  ;;  %v2244_v8 = vpop.f32.mrb[191].mxu0 }
 0x29f   : > { %v2756_v9 = vpop.f32.mrb[191].mxu1  ;;  %v4566_v10 = vpop.eup %4565  ;;  %3235 = vst.msk [vmem:[%s4922_s21 + $0x2e0] sm:$0xff] %vm3142_vm0, %v4564_v7  ;;  %4577 = vtanh.f32 %v2754_v6 }
 0x2a0   : > { %v4568_v11 = vpop.eup %4567  ;;  %3363 = vst.msk [vmem:[%s4922_s21 + $0x6e0] sm:$0xff] %vm3142_vm0, %v4566_v10 }
 0x2a1   : > { %v4570_v12 = vpop.eup %4569  ;;  %3236 = vst.msk [vmem:[%s4922_s21 + $0x2e8] sm:$0xff] %vm3142_vm0, %v4568_v11 }
 0x2a2   : > { %3364 = vst.msk [vmem:[%s4922_s21 + $0x6e8] sm:$0xff] %vm3142_vm0, %v4570_v12 }
 0x2a3   : > { %v2247_v13 = vpop.f32.mrb[192].mxu0  ;;  %v2759_v14 = vpop.f32.mrb[192].mxu1 }
 0x2a4   : > { %4579 = vtanh.f32 %v2247_v13  ;;  %v2249_v15 = vpop.f32.mrb[193].mxu0  ;;  %v2761_v16 = vpop.f32.mrb[193].mxu1 }
 0x2a5   : > { %4581 = vtanh.f32 %v2759_v14  ;;  %v2250_v17 = vpop.f32.mrb[194].mxu0  ;;  %v2762_v18 = vpop.f32.mrb[194].mxu1 }
 0x2a6   : > { %v4572_v19 = vpop.eup %4571  ;;  %4583 = vtanh.f32 %v2250_v17  ;;  %v2252_v20 = vpop.f32.mrb[195].mxu0 }
 0x2a7   : > { %v2764_v21 = vpop.f32.mrb[195].mxu1  ;;  %v4574_v22 = vpop.eup %4573  ;;  %3237 = vst.msk [vmem:[%s4922_s21 + $0x2f0] sm:$0xff] %vm3142_vm0, %v4572_v19  ;;  %4585 = vtanh.f32 %v2762_v18 }
 0x2a8   : > { %v4576_v23 = vpop.eup %4575  ;;  %3365 = vst.msk [vmem:[%s4922_s21 + $0x6f0] sm:$0xff] %vm3142_vm0, %v4574_v22 }
 0x2a9   : > { %v4578_v24 = vpop.eup %4577  ;;  %3238 = vst.msk [vmem:[%s4922_s21 + $0x2f8] sm:$0xff] %vm3142_vm0, %v4576_v23 }
 0x2aa   : > { %3366 = vst.msk [vmem:[%s4922_s21 + $0x6f8] sm:$0xff] %vm3142_vm0, %v4578_v24 }
 0x2ab   : > { %v2255_v25 = vpop.f32.mrb[196].mxu0  ;;  %v2767_v26 = vpop.f32.mrb[196].mxu1 }
 0x2ac   : > { %4587 = vtanh.f32 %v2255_v25  ;;  %v2257_v27 = vpop.f32.mrb[197].mxu0  ;;  %v2769_v28 = vpop.f32.mrb[197].mxu1 }
 0x2ad   : > { %4589 = vtanh.f32 %v2767_v26  ;;  %v2258_v29 = vpop.f32.mrb[198].mxu0  ;;  %v2770_v30 = vpop.f32.mrb[198].mxu1 }
 0x2ae   : > { %v4580_v31 = vpop.eup %4579  ;;  %4591 = vtanh.f32 %v2258_v29  ;;  %v2260_v32 = vpop.f32.mrb[199].mxu0 }
 0x2af   : > { %v2772_v33 = vpop.f32.mrb[199].mxu1  ;;  %v4582_v34 = vpop.eup %4581  ;;  %3239 = vst.msk [vmem:[%s4922_s21 + $0x300] sm:$0xff] %vm3142_vm0, %v4580_v31  ;;  %4593 = vtanh.f32 %v2770_v30 }
 0x2b0   : > { %v4584_v35 = vpop.eup %4583  ;;  %3367 = vst.msk [vmem:[%s4922_s21 + $0x700] sm:$0xff] %vm3142_vm0, %v4582_v34 }
 0x2b1   : > { %v4586_v36 = vpop.eup %4585  ;;  %3240 = vst.msk [vmem:[%s4922_s21 + $0x308] sm:$0xff] %vm3142_vm0, %v4584_v35 }
 0x2b2   : > { %3368 = vst.msk [vmem:[%s4922_s21 + $0x708] sm:$0xff] %vm3142_vm0, %v4586_v36 }
 0x2b3   : > { %v2263_v37 = vpop.f32.mrb[200].mxu0  ;;  %v2775_v38 = vpop.f32.mrb[200].mxu1 }
 0x2b4   : > { %4595 = vtanh.f32 %v2263_v37  ;;  %v2265_v39 = vpop.f32.mrb[201].mxu0  ;;  %v2777_v40 = vpop.f32.mrb[201].mxu1 }
 0x2b5   : > { %4597 = vtanh.f32 %v2775_v38  ;;  %v2266_v41 = vpop.f32.mrb[202].mxu0  ;;  %v2778_v42 = vpop.f32.mrb[202].mxu1 }
 0x2b6   : > { %v4588_v43 = vpop.eup %4587  ;;  %4599 = vtanh.f32 %v2266_v41  ;;  %v2268_v44 = vpop.f32.mrb[203].mxu0 }
 0x2b7   : > { %v2780_v45 = vpop.f32.mrb[203].mxu1  ;;  %v4590_v46 = vpop.eup %4589  ;;  %3241 = vst.msk [vmem:[%s4922_s21 + $0x310] sm:$0xff] %vm3142_vm0, %v4588_v43  ;;  %4601 = vtanh.f32 %v2778_v42 }
 0x2b8   : > { %v4592_v47 = vpop.eup %4591  ;;  %3369 = vst.msk [vmem:[%s4922_s21 + $0x710] sm:$0xff] %vm3142_vm0, %v4590_v46 }
 0x2b9   : > { %v4594_v48 = vpop.eup %4593  ;;  %3242 = vst.msk [vmem:[%s4922_s21 + $0x318] sm:$0xff] %vm3142_vm0, %v4592_v47 }
 0x2ba   : > { %3370 = vst.msk [vmem:[%s4922_s21 + $0x718] sm:$0xff] %vm3142_vm0, %v4594_v48 }
 0x2bb   : > { %v2271_v49 = vpop.f32.mrb[204].mxu0  ;;  %v2783_v50 = vpop.f32.mrb[204].mxu1 }
 0x2bc   : > { %4603 = vtanh.f32 %v2271_v49  ;;  %v2273_v51 = vpop.f32.mrb[205].mxu0  ;;  %v2785_v52 = vpop.f32.mrb[205].mxu1 }
 0x2bd   : > { %4605 = vtanh.f32 %v2783_v50  ;;  %v2274_v53 = vpop.f32.mrb[206].mxu0  ;;  %v2786_v54 = vpop.f32.mrb[206].mxu1 }
 0x2be   : > { %v4596_v55 = vpop.eup %4595  ;;  %4607 = vtanh.f32 %v2274_v53  ;;  %v2276_v56 = vpop.f32.mrb[207].mxu0 }
 0x2bf   : > { %v2788_v57 = vpop.f32.mrb[207].mxu1  ;;  %v4598_v58 = vpop.eup %4597  ;;  %3243 = vst.msk [vmem:[%s4922_s21 + $0x320] sm:$0xff] %vm3142_vm0, %v4596_v55  ;;  %4609 = vtanh.f32 %v2786_v54 }
 0x2c0   : > { %v4600_v59 = vpop.eup %4599  ;;  %3371 = vst.msk [vmem:[%s4922_s21 + $0x720] sm:$0xff] %vm3142_vm0, %v4598_v58 }
 0x2c1   : > { %v4602_v60 = vpop.eup %4601  ;;  %3244 = vst.msk [vmem:[%s4922_s21 + $0x328] sm:$0xff] %vm3142_vm0, %v4600_v59 }
 0x2c2   : > { %3372 = vst.msk [vmem:[%s4922_s21 + $0x728] sm:$0xff] %vm3142_vm0, %v4602_v60 }
 0x2c3   : > { %v2279_v61 = vpop.f32.mrb[208].mxu0  ;;  %v2791_v62 = vpop.f32.mrb[208].mxu1 }
 0x2c4   : > { %4611 = vtanh.f32 %v2279_v61  ;;  %v2281_v63 = vpop.f32.mrb[209].mxu0  ;;  %v2793_v0 = vpop.f32.mrb[209].mxu1 }
 0x2c5   : > { %4613 = vtanh.f32 %v2791_v62  ;;  %v2282_v1 = vpop.f32.mrb[210].mxu0  ;;  %v2794_v2 = vpop.f32.mrb[210].mxu1 }
 0x2c6   : > { %v4604_v3 = vpop.eup %4603  ;;  %4615 = vtanh.f32 %v2282_v1  ;;  %v2284_v4 = vpop.f32.mrb[211].mxu0 }
 0x2c7   : > { %v2796_v5 = vpop.f32.mrb[211].mxu1  ;;  %v4606_v6 = vpop.eup %4605  ;;  %3245 = vst.msk [vmem:[%s4922_s21 + $0x330] sm:$0xff] %vm3142_vm0, %v4604_v3  ;;  %4617 = vtanh.f32 %v2794_v2 }
 0x2c8   : > { %v4608_v7 = vpop.eup %4607  ;;  %3373 = vst.msk [vmem:[%s4922_s21 + $0x730] sm:$0xff] %vm3142_vm0, %v4606_v6 }
 0x2c9   : > { %v4610_v8 = vpop.eup %4609  ;;  %3246 = vst.msk [vmem:[%s4922_s21 + $0x338] sm:$0xff] %vm3142_vm0, %v4608_v7 }
 0x2ca   : > { %3374 = vst.msk [vmem:[%s4922_s21 + $0x738] sm:$0xff] %vm3142_vm0, %v4610_v8 }
 0x2cb   : > { %v2287_v9 = vpop.f32.mrb[212].mxu0  ;;  %v2799_v10 = vpop.f32.mrb[212].mxu1 }
 0x2cc   : > { %4619 = vtanh.f32 %v2287_v9  ;;  %v2289_v11 = vpop.f32.mrb[213].mxu0  ;;  %v2801_v12 = vpop.f32.mrb[213].mxu1 }
 0x2cd   : > { %4621 = vtanh.f32 %v2799_v10  ;;  %v2290_v13 = vpop.f32.mrb[214].mxu0  ;;  %v2802_v14 = vpop.f32.mrb[214].mxu1 }
 0x2ce   : > { %v4612_v15 = vpop.eup %4611  ;;  %4623 = vtanh.f32 %v2290_v13  ;;  %v2292_v16 = vpop.f32.mrb[215].mxu0 }
 0x2cf   : > { %v2804_v17 = vpop.f32.mrb[215].mxu1  ;;  %v4614_v18 = vpop.eup %4613  ;;  %3247 = vst.msk [vmem:[%s4922_s21 + $0x340] sm:$0xff] %vm3142_vm0, %v4612_v15  ;;  %4625 = vtanh.f32 %v2802_v14 }
 0x2d0   : > { %v4616_v19 = vpop.eup %4615  ;;  %3375 = vst.msk [vmem:[%s4922_s21 + $0x740] sm:$0xff] %vm3142_vm0, %v4614_v18 }
 0x2d1   : > { %v4618_v20 = vpop.eup %4617  ;;  %3248 = vst.msk [vmem:[%s4922_s21 + $0x348] sm:$0xff] %vm3142_vm0, %v4616_v19 }
 0x2d2   : > { %3376 = vst.msk [vmem:[%s4922_s21 + $0x748] sm:$0xff] %vm3142_vm0, %v4618_v20 }
 0x2d3   : > { %v2295_v21 = vpop.f32.mrb[216].mxu0  ;;  %v2807_v22 = vpop.f32.mrb[216].mxu1 }
 0x2d4   : > { %4627 = vtanh.f32 %v2295_v21  ;;  %v2297_v23 = vpop.f32.mrb[217].mxu0  ;;  %v2809_v24 = vpop.f32.mrb[217].mxu1 }
 0x2d5   : > { %4629 = vtanh.f32 %v2807_v22  ;;  %v2298_v25 = vpop.f32.mrb[218].mxu0  ;;  %v2810_v26 = vpop.f32.mrb[218].mxu1 }
 0x2d6   : > { %v4620_v27 = vpop.eup %4619  ;;  %4631 = vtanh.f32 %v2298_v25  ;;  %v2300_v28 = vpop.f32.mrb[219].mxu0 }
 0x2d7   : > { %v2812_v29 = vpop.f32.mrb[219].mxu1  ;;  %v4622_v30 = vpop.eup %4621  ;;  %3249 = vst.msk [vmem:[%s4922_s21 + $0x350] sm:$0xff] %vm3142_vm0, %v4620_v27  ;;  %4633 = vtanh.f32 %v2810_v26 }
 0x2d8   : > { %v4624_v31 = vpop.eup %4623  ;;  %3377 = vst.msk [vmem:[%s4922_s21 + $0x750] sm:$0xff] %vm3142_vm0, %v4622_v30 }
 0x2d9   : > { %v4626_v32 = vpop.eup %4625  ;;  %3250 = vst.msk [vmem:[%s4922_s21 + $0x358] sm:$0xff] %vm3142_vm0, %v4624_v31 }
 0x2da   : > { %3378 = vst.msk [vmem:[%s4922_s21 + $0x758] sm:$0xff] %vm3142_vm0, %v4626_v32 }
 0x2db   : > { %v2303_v33 = vpop.f32.mrb[220].mxu0  ;;  %v2815_v34 = vpop.f32.mrb[220].mxu1 }
 0x2dc   : > { %4635 = vtanh.f32 %v2303_v33  ;;  %v2305_v35 = vpop.f32.mrb[221].mxu0  ;;  %v2817_v36 = vpop.f32.mrb[221].mxu1 }
 0x2dd   : > { %4637 = vtanh.f32 %v2815_v34  ;;  %v2306_v37 = vpop.f32.mrb[222].mxu0  ;;  %v2818_v38 = vpop.f32.mrb[222].mxu1 }
 0x2de   : > { %v4628_v39 = vpop.eup %4627  ;;  %4639 = vtanh.f32 %v2306_v37  ;;  %v2308_v40 = vpop.f32.mrb[223].mxu0 }
 0x2df   : > { %v2820_v41 = vpop.f32.mrb[223].mxu1  ;;  %v4630_v42 = vpop.eup %4629  ;;  %3251 = vst.msk [vmem:[%s4922_s21 + $0x360] sm:$0xff] %vm3142_vm0, %v4628_v39  ;;  %4641 = vtanh.f32 %v2818_v38 }
 0x2e0   : > { %v4632_v43 = vpop.eup %4631  ;;  %3379 = vst.msk [vmem:[%s4922_s21 + $0x760] sm:$0xff] %vm3142_vm0, %v4630_v42 }
 0x2e1   : > { %v4634_v44 = vpop.eup %4633  ;;  %3252 = vst.msk [vmem:[%s4922_s21 + $0x368] sm:$0xff] %vm3142_vm0, %v4632_v43 }
 0x2e2   : > { %3380 = vst.msk [vmem:[%s4922_s21 + $0x768] sm:$0xff] %vm3142_vm0, %v4634_v44 }
 0x2e3   : > { %v2311_v45 = vpop.f32.mrb[224].mxu0  ;;  %v2823_v46 = vpop.f32.mrb[224].mxu1 }
 0x2e4   : > { %4643 = vtanh.f32 %v2311_v45  ;;  %v2313_v47 = vpop.f32.mrb[225].mxu0  ;;  %v2825_v48 = vpop.f32.mrb[225].mxu1 }
 0x2e5   : > { %4645 = vtanh.f32 %v2823_v46  ;;  %v2314_v49 = vpop.f32.mrb[226].mxu0  ;;  %v2826_v50 = vpop.f32.mrb[226].mxu1 }
 0x2e6   : > { %v4636_v51 = vpop.eup %4635  ;;  %4647 = vtanh.f32 %v2314_v49  ;;  %v2316_v52 = vpop.f32.mrb[227].mxu0 }
 0x2e7   : > { %v2828_v53 = vpop.f32.mrb[227].mxu1  ;;  %v4638_v54 = vpop.eup %4637  ;;  %3253 = vst.msk [vmem:[%s4922_s21 + $0x370] sm:$0xff] %vm3142_vm0, %v4636_v51  ;;  %4649 = vtanh.f32 %v2826_v50 }
 0x2e8   : > { %v4640_v55 = vpop.eup %4639  ;;  %3381 = vst.msk [vmem:[%s4922_s21 + $0x770] sm:$0xff] %vm3142_vm0, %v4638_v54 }
 0x2e9   : > { %v4642_v56 = vpop.eup %4641  ;;  %3254 = vst.msk [vmem:[%s4922_s21 + $0x378] sm:$0xff] %vm3142_vm0, %v4640_v55 }
 0x2ea   : > { %3382 = vst.msk [vmem:[%s4922_s21 + $0x778] sm:$0xff] %vm3142_vm0, %v4642_v56 }
 0x2eb   : > { %v2319_v57 = vpop.f32.mrb[228].mxu0  ;;  %v2831_v58 = vpop.f32.mrb[228].mxu1 }
 0x2ec   : > { %4651 = vtanh.f32 %v2319_v57  ;;  %v2321_v59 = vpop.f32.mrb[229].mxu0  ;;  %v2833_v60 = vpop.f32.mrb[229].mxu1 }
 0x2ed   : > { %4653 = vtanh.f32 %v2831_v58  ;;  %v2322_v61 = vpop.f32.mrb[230].mxu0  ;;  %v2834_v62 = vpop.f32.mrb[230].mxu1 }
 0x2ee   : > { %v4644_v63 = vpop.eup %4643  ;;  %4655 = vtanh.f32 %v2322_v61  ;;  %v2324_v0 = vpop.f32.mrb[231].mxu0 }
 0x2ef   : > { %v2836_v1 = vpop.f32.mrb[231].mxu1  ;;  %v4646_v2 = vpop.eup %4645  ;;  %3255 = vst.msk [vmem:[%s4922_s21 + $0x380] sm:$0xff] %vm3142_vm0, %v4644_v63  ;;  %4657 = vtanh.f32 %v2834_v62 }
 0x2f0   : > { %v4648_v3 = vpop.eup %4647  ;;  %3383 = vst.msk [vmem:[%s4922_s21 + $0x780] sm:$0xff] %vm3142_vm0, %v4646_v2 }
 0x2f1   : > { %v4650_v4 = vpop.eup %4649  ;;  %3256 = vst.msk [vmem:[%s4922_s21 + $0x388] sm:$0xff] %vm3142_vm0, %v4648_v3 }
 0x2f2   : > { %3384 = vst.msk [vmem:[%s4922_s21 + $0x788] sm:$0xff] %vm3142_vm0, %v4650_v4 }
 0x2f3   : > { %v2327_v5 = vpop.f32.mrb[232].mxu0  ;;  %v2839_v6 = vpop.f32.mrb[232].mxu1 }
 0x2f4   : > { %4659 = vtanh.f32 %v2327_v5  ;;  %v2329_v7 = vpop.f32.mrb[233].mxu0  ;;  %v2841_v8 = vpop.f32.mrb[233].mxu1 }
 0x2f5   : > { %4661 = vtanh.f32 %v2839_v6  ;;  %v2330_v9 = vpop.f32.mrb[234].mxu0  ;;  %v2842_v10 = vpop.f32.mrb[234].mxu1 }
 0x2f6   : > { %v4652_v11 = vpop.eup %4651  ;;  %4663 = vtanh.f32 %v2330_v9  ;;  %v2332_v12 = vpop.f32.mrb[235].mxu0 }
 0x2f7   : > { %v2844_v13 = vpop.f32.mrb[235].mxu1  ;;  %v4654_v14 = vpop.eup %4653  ;;  %3257 = vst.msk [vmem:[%s4922_s21 + $0x390] sm:$0xff] %vm3142_vm0, %v4652_v11  ;;  %4665 = vtanh.f32 %v2842_v10 }
 0x2f8   : > { %v4656_v15 = vpop.eup %4655  ;;  %3385 = vst.msk [vmem:[%s4922_s21 + $0x790] sm:$0xff] %vm3142_vm0, %v4654_v14 }
 0x2f9   : > { %v4658_v16 = vpop.eup %4657  ;;  %3258 = vst.msk [vmem:[%s4922_s21 + $0x398] sm:$0xff] %vm3142_vm0, %v4656_v15 }
 0x2fa   : > { %3386 = vst.msk [vmem:[%s4922_s21 + $0x798] sm:$0xff] %vm3142_vm0, %v4658_v16 }
 0x2fb   : > { %v2335_v17 = vpop.f32.mrb[236].mxu0  ;;  %v2847_v18 = vpop.f32.mrb[236].mxu1 }
 0x2fc   : > { %4667 = vtanh.f32 %v2335_v17  ;;  %v2337_v19 = vpop.f32.mrb[237].mxu0  ;;  %v2849_v20 = vpop.f32.mrb[237].mxu1 }
 0x2fd   : > { %4669 = vtanh.f32 %v2847_v18  ;;  %v2338_v21 = vpop.f32.mrb[238].mxu0  ;;  %v2850_v22 = vpop.f32.mrb[238].mxu1 }
 0x2fe   : > { %v4660_v23 = vpop.eup %4659  ;;  %4671 = vtanh.f32 %v2338_v21  ;;  %v2340_v24 = vpop.f32.mrb[239].mxu0 }
 0x2ff   : > { %v2852_v25 = vpop.f32.mrb[239].mxu1  ;;  %v4662_v26 = vpop.eup %4661  ;;  %3259 = vst.msk [vmem:[%s4922_s21 + $0x3a0] sm:$0xff] %vm3142_vm0, %v4660_v23  ;;  %4673 = vtanh.f32 %v2850_v22 }
 0x300   : > { %v4664_v27 = vpop.eup %4663  ;;  %3387 = vst.msk [vmem:[%s4922_s21 + $0x7a0] sm:$0xff] %vm3142_vm0, %v4662_v26 }
 0x301   : > { %v4666_v28 = vpop.eup %4665  ;;  %3260 = vst.msk [vmem:[%s4922_s21 + $0x3a8] sm:$0xff] %vm3142_vm0, %v4664_v27 }
 0x302   : > { %3388 = vst.msk [vmem:[%s4922_s21 + $0x7a8] sm:$0xff] %vm3142_vm0, %v4666_v28 }
 0x303   : > { %v2343_v29 = vpop.f32.mrb[240].mxu0  ;;  %v2855_v30 = vpop.f32.mrb[240].mxu1 }
 0x304   : > { %4675 = vtanh.f32 %v2343_v29  ;;  %v2345_v31 = vpop.f32.mrb[241].mxu0  ;;  %v2857_v32 = vpop.f32.mrb[241].mxu1 }
 0x305   : > { %4677 = vtanh.f32 %v2855_v30  ;;  %v2346_v33 = vpop.f32.mrb[242].mxu0  ;;  %v2858_v34 = vpop.f32.mrb[242].mxu1 }
 0x306   : > { %v4668_v35 = vpop.eup %4667  ;;  %4679 = vtanh.f32 %v2346_v33  ;;  %v2348_v36 = vpop.f32.mrb[243].mxu0 }
 0x307   : > { %v2860_v37 = vpop.f32.mrb[243].mxu1  ;;  %v4670_v38 = vpop.eup %4669  ;;  %3261 = vst.msk [vmem:[%s4922_s21 + $0x3b0] sm:$0xff] %vm3142_vm0, %v4668_v35  ;;  %4681 = vtanh.f32 %v2858_v34 }
 0x308   : > { %v4672_v39 = vpop.eup %4671  ;;  %3389 = vst.msk [vmem:[%s4922_s21 + $0x7b0] sm:$0xff] %vm3142_vm0, %v4670_v38 }
 0x309   : > { %v4674_v40 = vpop.eup %4673  ;;  %3262 = vst.msk [vmem:[%s4922_s21 + $0x3b8] sm:$0xff] %vm3142_vm0, %v4672_v39 }
 0x30a   : > { %3390 = vst.msk [vmem:[%s4922_s21 + $0x7b8] sm:$0xff] %vm3142_vm0, %v4674_v40 }
 0x30b   : > { %v2351_v41 = vpop.f32.mrb[244].mxu0  ;;  %v2863_v42 = vpop.f32.mrb[244].mxu1 }
 0x30c   : > { %4683 = vtanh.f32 %v2351_v41  ;;  %v2353_v43 = vpop.f32.mrb[245].mxu0  ;;  %v2865_v44 = vpop.f32.mrb[245].mxu1 }
 0x30d   : > { %4685 = vtanh.f32 %v2863_v42  ;;  %v2354_v45 = vpop.f32.mrb[246].mxu0  ;;  %v2866_v46 = vpop.f32.mrb[246].mxu1 }
 0x30e   : > { %v4676_v47 = vpop.eup %4675  ;;  %4687 = vtanh.f32 %v2354_v45  ;;  %v2356_v48 = vpop.f32.mrb[247].mxu0 }
 0x30f   : > { %v2868_v49 = vpop.f32.mrb[247].mxu1  ;;  %v4678_v50 = vpop.eup %4677  ;;  %3263 = vst.msk [vmem:[%s4922_s21 + $0x3c0] sm:$0xff] %vm3142_vm0, %v4676_v47  ;;  %4689 = vtanh.f32 %v2866_v46 }
 0x310   : > { %v4680_v51 = vpop.eup %4679  ;;  %3391 = vst.msk [vmem:[%s4922_s21 + $0x7c0] sm:$0xff] %vm3142_vm0, %v4678_v50 }
 0x311   : > { %v4682_v52 = vpop.eup %4681  ;;  %3264 = vst.msk [vmem:[%s4922_s21 + $0x3c8] sm:$0xff] %vm3142_vm0, %v4680_v51 }
 0x312   : > { %3392 = vst.msk [vmem:[%s4922_s21 + $0x7c8] sm:$0xff] %vm3142_vm0, %v4682_v52 }
 0x313   : > { %v2359_v53 = vpop.f32.mrb[248].mxu0  ;;  %v2871_v54 = vpop.f32.mrb[248].mxu1 }
 0x314   : > { %4691 = vtanh.f32 %v2359_v53  ;;  %v2361_v55 = vpop.f32.mrb[249].mxu0  ;;  %v2873_v56 = vpop.f32.mrb[249].mxu1 }
 0x315   : > { %4693 = vtanh.f32 %v2871_v54  ;;  %v2362_v57 = vpop.f32.mrb[250].mxu0  ;;  %v2874_v58 = vpop.f32.mrb[250].mxu1 }
 0x316   : > { %v4684_v59 = vpop.eup %4683  ;;  %4695 = vtanh.f32 %v2362_v57  ;;  %v2364_v60 = vpop.f32.mrb[251].mxu0 }
 0x317   : > { %v2876_v61 = vpop.f32.mrb[251].mxu1  ;;  %v4686_v62 = vpop.eup %4685  ;;  %3265 = vst.msk [vmem:[%s4922_s21 + $0x3d0] sm:$0xff] %vm3142_vm0, %v4684_v59  ;;  %4697 = vtanh.f32 %v2874_v58 }
 0x318   : > { %v4688_v63 = vpop.eup %4687  ;;  %3393 = vst.msk [vmem:[%s4922_s21 + $0x7d0] sm:$0xff] %vm3142_vm0, %v4686_v62 }
 0x319   : > { %v4690_v0 = vpop.eup %4689  ;;  %3266 = vst.msk [vmem:[%s4922_s21 + $0x3d8] sm:$0xff] %vm3142_vm0, %v4688_v63 }
 0x31a   : > { %3394 = vst.msk [vmem:[%s4922_s21 + $0x7d8] sm:$0xff] %vm3142_vm0, %v4690_v0 }
 0x31b   : > { %v2367_v1 = vpop.f32.mrb[252].mxu0  ;;  %v2879_v2 = vpop.f32.mrb[252].mxu1 }
 0x31c   : > { %4699 = vtanh.f32 %v2367_v1  ;;  %v2369_v3 = vpop.f32.mrb[253].mxu0  ;;  %v2881_v4 = vpop.f32.mrb[253].mxu1 }
 0x31d   : > { %4701 = vtanh.f32 %v2879_v2  ;;  %v2370_v5 = vpop.f32.mrb[254].mxu0  ;;  %v2882_v6 = vpop.f32.mrb[254].mxu1 }
 0x31e   : > { %v4692_v7 = vpop.eup %4691  ;;  %4703 = vtanh.f32 %v2370_v5  ;;  %v2372_v8 = vpop.f32.mrb[255].mxu0 }
 0x31f   : > { %v2884_v9 = vpop.f32.mrb[255].mxu1  ;;  %v4694_v10 = vpop.eup %4693  ;;  %3267 = vst.msk [vmem:[%s4922_s21 + $0x3e0] sm:$0xff] %vm3142_vm0, %v4692_v7  ;;  %4705 = vtanh.f32 %v2882_v6 }
 0x320   : > { %v4696_v11 = vpop.eup %4695  ;;  %3395 = vst.msk [vmem:[%s4922_s21 + $0x7e0] sm:$0xff] %vm3142_vm0, %v4694_v10 }
 0x321   : > { %v4698_v12 = vpop.eup %4697  ;;  %3268 = vst.msk [vmem:[%s4922_s21 + $0x3e8] sm:$0xff] %vm3142_vm0, %v4696_v11 }
 0x322   : > { %3396 = vst.msk [vmem:[%s4922_s21 + $0x7e8] sm:$0xff] %vm3142_vm0, %v4698_v12 }
 0x326   : > { %v4700_v13 = vpop.eup %4699 }
 0x327   : > { %v4702_v14 = vpop.eup %4701  ;;  %3269 = vst.msk [vmem:[%s4922_s21 + $0x3f0] sm:$0xff] %vm3142_vm0, %v4700_v13 }
 0x328   : > { %v4704_v15 = vpop.eup %4703  ;;  %3397 = vst.msk [vmem:[%s4922_s21 + $0x7f0] sm:$0xff] %vm3142_vm0, %v4702_v14 }
 0x329   : > { %v4706_v16 = vpop.eup %4705  ;;  %3270 = vst.msk [vmem:[%s4922_s21 + $0x3f8] sm:$0xff] %vm3142_vm0, %v4704_v15 }
 0x32a   : > { %3398 = vst.msk [vmem:[%s4922_s21 + $0x7f8] sm:$0xff] %vm3142_vm0, %v4706_v16 }
 0x32b PF: > { %s12_s9 = sadd.s32 1, %s4713_s9  }
 0x32c   : > { %p9_p4 = scmp.ge.s32.totalorder %s12_s9, 6  }
 0x32e   :  { %11 = sbr.rel (!%p9_p4) target bundleno = 1 (0x1), region = 61 }

</bundles_post_ra>
